<compile_context>
chip_gen: v7x
topology: tpu7x:2x2x1
jax: 0.10.0
libtpu: 0.0.40
codegen_flags: <defaults>
</compile_context>

<pallas_src>
import functools

import jax
import jax.numpy as jnp
from jax.experimental import pallas as pl
from jax.experimental.pallas import tpu as pltpu


def _round_up(x, m):
    return (x + m - 1) // m * m


def _pack_weight(w_oihw, cin_p, cout_p):
    """torch (Cout, Cin, 3, 3) -> (9*cin_p, cout_p) im2col weight, zero padded.

    Row (t*cin_p + ci) holds tap t = kh*3 + kw, input channel ci.  Padded
    rows/cols are zero so the lane-padded patch buffer contributes nothing.
    """
    cout, cin = w_oihw.shape[0], w_oihw.shape[1]
    w_hwio = jnp.transpose(w_oihw, (2, 3, 1, 0)).astype(jnp.float32)  # (3,3,Ci,Co)
    w_taps = w_hwio.reshape(9, cin, cout)
    w_taps = jnp.pad(w_taps, ((0, 0), (0, cin_p - cin), (0, cout_p - cout)))
    return w_taps.reshape(9 * cin_p, cout_p)


def _conv3x3_flat(src_ref, pat_ref, w_ref, b_ref, *, base, Wp, M):
    """3x3 conv over a flat zero-padded buffer: im2col + one MXU matmul.

    src_ref : (L, C_pad)       flat padded input, row stride Wp, image origin
                               at row `base`, zero halo everywhere else.
    pat_ref : (M, 9*C_pad)     lane-tile-aligned im2col patch buffer.
    w_ref   : (9*C_pad, Co_p)  zero-padded weights (tap-major rows).
    b_ref   : (1, Co_p)
    returns : (M, Co_p) float32, bias added, ReLU applied.  Columns with
              w >= W of each flat row are junk and must be masked by callers.
    """
    c_pad = src_ref.shape[1]
    for kh in range(3):
        for kw in range(3):
            t = kh * 3 + kw
            off = base + kh * Wp + kw          # contiguous leading-dim window
            pat_ref[:, t * c_pad:(t + 1) * c_pad] = src_ref[off:off + M, :]
    acc = jnp.dot(pat_ref[...], w_ref[...], preferred_element_type=jnp.float32)
    return jnp.maximum(acc + b_ref[...], 0.0)


def _compress_kernel(x_ref, w1_ref, b1_ref, w2_ref, b2_ref, *refs,
                     H, W, Cin, Cout, Wp, M, base, pooling):
    if pooling:
        (bp_ref, pool_ref,
         xpad_ref, pat1_ref, y1pad_ref, pat2_ref, vpool_ref) = refs
    else:
        (bp_ref, xpad_ref, pat1_ref, y1pad_ref, pat2_ref) = refs

    # ---- stage 0: scatter the input rows into the flat zero-padded buffer ----
    # Image row h lives at rows [base + (h+1)*Wp + 1, +W); `base` is chosen so
    # these offsets are sublane (8) aligned.  Everything else stays zero (halo).
    xpad_ref[...] = jnp.zeros_like(xpad_ref)
    for h in range(H):
        r = base + (h + 1) * Wp + 1
        xpad_ref[r:r + W, 0:Cin] = x_ref[0, h].astype(jnp.float32)

    # ---- conv1 + bias + ReLU (single matmul, K = 9 * cin_p) ----
    y1 = _conv3x3_flat(xpad_ref, pat1_ref, w1_ref, b1_ref, base=base, Wp=Wp, M=M)

    # ---- re-pad conv1's output for conv2 with one masked, shifted store ----
    # Flat index p = h*Wp + w; columns w >= W are junk -> zero them so they
    # become the left/right halo of the next conv (shift-by-(Wp+1) trick).
    col = jax.lax.broadcasted_iota(jnp.int32, (M, 1), 0) % Wp
    y1 = jnp.where(col < W, y1, 0.0)
    y1pad_ref[...] = jnp.zeros_like(y1pad_ref)
    y1pad_ref[base + Wp + 1:base + Wp + 1 + M, :] = y1

    # ---- conv2 + bias + ReLU ----
    y2 = _conv3x3_flat(y1pad_ref, pat2_ref, w2_ref, b2_ref, base=base, Wp=Wp, M=M)

    # ---- epilogue: before_pool rows + fused 2x2/2 max-pool (vertical part) ----
    for h in range(H):
        row = y2[h * Wp:h * Wp + W, 0:Cout]            # (W, Cout) f32
        bp_ref[0, h] = row.astype(bp_ref.dtype)
        if pooling:
            i = h // 2
            if h % 2 == 0:
                vpool_ref[i] = row
            else:
                vpool_ref[i] = jnp.maximum(vpool_ref[i], row)

    # ---- horizontal part of the max-pool ----
    if pooling:
        for j in range(W // 2):
            pool_ref[0, :, j, :] = jnp.maximum(
                vpool_ref[:, 2 * j, :], vpool_ref[:, 2 * j + 1, :]
            ).astype(pool_ref.dtype)


def compress_forward(x_nchw, w1_oihw, b1, w2_oihw, b2, pooling=True):
    """Fused Compress forward.  x is NCHW; returns (out, before_pool) in NCHW."""
    N, Cin, H, W = x_nchw.shape
    Cout = w1_oihw.shape[0]
    if pooling:
        assert H % 2 == 0 and W % 2 == 0, "2x2/2 max-pool path assumes even H, W"

    cin_p = _round_up(Cin, 128)         # lane-dense / MXU-aligned channels
    cout_p = _round_up(Cout, 128)
    Wp = _round_up(W + 2, 8)            # padded flat row stride (>= W+2)
    M = H * Wp                          # rows of the flat conv matmul
    base = 7                            # (base + 1) % 8 == 0 -> aligned stores
    L = _round_up(base + M + 2 * Wp + 2, 8)
    H2, W2 = H // 2, W // 2

    w1p = _pack_weight(w1_oihw, cin_p, cout_p)
    w2p = _pack_weight(w2_oihw, cout_p, cout_p)
    b1p = jnp.pad(b1, (0, cout_p - Cout)).reshape(1, cout_p).astype(jnp.float32)
    b2p = jnp.pad(b2, (0, cout_p - Cout)).reshape(1, cout_p).astype(jnp.float32)

    x_nhwc = jnp.transpose(x_nchw, (0, 2, 3, 1))        # NCHW -> NHWC (layout only)

    kernel = functools.partial(
        _compress_kernel,
        H=H, W=W, Cin=Cin, Cout=Cout, Wp=Wp, M=M, base=base, pooling=pooling)

    out_shape = [jax.ShapeDtypeStruct((N, H, W, Cout), x_nchw.dtype)]
    out_specs = [pl.BlockSpec((1, H, W, Cout), lambda n: (n, 0, 0, 0))]
    scratch = [
        pltpu.VMEM((L, cin_p), jnp.float32),        # flat zero-padded conv1 input
        pltpu.VMEM((M, 9 * cin_p), jnp.float32),    # conv1 im2col patches
        pltpu.VMEM((L, cout_p), jnp.float32),       # flat zero-padded conv2 input
        pltpu.VMEM((M, 9 * cout_p), jnp.float32),   # conv2 im2col patches
    ]
    if pooling:
        out_shape.append(jax.ShapeDtypeStruct((N, H2, W2, Cout), x_nchw.dtype))
        out_specs.append(pl.BlockSpec((1, H2, W2, Cout), lambda n: (n, 0, 0, 0)))
        scratch.append(pltpu.VMEM((H2, W, Cout), jnp.float32))  # row-pair maxima

    outs = pl.pallas_call(
        kernel,
        out_shape=tuple(out_shape),
        grid_spec=pltpu.PrefetchScalarGridSpec(
            num_scalar_prefetch=0,
            grid=(N,),
            in_specs=[
                pl.BlockSpec((1, H, W, Cin), lambda n: (n, 0, 0, 0)),
                pl.BlockSpec((9 * cin_p, cout_p), lambda n: (0, 0)),
                pl.BlockSpec((1, cout_p), lambda n: (0, 0)),
                pl.BlockSpec((9 * cout_p, cout_p), lambda n: (0, 0)),
                pl.BlockSpec((1, cout_p), lambda n: (0, 0)),
            ],
            out_specs=tuple(out_specs),
            scratch_shapes=scratch,
        ),
        compiler_params=pltpu.CompilerParams(
            dimension_semantics=("parallel",),
            vmem_limit_bytes=32 * 1024 * 1024,
        ),
    )(x_nhwc, w1p, b1p, w2p, b2p)

    if pooling:
        bp_nhwc, pooled_nhwc = outs
        before_pool = jnp.transpose(bp_nhwc, (0, 3, 1, 2))      # NHWC -> NCHW
        pooled = jnp.transpose(pooled_nhwc, (0, 3, 1, 2))
        return pooled, before_pool
    else:
        bp_nhwc = outs[0] if isinstance(outs, (tuple, list)) else outs
        before_pool = jnp.transpose(bp_nhwc, (0, 3, 1, 2))
        return before_pool, before_pool


class Compress:
    """conv3x3+ReLU, conv3x3+ReLU, optional 2x2 maxpool.  NCHW I/O."""

    def __init__(self, in_channels, out_channels, pooling=True, *, key):
        self.in_channels = in_channels
        self.out_channels = out_channels
        self.pooling = pooling
        k1, k2, k3, k4 = jax.random.split(key, 4)
        # PyTorch parameter shapes: (Cout, Cin, 3, 3), (Cout,)
        self.w1_oihw = 0.1 * jax.random.normal(
            k1, (out_channels, in_channels, 3, 3), jnp.float32)
        self.b1 = 0.1 * jax.random.normal(k2, (out_channels,), jnp.float32)
        self.w2_oihw = 0.1 * jax.random.normal(
            k3, (out_channels, out_channels, 3, 3), jnp.float32)
        self.b2 = 0.1 * jax.random.normal(k4, (out_channels,), jnp.float32)

    def __call__(self, x_nchw):
        return compress_forward(x_nchw, self.w1_oihw, self.b1,
                                self.w2_oihw, self.b2, pooling=self.pooling)


# ---------------------------------------------------------------------------
# Pure-JAX reference (mirrors torch semantics) for verification
# ---------------------------------------------------------------------------
def _reference(x, w1, b1, w2, b2, pooling):
    dn = ("NCHW", "OIHW", "NCHW")
    y = jax.lax.conv_general_dilated(x, w1, (1, 1), ((1, 1), (1, 1)),
                                     dimension_numbers=dn)
    y = jnp.maximum(y + b1[None, :, None, None], 0.0)
    y = jax.lax.conv_general_dilated(y, w2, (1, 1), ((1, 1), (1, 1)),
                                     dimension_numbers=dn)
    y = jnp.maximum(y + b2[None, :, None, None], 0.0)
    before_pool = y
    if pooling:
        y = jax.lax.reduce_window(y, -jnp.inf, jax.lax.max,
                                  (1, 1, 2, 2), (1, 1, 2, 2), "VALID")
    return y, before_pool


if __name__ == "__main__":
    key = jax.random.PRNGKey(0)
    k_x, k_p = jax.random.split(key)

    N, Cin, Cout, H, W = 2, 4, 8, 16, 16
    x = jax.random.normal(k_x, (N, Cin, H, W), jnp.float32)     # NCHW input

    module = Compress(Cin, Cout, pooling=True, key=k_p)
    pooled, before_pool = module(x)
    pooled = jax.block_until_ready(pooled)
    before_pool = jax.block_until_ready(before_pool)

    ref_pooled, ref_before = _reference(x, module.w1_oihw, module.b1,
                                        module.w2_oihw, module.b2, True)
    assert pooled.shape == (N, Cout, H // 2, W // 2)
    assert before_pool.shape == (N, Cout, H, W)
    assert jnp.allclose(before_pool, ref_before, atol=2e-4, rtol=2e-4), float(
        jnp.max(jnp.abs(before_pool - ref_before)))
    assert jnp.allclose(pooled, ref_pooled, atol=2e-4, rtol=2e-4), float(
        jnp.max(jnp.abs(pooled - ref_pooled)))

    print("KERNEL_OK")
</pallas_src>

<mosaic_0001>
module attributes {stable_mosaic.version = 11 : i64} {
  func.func @_compress_kernel(%arg0: i32, %arg1: memref<1x16x16x4xf32, #tpu.memory_space<vmem>>, %arg2: memref<1152x128xf32, #tpu.memory_space<vmem>>, %arg3: memref<1x128xf32, #tpu.memory_space<vmem>>, %arg4: memref<1152x128xf32, #tpu.memory_space<vmem>>, %arg5: memref<1x128xf32, #tpu.memory_space<vmem>>, %arg6: memref<1x16x16x8xf32, #tpu.memory_space<vmem>>, %arg7: memref<1x8x8x8xf32, #tpu.memory_space<vmem>>, %arg8: memref<448x128xf32, #tpu.memory_space<vmem>>, %arg9: memref<384x1152xf32, #tpu.memory_space<vmem>>, %arg10: memref<448x128xf32, #tpu.memory_space<vmem>>, %arg11: memref<384x1152xf32, #tpu.memory_space<vmem>>, %arg12: memref<8x16x8xf32, #tpu.memory_space<vmem>>) attributes {dimension_semantics = [#tpu.dimension_semantics<parallel>], iteration_bounds = array<i64: 2>, scalar_prefetch = 0 : i64, scratch_operands = 5 : i64, tpu.core_type = #tpu.core_type<tc>, window_params = [{transform_indices = @transform_0, window_bounds = array<i64: 1, 16, 16, 4>}, {pipeline_mode = #tpu.pipeline_mode<synchronous>, transform_indices = @transform_1, window_bounds = array<i64: 1152, 128>}, {pipeline_mode = #tpu.pipeline_mode<synchronous>, transform_indices = @transform_2, window_bounds = array<i64: 1, 128>}, {pipeline_mode = #tpu.pipeline_mode<synchronous>, transform_indices = @transform_3, window_bounds = array<i64: 1152, 128>}, {pipeline_mode = #tpu.pipeline_mode<synchronous>, transform_indices = @transform_4, window_bounds = array<i64: 1, 128>}, {transform_indices = @transform_5, window_bounds = array<i64: 1, 16, 16, 8>}, {transform_indices = @transform_6, window_bounds = array<i64: 1, 8, 8, 8>}]} {
    %cst = arith.constant 0.000000e+00 : f32
    %0 = vector.broadcast %cst : f32 to vector<448x128xf32>
    %c0 = arith.constant 0 : index
    %c0_0 = arith.constant 0 : index
    %1 = vector.load %arg8[%c0, %c0_0] : memref<448x128xf32, #tpu.memory_space<vmem>>, vector<448x128xf32>
    tpu.vector_store %arg8[%c0, %c0_0], %0 {strides = array<i32>} : memref<448x128xf32, #tpu.memory_space<vmem>>, vector<448x128xf32>,
    %c0_1 = arith.constant 0 : index
    %c0_2 = arith.constant 0 : index
    %c0_3 = arith.constant 0 : index
    %c0_4 = arith.constant 0 : index
    %2 = vector.load %arg1[%c0_1, %c0_2, %c0_3, %c0_4] : memref<1x16x16x4xf32, #tpu.memory_space<vmem>>, vector<1x1x16x4xf32>
    %3 = vector.shape_cast %2 : vector<1x1x16x4xf32> to vector<16x4xf32>
    %c32 = arith.constant 32 : index
    %c0_5 = arith.constant 0 : index
    %4 = vector.load %arg8[%c32, %c0_5] : memref<448x128xf32, #tpu.memory_space<vmem>>, vector<16x4xf32>
    tpu.vector_store %arg8[%c32, %c0_5], %3 {strides = array<i32>} : memref<448x128xf32, #tpu.memory_space<vmem>>, vector<16x4xf32>,
    %c0_6 = arith.constant 0 : index
    %c1 = arith.constant 1 : index
    %c0_7 = arith.constant 0 : index
    %c0_8 = arith.constant 0 : index
    %5 = vector.load %arg1[%c0_6, %c1, %c0_7, %c0_8] : memref<1x16x16x4xf32, #tpu.memory_space<vmem>>, vector<1x1x16x4xf32>
    %6 = vector.shape_cast %5 : vector<1x1x16x4xf32> to vector<16x4xf32>
    %c56 = arith.constant 56 : index
    %c0_9 = arith.constant 0 : index
    %7 = vector.load %arg8[%c56, %c0_9] : memref<448x128xf32, #tpu.memory_space<vmem>>, vector<16x4xf32>
    tpu.vector_store %arg8[%c56, %c0_9], %6 {strides = array<i32>} : memref<448x128xf32, #tpu.memory_space<vmem>>, vector<16x4xf32>,
    %c0_10 = arith.constant 0 : index
    %c2 = arith.constant 2 : index
    %c0_11 = arith.constant 0 : index
    %c0_12 = arith.constant 0 : index
    %8 = vector.load %arg1[%c0_10, %c2, %c0_11, %c0_12] : memref<1x16x16x4xf32, #tpu.memory_space<vmem>>, vector<1x1x16x4xf32>
    %9 = vector.shape_cast %8 : vector<1x1x16x4xf32> to vector<16x4xf32>
    %c80 = arith.constant 80 : index
    %c0_13 = arith.constant 0 : index
    %10 = vector.load %arg8[%c80, %c0_13] : memref<448x128xf32, #tpu.memory_space<vmem>>, vector<16x4xf32>
    tpu.vector_store %arg8[%c80, %c0_13], %9 {strides = array<i32>} : memref<448x128xf32, #tpu.memory_space<vmem>>, vector<16x4xf32>,
    %c0_14 = arith.constant 0 : index
    %c3 = arith.constant 3 : index
    %c0_15 = arith.constant 0 : index
    %c0_16 = arith.constant 0 : index
    %11 = vector.load %arg1[%c0_14, %c3, %c0_15, %c0_16] : memref<1x16x16x4xf32, #tpu.memory_space<vmem>>, vector<1x1x16x4xf32>
    %12 = vector.shape_cast %11 : vector<1x1x16x4xf32> to vector<16x4xf32>
    %c104 = arith.constant 104 : index
    %c0_17 = arith.constant 0 : index
    %13 = vector.load %arg8[%c104, %c0_17] : memref<448x128xf32, #tpu.memory_space<vmem>>, vector<16x4xf32>
    tpu.vector_store %arg8[%c104, %c0_17], %12 {strides = array<i32>} : memref<448x128xf32, #tpu.memory_space<vmem>>, vector<16x4xf32>,
    %c0_18 = arith.constant 0 : index
    %c4 = arith.constant 4 : index
    %c0_19 = arith.constant 0 : index
    %c0_20 = arith.constant 0 : index
    %14 = vector.load %arg1[%c0_18, %c4, %c0_19, %c0_20] : memref<1x16x16x4xf32, #tpu.memory_space<vmem>>, vector<1x1x16x4xf32>
    %15 = vector.shape_cast %14 : vector<1x1x16x4xf32> to vector<16x4xf32>
    %c128 = arith.constant 128 : index
    %c0_21 = arith.constant 0 : index
    %16 = vector.load %arg8[%c128, %c0_21] : memref<448x128xf32, #tpu.memory_space<vmem>>, vector<16x4xf32>
    tpu.vector_store %arg8[%c128, %c0_21], %15 {strides = array<i32>} : memref<448x128xf32, #tpu.memory_space<vmem>>, vector<16x4xf32>,
    %c0_22 = arith.constant 0 : index
    %c5 = arith.constant 5 : index
    %c0_23 = arith.constant 0 : index
    %c0_24 = arith.constant 0 : index
    %17 = vector.load %arg1[%c0_22, %c5, %c0_23, %c0_24] : memref<1x16x16x4xf32, #tpu.memory_space<vmem>>, vector<1x1x16x4xf32>
    %18 = vector.shape_cast %17 : vector<1x1x16x4xf32> to vector<16x4xf32>
    %c152 = arith.constant 152 : index
    %c0_25 = arith.constant 0 : index
    %19 = vector.load %arg8[%c152, %c0_25] : memref<448x128xf32, #tpu.memory_space<vmem>>, vector<16x4xf32>
    tpu.vector_store %arg8[%c152, %c0_25], %18 {strides = array<i32>} : memref<448x128xf32, #tpu.memory_space<vmem>>, vector<16x4xf32>,
    %c0_26 = arith.constant 0 : index
    %c6 = arith.constant 6 : index
    %c0_27 = arith.constant 0 : index
    %c0_28 = arith.constant 0 : index
    %20 = vector.load %arg1[%c0_26, %c6, %c0_27, %c0_28] : memref<1x16x16x4xf32, #tpu.memory_space<vmem>>, vector<1x1x16x4xf32>
    %21 = vector.shape_cast %20 : vector<1x1x16x4xf32> to vector<16x4xf32>
    %c176 = arith.constant 176 : index
    %c0_29 = arith.constant 0 : index
    %22 = vector.load %arg8[%c176, %c0_29] : memref<448x128xf32, #tpu.memory_space<vmem>>, vector<16x4xf32>
    tpu.vector_store %arg8[%c176, %c0_29], %21 {strides = array<i32>} : memref<448x128xf32, #tpu.memory_space<vmem>>, vector<16x4xf32>,
    %c0_30 = arith.constant 0 : index
    %c7 = arith.constant 7 : index
    %c0_31 = arith.constant 0 : index
    %c0_32 = arith.constant 0 : index
    %23 = vector.load %arg1[%c0_30, %c7, %c0_31, %c0_32] : memref<1x16x16x4xf32, #tpu.memory_space<vmem>>, vector<1x1x16x4xf32>
    %24 = vector.shape_cast %23 : vector<1x1x16x4xf32> to vector<16x4xf32>
    %c200 = arith.constant 200 : index
    %c0_33 = arith.constant 0 : index
    %25 = vector.load %arg8[%c200, %c0_33] : memref<448x128xf32, #tpu.memory_space<vmem>>, vector<16x4xf32>
    tpu.vector_store %arg8[%c200, %c0_33], %24 {strides = array<i32>} : memref<448x128xf32, #tpu.memory_space<vmem>>, vector<16x4xf32>,
    %c0_34 = arith.constant 0 : index
    %c8 = arith.constant 8 : index
    %c0_35 = arith.constant 0 : index
    %c0_36 = arith.constant 0 : index
    %26 = vector.load %arg1[%c0_34, %c8, %c0_35, %c0_36] : memref<1x16x16x4xf32, #tpu.memory_space<vmem>>, vector<1x1x16x4xf32>
    %27 = vector.shape_cast %26 : vector<1x1x16x4xf32> to vector<16x4xf32>
    %c224 = arith.constant 224 : index
    %c0_37 = arith.constant 0 : index
    %28 = vector.load %arg8[%c224, %c0_37] : memref<448x128xf32, #tpu.memory_space<vmem>>, vector<16x4xf32>
    tpu.vector_store %arg8[%c224, %c0_37], %27 {strides = array<i32>} : memref<448x128xf32, #tpu.memory_space<vmem>>, vector<16x4xf32>,
    %c0_38 = arith.constant 0 : index
    %c9 = arith.constant 9 : index
    %c0_39 = arith.constant 0 : index
    %c0_40 = arith.constant 0 : index
    %29 = vector.load %arg1[%c0_38, %c9, %c0_39, %c0_40] : memref<1x16x16x4xf32, #tpu.memory_space<vmem>>, vector<1x1x16x4xf32>
    %30 = vector.shape_cast %29 : vector<1x1x16x4xf32> to vector<16x4xf32>
    %c248 = arith.constant 248 : index
    %c0_41 = arith.constant 0 : index
    %31 = vector.load %arg8[%c248, %c0_41] : memref<448x128xf32, #tpu.memory_space<vmem>>, vector<16x4xf32>
    tpu.vector_store %arg8[%c248, %c0_41], %30 {strides = array<i32>} : memref<448x128xf32, #tpu.memory_space<vmem>>, vector<16x4xf32>,
    %c0_42 = arith.constant 0 : index
    %c10 = arith.constant 10 : index
    %c0_43 = arith.constant 0 : index
    %c0_44 = arith.constant 0 : index
    %32 = vector.load %arg1[%c0_42, %c10, %c0_43, %c0_44] : memref<1x16x16x4xf32, #tpu.memory_space<vmem>>, vector<1x1x16x4xf32>
    %33 = vector.shape_cast %32 : vector<1x1x16x4xf32> to vector<16x4xf32>
    %c272 = arith.constant 272 : index
    %c0_45 = arith.constant 0 : index
    %34 = vector.load %arg8[%c272, %c0_45] : memref<448x128xf32, #tpu.memory_space<vmem>>, vector<16x4xf32>
    tpu.vector_store %arg8[%c272, %c0_45], %33 {strides = array<i32>} : memref<448x128xf32, #tpu.memory_space<vmem>>, vector<16x4xf32>,
    %c0_46 = arith.constant 0 : index
    %c11 = arith.constant 11 : index
    %c0_47 = arith.constant 0 : index
    %c0_48 = arith.constant 0 : index
    %35 = vector.load %arg1[%c0_46, %c11, %c0_47, %c0_48] : memref<1x16x16x4xf32, #tpu.memory_space<vmem>>, vector<1x1x16x4xf32>
    %36 = vector.shape_cast %35 : vector<1x1x16x4xf32> to vector<16x4xf32>
    %c296 = arith.constant 296 : index
    %c0_49 = arith.constant 0 : index
    %37 = vector.load %arg8[%c296, %c0_49] : memref<448x128xf32, #tpu.memory_space<vmem>>, vector<16x4xf32>
    tpu.vector_store %arg8[%c296, %c0_49], %36 {strides = array<i32>} : memref<448x128xf32, #tpu.memory_space<vmem>>, vector<16x4xf32>,
    %c0_50 = arith.constant 0 : index
    %c12 = arith.constant 12 : index
    %c0_51 = arith.constant 0 : index
    %c0_52 = arith.constant 0 : index
    %38 = vector.load %arg1[%c0_50, %c12, %c0_51, %c0_52] : memref<1x16x16x4xf32, #tpu.memory_space<vmem>>, vector<1x1x16x4xf32>
    %39 = vector.shape_cast %38 : vector<1x1x16x4xf32> to vector<16x4xf32>
    %c320 = arith.constant 320 : index
    %c0_53 = arith.constant 0 : index
    %40 = vector.load %arg8[%c320, %c0_53] : memref<448x128xf32, #tpu.memory_space<vmem>>, vector<16x4xf32>
    tpu.vector_store %arg8[%c320, %c0_53], %39 {strides = array<i32>} : memref<448x128xf32, #tpu.memory_space<vmem>>, vector<16x4xf32>,
    %c0_54 = arith.constant 0 : index
    %c13 = arith.constant 13 : index
    %c0_55 = arith.constant 0 : index
    %c0_56 = arith.constant 0 : index
    %41 = vector.load %arg1[%c0_54, %c13, %c0_55, %c0_56] : memref<1x16x16x4xf32, #tpu.memory_space<vmem>>, vector<1x1x16x4xf32>
    %42 = vector.shape_cast %41 : vector<1x1x16x4xf32> to vector<16x4xf32>
    %c344 = arith.constant 344 : index
    %c0_57 = arith.constant 0 : index
    %43 = vector.load %arg8[%c344, %c0_57] : memref<448x128xf32, #tpu.memory_space<vmem>>, vector<16x4xf32>
    tpu.vector_store %arg8[%c344, %c0_57], %42 {strides = array<i32>} : memref<448x128xf32, #tpu.memory_space<vmem>>, vector<16x4xf32>,
    %c0_58 = arith.constant 0 : index
    %c14 = arith.constant 14 : index
    %c0_59 = arith.constant 0 : index
    %c0_60 = arith.constant 0 : index
    %44 = vector.load %arg1[%c0_58, %c14, %c0_59, %c0_60] : memref<1x16x16x4xf32, #tpu.memory_space<vmem>>, vector<1x1x16x4xf32>
    %45 = vector.shape_cast %44 : vector<1x1x16x4xf32> to vector<16x4xf32>
    %c368 = arith.constant 368 : index
    %c0_61 = arith.constant 0 : index
    %46 = vector.load %arg8[%c368, %c0_61] : memref<448x128xf32, #tpu.memory_space<vmem>>, vector<16x4xf32>
    tpu.vector_store %arg8[%c368, %c0_61], %45 {strides = array<i32>} : memref<448x128xf32, #tpu.memory_space<vmem>>, vector<16x4xf32>,
    %c0_62 = arith.constant 0 : index
    %c15 = arith.constant 15 : index
    %c0_63 = arith.constant 0 : index
    %c0_64 = arith.constant 0 : index
    %47 = vector.load %arg1[%c0_62, %c15, %c0_63, %c0_64] : memref<1x16x16x4xf32, #tpu.memory_space<vmem>>, vector<1x1x16x4xf32>
    %48 = vector.shape_cast %47 : vector<1x1x16x4xf32> to vector<16x4xf32>
    %c392 = arith.constant 392 : index
    %c0_65 = arith.constant 0 : index
    %49 = vector.load %arg8[%c392, %c0_65] : memref<448x128xf32, #tpu.memory_space<vmem>>, vector<16x4xf32>
    tpu.vector_store %arg8[%c392, %c0_65], %48 {strides = array<i32>} : memref<448x128xf32, #tpu.memory_space<vmem>>, vector<16x4xf32>,
    %c7_66 = arith.constant 7 : index
    %c0_67 = arith.constant 0 : index
    %50 = vector.load %arg8[%c7_66, %c0_67] : memref<448x128xf32, #tpu.memory_space<vmem>>, vector<384x128xf32>
    %c0_68 = arith.constant 0 : index
    %c0_69 = arith.constant 0 : index
    %51 = vector.load %arg9[%c0_68, %c0_69] : memref<384x1152xf32, #tpu.memory_space<vmem>>, vector<384x128xf32>
    tpu.vector_store %arg9[%c0_68, %c0_69], %50 {strides = array<i32>} : memref<384x1152xf32, #tpu.memory_space<vmem>>, vector<384x128xf32>,
    %c8_70 = arith.constant 8 : index
    %c0_71 = arith.constant 0 : index
    %52 = vector.load %arg8[%c8_70, %c0_71] : memref<448x128xf32, #tpu.memory_space<vmem>>, vector<384x128xf32>
    %c0_72 = arith.constant 0 : index
    %c128_73 = arith.constant 128 : index
    %53 = vector.load %arg9[%c0_72, %c128_73] : memref<384x1152xf32, #tpu.memory_space<vmem>>, vector<384x128xf32>
    tpu.vector_store %arg9[%c0_72, %c128_73], %52 {strides = array<i32>} : memref<384x1152xf32, #tpu.memory_space<vmem>>, vector<384x128xf32>,
    %c9_74 = arith.constant 9 : index
    %c0_75 = arith.constant 0 : index
    %54 = vector.load %arg8[%c9_74, %c0_75] : memref<448x128xf32, #tpu.memory_space<vmem>>, vector<384x128xf32>
    %c0_76 = arith.constant 0 : index
    %c256 = arith.constant 256 : index
    %55 = vector.load %arg9[%c0_76, %c256] : memref<384x1152xf32, #tpu.memory_space<vmem>>, vector<384x128xf32>
    tpu.vector_store %arg9[%c0_76, %c256], %54 {strides = array<i32>} : memref<384x1152xf32, #tpu.memory_space<vmem>>, vector<384x128xf32>,
    %c31 = arith.constant 31 : index
    %c0_77 = arith.constant 0 : index
    %56 = vector.load %arg8[%c31, %c0_77] : memref<448x128xf32, #tpu.memory_space<vmem>>, vector<384x128xf32>
    %c0_78 = arith.constant 0 : index
    %c384 = arith.constant 384 : index
    %57 = vector.load %arg9[%c0_78, %c384] : memref<384x1152xf32, #tpu.memory_space<vmem>>, vector<384x128xf32>
    tpu.vector_store %arg9[%c0_78, %c384], %56 {strides = array<i32>} : memref<384x1152xf32, #tpu.memory_space<vmem>>, vector<384x128xf32>,
    %c32_79 = arith.constant 32 : index
    %c0_80 = arith.constant 0 : index
    %58 = vector.load %arg8[%c32_79, %c0_80] : memref<448x128xf32, #tpu.memory_space<vmem>>, vector<384x128xf32>
    %c0_81 = arith.constant 0 : index
    %c512 = arith.constant 512 : index
    %59 = vector.load %arg9[%c0_81, %c512] : memref<384x1152xf32, #tpu.memory_space<vmem>>, vector<384x128xf32>
    tpu.vector_store %arg9[%c0_81, %c512], %58 {strides = array<i32>} : memref<384x1152xf32, #tpu.memory_space<vmem>>, vector<384x128xf32>,
    %c33 = arith.constant 33 : index
    %c0_82 = arith.constant 0 : index
    %60 = vector.load %arg8[%c33, %c0_82] : memref<448x128xf32, #tpu.memory_space<vmem>>, vector<384x128xf32>
    %c0_83 = arith.constant 0 : index
    %c640 = arith.constant 640 : index
    %61 = vector.load %arg9[%c0_83, %c640] : memref<384x1152xf32, #tpu.memory_space<vmem>>, vector<384x128xf32>
    tpu.vector_store %arg9[%c0_83, %c640], %60 {strides = array<i32>} : memref<384x1152xf32, #tpu.memory_space<vmem>>, vector<384x128xf32>,
    %c55 = arith.constant 55 : index
    %c0_84 = arith.constant 0 : index
    %62 = vector.load %arg8[%c55, %c0_84] : memref<448x128xf32, #tpu.memory_space<vmem>>, vector<384x128xf32>
    %c0_85 = arith.constant 0 : index
    %c768 = arith.constant 768 : index
    %63 = vector.load %arg9[%c0_85, %c768] : memref<384x1152xf32, #tpu.memory_space<vmem>>, vector<384x128xf32>
    tpu.vector_store %arg9[%c0_85, %c768], %62 {strides = array<i32>} : memref<384x1152xf32, #tpu.memory_space<vmem>>, vector<384x128xf32>,
    %c56_86 = arith.constant 56 : index
    %c0_87 = arith.constant 0 : index
    %64 = vector.load %arg8[%c56_86, %c0_87] : memref<448x128xf32, #tpu.memory_space<vmem>>, vector<384x128xf32>
    %c0_88 = arith.constant 0 : index
    %c896 = arith.constant 896 : index
    %65 = vector.load %arg9[%c0_88, %c896] : memref<384x1152xf32, #tpu.memory_space<vmem>>, vector<384x128xf32>
    tpu.vector_store %arg9[%c0_88, %c896], %64 {strides = array<i32>} : memref<384x1152xf32, #tpu.memory_space<vmem>>, vector<384x128xf32>,
    %c57 = arith.constant 57 : index
    %c0_89 = arith.constant 0 : index
    %66 = vector.load %arg8[%c57, %c0_89] : memref<448x128xf32, #tpu.memory_space<vmem>>, vector<384x128xf32>
    %c0_90 = arith.constant 0 : index
    %c1024 = arith.constant 1024 : index
    %67 = vector.load %arg9[%c0_90, %c1024] : memref<384x1152xf32, #tpu.memory_space<vmem>>, vector<384x128xf32>
    tpu.vector_store %arg9[%c0_90, %c1024], %66 {strides = array<i32>} : memref<384x1152xf32, #tpu.memory_space<vmem>>, vector<384x128xf32>,
    %c0_91 = arith.constant 0 : index
    %c0_92 = arith.constant 0 : index
    %68 = vector.load %arg9[%c0_91, %c0_92] : memref<384x1152xf32, #tpu.memory_space<vmem>>, vector<384x1152xf32>
    %c0_93 = arith.constant 0 : index
    %c0_94 = arith.constant 0 : index
    %69 = vector.load %arg2[%c0_93, %c0_94] : memref<1152x128xf32, #tpu.memory_space<vmem>>, vector<1152x128xf32>
    %cst_95 = arith.constant dense<0.000000e+00> : vector<384x128xf32>
    %70 = tpu.matmul %68, %69, %cst_95 {dimension_numbers = #tpu.dot_dimension_numbers<[1], [0], [0], [1], [0, 0, 1, 1], [], []>} : vector<384x1152xf32>, vector<1152x128xf32>, vector<384x128xf32> -> vector<384x128xf32>
    %c0_96 = arith.constant 0 : index
    %c0_97 = arith.constant 0 : index
    %71 = vector.load %arg3[%c0_96, %c0_97] : memref<1x128xf32, #tpu.memory_space<vmem>>, vector<1x128xf32>
    %72 = vector.broadcast %71 : vector<1x128xf32> to vector<384x128xf32>
    %73 = arith.addf %70, %72 : vector<384x128xf32>
    %cst_98 = arith.constant 0.000000e+00 : f32
    %74 = vector.broadcast %cst_98 : f32 to vector<384x128xf32>
    %75 = arith.maximumf %73, %74 : vector<384x128xf32>
    %76 = tpu.iota {dimensions = array<i32: 0>} : vector<384x1xi32>
    %c24_i32 = arith.constant 24 : i32
    %c0_i32 = arith.constant 0 : i32
    %77 = arith.cmpi eq, %c24_i32, %c0_i32 : i32
    %c1_i32 = arith.constant 1 : i32
    %78 = arith.select %77, %c1_i32, %c24_i32 : i32
    %79 = vector.broadcast %78 : i32 to vector<384x1xi32>
    %80 = arith.remsi %76, %79 : vector<384x1xi32>
    %c0_i32_99 = arith.constant 0 : i32
    %81 = vector.broadcast %c0_i32_99 : i32 to vector<384x1xi32>
    %82 = arith.cmpi ne, %80, %81 : vector<384x1xi32>
    %c0_i32_100 = arith.constant 0 : i32
    %83 = vector.broadcast %c0_i32_100 : i32 to vector<384x1xi32>
    %84 = arith.cmpi slt, %80, %83 : vector<384x1xi32>
    %c0_i32_101 = arith.constant 0 : i32
    %85 = arith.cmpi slt, %78, %c0_i32_101 : i32
    %86 = vector.broadcast %85 : i1 to vector<384x1xi1>
    %87 = vector.broadcast %86 : vector<384x1xi1> to vector<384x1xi1>
    %88 = arith.xori %84, %87 : vector<384x1xi1>
    %89 = arith.andi %88, %82 : vector<384x1xi1>
    %90 = vector.broadcast %78 : i32 to vector<384x1xi32>
    %91 = arith.addi %80, %90 : vector<384x1xi32>
    %92 = arith.select %89, %91, %80 : vector<384x1xi1>, vector<384x1xi32>
    %c16_i32 = arith.constant 16 : i32
    %93 = vector.broadcast %c16_i32 : i32 to vector<384x1xi32>
    %94 = arith.cmpi slt, %92, %93 : vector<384x1xi32>
    %cst_102 = arith.constant 0.000000e+00 : f32
    %95 = vector.shape_cast %94 : vector<384x1xi1> to vector<384x1xi1>
    %96 = vector.broadcast %95 : vector<384x1xi1> to vector<384x128xi1>
    %97 = vector.broadcast %cst_102 : f32 to vector<384x128xf32>
    %98 = arith.select %96, %75, %97 : vector<384x128xi1>, vector<384x128xf32>
    %cst_103 = arith.constant 0.000000e+00 : f32
    %99 = vector.broadcast %cst_103 : f32 to vector<448x128xf32>
    %c0_104 = arith.constant 0 : index
    %c0_105 = arith.constant 0 : index
    %100 = vector.load %arg10[%c0_104, %c0_105] : memref<448x128xf32, #tpu.memory_space<vmem>>, vector<448x128xf32>
    tpu.vector_store %arg10[%c0_104, %c0_105], %99 {strides = array<i32>} : memref<448x128xf32, #tpu.memory_space<vmem>>, vector<448x128xf32>,
    %c32_106 = arith.constant 32 : index
    %c0_107 = arith.constant 0 : index
    %101 = vector.load %arg10[%c32_106, %c0_107] : memref<448x128xf32, #tpu.memory_space<vmem>>, vector<384x128xf32>
    tpu.vector_store %arg10[%c32_106, %c0_107], %98 {strides = array<i32>} : memref<448x128xf32, #tpu.memory_space<vmem>>, vector<384x128xf32>,
    %c7_108 = arith.constant 7 : index
    %c0_109 = arith.constant 0 : index
    %102 = vector.load %arg10[%c7_108, %c0_109] : memref<448x128xf32, #tpu.memory_space<vmem>>, vector<384x128xf32>
    %c0_110 = arith.constant 0 : index
    %c0_111 = arith.constant 0 : index
    %103 = vector.load %arg11[%c0_110, %c0_111] : memref<384x1152xf32, #tpu.memory_space<vmem>>, vector<384x128xf32>
    tpu.vector_store %arg11[%c0_110, %c0_111], %102 {strides = array<i32>} : memref<384x1152xf32, #tpu.memory_space<vmem>>, vector<384x128xf32>,
    %c8_112 = arith.constant 8 : index
    %c0_113 = arith.constant 0 : index
    %104 = vector.load %arg10[%c8_112, %c0_113] : memref<448x128xf32, #tpu.memory_space<vmem>>, vector<384x128xf32>
    %c0_114 = arith.constant 0 : index
    %c128_115 = arith.constant 128 : index
    %105 = vector.load %arg11[%c0_114, %c128_115] : memref<384x1152xf32, #tpu.memory_space<vmem>>, vector<384x128xf32>
    tpu.vector_store %arg11[%c0_114, %c128_115], %104 {strides = array<i32>} : memref<384x1152xf32, #tpu.memory_space<vmem>>, vector<384x128xf32>,
    %c9_116 = arith.constant 9 : index
    %c0_117 = arith.constant 0 : index
    %106 = vector.load %arg10[%c9_116, %c0_117] : memref<448x128xf32, #tpu.memory_space<vmem>>, vector<384x128xf32>
    %c0_118 = arith.constant 0 : index
    %c256_119 = arith.constant 256 : index
    %107 = vector.load %arg11[%c0_118, %c256_119] : memref<384x1152xf32, #tpu.memory_space<vmem>>, vector<384x128xf32>
    tpu.vector_store %arg11[%c0_118, %c256_119], %106 {strides = array<i32>} : memref<384x1152xf32, #tpu.memory_space<vmem>>, vector<384x128xf32>,
    %c31_120 = arith.constant 31 : index
    %c0_121 = arith.constant 0 : index
    %108 = vector.load %arg10[%c31_120, %c0_121] : memref<448x128xf32, #tpu.memory_space<vmem>>, vector<384x128xf32>
    %c0_122 = arith.constant 0 : index
    %c384_123 = arith.constant 384 : index
    %109 = vector.load %arg11[%c0_122, %c384_123] : memref<384x1152xf32, #tpu.memory_space<vmem>>, vector<384x128xf32>
    tpu.vector_store %arg11[%c0_122, %c384_123], %108 {strides = array<i32>} : memref<384x1152xf32, #tpu.memory_space<vmem>>, vector<384x128xf32>,
    %c32_124 = arith.constant 32 : index
    %c0_125 = arith.constant 0 : index
    %110 = vector.load %arg10[%c32_124, %c0_125] : memref<448x128xf32, #tpu.memory_space<vmem>>, vector<384x128xf32>
    %c0_126 = arith.constant 0 : index
    %c512_127 = arith.constant 512 : index
    %111 = vector.load %arg11[%c0_126, %c512_127] : memref<384x1152xf32, #tpu.memory_space<vmem>>, vector<384x128xf32>
    tpu.vector_store %arg11[%c0_126, %c512_127], %110 {strides = array<i32>} : memref<384x1152xf32, #tpu.memory_space<vmem>>, vector<384x128xf32>,
    %c33_128 = arith.constant 33 : index
    %c0_129 = arith.constant 0 : index
    %112 = vector.load %arg10[%c33_128, %c0_129] : memref<448x128xf32, #tpu.memory_space<vmem>>, vector<384x128xf32>
    %c0_130 = arith.constant 0 : index
    %c640_131 = arith.constant 640 : index
    %113 = vector.load %arg11[%c0_130, %c640_131] : memref<384x1152xf32, #tpu.memory_space<vmem>>, vector<384x128xf32>
    tpu.vector_store %arg11[%c0_130, %c640_131], %112 {strides = array<i32>} : memref<384x1152xf32, #tpu.memory_space<vmem>>, vector<384x128xf32>,
    %c55_132 = arith.constant 55 : index
    %c0_133 = arith.constant 0 : index
    %114 = vector.load %arg10[%c55_132, %c0_133] : memref<448x128xf32, #tpu.memory_space<vmem>>, vector<384x128xf32>
    %c0_134 = arith.constant 0 : index
    %c768_135 = arith.constant 768 : index
    %115 = vector.load %arg11[%c0_134, %c768_135] : memref<384x1152xf32, #tpu.memory_space<vmem>>, vector<384x128xf32>
    tpu.vector_store %arg11[%c0_134, %c768_135], %114 {strides = array<i32>} : memref<384x1152xf32, #tpu.memory_space<vmem>>, vector<384x128xf32>,
    %c56_136 = arith.constant 56 : index
    %c0_137 = arith.constant 0 : index
    %116 = vector.load %arg10[%c56_136, %c0_137] : memref<448x128xf32, #tpu.memory_space<vmem>>, vector<384x128xf32>
    %c0_138 = arith.constant 0 : index
    %c896_139 = arith.constant 896 : index
    %117 = vector.load %arg11[%c0_138, %c896_139] : memref<384x1152xf32, #tpu.memory_space<vmem>>, vector<384x128xf32>
    tpu.vector_store %arg11[%c0_138, %c896_139], %116 {strides = array<i32>} : memref<384x1152xf32, #tpu.memory_space<vmem>>, vector<384x128xf32>,
    %c57_140 = arith.constant 57 : index
    %c0_141 = arith.constant 0 : index
    %118 = vector.load %arg10[%c57_140, %c0_141] : memref<448x128xf32, #tpu.memory_space<vmem>>, vector<384x128xf32>
    %c0_142 = arith.constant 0 : index
    %c1024_143 = arith.constant 1024 : index
    %119 = vector.load %arg11[%c0_142, %c1024_143] : memref<384x1152xf32, #tpu.memory_space<vmem>>, vector<384x128xf32>
    tpu.vector_store %arg11[%c0_142, %c1024_143], %118 {strides = array<i32>} : memref<384x1152xf32, #tpu.memory_space<vmem>>, vector<384x128xf32>,
    %c0_144 = arith.constant 0 : index
    %c0_145 = arith.constant 0 : index
    %120 = vector.load %arg11[%c0_144, %c0_145] : memref<384x1152xf32, #tpu.memory_space<vmem>>, vector<384x1152xf32>
    %c0_146 = arith.constant 0 : index
    %c0_147 = arith.constant 0 : index
    %121 = vector.load %arg4[%c0_146, %c0_147] : memref<1152x128xf32, #tpu.memory_space<vmem>>, vector<1152x128xf32>
    %cst_148 = arith.constant dense<0.000000e+00> : vector<384x128xf32>
    %122 = tpu.matmul %120, %121, %cst_148 {dimension_numbers = #tpu.dot_dimension_numbers<[1], [0], [0], [1], [0, 0, 1, 1], [], []>} : vector<384x1152xf32>, vector<1152x128xf32>, vector<384x128xf32> -> vector<384x128xf32>
    %c0_149 = arith.constant 0 : index
    %c0_150 = arith.constant 0 : index
    %123 = vector.load %arg5[%c0_149, %c0_150] : memref<1x128xf32, #tpu.memory_space<vmem>>, vector<1x128xf32>
    %124 = vector.broadcast %123 : vector<1x128xf32> to vector<384x128xf32>
    %125 = arith.addf %122, %124 : vector<384x128xf32>
    %cst_151 = arith.constant 0.000000e+00 : f32
    %126 = vector.broadcast %cst_151 : f32 to vector<384x128xf32>
    %127 = arith.maximumf %125, %126 : vector<384x128xf32>
    %128 = vector.extract_strided_slice %127 {offsets = [0, 0], sizes = [16, 8], strides = [1, 1]} : vector<384x128xf32> to vector<16x8xf32>
    %c0_152 = arith.constant 0 : index
    %c0_153 = arith.constant 0 : index
    %c0_154 = arith.constant 0 : index
    %c0_155 = arith.constant 0 : index
    %129 = vector.load %arg6[%c0_152, %c0_153, %c0_154, %c0_155] : memref<1x16x16x8xf32, #tpu.memory_space<vmem>>, vector<1x1x16x8xf32>
    %130 = vector.shape_cast %129 : vector<1x1x16x8xf32> to vector<16x8xf32>
    %131 = vector.shape_cast %128 : vector<16x8xf32> to vector<1x1x16x8xf32>
    tpu.vector_store %arg6[%c0_152, %c0_153, %c0_154, %c0_155], %131 {strides = array<i32>} : memref<1x16x16x8xf32, #tpu.memory_space<vmem>>, vector<1x1x16x8xf32>,
    %c0_156 = arith.constant 0 : index
    %c0_157 = arith.constant 0 : index
    %c0_158 = arith.constant 0 : index
    %132 = vector.load %arg12[%c0_156, %c0_157, %c0_158] : memref<8x16x8xf32, #tpu.memory_space<vmem>>, vector<1x16x8xf32>
    %133 = vector.shape_cast %132 : vector<1x16x8xf32> to vector<16x8xf32>
    %134 = vector.shape_cast %128 : vector<16x8xf32> to vector<1x16x8xf32>
    tpu.vector_store %arg12[%c0_156, %c0_157, %c0_158], %134 {strides = array<i32>} : memref<8x16x8xf32, #tpu.memory_space<vmem>>, vector<1x16x8xf32>,
    %135 = vector.extract_strided_slice %127 {offsets = [24, 0], sizes = [16, 8], strides = [1, 1]} : vector<384x128xf32> to vector<16x8xf32>
    %c0_159 = arith.constant 0 : index
    %c1_160 = arith.constant 1 : index
    %c0_161 = arith.constant 0 : index
    %c0_162 = arith.constant 0 : index
    %136 = vector.load %arg6[%c0_159, %c1_160, %c0_161, %c0_162] : memref<1x16x16x8xf32, #tpu.memory_space<vmem>>, vector<1x1x16x8xf32>
    %137 = vector.shape_cast %136 : vector<1x1x16x8xf32> to vector<16x8xf32>
    %138 = vector.shape_cast %135 : vector<16x8xf32> to vector<1x1x16x8xf32>
    tpu.vector_store %arg6[%c0_159, %c1_160, %c0_161, %c0_162], %138 {strides = array<i32>} : memref<1x16x16x8xf32, #tpu.memory_space<vmem>>, vector<1x1x16x8xf32>,
    %c0_163 = arith.constant 0 : index
    %c0_164 = arith.constant 0 : index
    %c0_165 = arith.constant 0 : index
    %139 = vector.load %arg12[%c0_163, %c0_164, %c0_165] : memref<8x16x8xf32, #tpu.memory_space<vmem>>, vector<1x16x8xf32>
    %140 = vector.shape_cast %139 : vector<1x16x8xf32> to vector<16x8xf32>
    %141 = arith.maximumf %140, %135 : vector<16x8xf32>
    %c0_166 = arith.constant 0 : index
    %c0_167 = arith.constant 0 : index
    %c0_168 = arith.constant 0 : index
    %142 = vector.load %arg12[%c0_166, %c0_167, %c0_168] : memref<8x16x8xf32, #tpu.memory_space<vmem>>, vector<1x16x8xf32>
    %143 = vector.shape_cast %142 : vector<1x16x8xf32> to vector<16x8xf32>
    %144 = vector.shape_cast %141 : vector<16x8xf32> to vector<1x16x8xf32>
    tpu.vector_store %arg12[%c0_166, %c0_167, %c0_168], %144 {strides = array<i32>} : memref<8x16x8xf32, #tpu.memory_space<vmem>>, vector<1x16x8xf32>,
    %145 = vector.extract_strided_slice %127 {offsets = [48, 0], sizes = [16, 8], strides = [1, 1]} : vector<384x128xf32> to vector<16x8xf32>
    %c0_169 = arith.constant 0 : index
    %c2_170 = arith.constant 2 : index
    %c0_171 = arith.constant 0 : index
    %c0_172 = arith.constant 0 : index
    %146 = vector.load %arg6[%c0_169, %c2_170, %c0_171, %c0_172] : memref<1x16x16x8xf32, #tpu.memory_space<vmem>>, vector<1x1x16x8xf32>
    %147 = vector.shape_cast %146 : vector<1x1x16x8xf32> to vector<16x8xf32>
    %148 = vector.shape_cast %145 : vector<16x8xf32> to vector<1x1x16x8xf32>
    tpu.vector_store %arg6[%c0_169, %c2_170, %c0_171, %c0_172], %148 {strides = array<i32>} : memref<1x16x16x8xf32, #tpu.memory_space<vmem>>, vector<1x1x16x8xf32>,
    %c1_173 = arith.constant 1 : index
    %c0_174 = arith.constant 0 : index
    %c0_175 = arith.constant 0 : index
    %149 = vector.load %arg12[%c1_173, %c0_174, %c0_175] : memref<8x16x8xf32, #tpu.memory_space<vmem>>, vector<1x16x8xf32>
    %150 = vector.shape_cast %149 : vector<1x16x8xf32> to vector<16x8xf32>
    %151 = vector.shape_cast %145 : vector<16x8xf32> to vector<1x16x8xf32>
    tpu.vector_store %arg12[%c1_173, %c0_174, %c0_175], %151 {strides = array<i32>} : memref<8x16x8xf32, #tpu.memory_space<vmem>>, vector<1x16x8xf32>,
    %152 = vector.extract_strided_slice %127 {offsets = [72, 0], sizes = [16, 8], strides = [1, 1]} : vector<384x128xf32> to vector<16x8xf32>
    %c0_176 = arith.constant 0 : index
    %c3_177 = arith.constant 3 : index
    %c0_178 = arith.constant 0 : index
    %c0_179 = arith.constant 0 : index
    %153 = vector.load %arg6[%c0_176, %c3_177, %c0_178, %c0_179] : memref<1x16x16x8xf32, #tpu.memory_space<vmem>>, vector<1x1x16x8xf32>
    %154 = vector.shape_cast %153 : vector<1x1x16x8xf32> to vector<16x8xf32>
    %155 = vector.shape_cast %152 : vector<16x8xf32> to vector<1x1x16x8xf32>
    tpu.vector_store %arg6[%c0_176, %c3_177, %c0_178, %c0_179], %155 {strides = array<i32>} : memref<1x16x16x8xf32, #tpu.memory_space<vmem>>, vector<1x1x16x8xf32>,
    %c1_180 = arith.constant 1 : index
    %c0_181 = arith.constant 0 : index
    %c0_182 = arith.constant 0 : index
    %156 = vector.load %arg12[%c1_180, %c0_181, %c0_182] : memref<8x16x8xf32, #tpu.memory_space<vmem>>, vector<1x16x8xf32>
    %157 = vector.shape_cast %156 : vector<1x16x8xf32> to vector<16x8xf32>
    %158 = arith.maximumf %157, %152 : vector<16x8xf32>
    %c1_183 = arith.constant 1 : index
    %c0_184 = arith.constant 0 : index
    %c0_185 = arith.constant 0 : index
    %159 = vector.load %arg12[%c1_183, %c0_184, %c0_185] : memref<8x16x8xf32, #tpu.memory_space<vmem>>, vector<1x16x8xf32>
    %160 = vector.shape_cast %159 : vector<1x16x8xf32> to vector<16x8xf32>
    %161 = vector.shape_cast %158 : vector<16x8xf32> to vector<1x16x8xf32>
    tpu.vector_store %arg12[%c1_183, %c0_184, %c0_185], %161 {strides = array<i32>} : memref<8x16x8xf32, #tpu.memory_space<vmem>>, vector<1x16x8xf32>,
    %162 = vector.extract_strided_slice %127 {offsets = [96, 0], sizes = [16, 8], strides = [1, 1]} : vector<384x128xf32> to vector<16x8xf32>
    %c0_186 = arith.constant 0 : index
    %c4_187 = arith.constant 4 : index
    %c0_188 = arith.constant 0 : index
    %c0_189 = arith.constant 0 : index
    %163 = vector.load %arg6[%c0_186, %c4_187, %c0_188, %c0_189] : memref<1x16x16x8xf32, #tpu.memory_space<vmem>>, vector<1x1x16x8xf32>
    %164 = vector.shape_cast %163 : vector<1x1x16x8xf32> to vector<16x8xf32>
    %165 = vector.shape_cast %162 : vector<16x8xf32> to vector<1x1x16x8xf32>
    tpu.vector_store %arg6[%c0_186, %c4_187, %c0_188, %c0_189], %165 {strides = array<i32>} : memref<1x16x16x8xf32, #tpu.memory_space<vmem>>, vector<1x1x16x8xf32>,
    %c2_190 = arith.constant 2 : index
    %c0_191 = arith.constant 0 : index
    %c0_192 = arith.constant 0 : index
    %166 = vector.load %arg12[%c2_190, %c0_191, %c0_192] : memref<8x16x8xf32, #tpu.memory_space<vmem>>, vector<1x16x8xf32>
    %167 = vector.shape_cast %166 : vector<1x16x8xf32> to vector<16x8xf32>
    %168 = vector.shape_cast %162 : vector<16x8xf32> to vector<1x16x8xf32>
    tpu.vector_store %arg12[%c2_190, %c0_191, %c0_192], %168 {strides = array<i32>} : memref<8x16x8xf32, #tpu.memory_space<vmem>>, vector<1x16x8xf32>,
    %169 = vector.extract_strided_slice %127 {offsets = [120, 0], sizes = [16, 8], strides = [1, 1]} : vector<384x128xf32> to vector<16x8xf32>
    %c0_193 = arith.constant 0 : index
    %c5_194 = arith.constant 5 : index
    %c0_195 = arith.constant 0 : index
    %c0_196 = arith.constant 0 : index
    %170 = vector.load %arg6[%c0_193, %c5_194, %c0_195, %c0_196] : memref<1x16x16x8xf32, #tpu.memory_space<vmem>>, vector<1x1x16x8xf32>
    %171 = vector.shape_cast %170 : vector<1x1x16x8xf32> to vector<16x8xf32>
    %172 = vector.shape_cast %169 : vector<16x8xf32> to vector<1x1x16x8xf32>
    tpu.vector_store %arg6[%c0_193, %c5_194, %c0_195, %c0_196], %172 {strides = array<i32>} : memref<1x16x16x8xf32, #tpu.memory_space<vmem>>, vector<1x1x16x8xf32>,
    %c2_197 = arith.constant 2 : index
    %c0_198 = arith.constant 0 : index
    %c0_199 = arith.constant 0 : index
    %173 = vector.load %arg12[%c2_197, %c0_198, %c0_199] : memref<8x16x8xf32, #tpu.memory_space<vmem>>, vector<1x16x8xf32>
    %174 = vector.shape_cast %173 : vector<1x16x8xf32> to vector<16x8xf32>
    %175 = arith.maximumf %174, %169 : vector<16x8xf32>
    %c2_200 = arith.constant 2 : index
    %c0_201 = arith.constant 0 : index
    %c0_202 = arith.constant 0 : index
    %176 = vector.load %arg12[%c2_200, %c0_201, %c0_202] : memref<8x16x8xf32, #tpu.memory_space<vmem>>, vector<1x16x8xf32>
    %177 = vector.shape_cast %176 : vector<1x16x8xf32> to vector<16x8xf32>
    %178 = vector.shape_cast %175 : vector<16x8xf32> to vector<1x16x8xf32>
    tpu.vector_store %arg12[%c2_200, %c0_201, %c0_202], %178 {strides = array<i32>} : memref<8x16x8xf32, #tpu.memory_space<vmem>>, vector<1x16x8xf32>,
    %179 = vector.extract_strided_slice %127 {offsets = [144, 0], sizes = [16, 8], strides = [1, 1]} : vector<384x128xf32> to vector<16x8xf32>
    %c0_203 = arith.constant 0 : index
    %c6_204 = arith.constant 6 : index
    %c0_205 = arith.constant 0 : index
    %c0_206 = arith.constant 0 : index
    %180 = vector.load %arg6[%c0_203, %c6_204, %c0_205, %c0_206] : memref<1x16x16x8xf32, #tpu.memory_space<vmem>>, vector<1x1x16x8xf32>
    %181 = vector.shape_cast %180 : vector<1x1x16x8xf32> to vector<16x8xf32>
    %182 = vector.shape_cast %179 : vector<16x8xf32> to vector<1x1x16x8xf32>
    tpu.vector_store %arg6[%c0_203, %c6_204, %c0_205, %c0_206], %182 {strides = array<i32>} : memref<1x16x16x8xf32, #tpu.memory_space<vmem>>, vector<1x1x16x8xf32>,
    %c3_207 = arith.constant 3 : index
    %c0_208 = arith.constant 0 : index
    %c0_209 = arith.constant 0 : index
    %183 = vector.load %arg12[%c3_207, %c0_208, %c0_209] : memref<8x16x8xf32, #tpu.memory_space<vmem>>, vector<1x16x8xf32>
    %184 = vector.shape_cast %183 : vector<1x16x8xf32> to vector<16x8xf32>
    %185 = vector.shape_cast %179 : vector<16x8xf32> to vector<1x16x8xf32>
    tpu.vector_store %arg12[%c3_207, %c0_208, %c0_209], %185 {strides = array<i32>} : memref<8x16x8xf32, #tpu.memory_space<vmem>>, vector<1x16x8xf32>,
    %186 = vector.extract_strided_slice %127 {offsets = [168, 0], sizes = [16, 8], strides = [1, 1]} : vector<384x128xf32> to vector<16x8xf32>
    %c0_210 = arith.constant 0 : index
    %c7_211 = arith.constant 7 : index
    %c0_212 = arith.constant 0 : index
    %c0_213 = arith.constant 0 : index
    %187 = vector.load %arg6[%c0_210, %c7_211, %c0_212, %c0_213] : memref<1x16x16x8xf32, #tpu.memory_space<vmem>>, vector<1x1x16x8xf32>
    %188 = vector.shape_cast %187 : vector<1x1x16x8xf32> to vector<16x8xf32>
    %189 = vector.shape_cast %186 : vector<16x8xf32> to vector<1x1x16x8xf32>
    tpu.vector_store %arg6[%c0_210, %c7_211, %c0_212, %c0_213], %189 {strides = array<i32>} : memref<1x16x16x8xf32, #tpu.memory_space<vmem>>, vector<1x1x16x8xf32>,
    %c3_214 = arith.constant 3 : index
    %c0_215 = arith.constant 0 : index
    %c0_216 = arith.constant 0 : index
    %190 = vector.load %arg12[%c3_214, %c0_215, %c0_216] : memref<8x16x8xf32, #tpu.memory_space<vmem>>, vector<1x16x8xf32>
    %191 = vector.shape_cast %190 : vector<1x16x8xf32> to vector<16x8xf32>
    %192 = arith.maximumf %191, %186 : vector<16x8xf32>
    %c3_217 = arith.constant 3 : index
    %c0_218 = arith.constant 0 : index
    %c0_219 = arith.constant 0 : index
    %193 = vector.load %arg12[%c3_217, %c0_218, %c0_219] : memref<8x16x8xf32, #tpu.memory_space<vmem>>, vector<1x16x8xf32>
    %194 = vector.shape_cast %193 : vector<1x16x8xf32> to vector<16x8xf32>
    %195 = vector.shape_cast %192 : vector<16x8xf32> to vector<1x16x8xf32>
    tpu.vector_store %arg12[%c3_217, %c0_218, %c0_219], %195 {strides = array<i32>} : memref<8x16x8xf32, #tpu.memory_space<vmem>>, vector<1x16x8xf32>,
    %196 = vector.extract_strided_slice %127 {offsets = [192, 0], sizes = [16, 8], strides = [1, 1]} : vector<384x128xf32> to vector<16x8xf32>
    %c0_220 = arith.constant 0 : index
    %c8_221 = arith.constant 8 : index
    %c0_222 = arith.constant 0 : index
    %c0_223 = arith.constant 0 : index
    %197 = vector.load %arg6[%c0_220, %c8_221, %c0_222, %c0_223] : memref<1x16x16x8xf32, #tpu.memory_space<vmem>>, vector<1x1x16x8xf32>
    %198 = vector.shape_cast %197 : vector<1x1x16x8xf32> to vector<16x8xf32>
    %199 = vector.shape_cast %196 : vector<16x8xf32> to vector<1x1x16x8xf32>
    tpu.vector_store %arg6[%c0_220, %c8_221, %c0_222, %c0_223], %199 {strides = array<i32>} : memref<1x16x16x8xf32, #tpu.memory_space<vmem>>, vector<1x1x16x8xf32>,
    %c4_224 = arith.constant 4 : index
    %c0_225 = arith.constant 0 : index
    %c0_226 = arith.constant 0 : index
    %200 = vector.load %arg12[%c4_224, %c0_225, %c0_226] : memref<8x16x8xf32, #tpu.memory_space<vmem>>, vector<1x16x8xf32>
    %201 = vector.shape_cast %200 : vector<1x16x8xf32> to vector<16x8xf32>
    %202 = vector.shape_cast %196 : vector<16x8xf32> to vector<1x16x8xf32>
    tpu.vector_store %arg12[%c4_224, %c0_225, %c0_226], %202 {strides = array<i32>} : memref<8x16x8xf32, #tpu.memory_space<vmem>>, vector<1x16x8xf32>,
    %203 = vector.extract_strided_slice %127 {offsets = [216, 0], sizes = [16, 8], strides = [1, 1]} : vector<384x128xf32> to vector<16x8xf32>
    %c0_227 = arith.constant 0 : index
    %c9_228 = arith.constant 9 : index
    %c0_229 = arith.constant 0 : index
    %c0_230 = arith.constant 0 : index
    %204 = vector.load %arg6[%c0_227, %c9_228, %c0_229, %c0_230] : memref<1x16x16x8xf32, #tpu.memory_space<vmem>>, vector<1x1x16x8xf32>
    %205 = vector.shape_cast %204 : vector<1x1x16x8xf32> to vector<16x8xf32>
    %206 = vector.shape_cast %203 : vector<16x8xf32> to vector<1x1x16x8xf32>
    tpu.vector_store %arg6[%c0_227, %c9_228, %c0_229, %c0_230], %206 {strides = array<i32>} : memref<1x16x16x8xf32, #tpu.memory_space<vmem>>, vector<1x1x16x8xf32>,
    %c4_231 = arith.constant 4 : index
    %c0_232 = arith.constant 0 : index
    %c0_233 = arith.constant 0 : index
    %207 = vector.load %arg12[%c4_231, %c0_232, %c0_233] : memref<8x16x8xf32, #tpu.memory_space<vmem>>, vector<1x16x8xf32>
    %208 = vector.shape_cast %207 : vector<1x16x8xf32> to vector<16x8xf32>
    %209 = arith.maximumf %208, %203 : vector<16x8xf32>
    %c4_234 = arith.constant 4 : index
    %c0_235 = arith.constant 0 : index
    %c0_236 = arith.constant 0 : index
    %210 = vector.load %arg12[%c4_234, %c0_235, %c0_236] : memref<8x16x8xf32, #tpu.memory_space<vmem>>, vector<1x16x8xf32>
    %211 = vector.shape_cast %210 : vector<1x16x8xf32> to vector<16x8xf32>
    %212 = vector.shape_cast %209 : vector<16x8xf32> to vector<1x16x8xf32>
    tpu.vector_store %arg12[%c4_234, %c0_235, %c0_236], %212 {strides = array<i32>} : memref<8x16x8xf32, #tpu.memory_space<vmem>>, vector<1x16x8xf32>,
    %213 = vector.extract_strided_slice %127 {offsets = [240, 0], sizes = [16, 8], strides = [1, 1]} : vector<384x128xf32> to vector<16x8xf32>
    %c0_237 = arith.constant 0 : index
    %c10_238 = arith.constant 10 : index
    %c0_239 = arith.constant 0 : index
    %c0_240 = arith.constant 0 : index
    %214 = vector.load %arg6[%c0_237, %c10_238, %c0_239, %c0_240] : memref<1x16x16x8xf32, #tpu.memory_space<vmem>>, vector<1x1x16x8xf32>
    %215 = vector.shape_cast %214 : vector<1x1x16x8xf32> to vector<16x8xf32>
    %216 = vector.shape_cast %213 : vector<16x8xf32> to vector<1x1x16x8xf32>
    tpu.vector_store %arg6[%c0_237, %c10_238, %c0_239, %c0_240], %216 {strides = array<i32>} : memref<1x16x16x8xf32, #tpu.memory_space<vmem>>, vector<1x1x16x8xf32>,
    %c5_241 = arith.constant 5 : index
    %c0_242 = arith.constant 0 : index
    %c0_243 = arith.constant 0 : index
    %217 = vector.load %arg12[%c5_241, %c0_242, %c0_243] : memref<8x16x8xf32, #tpu.memory_space<vmem>>, vector<1x16x8xf32>
    %218 = vector.shape_cast %217 : vector<1x16x8xf32> to vector<16x8xf32>
    %219 = vector.shape_cast %213 : vector<16x8xf32> to vector<1x16x8xf32>
    tpu.vector_store %arg12[%c5_241, %c0_242, %c0_243], %219 {strides = array<i32>} : memref<8x16x8xf32, #tpu.memory_space<vmem>>, vector<1x16x8xf32>,
    %220 = vector.extract_strided_slice %127 {offsets = [264, 0], sizes = [16, 8], strides = [1, 1]} : vector<384x128xf32> to vector<16x8xf32>
    %c0_244 = arith.constant 0 : index
    %c11_245 = arith.constant 11 : index
    %c0_246 = arith.constant 0 : index
    %c0_247 = arith.constant 0 : index
    %221 = vector.load %arg6[%c0_244, %c11_245, %c0_246, %c0_247] : memref<1x16x16x8xf32, #tpu.memory_space<vmem>>, vector<1x1x16x8xf32>
    %222 = vector.shape_cast %221 : vector<1x1x16x8xf32> to vector<16x8xf32>
    %223 = vector.shape_cast %220 : vector<16x8xf32> to vector<1x1x16x8xf32>
    tpu.vector_store %arg6[%c0_244, %c11_245, %c0_246, %c0_247], %223 {strides = array<i32>} : memref<1x16x16x8xf32, #tpu.memory_space<vmem>>, vector<1x1x16x8xf32>,
    %c5_248 = arith.constant 5 : index
    %c0_249 = arith.constant 0 : index
    %c0_250 = arith.constant 0 : index
    %224 = vector.load %arg12[%c5_248, %c0_249, %c0_250] : memref<8x16x8xf32, #tpu.memory_space<vmem>>, vector<1x16x8xf32>
    %225 = vector.shape_cast %224 : vector<1x16x8xf32> to vector<16x8xf32>
    %226 = arith.maximumf %225, %220 : vector<16x8xf32>
    %c5_251 = arith.constant 5 : index
    %c0_252 = arith.constant 0 : index
    %c0_253 = arith.constant 0 : index
    %227 = vector.load %arg12[%c5_251, %c0_252, %c0_253] : memref<8x16x8xf32, #tpu.memory_space<vmem>>, vector<1x16x8xf32>
    %228 = vector.shape_cast %227 : vector<1x16x8xf32> to vector<16x8xf32>
    %229 = vector.shape_cast %226 : vector<16x8xf32> to vector<1x16x8xf32>
    tpu.vector_store %arg12[%c5_251, %c0_252, %c0_253], %229 {strides = array<i32>} : memref<8x16x8xf32, #tpu.memory_space<vmem>>, vector<1x16x8xf32>,
    %230 = vector.extract_strided_slice %127 {offsets = [288, 0], sizes = [16, 8], strides = [1, 1]} : vector<384x128xf32> to vector<16x8xf32>
    %c0_254 = arith.constant 0 : index
    %c12_255 = arith.constant 12 : index
    %c0_256 = arith.constant 0 : index
    %c0_257 = arith.constant 0 : index
    %231 = vector.load %arg6[%c0_254, %c12_255, %c0_256, %c0_257] : memref<1x16x16x8xf32, #tpu.memory_space<vmem>>, vector<1x1x16x8xf32>
    %232 = vector.shape_cast %231 : vector<1x1x16x8xf32> to vector<16x8xf32>
    %233 = vector.shape_cast %230 : vector<16x8xf32> to vector<1x1x16x8xf32>
    tpu.vector_store %arg6[%c0_254, %c12_255, %c0_256, %c0_257], %233 {strides = array<i32>} : memref<1x16x16x8xf32, #tpu.memory_space<vmem>>, vector<1x1x16x8xf32>,
    %c6_258 = arith.constant 6 : index
    %c0_259 = arith.constant 0 : index
    %c0_260 = arith.constant 0 : index
    %234 = vector.load %arg12[%c6_258, %c0_259, %c0_260] : memref<8x16x8xf32, #tpu.memory_space<vmem>>, vector<1x16x8xf32>
    %235 = vector.shape_cast %234 : vector<1x16x8xf32> to vector<16x8xf32>
    %236 = vector.shape_cast %230 : vector<16x8xf32> to vector<1x16x8xf32>
    tpu.vector_store %arg12[%c6_258, %c0_259, %c0_260], %236 {strides = array<i32>} : memref<8x16x8xf32, #tpu.memory_space<vmem>>, vector<1x16x8xf32>,
    %237 = vector.extract_strided_slice %127 {offsets = [312, 0], sizes = [16, 8], strides = [1, 1]} : vector<384x128xf32> to vector<16x8xf32>
    %c0_261 = arith.constant 0 : index
    %c13_262 = arith.constant 13 : index
    %c0_263 = arith.constant 0 : index
    %c0_264 = arith.constant 0 : index
    %238 = vector.load %arg6[%c0_261, %c13_262, %c0_263, %c0_264] : memref<1x16x16x8xf32, #tpu.memory_space<vmem>>, vector<1x1x16x8xf32>
    %239 = vector.shape_cast %238 : vector<1x1x16x8xf32> to vector<16x8xf32>
    %240 = vector.shape_cast %237 : vector<16x8xf32> to vector<1x1x16x8xf32>
    tpu.vector_store %arg6[%c0_261, %c13_262, %c0_263, %c0_264], %240 {strides = array<i32>} : memref<1x16x16x8xf32, #tpu.memory_space<vmem>>, vector<1x1x16x8xf32>,
    %c6_265 = arith.constant 6 : index
    %c0_266 = arith.constant 0 : index
    %c0_267 = arith.constant 0 : index
    %241 = vector.load %arg12[%c6_265, %c0_266, %c0_267] : memref<8x16x8xf32, #tpu.memory_space<vmem>>, vector<1x16x8xf32>
    %242 = vector.shape_cast %241 : vector<1x16x8xf32> to vector<16x8xf32>
    %243 = arith.maximumf %242, %237 : vector<16x8xf32>
    %c6_268 = arith.constant 6 : index
    %c0_269 = arith.constant 0 : index
    %c0_270 = arith.constant 0 : index
    %244 = vector.load %arg12[%c6_268, %c0_269, %c0_270] : memref<8x16x8xf32, #tpu.memory_space<vmem>>, vector<1x16x8xf32>
    %245 = vector.shape_cast %244 : vector<1x16x8xf32> to vector<16x8xf32>
    %246 = vector.shape_cast %243 : vector<16x8xf32> to vector<1x16x8xf32>
    tpu.vector_store %arg12[%c6_268, %c0_269, %c0_270], %246 {strides = array<i32>} : memref<8x16x8xf32, #tpu.memory_space<vmem>>, vector<1x16x8xf32>,
    %247 = vector.extract_strided_slice %127 {offsets = [336, 0], sizes = [16, 8], strides = [1, 1]} : vector<384x128xf32> to vector<16x8xf32>
    %c0_271 = arith.constant 0 : index
    %c14_272 = arith.constant 14 : index
    %c0_273 = arith.constant 0 : index
    %c0_274 = arith.constant 0 : index
    %248 = vector.load %arg6[%c0_271, %c14_272, %c0_273, %c0_274] : memref<1x16x16x8xf32, #tpu.memory_space<vmem>>, vector<1x1x16x8xf32>
    %249 = vector.shape_cast %248 : vector<1x1x16x8xf32> to vector<16x8xf32>
    %250 = vector.shape_cast %247 : vector<16x8xf32> to vector<1x1x16x8xf32>
    tpu.vector_store %arg6[%c0_271, %c14_272, %c0_273, %c0_274], %250 {strides = array<i32>} : memref<1x16x16x8xf32, #tpu.memory_space<vmem>>, vector<1x1x16x8xf32>,
    %c7_275 = arith.constant 7 : index
    %c0_276 = arith.constant 0 : index
    %c0_277 = arith.constant 0 : index
    %251 = vector.load %arg12[%c7_275, %c0_276, %c0_277] : memref<8x16x8xf32, #tpu.memory_space<vmem>>, vector<1x16x8xf32>
    %252 = vector.shape_cast %251 : vector<1x16x8xf32> to vector<16x8xf32>
    %253 = vector.shape_cast %247 : vector<16x8xf32> to vector<1x16x8xf32>
    tpu.vector_store %arg12[%c7_275, %c0_276, %c0_277], %253 {strides = array<i32>} : memref<8x16x8xf32, #tpu.memory_space<vmem>>, vector<1x16x8xf32>,
    %254 = vector.extract_strided_slice %127 {offsets = [360, 0], sizes = [16, 8], strides = [1, 1]} : vector<384x128xf32> to vector<16x8xf32>
    %c0_278 = arith.constant 0 : index
    %c15_279 = arith.constant 15 : index
    %c0_280 = arith.constant 0 : index
    %c0_281 = arith.constant 0 : index
    %255 = vector.load %arg6[%c0_278, %c15_279, %c0_280, %c0_281] : memref<1x16x16x8xf32, #tpu.memory_space<vmem>>, vector<1x1x16x8xf32>
    %256 = vector.shape_cast %255 : vector<1x1x16x8xf32> to vector<16x8xf32>
    %257 = vector.shape_cast %254 : vector<16x8xf32> to vector<1x1x16x8xf32>
    tpu.vector_store %arg6[%c0_278, %c15_279, %c0_280, %c0_281], %257 {strides = array<i32>} : memref<1x16x16x8xf32, #tpu.memory_space<vmem>>, vector<1x1x16x8xf32>,
    %c7_282 = arith.constant 7 : index
    %c0_283 = arith.constant 0 : index
    %c0_284 = arith.constant 0 : index
    %258 = vector.load %arg12[%c7_282, %c0_283, %c0_284] : memref<8x16x8xf32, #tpu.memory_space<vmem>>, vector<1x16x8xf32>
    %259 = vector.shape_cast %258 : vector<1x16x8xf32> to vector<16x8xf32>
    %260 = arith.maximumf %259, %254 : vector<16x8xf32>
    %c7_285 = arith.constant 7 : index
    %c0_286 = arith.constant 0 : index
    %c0_287 = arith.constant 0 : index
    %261 = vector.load %arg12[%c7_285, %c0_286, %c0_287] : memref<8x16x8xf32, #tpu.memory_space<vmem>>, vector<1x16x8xf32>
    %262 = vector.shape_cast %261 : vector<1x16x8xf32> to vector<16x8xf32>
    %263 = vector.shape_cast %260 : vector<16x8xf32> to vector<1x16x8xf32>
    tpu.vector_store %arg12[%c7_285, %c0_286, %c0_287], %263 {strides = array<i32>} : memref<8x16x8xf32, #tpu.memory_space<vmem>>, vector<1x16x8xf32>,
    %c0_288 = arith.constant 0 : index
    %c0_289 = arith.constant 0 : index
    %c0_290 = arith.constant 0 : index
    %264 = vector.load %arg12[%c0_288, %c0_289, %c0_290] : memref<8x16x8xf32, #tpu.memory_space<vmem>>, vector<8x1x8xf32>
    %265 = vector.shape_cast %264 : vector<8x1x8xf32> to vector<8x8xf32>
    %c0_291 = arith.constant 0 : index
    %c1_292 = arith.constant 1 : index
    %c0_293 = arith.constant 0 : index
    %266 = vector.load %arg12[%c0_291, %c1_292, %c0_293] : memref<8x16x8xf32, #tpu.memory_space<vmem>>, vector<8x1x8xf32>
    %267 = vector.shape_cast %266 : vector<8x1x8xf32> to vector<8x8xf32>
    %268 = arith.maximumf %265, %267 : vector<8x8xf32>
    %c0_294 = arith.constant 0 : index
    %c0_295 = arith.constant 0 : index
    %c0_296 = arith.constant 0 : index
    %c0_297 = arith.constant 0 : index
    %269 = vector.load %arg7[%c0_294, %c0_295, %c0_296, %c0_297] : memref<1x8x8x8xf32, #tpu.memory_space<vmem>>, vector<1x8x1x8xf32>
    %270 = vector.shape_cast %269 : vector<1x8x1x8xf32> to vector<8x8xf32>
    %271 = vector.shape_cast %268 : vector<8x8xf32> to vector<1x8x1x8xf32>
    tpu.vector_store %arg7[%c0_294, %c0_295, %c0_296, %c0_297], %271 {strides = array<i32>} : memref<1x8x8x8xf32, #tpu.memory_space<vmem>>, vector<1x8x1x8xf32>,
    %c0_298 = arith.constant 0 : index
    %c2_299 = arith.constant 2 : index
    %c0_300 = arith.constant 0 : index
    %272 = vector.load %arg12[%c0_298, %c2_299, %c0_300] : memref<8x16x8xf32, #tpu.memory_space<vmem>>, vector<8x1x8xf32>
    %273 = vector.shape_cast %272 : vector<8x1x8xf32> to vector<8x8xf32>
    %c0_301 = arith.constant 0 : index
    %c3_302 = arith.constant 3 : index
    %c0_303 = arith.constant 0 : index
    %274 = vector.load %arg12[%c0_301, %c3_302, %c0_303] : memref<8x16x8xf32, #tpu.memory_space<vmem>>, vector<8x1x8xf32>
    %275 = vector.shape_cast %274 : vector<8x1x8xf32> to vector<8x8xf32>
    %276 = arith.maximumf %273, %275 : vector<8x8xf32>
    %c0_304 = arith.constant 0 : index
    %c0_305 = arith.constant 0 : index
    %c1_306 = arith.constant 1 : index
    %c0_307 = arith.constant 0 : index
    %277 = vector.load %arg7[%c0_304, %c0_305, %c1_306, %c0_307] : memref<1x8x8x8xf32, #tpu.memory_space<vmem>>, vector<1x8x1x8xf32>
    %278 = vector.shape_cast %277 : vector<1x8x1x8xf32> to vector<8x8xf32>
    %279 = vector.shape_cast %276 : vector<8x8xf32> to vector<1x8x1x8xf32>
    tpu.vector_store %arg7[%c0_304, %c0_305, %c1_306, %c0_307], %279 {strides = array<i32>} : memref<1x8x8x8xf32, #tpu.memory_space<vmem>>, vector<1x8x1x8xf32>,
    %c0_308 = arith.constant 0 : index
    %c4_309 = arith.constant 4 : index
    %c0_310 = arith.constant 0 : index
    %280 = vector.load %arg12[%c0_308, %c4_309, %c0_310] : memref<8x16x8xf32, #tpu.memory_space<vmem>>, vector<8x1x8xf32>
    %281 = vector.shape_cast %280 : vector<8x1x8xf32> to vector<8x8xf32>
    %c0_311 = arith.constant 0 : index
    %c5_312 = arith.constant 5 : index
    %c0_313 = arith.constant 0 : index
    %282 = vector.load %arg12[%c0_311, %c5_312, %c0_313] : memref<8x16x8xf32, #tpu.memory_space<vmem>>, vector<8x1x8xf32>
    %283 = vector.shape_cast %282 : vector<8x1x8xf32> to vector<8x8xf32>
    %284 = arith.maximumf %281, %283 : vector<8x8xf32>
    %c0_314 = arith.constant 0 : index
    %c0_315 = arith.constant 0 : index
    %c2_316 = arith.constant 2 : index
    %c0_317 = arith.constant 0 : index
    %285 = vector.load %arg7[%c0_314, %c0_315, %c2_316, %c0_317] : memref<1x8x8x8xf32, #tpu.memory_space<vmem>>, vector<1x8x1x8xf32>
    %286 = vector.shape_cast %285 : vector<1x8x1x8xf32> to vector<8x8xf32>
    %287 = vector.shape_cast %284 : vector<8x8xf32> to vector<1x8x1x8xf32>
    tpu.vector_store %arg7[%c0_314, %c0_315, %c2_316, %c0_317], %287 {strides = array<i32>} : memref<1x8x8x8xf32, #tpu.memory_space<vmem>>, vector<1x8x1x8xf32>,
    %c0_318 = arith.constant 0 : index
    %c6_319 = arith.constant 6 : index
    %c0_320 = arith.constant 0 : index
    %288 = vector.load %arg12[%c0_318, %c6_319, %c0_320] : memref<8x16x8xf32, #tpu.memory_space<vmem>>, vector<8x1x8xf32>
    %289 = vector.shape_cast %288 : vector<8x1x8xf32> to vector<8x8xf32>
    %c0_321 = arith.constant 0 : index
    %c7_322 = arith.constant 7 : index
    %c0_323 = arith.constant 0 : index
    %290 = vector.load %arg12[%c0_321, %c7_322, %c0_323] : memref<8x16x8xf32, #tpu.memory_space<vmem>>, vector<8x1x8xf32>
    %291 = vector.shape_cast %290 : vector<8x1x8xf32> to vector<8x8xf32>
    %292 = arith.maximumf %289, %291 : vector<8x8xf32>
    %c0_324 = arith.constant 0 : index
    %c0_325 = arith.constant 0 : index
    %c3_326 = arith.constant 3 : index
    %c0_327 = arith.constant 0 : index
    %293 = vector.load %arg7[%c0_324, %c0_325, %c3_326, %c0_327] : memref<1x8x8x8xf32, #tpu.memory_space<vmem>>, vector<1x8x1x8xf32>
    %294 = vector.shape_cast %293 : vector<1x8x1x8xf32> to vector<8x8xf32>
    %295 = vector.shape_cast %292 : vector<8x8xf32> to vector<1x8x1x8xf32>
    tpu.vector_store %arg7[%c0_324, %c0_325, %c3_326, %c0_327], %295 {strides = array<i32>} : memref<1x8x8x8xf32, #tpu.memory_space<vmem>>, vector<1x8x1x8xf32>,
    %c0_328 = arith.constant 0 : index
    %c8_329 = arith.constant 8 : index
    %c0_330 = arith.constant 0 : index
    %296 = vector.load %arg12[%c0_328, %c8_329, %c0_330] : memref<8x16x8xf32, #tpu.memory_space<vmem>>, vector<8x1x8xf32>
    %297 = vector.shape_cast %296 : vector<8x1x8xf32> to vector<8x8xf32>
    %c0_331 = arith.constant 0 : index
    %c9_332 = arith.constant 9 : index
    %c0_333 = arith.constant 0 : index
    %298 = vector.load %arg12[%c0_331, %c9_332, %c0_333] : memref<8x16x8xf32, #tpu.memory_space<vmem>>, vector<8x1x8xf32>
    %299 = vector.shape_cast %298 : vector<8x1x8xf32> to vector<8x8xf32>
    %300 = arith.maximumf %297, %299 : vector<8x8xf32>
    %c0_334 = arith.constant 0 : index
    %c0_335 = arith.constant 0 : index
    %c4_336 = arith.constant 4 : index
    %c0_337 = arith.constant 0 : index
    %301 = vector.load %arg7[%c0_334, %c0_335, %c4_336, %c0_337] : memref<1x8x8x8xf32, #tpu.memory_space<vmem>>, vector<1x8x1x8xf32>
    %302 = vector.shape_cast %301 : vector<1x8x1x8xf32> to vector<8x8xf32>
    %303 = vector.shape_cast %300 : vector<8x8xf32> to vector<1x8x1x8xf32>
    tpu.vector_store %arg7[%c0_334, %c0_335, %c4_336, %c0_337], %303 {strides = array<i32>} : memref<1x8x8x8xf32, #tpu.memory_space<vmem>>, vector<1x8x1x8xf32>,
    %c0_338 = arith.constant 0 : index
    %c10_339 = arith.constant 10 : index
    %c0_340 = arith.constant 0 : index
    %304 = vector.load %arg12[%c0_338, %c10_339, %c0_340] : memref<8x16x8xf32, #tpu.memory_space<vmem>>, vector<8x1x8xf32>
    %305 = vector.shape_cast %304 : vector<8x1x8xf32> to vector<8x8xf32>
    %c0_341 = arith.constant 0 : index
    %c11_342 = arith.constant 11 : index
    %c0_343 = arith.constant 0 : index
    %306 = vector.load %arg12[%c0_341, %c11_342, %c0_343] : memref<8x16x8xf32, #tpu.memory_space<vmem>>, vector<8x1x8xf32>
    %307 = vector.shape_cast %306 : vector<8x1x8xf32> to vector<8x8xf32>
    %308 = arith.maximumf %305, %307 : vector<8x8xf32>
    %c0_344 = arith.constant 0 : index
    %c0_345 = arith.constant 0 : index
    %c5_346 = arith.constant 5 : index
    %c0_347 = arith.constant 0 : index
    %309 = vector.load %arg7[%c0_344, %c0_345, %c5_346, %c0_347] : memref<1x8x8x8xf32, #tpu.memory_space<vmem>>, vector<1x8x1x8xf32>
    %310 = vector.shape_cast %309 : vector<1x8x1x8xf32> to vector<8x8xf32>
    %311 = vector.shape_cast %308 : vector<8x8xf32> to vector<1x8x1x8xf32>
    tpu.vector_store %arg7[%c0_344, %c0_345, %c5_346, %c0_347], %311 {strides = array<i32>} : memref<1x8x8x8xf32, #tpu.memory_space<vmem>>, vector<1x8x1x8xf32>,
    %c0_348 = arith.constant 0 : index
    %c12_349 = arith.constant 12 : index
    %c0_350 = arith.constant 0 : index
    %312 = vector.load %arg12[%c0_348, %c12_349, %c0_350] : memref<8x16x8xf32, #tpu.memory_space<vmem>>, vector<8x1x8xf32>
    %313 = vector.shape_cast %312 : vector<8x1x8xf32> to vector<8x8xf32>
    %c0_351 = arith.constant 0 : index
    %c13_352 = arith.constant 13 : index
    %c0_353 = arith.constant 0 : index
    %314 = vector.load %arg12[%c0_351, %c13_352, %c0_353] : memref<8x16x8xf32, #tpu.memory_space<vmem>>, vector<8x1x8xf32>
    %315 = vector.shape_cast %314 : vector<8x1x8xf32> to vector<8x8xf32>
    %316 = arith.maximumf %313, %315 : vector<8x8xf32>
    %c0_354 = arith.constant 0 : index
    %c0_355 = arith.constant 0 : index
    %c6_356 = arith.constant 6 : index
    %c0_357 = arith.constant 0 : index
    %317 = vector.load %arg7[%c0_354, %c0_355, %c6_356, %c0_357] : memref<1x8x8x8xf32, #tpu.memory_space<vmem>>, vector<1x8x1x8xf32>
    %318 = vector.shape_cast %317 : vector<1x8x1x8xf32> to vector<8x8xf32>
    %319 = vector.shape_cast %316 : vector<8x8xf32> to vector<1x8x1x8xf32>
    tpu.vector_store %arg7[%c0_354, %c0_355, %c6_356, %c0_357], %319 {strides = array<i32>} : memref<1x8x8x8xf32, #tpu.memory_space<vmem>>, vector<1x8x1x8xf32>,
    %c0_358 = arith.constant 0 : index
    %c14_359 = arith.constant 14 : index
    %c0_360 = arith.constant 0 : index
    %320 = vector.load %arg12[%c0_358, %c14_359, %c0_360] : memref<8x16x8xf32, #tpu.memory_space<vmem>>, vector<8x1x8xf32>
    %321 = vector.shape_cast %320 : vector<8x1x8xf32> to vector<8x8xf32>
    %c0_361 = arith.constant 0 : index
    %c15_362 = arith.constant 15 : index
    %c0_363 = arith.constant 0 : index
    %322 = vector.load %arg12[%c0_361, %c15_362, %c0_363] : memref<8x16x8xf32, #tpu.memory_space<vmem>>, vector<8x1x8xf32>
    %323 = vector.shape_cast %322 : vector<8x1x8xf32> to vector<8x8xf32>
    %324 = arith.maximumf %321, %323 : vector<8x8xf32>
    %c0_364 = arith.constant 0 : index
    %c0_365 = arith.constant 0 : index
    %c7_366 = arith.constant 7 : index
    %c0_367 = arith.constant 0 : index
    %325 = vector.load %arg7[%c0_364, %c0_365, %c7_366, %c0_367] : memref<1x8x8x8xf32, #tpu.memory_space<vmem>>, vector<1x8x1x8xf32>
    %326 = vector.shape_cast %325 : vector<1x8x1x8xf32> to vector<8x8xf32>
    %327 = vector.shape_cast %324 : vector<8x8xf32> to vector<1x8x1x8xf32>
    tpu.vector_store %arg7[%c0_364, %c0_365, %c7_366, %c0_367], %327 {strides = array<i32>} : memref<1x8x8x8xf32, #tpu.memory_space<vmem>>, vector<1x8x1x8xf32>,
    return
  }
  func.func @transform_0(%arg0: i32) -> (i32, i32, i32, i32) {
    %c0_i32 = arith.constant 0 : i32
    %c0_i32_0 = arith.constant 0 : i32
    %c0_i32_1 = arith.constant 0 : i32
    %c0_i32_2 = arith.constant 0 : i32
    return %arg0, %c0_i32, %c0_i32_0, %c0_i32_1 : i32, i32, i32, i32
  }
  func.func @transform_1(%arg0: i32) -> (i32, i32) {
    %c0_i32 = arith.constant 0 : i32
    %c0_i32_0 = arith.constant 0 : i32
    %c0_i32_1 = arith.constant 0 : i32
    return %c0_i32, %c0_i32_0 : i32, i32
  }
  func.func @transform_2(%arg0: i32) -> (i32, i32) {
    %c0_i32 = arith.constant 0 : i32
    %c0_i32_0 = arith.constant 0 : i32
    %c0_i32_1 = arith.constant 0 : i32
    return %c0_i32, %c0_i32_0 : i32, i32
  }
  func.func @transform_3(%arg0: i32) -> (i32, i32) {
    %c0_i32 = arith.constant 0 : i32
    %c0_i32_0 = arith.constant 0 : i32
    %c0_i32_1 = arith.constant 0 : i32
    return %c0_i32, %c0_i32_0 : i32, i32
  }
  func.func @transform_4(%arg0: i32) -> (i32, i32) {
    %c0_i32 = arith.constant 0 : i32
    %c0_i32_0 = arith.constant 0 : i32
    %c0_i32_1 = arith.constant 0 : i32
    return %c0_i32, %c0_i32_0 : i32, i32
  }
  func.func @transform_5(%arg0: i32) -> (i32, i32, i32, i32) {
    %c0_i32 = arith.constant 0 : i32
    %c0_i32_0 = arith.constant 0 : i32
    %c0_i32_1 = arith.constant 0 : i32
    %c0_i32_2 = arith.constant 0 : i32
    return %arg0, %c0_i32, %c0_i32_0, %c0_i32_1 : i32, i32, i32, i32
  }
  func.func @transform_6(%arg0: i32) -> (i32, i32, i32, i32) {
    %c0_i32 = arith.constant 0 : i32
    %c0_i32_0 = arith.constant 0 : i32
    %c0_i32_1 = arith.constant 0 : i32
    %c0_i32_2 = arith.constant 0 : i32
    return %arg0, %c0_i32, %c0_i32_0, %c0_i32_1 : i32, i32, i32, i32
  }
}

</mosaic_0001>

<bundles_post_ra>
// kernel: tpu_custom_call.1
= control target key start
LH: loop header
LB: loop body
LE: loop exit
PB: predicated region body
PF: predicated region fallthrough
CT: control target
= control target key end

     0   :  { %12 = vsyncpa [#allocation8], 0  ;;  %s13428_s0 = inlined_call_operand.vmem [shape: f32[2,16,16,4], index: 0, kind: input, shape index: {}]   ;;  %s13429_s1 = inlined_call_operand.hbm [shape: f32[1152,128], index: 1, kind: input, shape index: {}]   ;;  %s13430_s2 = inlined_call_operand.vmem [shape: f32[1,128], index: 2, kind: input, shape index: {}]   ;;  %s13431_s3 = inlined_call_operand.hbm [shape: f32[1152,128], index: 3, kind: input, shape index: {}]   ;;  %s13432_s4 = inlined_call_operand.vmem [shape: f32[1,128], index: 4, kind: input, shape index: {}]   ;;  %s13433_s5 = inlined_call_operand.vmem [shape: f32[2,16,16,8], index: 5, kind: output, shape index: {0}]   ;;  %s13434_s6 = inlined_call_operand.hbm [shape: f32[2,8,8,8], index: 6, kind: output, shape index: {1}]  }
   0x1   :  { %13 = vsyncpa [#allocation11], 0 }
   0x2   :  { %14 = vsyncpa [#allocation9], 0 }
   0x3   :  { %16 = vsyncpa [#allocation9 + $0x1], 0  ;;  %s9839_s21 = smov 0   ;;  %s9841_s22 = smov 0  }
   0x4   :  { %s9843_s23 = smov 0   ;;  %s9845_s24 = smov 0  }
   0x5 LB: > { %s9860_s25 = sadd.s32 4294967295, %s9793_s24   ;;  %s7993_s26 = sadd.s32 4294967294, %s9793_s24   ;;  %s9793_s24 = sphi %s9845_s24, %s13678_s24   ;;  %s9789_s23 = sphi %s9843_s23, %s13677_s23   ;;  %s9785_s22 = sphi %s9841_s22, %s13676_s22   ;;  %s9781_s21 = sphi %s9839_s21, %s13675_s21  }
   0x6   : > { %s9864_s27 = sadd.s32 1, %s9793_s24   ;;  %s165_s28 = sadd.s32 1, %s9789_s23 }
   0x7   : > { %s162_s29 = ssub.s32 %s9793_s24, %s9864_s27  ;;  %p175_p0 = scmp.ne.s32.totalorder %s9789_s23, %s9785_s22 }
   0x8   : > { %p163_p1 = scmp.eq.s32.totalorder %s162_s29, 0  ;;  %p176_p2 = scmp.eq.s32.totalorder %s9860_s25, 1 }
   0x9   : > { %p181_p3 = scmp.ne.s32.totalorder %s9785_s22, %s9781_s21  ;;  %p182_p4 = scmp.eq.s32.totalorder %s7993_s26, 1 }
   0xa   : > { %s9875_s30 = scalar_select %p163_p1, %s9789_s23, %s165_s28  }
   0xb   : > { %p9877_p5 = por %p176_p2, %p175_p0  ;;  %p9881_p6 = por %p182_p4, %p181_p3 }
   0xc   : > { %p7994_p7 = scmp.ge.s32.totalorder %s9793_s24, 1  ;;  %p189_p8 = scmp.lt.s32.totalorder %s9793_s24, 3 }
   0xd   : > { %s13443_s7 = scalar_select %p9877_p5, 1, 0 }
   0xe   : > { %s13444_s8 = scalar_select %p9881_p6, 1, 0 }
   0xf   : > { %p13435_p9 = scmp.eq.s32.totalorder %s9860_s25, 0  ;;  %p9888_p10 = pnand %p7994_p7, %p189_p8 }
  0x10   : > { %s9795_s10 = smov [#allocation7]   ;;  %s9796_s13 = smov [#allocation10]  }
  0x11   : > { %s13445_s9 = scalar_select %p9888_p10, 1, 0 }
  0x12   : > { %s201_s11 = sshll.u32 %s9795_s10, 4  ;;  %p9560_p11 = pneg %p9888_p10  ;;  %s202_s11 = int_to_ptr.vmem [resolvable:$true] %s201_s11 }
  0x13   : > { %s217_s14 = sshll.u32 %s9796_s13, 4  ;;  %s9667_s17 = scalar_lea.hbm %s13429_s1, 18432  ;;  %s9900_s14 = int_to_ptr.vmem [resolvable:$true] %s217_s14 }
  0x14   : > { %p9896_p12 = pnand %p13435_p9, %p9560_p11  ;;  %p9668_p13 = scmp.ne.s32.totalorder %s13429_s1, %s9667_s17 }
  0x15   : > { %p9674_p3 = scmp.lt.u32.totalorder %s9667_s17, %s13429_s1 }
  0x16   : > { %p9669_p0 = pneg %p9896_p12 }
  0x18   : > { %p9670_p1 = pnand %p9669_p0, %p9668_p13 }
  0x1a   : > { %p9671_p2 = pneg %p9670_p1 }
  0x1c   : > { %p9676_p4 = pnand %p9674_p3, %p9671_p2 }
  0x1e   : > { %9679 = shalt.err (!%p9676_p4)
}
  0x1f   : > { %s9680_s28 = scalar_lea.vmem %s202_s11, 18432  ;;  %p9688_p9 = scmp.lt.s32.totalorder %s202_s11, %s202_s11 }
  0x20   : > { %p9681_p7 = scmp.ne.s32.totalorder %s202_s11, %s9680_s28  ;;  %p9689_p6 = scmp.lt.s32.totalorder %s9680_s28, %s9680_s28 }
  0x22   : > { %p9683_p8 = pnand %p9681_p7, %p9669_p0  ;;  %p9690_p5 = por %p9689_p6, %p9688_p9 }
  0x24   : > { %p9684_p11 = pneg %p9683_p8 }
  0x26   : > { %p9691_p10 = pnand %p9690_p5, %p9684_p11 }
  0x28   : > { %9694 = shalt.err (!%p9691_p10)
}
  0x29   : > { %s9797_s29 = smov 128   ;;  %s9798_s10 = smov 8  }
  0x2a   : > { %9563 = dma.hbm_to_vmem [thread:$0]  (!%p9896_p12), %s13429_s1, 18432, %s202_s11, [#allocation8], %s9797_s29, %s9797_s29, %s9798_s10  }
  0x2b   : > { %s9695_s18 = scalar_lea.hbm %s13431_s3, 18432 }
  0x2c   : > { %p9696_p13 = scmp.ne.s32.totalorder %s13431_s3, %s9695_s18  ;;  %p9702_p9 = scmp.lt.u32.totalorder %s9695_s18, %s13431_s3 }
  0x2e   : > { %p9698_p5 = pnand %p9696_p13, %p9669_p0 }
  0x30   : > { %p9699_p6 = pneg %p9698_p5 }
  0x32   : > { %p9704_p10 = pnand %p9702_p9, %p9699_p6 }
  0x34   : > { %9707 = shalt.err (!%p9704_p10)
}
  0x35   : > { %s9708_s11 = scalar_lea.vmem %s9900_s14, 18432  ;;  %p9716_p4 = scmp.lt.s32.totalorder %s9900_s14, %s9900_s14 }
  0x36   : > { %p9709_p1 = scmp.ne.s32.totalorder %s9900_s14, %s9708_s11  ;;  %p9717_p7 = scmp.lt.s32.totalorder %s9708_s11, %s9708_s11 }
  0x38   : > { %p9711_p2 = pnand %p9709_p1, %p9669_p0  ;;  %p9718_p8 = por %p9717_p7, %p9716_p4 }
  0x3a   : > { %p9712_p3 = pneg %p9711_p2 }
  0x3c   : > { %p9719_p11 = pnand %p9718_p8, %p9712_p3 }
  0x3e   : > { %9722 = shalt.err (!%p9719_p11)
}
  0x3f   : > { %9566 = dma.hbm_to_vmem [thread:$0]  (!%p9896_p12), %s13431_s3, 18432, %s9900_s14, [#allocation11], %s9797_s29, %s9797_s29, %s9798_s10  }
  0x40   : > { %p13447_p13 = scmp.ne.s32.totalorder %s13445_s9, 0 }
  0x42   : > { %244 = sbr.rel (%p13447_p13) target bundleno = 2063 (0x80f), region = 40 }
  0x49   : > { %p13448_p5 = scmp.eq.s32.totalorder %s9860_s25, 0 }
  0x4b   : > { %9768 = dma.done.wait (%p13448_p5), [#allocation8], 18432   ;;  %p13449_p0 = pmov %p13448_p5 }
  0x4d   : > { %9770 = vsyncadd (%p13449_p0), [#allocation8], 4294948864  ;;  %p13450_p6 = pmov %p13449_p0 }
  0x4e   : > { %p13451_p9 = pmov %p13449_p0 }
  0x4f   : > { %9772 = dma.done.wait (%p13450_p6), [#allocation11], 18432  }
  0x50   : > { %9774 = vsyncadd (%p13451_p9), [#allocation11], 4294948864  ;;  %v13438_v0 = vmov 0.0|0.0   ;;  %v9800_v1 = vmov 0.0   ;;  %p283_p12 = scmp.lt.s32.totalorder %s9860_s25, 1  ;;  %v1725_v2 = vld [vmem:[#allocation7] sm:$0xff] }
  0x51   : > { %8412 = vmatprep.subr.bf16.mxu0 %v13438_v0  ;;  %294 = vst [vmem:[#allocation2 + $0x8] sm:$0xff] %v9800_v1  ;;  %1940 = vmatprep.mubr.f32.mxu0 %v9800_v1  ;;  %293 = vst [vmem:[#allocation2] sm:$0xff] %v9800_v1  ;;  %v1726_v3 = vld [vmem:[#allocation7 + $0x8] sm:$0xff]  ;;  %v1727_v4 = vld [vmem:[#allocation7 + $0x10] sm:$0xff]  ;;  %vm351_vm0 = vcmask 31744   ;;  %s8075_s17 = sshll.u32 %s9860_s25, 10 }
  0x52   : > { %295 = vst [vmem:[#allocation2 + $0x10] sm:$0xff] %v9800_v1  ;;  %296 = vst [vmem:[#allocation2 + $0x18] sm:$0xff] %v9800_v1  ;;  %v8413_v5 = vpack.c.bf16 %v1726_v3, %v1725_v2  ;;  %v1728_v6 = vld [vmem:[#allocation7 + $0x18] sm:$0xff]  ;;  %s10027_s9 = scalar_select %p283_p12, %s9860_s25, 1  ;;  %v1729_v8 = vld [vmem:[#allocation7 + $0x20] sm:$0xff] }
  0x53   : > { %297 = vst [vmem:[#allocation2 + $0x20] sm:$0xff] %v9800_v1  ;;  %298 = vst [vmem:[#allocation2 + $0x28] sm:$0xff] %v9800_v1  ;;  %v8416_v7 = vpack.c.bf16 %v1728_v6, %v1727_v4  ;;  %v1730_v9 = vld [vmem:[#allocation7 + $0x28] sm:$0xff]  ;;  %v1731_v11 = vld [vmem:[#allocation7 + $0x30] sm:$0xff]  ;;  %s13371_s26 = scalar_lea.hbm %s13434_s6, %s8075_s17  ;;  %p13673_p1 = scmp.ne.s32.totalorder %s13443_s7, 0 }
  0x54   : > { %299 = vst [vmem:[#allocation2 + $0x30] sm:$0xff] %v9800_v1  ;;  %300 = vst [vmem:[#allocation2 + $0x38] sm:$0xff] %v9800_v1  ;;  %8414 = vmatpush1.bf16.msra.mxu0 %v8413_v5  ;;  %s8073_s12 = sshll.u32 %s10027_s9, 8  ;;  %v8419_v10 = vpack.c.bf16 %v1730_v9, %v1729_v8  ;;  %v1732_v12 = vld [vmem:[#allocation7 + $0x38] sm:$0xff]  ;;  %v1733_v14 = vld [vmem:[#allocation7 + $0x40] sm:$0xff]  ;;  %s280_s9 = sand.u32 1, %s9785_s22  }
  0x55   : > { %301 = vst [vmem:[#allocation2 + $0x40] sm:$0xff] %v9800_v1  ;;  %302 = vst [vmem:[#allocation2 + $0x48] sm:$0xff] %v9800_v1  ;;  %8415 = vmatprep.subr.bf16.mxu0 %v13438_v0  ;;  %s10037_s10 = scalar_lea.vmem %s13428_s0, %s8073_s12  ;;  %v8422_v13 = vpack.c.bf16 %v1732_v12, %v1731_v11  ;;  %v1734_v15 = vld [vmem:[#allocation7 + $0x48] sm:$0xff]  ;;  %v1735_v21 = vld [vmem:[#allocation7 + $0x50] sm:$0xff]  ;;  %s13083_s14 = scalar_lea.vmem %s13433_s5, %s8073_s12 }
  0x56   : > { %303 = vst [vmem:[#allocation2 + $0x50] sm:$0xff] %v9800_v1  ;;  %304 = vst [vmem:[#allocation2 + $0x58] sm:$0xff] %v9800_v1  ;;  %v349_v16 = vld [vmem:[%s10037_s10] sm:$0xff]  ;;  %v350_v17 = vld [vmem:[%s10037_s10 + $0x8] sm:$0xff]  ;;  %v8425_v20 = vpack.c.bf16 %v1734_v15, %v1733_v14  ;;  %s8001_s12 = sshll.u32 %s280_s9, 6  ;;  %s13387_s25 = scalar_lea.sflag [#allocation9], %s280_s9 }
  0x57   : > { %305 = vst [vmem:[#allocation2 + $0x60] sm:$0xff] %v9800_v1  ;;  %306 = vst [vmem:[#allocation2 + $0x68] sm:$0xff] %v9800_v1  ;;  %v8006_v18 = vld [vmem:[%s10037_s10 + $0x10] sm:$0xff]  ;;  %v8007_v19 = vld [vmem:[%s10037_s10 + $0x18] sm:$0xff]  ;;  %s13117_s29 = scalar_lea.vmem [#allocation12], %s8001_s12  ;;  %s9801_s11 = smov [#allocation12]  }
  0x58   : > { %307 = vst [vmem:[#allocation2 + $0x70] sm:$0xff] %v9800_v1  ;;  %308 = vst [vmem:[#allocation2 + $0x78] sm:$0xff] %v9800_v1  ;;  %8417 = vmatpush1.bf16.msra.mxu0 %v8416_v7  ;;  %v8008_v22 = vld [vmem:[%s10037_s10 + $0x20] sm:$0xff]  ;;  %v1736_v23 = vld [vmem:[#allocation7 + $0x58] sm:$0xff]  ;;  %s7884_s18 = sshll.u32 %s13117_s29, 4  ;;  %s9727_s13 = sshll.u32 %s9801_s11, 4  ;;  %s13375_s18 = int_to_ptr.vmem [resolvable:$true] %s7884_s18  ;;  %s9728_s13 = int_to_ptr.vmem [resolvable:$false] %s9727_s13 }
  0x59   : > { %309 = vst [vmem:[#allocation2 + $0x80] sm:$0xff] %v9800_v1  ;;  %310 = vst [vmem:[#allocation2 + $0x88] sm:$0xff] %v9800_v1  ;;  %8418 = vmatprep.subr.bf16.mxu0 %v13438_v0  ;;  %v8009_v24 = vld [vmem:[%s10037_s10 + $0x28] sm:$0xff]  ;;  %v8010_v25 = vld [vmem:[%s10037_s10 + $0x30] sm:$0xff]  ;;  %v8428_v29 = vpack.c.bf16 %v1736_v23, %v1735_v21  ;;  %s9723_s28 = scalar_lea.vmem %s13375_s18, 1024  ;;  %s9729_s15 = scalar_lea.vmem %s9728_s13, 2048 }
  0x5a   : > { %311 = vst [vmem:[#allocation2 + $0x90] sm:$0xff] %v9800_v1  ;;  %312 = vst [vmem:[#allocation2 + $0x98] sm:$0xff] %v9800_v1  ;;  %v8011_v26 = vld [vmem:[%s10037_s10 + $0x38] sm:$0xff]  ;;  %v8012_v27 = vld [vmem:[%s10037_s10 + $0x40] sm:$0xff]  ;;  %p9724_p10 = scmp.ne.s32.totalorder %s13375_s18, %s9723_s28  ;;  %p9730_p4 = scmp.lt.s32.totalorder %s13375_s18, %s9728_s13 }
  0x5b   : > { %313 = vst [vmem:[#allocation2 + $0xa0] sm:$0xff] %v9800_v1  ;;  %314 = vst [vmem:[#allocation2 + $0xa8] sm:$0xff] %v9800_v1  ;;  %v8013_v28 = vld [vmem:[%s10037_s10 + $0x48] sm:$0xff]  ;;  %v8014_v30 = vld [vmem:[%s10037_s10 + $0x50] sm:$0xff]  ;;  %p9731_p7 = scmp.lt.s32.totalorder %s9729_s15, %s9723_s28 }
  0x5c   : > { %315 = vst [vmem:[#allocation2 + $0xb0] sm:$0xff] %v9800_v1  ;;  %316 = vst [vmem:[#allocation2 + $0xb8] sm:$0xff] %v9800_v1  ;;  %8420 = vmatpush1.bf16.msra.mxu0 %v8419_v10  ;;  %v1737_v31 = vld [vmem:[#allocation7 + $0x60] sm:$0xff]  ;;  %v1738_v32 = vld [vmem:[#allocation7 + $0x68] sm:$0xff]  ;;  %p9725_p2 = pnand %p9724_p10, %p13673_p1 }
  0x5d   : > { %317 = vst [vmem:[#allocation2 + $0xc0] sm:$0xff] %v9800_v1  ;;  %318 = vst [vmem:[#allocation2 + $0xc8] sm:$0xff] %v9800_v1  ;;  %8421 = vmatprep.subr.bf16.mxu0 %v13438_v0  ;;  %v8015_v33 = vld [vmem:[%s10037_s10 + $0x58] sm:$0xff]  ;;  %v8431_v34 = vpack.c.bf16 %v1738_v32, %v1737_v31  ;;  %v1739_v35 = vld [vmem:[#allocation7 + $0x70] sm:$0xff]  ;;  %p9732_p8 = por %p9731_p7, %p9730_p4 }
  0x5e   : > { %319 = vst [vmem:[#allocation2 + $0xd0] sm:$0xff] %v9800_v1  ;;  %320 = vst [vmem:[#allocation2 + $0xd8] sm:$0xff] %v9800_v1  ;;  %v1740_v36 = vld [vmem:[#allocation7 + $0x78] sm:$0xff]  ;;  %v1741_v38 = vld [vmem:[#allocation7 + $0x80] sm:$0xff]  ;;  %p9726_p3 = pneg %p9725_p2 }
  0x5f   : > { %321 = vst [vmem:[#allocation2 + $0xe0] sm:$0xff] %v9800_v1  ;;  %322 = vst [vmem:[#allocation2 + $0xe8] sm:$0xff] %v9800_v1  ;;  %v8434_v37 = vpack.c.bf16 %v1740_v36, %v1739_v35  ;;  %v1742_v39 = vld [vmem:[#allocation7 + $0x88] sm:$0xff]  ;;  %v8016_v40 = vld [vmem:[%s10037_s10 + $0x60] sm:$0xff] }
  0x60   : > { %323 = vst [vmem:[#allocation2 + $0xf0] sm:$0xff] %v9800_v1  ;;  %324 = vst [vmem:[#allocation2 + $0xf8] sm:$0xff] %v9800_v1  ;;  %8423 = vmatpush1.bf16.msra.mxu0 %v8422_v13  ;;  %v8437_v41 = vpack.c.bf16 %v1742_v39, %v1741_v38  ;;  %v8017_v42 = vld [vmem:[%s10037_s10 + $0x68] sm:$0xff]  ;;  %v8018_v43 = vld [vmem:[%s10037_s10 + $0x70] sm:$0xff]  ;;  %p9733_p11 = pnand %p9732_p8, %p9726_p3 }
  0x61   : > { %325 = vst [vmem:[#allocation2 + $0x100] sm:$0xff] %v9800_v1  ;;  %326 = vst [vmem:[#allocation2 + $0x108] sm:$0xff] %v9800_v1  ;;  %8424 = vmatprep.subr.bf16.mxu0 %v13438_v0  ;;  %v1743_v44 = vld [vmem:[#allocation7 + $0x90] sm:$0xff]  ;;  %v1744_v45 = vld [vmem:[#allocation7 + $0x98] sm:$0xff] }
  0x62   : > { %327 = vst [vmem:[#allocation2 + $0x110] sm:$0xff] %v9800_v1  ;;  %328 = vst [vmem:[#allocation2 + $0x118] sm:$0xff] %v9800_v1  ;;  %v8019_v46 = vld [vmem:[%s10037_s10 + $0x78] sm:$0xff]  ;;  %v8440_v47 = vpack.c.bf16 %v1744_v45, %v1743_v44  ;;  %v1745_v48 = vld [vmem:[#allocation7 + $0xa0] sm:$0xff] }
  0x63   : > { %329 = vst [vmem:[#allocation2 + $0x120] sm:$0xff] %v9800_v1  ;;  %330 = vst [vmem:[#allocation2 + $0x128] sm:$0xff] %v9800_v1  ;;  %v1746_v49 = vld [vmem:[#allocation7 + $0xa8] sm:$0xff]  ;;  %v8020_v50 = vld [vmem:[%s10037_s10 + $0x80] sm:$0xff] }
  0x64   : > { %331 = vst [vmem:[#allocation2 + $0x130] sm:$0xff] %v9800_v1  ;;  %332 = vst [vmem:[#allocation2 + $0x138] sm:$0xff] %v9800_v1  ;;  %8426 = vmatpush1.bf16.msra.mxu0 %v8425_v20  ;;  %v8443_v51 = vpack.c.bf16 %v1746_v49, %v1745_v48  ;;  %v1747_v52 = vld [vmem:[#allocation7 + $0xb0] sm:$0xff]  ;;  %v1748_v53 = vld [vmem:[#allocation7 + $0xb8] sm:$0xff] }
  0x65   : > { %333 = vst [vmem:[#allocation2 + $0x140] sm:$0xff] %v9800_v1  ;;  %334 = vst [vmem:[#allocation2 + $0x148] sm:$0xff] %v9800_v1  ;;  %8427 = vmatprep.subr.bf16.mxu0 %v13438_v0  ;;  %v8021_v54 = vld [vmem:[%s10037_s10 + $0x88] sm:$0xff]  ;;  %v8446_v55 = vpack.c.bf16 %v1748_v53, %v1747_v52  ;;  %v1749_v56 = vld [vmem:[#allocation7 + $0xc0] sm:$0xff] }
  0x66   : > { %335 = vst [vmem:[#allocation2 + $0x150] sm:$0xff] %v9800_v1  ;;  %336 = vst [vmem:[#allocation2 + $0x158] sm:$0xff] %v9800_v1  ;;  %v1750_v57 = vld [vmem:[#allocation7 + $0xc8] sm:$0xff]  ;;  %v1751_v59 = vld [vmem:[#allocation7 + $0xd0] sm:$0xff] }
  0x67   : > { %337 = vst [vmem:[#allocation2 + $0x160] sm:$0xff] %v9800_v1  ;;  %338 = vst [vmem:[#allocation2 + $0x168] sm:$0xff] %v9800_v1  ;;  %v8449_v58 = vpack.c.bf16 %v1750_v57, %v1749_v56  ;;  %v1752_v60 = vld [vmem:[#allocation7 + $0xd8] sm:$0xff]  ;;  %v8022_v61 = vld [vmem:[%s10037_s10 + $0x90] sm:$0xff] }
  0x68   : > { %339 = vst [vmem:[#allocation2 + $0x170] sm:$0xff] %v9800_v1  ;;  %340 = vst [vmem:[#allocation2 + $0x178] sm:$0xff] %v9800_v1  ;;  %8429 = vmatpush1.bf16.msra.mxu0 %v8428_v29  ;;  %v8452_v62 = vpack.c.bf16 %v1752_v60, %v1751_v59  ;;  %v1753_v63 = vld [vmem:[#allocation7 + $0xe0] sm:$0xff]  ;;  %v1754_v2 = vld [vmem:[#allocation7 + $0xe8] sm:$0xff] }
  0x69   : > { %341 = vst [vmem:[#allocation2 + $0x180] sm:$0xff] %v9800_v1  ;;  %342 = vst [vmem:[#allocation2 + $0x188] sm:$0xff] %v9800_v1  ;;  %8430 = vmatprep.subr.bf16.mxu0 %v13438_v0  ;;  %v8023_v3 = vld [vmem:[%s10037_s10 + $0x98] sm:$0xff]  ;;  %v8455_v4 = vpack.c.bf16 %v1754_v2, %v1753_v63  ;;  %v1755_v5 = vld [vmem:[#allocation7 + $0xf0] sm:$0xff] }
  0x6a   : > { %343 = vst [vmem:[#allocation2 + $0x190] sm:$0xff] %v9800_v1  ;;  %344 = vst [vmem:[#allocation2 + $0x198] sm:$0xff] %v9800_v1  ;;  %v1756_v6 = vld [vmem:[#allocation7 + $0xf8] sm:$0xff]  ;;  %v1757_v8 = vld [vmem:[#allocation7 + $0x100] sm:$0xff] }
  0x6b   : > { %345 = vst [vmem:[#allocation2 + $0x1a0] sm:$0xff] %v9800_v1  ;;  %346 = vst [vmem:[#allocation2 + $0x1a8] sm:$0xff] %v9800_v1  ;;  %v8458_v7 = vpack.c.bf16 %v1756_v6, %v1755_v5  ;;  %v1758_v9 = vld [vmem:[#allocation7 + $0x108] sm:$0xff]  ;;  %v8024_v10 = vld [vmem:[%s10037_s10 + $0xa0] sm:$0xff] }
  0x6c   : > { %347 = vst [vmem:[#allocation2 + $0x1b0] sm:$0xff] %v9800_v1  ;;  %348 = vst [vmem:[#allocation2 + $0x1b8] sm:$0xff] %v9800_v1  ;;  %8432 = vmatpush1.bf16.msra.mxu0 %v8431_v34  ;;  %v429_v11 = vld [vmem:[#allocation2 + $0x7] sm:$0xff]  ;;  %v8461_v12 = vpack.c.bf16 %v1758_v9, %v1757_v8  ;;  %v1759_v13 = vld [vmem:[#allocation7 + $0x110] sm:$0xff] }
  0x6d   : > { %4458 = vst [vmem:[#allocation4] sm:$0xff] %v9800_v1  ;;  %4459 = vst [vmem:[#allocation4 + $0x8] sm:$0xff] %v9800_v1  ;;  %8433 = vmatprep.subr.bf16.mxu0 %v13438_v0  ;;  %v1760_v14 = vld [vmem:[#allocation7 + $0x118] sm:$0xff]  ;;  %v8025_v15 = vld [vmem:[%s10037_s10 + $0xa8] sm:$0xff] }
  0x6e   : > { %4460 = vst [vmem:[#allocation4 + $0x10] sm:$0xff] %v9800_v1  ;;  %4461 = vst [vmem:[#allocation4 + $0x18] sm:$0xff] %v9800_v1  ;;  %v431_v20 = vld [vmem:[#allocation2 + $0x17] sm:$0xff]  ;;  %v1769_v38 = vld [vmem:[#allocation7 + $0x160] sm:$0xff] }
  0x6f   : > { %4510 = vst [vmem:[#allocation4 + $0x1a0] sm:$0xff] %v9800_v1  ;;  %4511 = vst [vmem:[#allocation4 + $0x1a8] sm:$0xff] %v9800_v1  ;;  %v8027_v31 = vld [vmem:[%s10037_s10 + $0xb8] sm:$0xff]  ;;  %v1767_v34 = vld [vmem:[#allocation7 + $0x150] sm:$0xff] }
  0x70   : > { %4512 = vst [vmem:[#allocation4 + $0x1b0] sm:$0xff] %v9800_v1  ;;  %4513 = vst [vmem:[#allocation4 + $0x1b8] sm:$0xff] %v9800_v1  ;;  %8435 = vmatpush1.bf16.msra.mxu0 %v8434_v37  ;;  %v1768_v35 = vld [vmem:[#allocation7 + $0x158] sm:$0xff]  ;;  %v1771_v45 = vld [vmem:[#allocation7 + $0x170] sm:$0xff] }
  0x71   : > { %352 = vst.msk [vmem:[#allocation2 + $0x20] sm:$0xff] %vm351_vm0, %v349_v16  ;;  %353 = vst.msk [vmem:[#allocation2 + $0x28] sm:$0xff] %vm351_vm0, %v350_v17  ;;  %8436 = vmatprep.subr.bf16.mxu0 %v13438_v0  ;;  %v430_v16 = vld [vmem:[#allocation2 + $0xf] sm:$0xff]  ;;  %v8464_v17 = vpack.c.bf16 %v1760_v14, %v1759_v13  ;;  %v8476_v37 = vpack.c.bf16 %v1768_v35, %v1767_v34  ;;  %v1776_v56 = vld [vmem:[#allocation7 + $0x198] sm:$0xff] }
  0x72   : > { %357 = vst.msk [vmem:[#allocation2 + $0x38] sm:$0xff] %vm351_vm0, %v8006_v18  ;;  %358 = vst.msk [vmem:[#allocation2 + $0x40] sm:$0xff] %vm351_vm0, %v8007_v19  ;;  %v1761_v18 = vld [vmem:[#allocation7 + $0x120] sm:$0xff]  ;;  %v1762_v19 = vld [vmem:[#allocation7 + $0x128] sm:$0xff] }
  0x73   : > { %362 = vst.msk [vmem:[#allocation2 + $0x50] sm:$0xff] %vm351_vm0, %v8008_v22  ;;  %363 = vst.msk [vmem:[#allocation2 + $0x58] sm:$0xff] %vm351_vm0, %v8009_v24  ;;  %v8467_v21 = vpack.c.bf16 %v1762_v19, %v1761_v18  ;;  %v1763_v22 = vld [vmem:[#allocation7 + $0x130] sm:$0xff]  ;;  %v1764_v24 = vld [vmem:[#allocation7 + $0x138] sm:$0xff] }
  0x74   : > { %367 = vst.msk [vmem:[#allocation2 + $0x68] sm:$0xff] %vm351_vm0, %v8010_v25  ;;  %368 = vst.msk [vmem:[#allocation2 + $0x70] sm:$0xff] %vm351_vm0, %v8011_v26  ;;  %8438 = vmatpush1.bf16.msra.mxu0 %v8437_v41  ;;  %v8026_v25 = vld [vmem:[%s10037_s10 + $0xb0] sm:$0xff]  ;;  %v8028_v41 = vld [vmem:[%s10037_s10 + $0xc0] sm:$0xff] }
  0x75   : > { %372 = vst.msk [vmem:[#allocation2 + $0x80] sm:$0xff] %vm351_vm0, %v8012_v27  ;;  %373 = vst.msk [vmem:[#allocation2 + $0x88] sm:$0xff] %vm351_vm0, %v8013_v28  ;;  %8439 = vmatprep.subr.bf16.mxu0 %v13438_v0  ;;  %v8470_v27 = vpack.c.bf16 %v1764_v24, %v1763_v22  ;;  %v1765_v28 = vld [vmem:[#allocation7 + $0x140] sm:$0xff]  ;;  %v8030_v57 = vld [vmem:[%s10037_s10 + $0xd0] sm:$0xff] }
  0x76   : > { %377 = vst.msk [vmem:[#allocation2 + $0x98] sm:$0xff] %vm351_vm0, %v8014_v30  ;;  %378 = vst.msk [vmem:[#allocation2 + $0xa0] sm:$0xff] %vm351_vm0, %v8015_v33  ;;  %v1766_v30 = vld [vmem:[#allocation7 + $0x148] sm:$0xff]  ;;  %v8031_v63 = vld [vmem:[%s10037_s10 + $0xd8] sm:$0xff] }
  0x77   : > { %382 = vst.msk [vmem:[#allocation2 + $0xb0] sm:$0xff] %vm351_vm0, %v8016_v40  ;;  %383 = vst.msk [vmem:[#allocation2 + $0xb8] sm:$0xff] %vm351_vm0, %v8017_v42  ;;  %v8473_v33 = vpack.c.bf16 %v1766_v30, %v1765_v28  ;;  %v1770_v40 = vld [vmem:[#allocation7 + $0x168] sm:$0xff]  ;;  %v1780_v5 = vld [vmem:[#allocation7 + $0x1b8] sm:$0xff] }
  0x78   : > { %387 = vst.msk [vmem:[#allocation2 + $0xc8] sm:$0xff] %vm351_vm0, %v8018_v43  ;;  %388 = vst.msk [vmem:[#allocation2 + $0xd0] sm:$0xff] %vm351_vm0, %v8019_v46  ;;  %8441 = vmatpush1.bf16.msra.mxu0 %v8440_v47  ;;  %v528_v23 = vld [vmem:[#allocation2 + $0x20] sm:$0xff]  ;;  %v529_v29 = vld [vmem:[#allocation2 + $0x28] sm:$0xff]  ;;  %v8479_v44 = vpack.c.bf16 %v1770_v40, %v1769_v38 }
  0x79   : > { %392 = vst.msk [vmem:[#allocation2 + $0xe0] sm:$0xff] %vm351_vm0, %v8020_v50  ;;  %8442 = vmatprep.subr.bf16.mxu0 %v13438_v0  ;;  %393 = vst.msk [vmem:[#allocation2 + $0xe8] sm:$0xff] %vm351_vm0, %v8021_v54  ;;  %v10103_v26 = vld [vmem:[#allocation2 + $0x1f] sm:$0xff]  ;;  %v10109_v32 = vld [vmem:[#allocation2 + $0x27] sm:$0xff] }
  0x7a   : > { %397 = vst.msk [vmem:[#allocation2 + $0xf8] sm:$0xff] %vm351_vm0, %v8022_v61  ;;  %398 = vst.msk [vmem:[#allocation2 + $0x100] sm:$0xff] %vm351_vm0, %v8023_v3  ;;  %v10114_v36 = vld [vmem:[#allocation2 + $0x2f] sm:$0xff]  ;;  %v531_v39 = vld [vmem:[#allocation2 + $0x38] sm:$0xff] }
  0x7b   : > { %402 = vst.msk [vmem:[#allocation2 + $0x110] sm:$0xff] %vm351_vm0, %v8024_v10  ;;  %403 = vst.msk [vmem:[#allocation2 + $0x118] sm:$0xff] %vm351_vm0, %v8025_v15  ;;  %v10120_v42 = vld [vmem:[#allocation2 + $0x37] sm:$0xff]  ;;  %v532_v43 = vld [vmem:[#allocation2 + $0x40] sm:$0xff] }
  0x7c   : > { %8444 = vmatpush1.bf16.msra.mxu0 %v8443_v51  ;;  %407 = vst.msk [vmem:[#allocation2 + $0x128] sm:$0xff] %vm351_vm0, %v8026_v25  ;;  %408 = vst.msk [vmem:[#allocation2 + $0x130] sm:$0xff] %vm351_vm0, %v8027_v31  ;;  %v1772_v46 = vld [vmem:[#allocation7 + $0x178] sm:$0xff]  ;;  %v8029_v47 = vld [vmem:[%s10037_s10 + $0xc8] sm:$0xff] }
  0x7d   : > { %8445 = vmatprep.subr.bf16.mxu0 %v13438_v0  ;;  %412 = vst.msk [vmem:[#allocation2 + $0x140] sm:$0xff] %vm351_vm0, %v8028_v41  ;;  %413 = vst.msk [vmem:[#allocation2 + $0x148] sm:$0xff] %vm351_vm0, %v8029_v47  ;;  %v10126_v48 = vld [vmem:[#allocation2 + $0x3f] sm:$0xff]  ;;  %v8482_v49 = vpack.c.bf16 %v1772_v46, %v1771_v45  ;;  %v1774_v51 = vld [vmem:[#allocation7 + $0x188] sm:$0xff] }
  0x7e   : > { %v1773_v50 = vld [vmem:[#allocation7 + $0x180] sm:$0xff]  ;;  %v534_v53 = vld [vmem:[#allocation2 + $0x50] sm:$0xff]  ;;  %417 = vst.msk [vmem:[#allocation2 + $0x158] sm:$0xff] %vm351_vm0, %v8030_v57  ;;  %v535_v59 = vld [vmem:[#allocation2 + $0x58] sm:$0xff] }
  0x7f   : > { %v10131_v52 = vld [vmem:[#allocation2 + $0x47] sm:$0xff]  ;;  %v8485_v54 = vpack.c.bf16 %v1774_v51, %v1773_v50  ;;  %418 = vst.msk [vmem:[#allocation2 + $0x160] sm:$0xff] %vm351_vm0, %v8031_v63  ;;  %v10143_v2 = vld [vmem:[#allocation2 + $0x57] sm:$0xff]  ;;  %v10148_v6 = vld [vmem:[#allocation2 + $0x5f] sm:$0xff] }
  0x80   : > { %8447 = vmatpush1.bf16.msra.mxu0 %v8446_v55  ;;  %v1775_v55 = vld [vmem:[#allocation7 + $0x190] sm:$0xff]  ;;  %v1777_v61 = vld [vmem:[#allocation7 + $0x1a0] sm:$0xff]  ;;  %v1782_v10 = vld [vmem:[#allocation7 + $0x1c8] sm:$0xff] }
  0x81   : > { %8448 = vmatprep.subr.bf16.mxu0 %v13438_v0  ;;  %v8488_v60 = vpack.c.bf16 %v1776_v56, %v1775_v55  ;;  %v1781_v9 = vld [vmem:[#allocation7 + $0x1c0] sm:$0xff]  ;;  %v538_v13 = vld [vmem:[#allocation2 + $0x70] sm:$0xff]  ;;  %v541_v30 = vld [vmem:[#allocation2 + $0x88] sm:$0xff] }
  0x82   : > { %v8497_v14 = vpack.c.bf16 %v1782_v10, %v1781_v9  ;;  %v1783_v15 = vld [vmem:[#allocation7 + $0x1d0] sm:$0xff]  ;;  %v540_v24 = vld [vmem:[#allocation2 + $0x80] sm:$0xff]  ;;  %v543_v34 = vld [vmem:[#allocation2 + $0x98] sm:$0xff] }
  0x83   : > { %v10160_v18 = vld [vmem:[#allocation2 + $0x6f] sm:$0xff]  ;;  %v10165_v22 = vld [vmem:[#allocation2 + $0x77] sm:$0xff]  ;;  %v10169_v28 = vld [vmem:[#allocation2 + $0x7f] sm:$0xff] }
  0x84   : > { %8450 = vmatpush1.bf16.msra.mxu0 %v8449_v58  ;;  %v10137_v58 = vld [vmem:[#allocation2 + $0x4f] sm:$0xff]  ;;  %v10173_v31 = vld [vmem:[#allocation2 + $0x87] sm:$0xff]  ;;  %v10181_v35 = vld [vmem:[#allocation2 + $0x97] sm:$0xff] }
  0x85   : > { %8451 = vmatprep.subr.bf16.mxu0 %v13438_v0  ;;  %v1787_v25 = vld [vmem:[#allocation7 + $0x1f0] sm:$0xff]  ;;  %v10184_v38 = vld [vmem:[#allocation2 + $0x9f] sm:$0xff]  ;;  %v549_v46 = vld [vmem:[#allocation2 + $0xc8] sm:$0xff] }
  0x86   : > { %v546_v40 = vld [vmem:[#allocation2 + $0xb0] sm:$0xff]  ;;  %v10198_v45 = vld [vmem:[#allocation2 + $0xbf] sm:$0xff]  ;;  %v10201_v47 = vld [vmem:[#allocation2 + $0xc7] sm:$0xff] }
  0x87   : > { %v10191_v41 = vld [vmem:[#allocation2 + $0xaf] sm:$0xff]  ;;  %v10208_v51 = vld [vmem:[#allocation2 + $0xd7] sm:$0xff]  ;;  %v10214_v56 = vld [vmem:[#allocation2 + $0xe7] sm:$0xff] }
  0x88   : > { %8453 = vmatpush1.bf16.msra.mxu0 %v8452_v62  ;;  %v1778_v62 = vld [vmem:[#allocation7 + $0x1a8] sm:$0xff] }
  0x89   : > { %8454 = vmatprep.subr.bf16.mxu0 %v13438_v0  ;;  %v8491_v3 = vpack.c.bf16 %v1778_v62, %v1777_v61  ;;  %v10204_v50 = vld [vmem:[#allocation2 + $0xcf] sm:$0xff]  ;;  %v556_v61 = vld [vmem:[#allocation2 + $0x100] sm:$0xff] }
  0x8a   : > { %v553_v55 = vld [vmem:[#allocation2 + $0xe8] sm:$0xff]  ;;  %v10224_v62 = vld [vmem:[#allocation2 + $0xff] sm:$0xff] }
  0x8b   : > { %v10218_v57 = vld [vmem:[#allocation2 + $0xef] sm:$0xff]  ;;  %v10228_v63 = vld [vmem:[#allocation2 + $0x107] sm:$0xff] }
  0x8c   : > { %8456 = vmatpush1.bf16.msra.mxu0 %v8455_v4  ;;  %v1779_v4 = vld [vmem:[#allocation7 + $0x1b0] sm:$0xff]  ;;  %v561_v9 = vld [vmem:[#allocation2 + $0x128] sm:$0xff] }
  0x8d   : > { %8457 = vmatprep.subr.bf16.mxu0 %v13438_v0  ;;  %v8494_v8 = vpack.c.bf16 %v1780_v5, %v1779_v4  ;;  %v10231_v4 = vld [vmem:[#allocation2 + $0x10f] sm:$0xff]  ;;  %v559_v5 = vld [vmem:[#allocation2 + $0x118] sm:$0xff]  ;;  %v10241_v10 = vld [vmem:[#allocation2 + $0x127] sm:$0xff] }
  0x90   : > { %8459 = vmatpush1.bf16.msra.mxu0 %v8458_v7  ;;  %v537_v7 = vld [vmem:[#allocation2 + $0x68] sm:$0xff] }
  0x91   : > { %8460 = vmatprep.subr.bf16.mxu0 %v13438_v0 }
  0x93   : > { %1941 = vmatmul.mubr.f32.vlgmr.msra.gmra.mrb[0].mxu0 %v429_v11  ;;  %v8032_v11 = vld [vmem:[%s10037_s10 + $0xe0] sm:$0xff] }
  0x94   : > { %8462 = vmatpush1.bf16.msra.mxu0 %v8461_v12  ;;  %1945 = vmatprep.mubr.f32.mxu0 %v9800_v1  ;;  %422 = vst.msk [vmem:[#allocation2 + $0x170] sm:$0xff] %vm351_vm0, %v8032_v11  ;;  %v10154_v12 = vld [vmem:[#allocation2 + $0x67] sm:$0xff]  ;;  %v562_v11 = vld [vmem:[#allocation2 + $0x130] sm:$0xff] }
  0x95   : > { %8463 = vmatprep.subr.bf16.mxu0 %v13438_v0 }
  0x97   : > { %1946 = vmatmul.mubr.f32.gmra.mrb[2].mxu0 %v430_v16  ;;  %v1784_v16 = vld [vmem:[#allocation7 + $0x1d8] sm:$0xff] }
  0x98   : > { %1950 = vmatprep.mubr.f32.mxu0 %v9800_v1  ;;  %8465 = vmatpush1.bf16.msra.mxu0 %v8464_v17  ;;  %v8033_v17 = vld [vmem:[%s10037_s10 + $0xe8] sm:$0xff]  ;;  %v8500_v19 = vpack.c.bf16 %v1784_v16, %v1783_v15  ;;  %v564_v15 = vld [vmem:[#allocation2 + $0x140] sm:$0xff] }
  0x99   : > { %8466 = vmatprep.subr.bf16.mxu0 %v13438_v0  ;;  %423 = vst.msk [vmem:[#allocation2 + $0x178] sm:$0xff] %vm351_vm0, %v8033_v17  ;;  %v10251_v16 = vld [vmem:[#allocation2 + $0x13f] sm:$0xff]  ;;  %v565_v17 = vld [vmem:[#allocation2 + $0x148] sm:$0xff] }
  0x9b   : > { %1951 = vmatmul.mubr.f32.gmra.mrb[4].mxu0 %v431_v20  ;;  %v1785_v20 = vld [vmem:[#allocation7 + $0x1e0] sm:$0xff] }
  0x9c   : > { %1955 = vmatprep.mubr.f32.mxu0 %v528_v23  ;;  %8468 = vmatpush1.bf16.msra.mxu0 %v8467_v21  ;;  %v1786_v21 = vld [vmem:[#allocation7 + $0x1e8] sm:$0xff] }
  0x9d   : > { %8469 = vmatprep.subr.bf16.mxu0 %v13438_v0  ;;  %v8503_v23 = vpack.c.bf16 %v1786_v21, %v1785_v20  ;;  %v10258_v20 = vld [vmem:[#allocation2 + $0x14f] sm:$0xff]  ;;  %v567_v21 = vld [vmem:[#allocation2 + $0x158] sm:$0xff] }
  0x9f   : > { %1956 = vmatmul.mubr.f32.gmra.mrb[6].mxu0 %v10103_v26 }
  0xa0   : > { %1960 = vmatprep.mubr.f32.mxu0 %v529_v29  ;;  %8471 = vmatpush1.bf16.msra.mxu0 %v8470_v27  ;;  %v1788_v27 = vld [vmem:[#allocation7 + $0x1f8] sm:$0xff] }
  0xa1   : > { %8472 = vmatprep.subr.bf16.mxu0 %v13438_v0  ;;  %v8506_v29 = vpack.c.bf16 %v1788_v27, %v1787_v25  ;;  %v10264_v25 = vld [vmem:[#allocation2 + $0x15f] sm:$0xff]  ;;  %v10268_v27 = vld [vmem:[#allocation2 + $0x167] sm:$0xff] }
  0xa3   : > { %1961 = vmatmul.mubr.f32.gmra.mrb[8].mxu0 %v10109_v32 }
  0xa4   : > { %1965 = vmatprep.mubr.f32.mxu0 %v9800_v1  ;;  %8474 = vmatpush1.bf16.msra.mxu0 %v8473_v33  ;;  %v10178_v33 = vld [vmem:[#allocation2 + $0x8f] sm:$0xff] }
  0xa5   : > { %8475 = vmatprep.subr.bf16.mxu0 %v13438_v0 }
  0xa7   : > { %1966 = vmatmul.mubr.f32.gmra.mrb[10].mxu0 %v10114_v36 }
  0xa8   : > { %1970 = vmatprep.mubr.f32.mxu0 %v531_v39  ;;  %8477 = vmatpush1.bf16.msra.mxu0 %v8476_v37  ;;  %v544_v37 = vld [vmem:[#allocation2 + $0xa0] sm:$0xff] }
  0xa9   : > { %8478 = vmatprep.subr.bf16.mxu0 %v13438_v0  ;;  %v10188_v39 = vld [vmem:[#allocation2 + $0xa7] sm:$0xff] }
  0xab   : > { %1971 = vmatmul.mubr.f32.gmra.mrb[12].mxu0 %v10120_v42 }
  0xac   : > { %1975 = vmatprep.mubr.f32.mxu0 %v532_v43  ;;  %8480 = vmatpush1.bf16.msra.mxu0 %v8479_v44  ;;  %v547_v43 = vld [vmem:[#allocation2 + $0xb8] sm:$0xff] }
  0xad   : > { %8481 = vmatprep.subr.bf16.mxu0 %v13438_v0  ;;  %v10194_v44 = vld [vmem:[#allocation2 + $0xb7] sm:$0xff] }
  0xaf   : > { %1976 = vmatmul.mubr.f32.gmra.mrb[14].mxu0 %v10126_v48 }
  0xb0   : > { %1980 = vmatprep.mubr.f32.mxu0 %v9800_v1  ;;  %8483 = vmatpush1.bf16.msra.mxu0 %v8482_v49  ;;  %v550_v49 = vld [vmem:[#allocation2 + $0xd0] sm:$0xff] }
  0xb1   : > { %8484 = vmatprep.subr.bf16.mxu0 %v13438_v0 }
  0xb3   : > { %1981 = vmatmul.mubr.f32.gmra.mrb[16].mxu0 %v10131_v52 }
  0xb4   : > { %1985 = vmatprep.mubr.f32.mxu0 %v534_v53  ;;  %8486 = vmatpush1.bf16.msra.mxu0 %v8485_v54  ;;  %v552_v53 = vld [vmem:[#allocation2 + $0xe0] sm:$0xff] }
  0xb5   : > { %8487 = vmatprep.subr.bf16.mxu0 %v13438_v0  ;;  %v10211_v54 = vld [vmem:[#allocation2 + $0xdf] sm:$0xff] }
  0xb7   : > { %1986 = vmatmul.mubr.f32.gmra.mrb[18].mxu0 %v10137_v58 }
  0xb8   : > { %1990 = vmatprep.mubr.f32.mxu0 %v535_v59  ;;  %8489 = vmatpush1.bf16.msra.mxu0 %v8488_v60  ;;  %v555_v59 = vld [vmem:[#allocation2 + $0xf8] sm:$0xff] }
  0xb9   : > { %8490 = vmatprep.subr.bf16.mxu0 %v13438_v0  ;;  %v10221_v60 = vld [vmem:[#allocation2 + $0xf7] sm:$0xff] }
  0xbb   : > { %1991 = vmatmul.mubr.f32.gmra.mrb[20].mxu0 %v10143_v2 }
  0xbc   : > { %1995 = vmatprep.mubr.f32.mxu0 %v9800_v1  ;;  %8492 = vmatpush1.bf16.msra.mxu0 %v8491_v3  ;;  %v558_v3 = vld [vmem:[#allocation2 + $0x110] sm:$0xff] }
  0xbd   : > { %8493 = vmatprep.subr.bf16.mxu0 %v13438_v0 }
  0xbf   : > { %1996 = vmatmul.mubr.f32.gmra.mrb[22].mxu0 %v10148_v6 }
  0xc0   : > { %2000 = vmatprep.mubr.f32.mxu0 %v537_v7  ;;  %8495 = vmatpush1.bf16.msra.mxu0 %v8494_v8  ;;  %v10234_v7 = vld [vmem:[#allocation2 + $0x117] sm:$0xff]  ;;  %v10238_v8 = vld [vmem:[#allocation2 + $0x11f] sm:$0xff] }
  0xc1   : > { %8496 = vmatprep.subr.bf16.mxu0 %v13438_v0 }
  0xc3   : > { %2001 = vmatmul.mubr.f32.gmra.mrb[24].mxu0 %v10154_v12 }
  0xc4   : > { %2005 = vmatprep.mubr.f32.mxu0 %v538_v13  ;;  %8498 = vmatpush1.bf16.msra.mxu0 %v8497_v14  ;;  %v10244_v13 = vld [vmem:[#allocation2 + $0x12f] sm:$0xff]  ;;  %v10248_v14 = vld [vmem:[#allocation2 + $0x137] sm:$0xff] }
  0xc5   : > { %8499 = vmatprep.subr.bf16.mxu0 %v13438_v0 }
  0xc7   : > { %2006 = vmatmul.mubr.f32.gmra.mrb[26].mxu0 %v10160_v18 }
  0xc8   : > { %2010 = vmatprep.mubr.f32.mxu0 %v9800_v1  ;;  %8501 = vmatpush1.bf16.msra.mxu0 %v8500_v19  ;;  %v10254_v19 = vld [vmem:[#allocation2 + $0x147] sm:$0xff] }
  0xc9   : > { %8502 = vmatprep.subr.bf16.mxu0 %v13438_v0 }
  0xcb   : > { %2011 = vmatmul.mubr.f32.gmra.mrb[28].mxu0 %v10165_v22 }
  0xcc   : > { %2015 = vmatprep.mubr.f32.mxu0 %v540_v24  ;;  %8504 = vmatpush1.bf16.msra.mxu0 %v8503_v23  ;;  %v10261_v23 = vld [vmem:[#allocation2 + $0x157] sm:$0xff]  ;;  %v568_v24 = vld [vmem:[#allocation2 + $0x160] sm:$0xff] }
  0xcd   : > { %8505 = vmatprep.subr.bf16.mxu0 %v13438_v0 }
  0xcf   : > { %2016 = vmatmul.mubr.f32.gmra.mrb[30].mxu0 %v10169_v28 }
  0xd0   : > { %2020 = vmatprep.mubr.f32.mxu0 %v541_v30  ;;  %8507 = vmatpush1.bf16.msra.mxu0 %v8506_v29  ;;  %v570_v29 = vld [vmem:[#allocation2 + $0x170] sm:$0xff] }
  0xd1   : > { %8508 = vmatprep.subr.bf16.mxu0 %v13438_v0  ;;  %v10271_v30 = vld [vmem:[#allocation2 + $0x16f] sm:$0xff] }
  0xd3   : > { %2021 = vmatmul.mubr.f32.gmra.mrb[32].mxu0 %v10173_v31 }
  0xd4   : > { %2025 = vmatprep.mubr.f32.mxu0 %v9800_v1 }
  0xd7   : > { %2026 = vmatmul.mubr.f32.gmra.mrb[34].mxu0 %v10178_v33 }
  0xd8   : > { %2030 = vmatprep.mubr.f32.mxu0 %v543_v34  ;;  %v571_v34 = vld [vmem:[#allocation2 + $0x178] sm:$0xff] }
  0xdb   : > { %2031 = vmatmul.mubr.f32.gmra.mrb[36].mxu0 %v10181_v35 }
  0xdc   : > { %2035 = vmatprep.mubr.f32.mxu0 %v544_v37  ;;  %v10274_v37 = vld [vmem:[#allocation2 + $0x177] sm:$0xff] }
  0xdf   : > { %2036 = vmatmul.mubr.f32.gmra.mrb[38].mxu0 %v10184_v38 }
  0xe0   : > { %2040 = vmatprep.mubr.f32.mxu0 %v9800_v1 }
  0xe3   : > { %2041 = vmatmul.mubr.f32.gmra.mrb[40].mxu0 %v10188_v39 }
  0xe4   : > { %2045 = vmatprep.mubr.f32.mxu0 %v546_v40  ;;  %v10278_v40 = vld [vmem:[#allocation2 + $0x17f] sm:$0xff] }
  0xe7   : > { %2046 = vmatmul.mubr.f32.gmra.mrb[42].mxu0 %v10191_v41 }
  0xe8   : > { %2050 = vmatprep.mubr.f32.mxu0 %v547_v43  ;;  %v1789_v43 = vld [vmem:[#allocation7 + $0x200] sm:$0xff] }
  0xeb   : > { %2051 = vmatmul.mubr.f32.gmra.mrb[44].mxu0 %v10194_v44 }
  0xec   : > { %2055 = vmatprep.mubr.f32.mxu0 %v9800_v1 }
  0xef   : > { %2056 = vmatmul.mubr.f32.gmra.mrb[46].mxu0 %v10198_v45 }
  0xf0   : > { %2060 = vmatprep.mubr.f32.mxu0 %v549_v46  ;;  %v1790_v46 = vld [vmem:[#allocation7 + $0x208] sm:$0xff] }
  0xf3   : > { %2061 = vmatmul.mubr.f32.gmra.mrb[48].mxu0 %v10201_v47 }
  0xf4   : > { %2065 = vmatprep.mubr.f32.mxu0 %v550_v49  ;;  %v621_v49 = vld [vmem:[#allocation2 + $0x9] sm:$0xff] }
  0xf7   : > { %2066 = vmatmul.mubr.f32.gmra.mrb[50].mxu0 %v10204_v50 }
  0xf8   : > { %2070 = vmatprep.mubr.f32.mxu0 %v9800_v1 }
  0xfb   : > { %2071 = vmatmul.mubr.f32.gmra.mrb[52].mxu0 %v10208_v51 }
  0xfc   : > { %2075 = vmatprep.mubr.f32.mxu0 %v552_v53  ;;  %v8509_v53 = vpack.c.bf16 %v1790_v46, %v1789_v43  ;;  %v10297_v43 = vld [vmem:[#allocation2 + $0x31] sm:$0xff] }
  0xff   : > { %2076 = vmatmul.mubr.f32.gmra.mrb[54].mxu0 %v10211_v54 }
 0x100   : > { %2080 = vmatprep.mubr.f32.mxu0 %v553_v55  ;;  %v1791_v55 = vld [vmem:[#allocation7 + $0x210] sm:$0xff] }
 0x103   : > { %2081 = vmatmul.mubr.f32.gmra.mrb[56].mxu0 %v10214_v56 }
 0x104   : > { %2085 = vmatprep.mubr.f32.mxu0 %v9800_v1 }
 0x107   : > { %2086 = vmatmul.mubr.f32.gmra.mrb[58].mxu0 %v10218_v57 }
 0x108   : > { %2090 = vmatprep.mubr.f32.mxu0 %v555_v59  ;;  %v1792_v59 = vld [vmem:[#allocation7 + $0x218] sm:$0xff] }
 0x10b   : > { %2091 = vmatmul.mubr.f32.gmra.mrb[60].mxu0 %v10221_v60 }
 0x10c   : > { %2095 = vmatprep.mubr.f32.mxu0 %v556_v61  ;;  %v622_v61 = vld [vmem:[#allocation2 + $0x11] sm:$0xff] }
 0x10f   : > { %2096 = vmatmul.mubr.f32.gmra.mrb[62].mxu0 %v10224_v62 }
 0x110   : > { %2100 = vmatprep.mubr.f32.mxu0 %v9800_v1 }
 0x113   : > { %2101 = vmatmul.mubr.f32.gmra.mrb[64].mxu0 %v10228_v63 }
 0x114   : > { %2105 = vmatprep.mubr.f32.mxu0 %v558_v3  ;;  %v8512_v3 = vpack.c.bf16 %v1792_v59, %v1791_v55  ;;  %v1803_v59 = vld [vmem:[#allocation7 + $0x270] sm:$0xff] }
 0x117   : > { %2106 = vmatmul.mubr.f32.gmra.mrb[66].mxu0 %v10231_v4 }
 0x118   : > { %2110 = vmatprep.mubr.f32.mxu0 %v559_v5  ;;  %v1794_v5 = vld [vmem:[#allocation7 + $0x228] sm:$0xff] }
 0x11b   : > { %2111 = vmatmul.mubr.f32.gmra.mrb[68].mxu0 %v10234_v7 }
 0x11c   : > { %2115 = vmatprep.mubr.f32.mxu0 %v9800_v1 }
 0x11f   : > { %2116 = vmatmul.mubr.f32.gmra.mrb[70].mxu0 %v10238_v8 }
 0x120   : > { %2120 = vmatprep.mubr.f32.mxu0 %v561_v9  ;;  %v623_v9 = vld [vmem:[#allocation2 + $0x19] sm:$0xff] }
 0x123   : > { %2121 = vmatmul.mubr.f32.gmra.mrb[72].mxu0 %v10241_v10 }
 0x124   : > { %2125 = vmatprep.mubr.f32.mxu0 %v562_v11  ;;  %v1795_v11 = vld [vmem:[#allocation7 + $0x230] sm:$0xff] }
 0x127   : > { %2126 = vmatmul.mubr.f32.gmra.mrb[74].mxu0 %v10244_v13 }
 0x128   : > { %2130 = vmatprep.mubr.f32.mxu0 %v9800_v1 }
 0x12b   : > { %2131 = vmatmul.mubr.f32.gmra.mrb[76].mxu0 %v10248_v14 }
 0x12c   : > { %2135 = vmatprep.mubr.f32.mxu0 %v564_v15  ;;  %v1796_v15 = vld [vmem:[#allocation7 + $0x238] sm:$0xff] }
 0x12f   : > { %2136 = vmatmul.mubr.f32.gmra.mrb[78].mxu0 %v10251_v16 }
 0x130   : > { %2140 = vmatprep.mubr.f32.mxu0 %v565_v17  ;;  %v8518_v17 = vpack.c.bf16 %v1796_v15, %v1795_v11  ;;  %v10317_v11 = vld [vmem:[#allocation2 + $0x51] sm:$0xff] }
 0x133   : > { %2141 = vmatmul.mubr.f32.gmra.mrb[80].mxu0 %v10254_v19 }
 0x134   : > { %2145 = vmatprep.mubr.f32.mxu0 %v9800_v1 }
 0x137   : > { %2146 = vmatmul.mubr.f32.gmra.mrb[82].mxu0 %v10258_v20 }
 0x138   : > { %2150 = vmatprep.mubr.f32.mxu0 %v567_v21  ;;  %v1797_v21 = vld [vmem:[#allocation7 + $0x240] sm:$0xff] }
 0x13b   : > { %2151 = vmatmul.mubr.f32.gmra.mrb[84].mxu0 %v10261_v23 }
 0x13c   : > { %2155 = vmatprep.mubr.f32.mxu0 %v568_v24  ;;  %v1798_v24 = vld [vmem:[#allocation7 + $0x248] sm:$0xff] }
 0x13f   : > { %2156 = vmatmul.mubr.f32.gmra.mrb[86].mxu0 %v10264_v25 }
 0x140   : > { %2160 = vmatprep.mubr.f32.mxu0 %v9800_v1 }
 0x143   : > { %2161 = vmatmul.mubr.f32.gmra.mrb[88].mxu0 %v10268_v27 }
 0x144   : > { %2165 = vmatprep.mubr.f32.mxu0 %v570_v29  ;;  %v8521_v29 = vpack.c.bf16 %v1798_v24, %v1797_v21  ;;  %v10322_v21 = vld [vmem:[#allocation2 + $0x59] sm:$0xff] }
 0x147   : > { %2166 = vmatmul.mubr.f32.gmra.mrb[90].mxu0 %v10271_v30 }
 0x148   : > { %2170 = vmatprep.mubr.f32.mxu0 %v571_v34  ;;  %v1799_v34 = vld [vmem:[#allocation7 + $0x250] sm:$0xff] }
 0x14b   : > { %2171 = vmatmul.mubr.f32.gmra.mrb[92].mxu0 %v10274_v37 }
 0x14c   : > { %2175 = vmatprep.mubr.f32.mxu0 %v9800_v1  ;;  %v1793_v1 = vld [vmem:[#allocation7 + $0x220] sm:$0xff] }
 0x14f   : > { %2176 = vmatmul.mubr.f32.gmra.mrb[94].mxu0 %v10278_v40 }
 0x150   : > { %2245 = vmatprep.mubr.f32.mxu0 %v10103_v26  ;;  %v8515_v26 = vpack.c.bf16 %v1794_v5, %v1793_v1  ;;  %v1805_v1 = vld [vmem:[#allocation7 + $0x280] sm:$0xff]  ;;  %v10312_v5 = vld [vmem:[#allocation2 + $0x49] sm:$0xff] }
 0x153   : > { %2246 = vmatmul.mubr.f32.vlgmr.msra.gmra.mrb[0].mxu0 %v621_v49  ;;  %v1801_v49 = vld [vmem:[#allocation7 + $0x260] sm:$0xff] }
 0x154   : > { %8510 = vmatpush1.bf16.msra.mxu0 %v8509_v53  ;;  %2250 = vmatprep.mubr.f32.mxu0 %v10109_v32  ;;  %v10287_v32 = vld [vmem:[#allocation2 + $0x21] sm:$0xff]  ;;  %v10302_v53 = vld [vmem:[#allocation2 + $0x39] sm:$0xff] }
 0x155   : > { %8511 = vmatprep.subr.bf16.mxu0 %v13438_v0 }
 0x157   : > { %2251 = vmatmul.mubr.f32.gmra.mrb[2].mxu0 %v622_v61  ;;  %v10307_v61 = vld [vmem:[#allocation2 + $0x41] sm:$0xff] }
 0x158   : > { %2255 = vmatprep.mubr.f32.mxu0 %v10114_v36  ;;  %8513 = vmatpush1.bf16.msra.mxu0 %v8512_v3  ;;  %v10292_v36 = vld [vmem:[#allocation2 + $0x29] sm:$0xff] }
 0x159   : > { %8514 = vmatprep.subr.bf16.mxu0 %v13438_v0 }
 0x15b   : > { %2256 = vmatmul.mubr.f32.gmra.mrb[4].mxu0 %v623_v9 }
 0x15c   : > { %2260 = vmatprep.mubr.f32.mxu0 %v10120_v42  ;;  %8516 = vmatpush1.bf16.msra.mxu0 %v8515_v26  ;;  %v1800_v42 = vld [vmem:[#allocation7 + $0x258] sm:$0xff]  ;;  %v1807_v26 = vld [vmem:[#allocation7 + $0x290] sm:$0xff] }
 0x15d   : > { %8517 = vmatprep.subr.bf16.mxu0 %v13438_v0  ;;  %v8524_v46 = vpack.c.bf16 %v1800_v42, %v1799_v34  ;;  %v10327_v34 = vld [vmem:[#allocation2 + $0x61] sm:$0xff] }
 0x15f   : > { %2261 = vmatmul.mubr.f32.gmra.mrb[6].mxu0 %v10287_v32 }
 0x160   : > { %2265 = vmatprep.mubr.f32.mxu0 %v10126_v48  ;;  %8519 = vmatpush1.bf16.msra.mxu0 %v8518_v17  ;;  %v1802_v48 = vld [vmem:[#allocation7 + $0x268] sm:$0xff]  ;;  %v1809_v17 = vld [vmem:[#allocation7 + $0x2a0] sm:$0xff] }
 0x161   : > { %8520 = vmatprep.subr.bf16.mxu0 %v13438_v0  ;;  %v8527_v55 = vpack.c.bf16 %v1802_v48, %v1801_v49  ;;  %v8034_v49 = vld [vmem:[%s10037_s10 + $0xf0] sm:$0xff] }
 0x162   : > { %427 = vst.msk [vmem:[#allocation2 + $0x188] sm:$0xff] %vm351_vm0, %v8034_v49  ;;  %v10334_v48 = vld [vmem:[#allocation2 + $0x69] sm:$0xff] }
 0x163   : > { %2266 = vmatmul.mubr.f32.gmra.mrb[8].mxu0 %v10292_v36 }
 0x164   : > { %2270 = vmatprep.mubr.f32.mxu0 %v10131_v52  ;;  %8522 = vmatpush1.bf16.msra.mxu0 %v8521_v29  ;;  %v1804_v52 = vld [vmem:[#allocation7 + $0x278] sm:$0xff] }
 0x165   : > { %8523 = vmatprep.subr.bf16.mxu0 %v13438_v0  ;;  %v8530_v3 = vpack.c.bf16 %v1804_v52, %v1803_v59  ;;  %v1812_v29 = vld [vmem:[#allocation7 + $0x2b8] sm:$0xff] }
 0x166   : > { %v1816_v59 = vld [vmem:[#allocation7 + $0x2d8] sm:$0xff] }
 0x167   : > { %2271 = vmatmul.mubr.f32.gmra.mrb[10].mxu0 %v10297_v43  ;;  %v8035_v52 = vld [vmem:[%s10037_s10 + $0xf8] sm:$0xff] }
 0x168   : > { %2275 = vmatprep.mubr.f32.mxu0 %v10137_v58  ;;  %8525 = vmatpush1.bf16.msra.mxu0 %v8524_v46  ;;  %v1806_v58 = vld [vmem:[#allocation7 + $0x288] sm:$0xff]  ;;  %428 = vst.msk [vmem:[#allocation2 + $0x190] sm:$0xff] %vm351_vm0, %v8035_v52 }
 0x169   : > { %8526 = vmatprep.subr.bf16.mxu0 %v13438_v0  ;;  %v8533_v9 = vpack.c.bf16 %v1806_v58, %v1805_v1  ;;  %v1814_v46 = vld [vmem:[#allocation7 + $0x2c8] sm:$0xff] }
 0x16a   : > { %v1818_v58 = vld [vmem:[#allocation7 + $0x2e8] sm:$0xff] }
 0x16b   : > { %2276 = vmatmul.mubr.f32.gmra.mrb[12].mxu0 %v10302_v53 }
 0x16c   : > { %2280 = vmatprep.mubr.f32.mxu0 %v10143_v2  ;;  %8528 = vmatpush1.bf16.msra.mxu0 %v8527_v55  ;;  %v1808_v2 = vld [vmem:[#allocation7 + $0x298] sm:$0xff]  ;;  %v1815_v55 = vld [vmem:[#allocation7 + $0x2d0] sm:$0xff] }
 0x16d   : > { %8529 = vmatprep.subr.bf16.mxu0 %v13438_v0  ;;  %v8536_v15 = vpack.c.bf16 %v1808_v2, %v1807_v26  ;;  %v8548_v1 = vpack.c.bf16 %v1816_v59, %v1815_v55  ;;  %v1819_v2 = vld [vmem:[#allocation7 + $0x2f0] sm:$0xff]  ;;  %v1824_v55 = vld [vmem:[#allocation7 + $0x318] sm:$0xff]  ;;  %v814_v59 = vld [vmem:[#allocation2 + $0x28] sm:$0xff] }
 0x16f   : > { %2281 = vmatmul.mubr.f32.gmra.mrb[14].mxu0 %v10307_v61 }
 0x170   : > { %2285 = vmatprep.mubr.f32.mxu0 %v10148_v6  ;;  %8531 = vmatpush1.bf16.msra.mxu0 %v8530_v3  ;;  %v1810_v6 = vld [vmem:[#allocation7 + $0x2a8] sm:$0xff]  ;;  %v10341_v3 = vld [vmem:[#allocation2 + $0x71] sm:$0xff] }
 0x171   : > { %8532 = vmatprep.subr.bf16.mxu0 %v13438_v0  ;;  %v8539_v24 = vpack.c.bf16 %v1810_v6, %v1809_v17  ;;  %v10365_v6 = vld [vmem:[#allocation2 + $0x99] sm:$0xff] }
 0x173   : > { %2286 = vmatmul.mubr.f32.gmra.mrb[16].mxu0 %v10312_v5 }
 0x174   : > { %2290 = vmatprep.mubr.f32.mxu0 %v10154_v12  ;;  %8534 = vmatpush1.bf16.msra.mxu0 %v8533_v9  ;;  %v1811_v12 = vld [vmem:[#allocation7 + $0x2b0] sm:$0xff]  ;;  %v10346_v9 = vld [vmem:[#allocation2 + $0x79] sm:$0xff] }
 0x175   : > { %8535 = vmatprep.subr.bf16.mxu0 %v13438_v0  ;;  %v8542_v42 = vpack.c.bf16 %v1812_v29, %v1811_v12  ;;  %v10472_v12 = vld [vmem:[#allocation2 + $0x171] sm:$0xff]  ;;  %v10475_v29 = vld [vmem:[#allocation2 + $0x179] sm:$0xff] }
 0x177   : > { %2291 = vmatmul.mubr.f32.gmra.mrb[18].mxu0 %v10317_v11 }
 0x178   : > { %2295 = vmatprep.mubr.f32.mxu0 %v10160_v18  ;;  %8537 = vmatpush1.bf16.msra.mxu0 %v8536_v15  ;;  %v1813_v18 = vld [vmem:[#allocation7 + $0x2c0] sm:$0xff] }
 0x179   : > { %8538 = vmatprep.subr.bf16.mxu0 %v13438_v0  ;;  %v10351_v15 = vld [vmem:[#allocation2 + $0x81] sm:$0xff] }
 0x17b   : > { %2296 = vmatmul.mubr.f32.gmra.mrb[20].mxu0 %v10322_v21 }
 0x17c   : > { %2300 = vmatprep.mubr.f32.mxu0 %v10165_v22  ;;  %8540 = vmatpush1.bf16.msra.mxu0 %v8539_v24  ;;  %v8545_v22 = vpack.c.bf16 %v1814_v46, %v1813_v18  ;;  %v10373_v24 = vld [vmem:[#allocation2 + $0xa9] sm:$0xff]  ;;  %v813_v46 = vld [vmem:[#allocation2 + $0x20] sm:$0xff] }
 0x17d   : > { %8541 = vmatprep.subr.bf16.mxu0 %v13438_v0  ;;  %v1822_v18 = vld [vmem:[#allocation7 + $0x308] sm:$0xff] }
 0x17f   : > { %2301 = vmatmul.mubr.f32.gmra.mrb[22].mxu0 %v10327_v34 }
 0x180   : > { %2305 = vmatprep.mubr.f32.mxu0 %v10169_v28  ;;  %8543 = vmatpush1.bf16.msra.mxu0 %v8542_v42  ;;  %v1817_v28 = vld [vmem:[#allocation7 + $0x2e0] sm:$0xff] }
 0x181   : > { %8544 = vmatprep.subr.bf16.mxu0 %v13438_v0  ;;  %v8551_v26 = vpack.c.bf16 %v1818_v58, %v1817_v28  ;;  %v10478_v42 = vld [vmem:[#allocation2 + $0x181] sm:$0xff] }
 0x182   : > { %v1826_v28 = vld [vmem:[#allocation7 + $0x328] sm:$0xff] }
 0x183   : > { %2306 = vmatmul.mubr.f32.gmra.mrb[24].mxu0 %v10334_v48 }
 0x184   : > { %2310 = vmatprep.mubr.f32.mxu0 %v10173_v31  ;;  %8546 = vmatpush1.bf16.msra.mxu0 %v8545_v22  ;;  %v1820_v31 = vld [vmem:[#allocation7 + $0x2f8] sm:$0xff]  ;;  %v1823_v22 = vld [vmem:[#allocation7 + $0x310] sm:$0xff] }
 0x185   : > { %8547 = vmatprep.subr.bf16.mxu0 %v13438_v0  ;;  %v8554_v17 = vpack.c.bf16 %v1820_v31, %v1819_v2  ;;  %v8560_v52 = vpack.c.bf16 %v1824_v55, %v1823_v22  ;;  %v10486_v2 = vld [vmem:[#allocation2 + $0x8] sm:$0xff]  ;;  %v1835_v22 = vld [vmem:[#allocation7 + $0x370] sm:$0xff]  ;;  %v1836_v55 = vld [vmem:[#allocation7 + $0x378] sm:$0xff] }
 0x187   : > { %2311 = vmatmul.mubr.f32.gmra.mrb[26].mxu0 %v10341_v3 }
 0x188   : > { %2315 = vmatprep.mubr.f32.mxu0 %v10178_v33  ;;  %8549 = vmatpush1.bf16.msra.mxu0 %v8548_v1  ;;  %v10356_v33 = vld [vmem:[#allocation2 + $0x89] sm:$0xff]  ;;  %v1825_v1 = vld [vmem:[#allocation7 + $0x320] sm:$0xff] }
 0x189   : > { %8550 = vmatprep.subr.bf16.mxu0 %v13438_v0  ;;  %v8563_v58 = vpack.c.bf16 %v1826_v28, %v1825_v1  ;;  %v1839_v28 = vld [vmem:[#allocation7 + $0x390] sm:$0xff] }
 0x18b   : > { %2316 = vmatmul.mubr.f32.gmra.mrb[28].mxu0 %v10346_v9 }
 0x18c   : > { %2320 = vmatprep.mubr.f32.mxu0 %v10181_v35  ;;  %8552 = vmatpush1.bf16.msra.mxu0 %v8551_v26  ;;  %v10361_v35 = vld [vmem:[#allocation2 + $0x91] sm:$0xff] }
 0x18d   : > { %8553 = vmatprep.subr.bf16.mxu0 %v13438_v0  ;;  %v1828_v26 = vld [vmem:[#allocation7 + $0x338] sm:$0xff] }
 0x18f   : > { %2321 = vmatmul.mubr.f32.gmra.mrb[30].mxu0 %v10351_v15 }
 0x190   : > { %2325 = vmatprep.mubr.f32.mxu0 %v10184_v38  ;;  %8555 = vmatpush1.bf16.msra.mxu0 %v8554_v17  ;;  %v10369_v38 = vld [vmem:[#allocation2 + $0xa1] sm:$0xff] }
 0x191   : > { %8556 = vmatprep.subr.bf16.mxu0 %v13438_v0  ;;  %v1829_v17 = vld [vmem:[#allocation7 + $0x340] sm:$0xff] }
 0x193   : > { %2326 = vmatmul.mubr.f32.gmra.mrb[32].mxu0 %v10356_v33 }
 0x194   : > { %2330 = vmatprep.mubr.f32.mxu0 %v10188_v39  ;;  %v10377_v39 = vld [vmem:[#allocation2 + $0xb1] sm:$0xff] }
 0x197   : > { %2331 = vmatmul.mubr.f32.gmra.mrb[34].mxu0 %v10361_v35 }
 0x198   : > { %2335 = vmatprep.mubr.f32.mxu0 %v10191_v41  ;;  %v10381_v41 = vld [vmem:[#allocation2 + $0xb9] sm:$0xff] }
 0x19b   : > { %2336 = vmatmul.mubr.f32.gmra.mrb[36].mxu0 %v10365_v6 }
 0x19c   : > { %2340 = vmatprep.mubr.f32.mxu0 %v10194_v44  ;;  %v10385_v44 = vld [vmem:[#allocation2 + $0xc1] sm:$0xff] }
 0x19f   : > { %2341 = vmatmul.mubr.f32.gmra.mrb[38].mxu0 %v10369_v38 }
 0x1a0   : > { %2345 = vmatprep.mubr.f32.mxu0 %v10198_v45  ;;  %v10389_v45 = vld [vmem:[#allocation2 + $0xc9] sm:$0xff] }
 0x1a3   : > { %2346 = vmatmul.mubr.f32.gmra.mrb[40].mxu0 %v10373_v24 }
 0x1a4   : > { %2350 = vmatprep.mubr.f32.mxu0 %v10201_v47  ;;  %v10393_v47 = vld [vmem:[#allocation2 + $0xd1] sm:$0xff] }
 0x1a7   : > { %2351 = vmatmul.mubr.f32.gmra.mrb[42].mxu0 %v10377_v39 }
 0x1a8   : > { %2355 = vmatprep.mubr.f32.mxu0 %v10204_v50  ;;  %v10397_v50 = vld [vmem:[#allocation2 + $0xd9] sm:$0xff] }
 0x1ab   : > { %2356 = vmatmul.mubr.f32.gmra.mrb[44].mxu0 %v10381_v41 }
 0x1ac   : > { %2360 = vmatprep.mubr.f32.mxu0 %v10208_v51  ;;  %v10401_v51 = vld [vmem:[#allocation2 + $0xe1] sm:$0xff] }
 0x1af   : > { %2361 = vmatmul.mubr.f32.gmra.mrb[46].mxu0 %v10385_v44 }
 0x1b0   : > { %2365 = vmatprep.mubr.f32.mxu0 %v10211_v54  ;;  %v10405_v54 = vld [vmem:[#allocation2 + $0xe9] sm:$0xff] }
 0x1b3   : > { %2366 = vmatmul.mubr.f32.gmra.mrb[48].mxu0 %v10389_v45 }
 0x1b4   : > { %2370 = vmatprep.mubr.f32.mxu0 %v10214_v56  ;;  %v10409_v56 = vld [vmem:[#allocation2 + $0xf1] sm:$0xff] }
 0x1b7   : > { %2371 = vmatmul.mubr.f32.gmra.mrb[50].mxu0 %v10393_v47 }
 0x1b8   : > { %2375 = vmatprep.mubr.f32.mxu0 %v10218_v57  ;;  %v10413_v57 = vld [vmem:[#allocation2 + $0xf9] sm:$0xff] }
 0x1bb   : > { %2376 = vmatmul.mubr.f32.gmra.mrb[52].mxu0 %v10397_v50 }
 0x1bc   : > { %2380 = vmatprep.mubr.f32.mxu0 %v10221_v60  ;;  %v10417_v60 = vld [vmem:[#allocation2 + $0x101] sm:$0xff] }
 0x1bf   : > { %2381 = vmatmul.mubr.f32.gmra.mrb[54].mxu0 %v10401_v51 }
 0x1c0   : > { %2385 = vmatprep.mubr.f32.mxu0 %v10224_v62  ;;  %v10421_v62 = vld [vmem:[#allocation2 + $0x109] sm:$0xff] }
 0x1c3   : > { %2386 = vmatmul.mubr.f32.gmra.mrb[56].mxu0 %v10405_v54 }
 0x1c4   : > { %2390 = vmatprep.mubr.f32.mxu0 %v10228_v63  ;;  %v10425_v63 = vld [vmem:[#allocation2 + $0x111] sm:$0xff] }
 0x1c7   : > { %2391 = vmatmul.mubr.f32.gmra.mrb[58].mxu0 %v10409_v56 }
 0x1c8   : > { %2395 = vmatprep.mubr.f32.mxu0 %v10231_v4  ;;  %v10429_v4 = vld [vmem:[#allocation2 + $0x119] sm:$0xff] }
 0x1cb   : > { %2396 = vmatmul.mubr.f32.gmra.mrb[60].mxu0 %v10413_v57 }
 0x1cc   : > { %2400 = vmatprep.mubr.f32.mxu0 %v10234_v7  ;;  %v10433_v7 = vld [vmem:[#allocation2 + $0x121] sm:$0xff] }
 0x1cf   : > { %2401 = vmatmul.mubr.f32.gmra.mrb[62].mxu0 %v10417_v60 }
 0x1d0   : > { %2405 = vmatprep.mubr.f32.mxu0 %v10238_v8  ;;  %v10437_v8 = vld [vmem:[#allocation2 + $0x129] sm:$0xff] }
 0x1d3   : > { %2406 = vmatmul.mubr.f32.gmra.mrb[64].mxu0 %v10421_v62 }
 0x1d4   : > { %2410 = vmatprep.mubr.f32.mxu0 %v10241_v10  ;;  %v10441_v10 = vld [vmem:[#allocation2 + $0x131] sm:$0xff] }
 0x1d7   : > { %2411 = vmatmul.mubr.f32.gmra.mrb[66].mxu0 %v10425_v63 }
 0x1d8   : > { %2415 = vmatprep.mubr.f32.mxu0 %v10244_v13  ;;  %v10445_v13 = vld [vmem:[#allocation2 + $0x139] sm:$0xff] }
 0x1db   : > { %2416 = vmatmul.mubr.f32.gmra.mrb[68].mxu0 %v10429_v4 }
 0x1dc   : > { %2420 = vmatprep.mubr.f32.mxu0 %v10248_v14  ;;  %v10449_v14 = vld [vmem:[#allocation2 + $0x141] sm:$0xff] }
 0x1df   : > { %2421 = vmatmul.mubr.f32.gmra.mrb[70].mxu0 %v10433_v7 }
 0x1e0   : > { %2425 = vmatprep.mubr.f32.mxu0 %v10251_v16  ;;  %v10453_v16 = vld [vmem:[#allocation2 + $0x149] sm:$0xff] }
 0x1e3   : > { %2426 = vmatmul.mubr.f32.gmra.mrb[72].mxu0 %v10437_v8 }
 0x1e4   : > { %2430 = vmatprep.mubr.f32.mxu0 %v10254_v19  ;;  %v10457_v19 = vld [vmem:[#allocation2 + $0x151] sm:$0xff] }
 0x1e7   : > { %2431 = vmatmul.mubr.f32.gmra.mrb[74].mxu0 %v10441_v10 }
 0x1e8   : > { %2435 = vmatprep.mubr.f32.mxu0 %v10258_v20  ;;  %v10461_v20 = vld [vmem:[#allocation2 + $0x159] sm:$0xff] }
 0x1eb   : > { %2436 = vmatmul.mubr.f32.gmra.mrb[76].mxu0 %v10445_v13 }
 0x1ec   : > { %2440 = vmatprep.mubr.f32.mxu0 %v10261_v23  ;;  %v10465_v23 = vld [vmem:[#allocation2 + $0x161] sm:$0xff] }
 0x1ef   : > { %2441 = vmatmul.mubr.f32.gmra.mrb[78].mxu0 %v10449_v14 }
 0x1f0   : > { %2445 = vmatprep.mubr.f32.mxu0 %v10264_v25  ;;  %v10469_v25 = vld [vmem:[#allocation2 + $0x169] sm:$0xff] }
 0x1f3   : > { %2446 = vmatmul.mubr.f32.gmra.mrb[80].mxu0 %v10453_v16 }
 0x1f4   : > { %2450 = vmatprep.mubr.f32.mxu0 %v10268_v27  ;;  %v762_v27 = vld [vmem:[#allocation2 + $0x187] sm:$0xff] }
 0x1f7   : > { %2451 = vmatmul.mubr.f32.gmra.mrb[82].mxu0 %v10457_v19 }
 0x1f8   : > { %2455 = vmatprep.mubr.f32.mxu0 %v10271_v30  ;;  %v763_v30 = vld [vmem:[#allocation2 + $0x18f] sm:$0xff] }
 0x1fb   : > { %2456 = vmatmul.mubr.f32.gmra.mrb[84].mxu0 %v10461_v20 }
 0x1fc   : > { %2460 = vmatprep.mubr.f32.mxu0 %v10274_v37  ;;  %v764_v37 = vld [vmem:[#allocation2 + $0x197] sm:$0xff] }
 0x1ff   : > { %2461 = vmatmul.mubr.f32.gmra.mrb[86].mxu0 %v10465_v23 }
 0x200   : > { %2465 = vmatprep.mubr.f32.mxu0 %v10278_v40  ;;  %v1821_v40 = vld [vmem:[#allocation7 + $0x300] sm:$0xff] }
 0x201   : > { %v8557_v49 = vpack.c.bf16 %v1822_v18, %v1821_v40  ;;  %v1833_v18 = vld [vmem:[#allocation7 + $0x360] sm:$0xff] }
 0x203   : > { %2466 = vmatmul.mubr.f32.gmra.mrb[88].mxu0 %v10469_v25 }
 0x204   : > { %2470 = vmatprep.mubr.f32.mxu0 %v762_v27  ;;  %v10495_v27 = vld [vmem:[#allocation2 + $0x40] sm:$0xff] }
 0x207   : > { %2471 = vmatmul.mubr.f32.gmra.mrb[90].mxu0 %v10472_v12 }
 0x208   : > { %2475 = vmatprep.mubr.f32.mxu0 %v763_v30 }
 0x20b   : > { %2476 = vmatmul.mubr.f32.gmra.mrb[92].mxu0 %v10475_v29 }
 0x20c   : > { %2480 = vmatprep.mubr.f32.mxu0 %v764_v37  ;;  %v1831_v37 = vld [vmem:[#allocation7 + $0x350] sm:$0xff] }
 0x20f   : > { %2481 = vmatmul.mubr.f32.gmra.mrb[94].mxu0 %v10478_v42 }
 0x210   : > { %2550 = vmatprep.mubr.f32.mxu0 %v10287_v32  ;;  %v1827_v32 = vld [vmem:[#allocation7 + $0x330] sm:$0xff] }
 0x211   : > { %v8566_v31 = vpack.c.bf16 %v1828_v26, %v1827_v32  ;;  %v1853_v32 = vld [vmem:[#allocation7 + $0x400] sm:$0xff] }
 0x213   : > { %2551 = vmatmul.mubr.f32.vlgmr.msra.gmra.mrb[0].mxu0 %v813_v46  ;;  %v1834_v46 = vld [vmem:[#allocation7 + $0x368] sm:$0xff] }
 0x214   : > { %8558 = vmatpush1.bf16.msra.mxu0 %v8557_v49  ;;  %2555 = vmatprep.mubr.f32.mxu0 %v10292_v36  ;;  %v10490_v36 = vld [vmem:[#allocation2 + $0x38] sm:$0xff]  ;;  %v8575_v49 = vpack.c.bf16 %v1834_v46, %v1833_v18  ;;  %v1843_v18 = vld [vmem:[#allocation7 + $0x3b0] sm:$0xff] }
 0x215   : > { %8559 = vmatprep.subr.bf16.mxu0 %v13438_v0  ;;  %v1844_v46 = vld [vmem:[#allocation7 + $0x3b8] sm:$0xff] }
 0x217   : > { %2556 = vmatmul.mubr.f32.gmra.mrb[2].mxu0 %v814_v59  ;;  %v8578_v59 = vpack.c.bf16 %v1836_v55, %v1835_v22  ;;  %v1858_v22 = vld [vmem:[#allocation7 + $0x428] sm:$0xff] }
 0x218   : > { %2560 = vmatprep.mubr.f32.mxu0 %v10297_v43  ;;  %8561 = vmatpush1.bf16.msra.mxu0 %v8560_v52  ;;  %v1830_v43 = vld [vmem:[#allocation7 + $0x348] sm:$0xff]  ;;  %v1837_v52 = vld [vmem:[#allocation7 + $0x380] sm:$0xff] }
 0x219   : > { %8562 = vmatprep.subr.bf16.mxu0 %v13438_v0  ;;  %v8569_v30 = vpack.c.bf16 %v1830_v43, %v1829_v17  ;;  %v1841_v43 = vld [vmem:[#allocation7 + $0x3a0] sm:$0xff] }
 0x21b   : > { %2561 = vmatmul.mubr.f32.gmra.mrb[4].mxu0 %v10486_v2 }
 0x21c   : > { %2565 = vmatprep.mubr.f32.mxu0 %v10302_v53  ;;  %8564 = vmatpush1.bf16.msra.mxu0 %v8563_v58  ;;  %v1832_v53 = vld [vmem:[#allocation7 + $0x358] sm:$0xff] }
 0x21d   : > { %8565 = vmatprep.subr.bf16.mxu0 %v13438_v0  ;;  %v8572_v40 = vpack.c.bf16 %v1832_v53, %v1831_v37  ;;  %v1840_v58 = vld [vmem:[#allocation7 + $0x398] sm:$0xff] }
 0x21e   : > { %v8584_v17 = vpack.c.bf16 %v1840_v58, %v1839_v28  ;;  %v1856_v37 = vld [vmem:[#allocation7 + $0x418] sm:$0xff]  ;;  %v10529_v58 = vld [vmem:[#allocation2 + $0x80] sm:$0xff] }
 0x21f   : > { %2566 = vmatmul.mubr.f32.gmra.mrb[6].mxu0 %v10490_v36 }
 0x220   : > { %2570 = vmatprep.mubr.f32.mxu0 %v10307_v61  ;;  %8567 = vmatpush1.bf16.msra.mxu0 %v8566_v31  ;;  %v10503_v61 = vld [vmem:[#allocation2 + $0x50] sm:$0xff]  ;;  %v10516_v31 = vld [vmem:[#allocation2 + $0x68] sm:$0xff] }
 0x221   : > { %8568 = vmatprep.subr.bf16.mxu0 %v13438_v0 }
 0x223   : > { %2571 = vmatmul.mubr.f32.gmra.mrb[8].mxu0 %v10495_v27 }
 0x224   : > { %2575 = vmatprep.mubr.f32.mxu0 %v10312_v5  ;;  %8570 = vmatpush1.bf16.msra.mxu0 %v8569_v30  ;;  %v10508_v5 = vld [vmem:[#allocation2 + $0x58] sm:$0xff]  ;;  %v1855_v30 = vld [vmem:[#allocation7 + $0x410] sm:$0xff] }
 0x225   : > { %8571 = vmatprep.subr.bf16.mxu0 %v13438_v0  ;;  %v8608_v53 = vpack.c.bf16 %v1856_v37, %v1855_v30  ;;  %v1849_v30 = vld [vmem:[#allocation7 + $0x3e0] sm:$0xff]  ;;  %v1850_v37 = vld [vmem:[#allocation7 + $0x3e8] sm:$0xff] }
 0x227   : > { %2576 = vmatmul.mubr.f32.gmra.mrb[10].mxu0 %v10486_v2 }
 0x228   : > { %2580 = vmatprep.mubr.f32.mxu0 %v10317_v11  ;;  %8573 = vmatpush1.bf16.msra.mxu0 %v8572_v40  ;;  %v1838_v11 = vld [vmem:[#allocation7 + $0x388] sm:$0xff]  ;;  %v10521_v40 = vld [vmem:[#allocation2 + $0x70] sm:$0xff] }
 0x229   : > { %8574 = vmatprep.subr.bf16.mxu0 %v13438_v0  ;;  %v8581_v1 = vpack.c.bf16 %v1838_v11, %v1837_v52  ;;  %v1846_v52 = vld [vmem:[#allocation7 + $0x3c8] sm:$0xff]  ;;  %v1859_v11 = vld [vmem:[#allocation7 + $0x430] sm:$0xff] }
 0x22b   : > { %2581 = vmatmul.mubr.f32.gmra.mrb[12].mxu0 %v10503_v61 }
 0x22c   : > { %2585 = vmatprep.mubr.f32.mxu0 %v10322_v21  ;;  %8576 = vmatpush1.bf16.msra.mxu0 %v8575_v49  ;;  %v1854_v21 = vld [vmem:[#allocation7 + $0x408] sm:$0xff]  ;;  %v1857_v49 = vld [vmem:[#allocation7 + $0x420] sm:$0xff] }
 0x22d   : > { %8577 = vmatprep.subr.bf16.mxu0 %v13438_v0  ;;  %v8604_v26 = vpack.c.bf16 %v1854_v21, %v1853_v32  ;;  %v8612_v55 = vpack.c.bf16 %v1858_v22, %v1857_v49  ;;  %v1848_v21 = vld [vmem:[#allocation7 + $0x3d8] sm:$0xff]  ;;  %v1865_v22 = vld [vmem:[#allocation7 + $0x460] sm:$0xff] }
 0x22e   : > { %v1852_v49 = vld [vmem:[#allocation7 + $0x3f8] sm:$0xff] }
 0x22f   : > { %2586 = vmatmul.mubr.f32.gmra.mrb[14].mxu0 %v10508_v5  ;;  %8605 = vmatprep.subr.bf16.mxu1 %v8604_v26 }
 0x230   : > { %2590 = vmatprep.mubr.f32.mxu0 %v10327_v34  ;;  %8579 = vmatpush1.bf16.msra.mxu0 %v8578_v59  ;;  %v1842_v34 = vld [vmem:[#allocation7 + $0x3a8] sm:$0xff]  ;;  %v8590_v59 = vpack.c.bf16 %v1844_v46, %v1843_v18  ;;  %v8599_v46 = vpack.c.bf16 %v1850_v37, %v1849_v30  ;;  %v10585_v37 = vld [vmem:[#allocation2 + $0xf8] sm:$0xff] }
 0x231   : > { %8580 = vmatprep.subr.bf16.mxu0 %v13438_v0  ;;  %8607 = vmatpush3.bf16.msra.mxu1 %v8604_v26  ;;  %v1861_v26 = vld [vmem:[#allocation7 + $0x440] sm:$0xff]  ;;  %v10579_v30 = vld [vmem:[#allocation2 + $0xe8] sm:$0xff] }
 0x232   : > { %8609 = vmatprep.subr.bf16.mxu1 %v8608_v53 }
 0x233   : > { %2591 = vmatmul.mubr.f32.gmra.mrb[16].mxu0 %v10486_v2 }
 0x234   : > { %2595 = vmatprep.mubr.f32.mxu0 %v10334_v48  ;;  %8582 = vmatpush1.bf16.msra.mxu0 %v8581_v1  ;;  %v8587_v48 = vpack.c.bf16 %v1842_v34, %v1841_v43  ;;  %v1860_v1 = vld [vmem:[#allocation7 + $0x438] sm:$0xff]  ;;  %v10534_v34 = vld [vmem:[#allocation2 + $0x88] sm:$0xff] }
 0x235   : > { %8583 = vmatprep.subr.bf16.mxu0 %v13438_v0  ;;  %8611 = vmatpush3.bf16.msra.mxu1 %v8608_v53  ;;  %v8616_v28 = vpack.c.bf16 %v1860_v1, %v1859_v11  ;;  %v1863_v53 = vld [vmem:[#allocation7 + $0x450] sm:$0xff]  ;;  %v1868_v11 = vld [vmem:[#allocation7 + $0x478] sm:$0xff] }
 0x236   : > { %8613 = vmatprep.subr.bf16.mxu1 %v8612_v55 }
 0x237   : > { %2596 = vmatmul.mubr.f32.gmra.mrb[18].mxu0 %v10516_v31 }
 0x238   : > { %2600 = vmatprep.mubr.f32.mxu0 %v10341_v3  ;;  %8585 = vmatpush1.bf16.msra.mxu0 %v8584_v17  ;;  %v1845_v3 = vld [vmem:[#allocation7 + $0x3c0] sm:$0xff]  ;;  %v1862_v17 = vld [vmem:[#allocation7 + $0x448] sm:$0xff] }
 0x239   : > { %8586 = vmatprep.subr.bf16.mxu0 %v13438_v0  ;;  %8615 = vmatpush3.bf16.msra.mxu1 %v8612_v55  ;;  %v8593_v32 = vpack.c.bf16 %v1846_v52, %v1845_v3  ;;  %v8620_v43 = vpack.c.bf16 %v1862_v17, %v1861_v26  ;;  %v1866_v55 = vld [vmem:[#allocation7 + $0x468] sm:$0xff]  ;;  %v10542_v3 = vld [vmem:[#allocation2 + $0x98] sm:$0xff] }
 0x23a   : > { %8617 = vmatprep.subr.bf16.mxu1 %v8616_v28  ;;  %v10559_v26 = vld [vmem:[#allocation2 + $0xb8] sm:$0xff]  ;;  %v10565_v17 = vld [vmem:[#allocation2 + $0xc8] sm:$0xff] }
 0x23b   : > { %2601 = vmatmul.mubr.f32.gmra.mrb[20].mxu0 %v10521_v40 }
 0x23c   : > { %2605 = vmatprep.mubr.f32.mxu0 %v10346_v9  ;;  %8588 = vmatpush1.bf16.msra.mxu0 %v8587_v48  ;;  %v1847_v9 = vld [vmem:[#allocation7 + $0x3d0] sm:$0xff]  ;;  %v1864_v48 = vld [vmem:[#allocation7 + $0x458] sm:$0xff] }
 0x23d   : > { %8589 = vmatprep.subr.bf16.mxu0 %v13438_v0  ;;  %8619 = vmatpush3.bf16.msra.mxu1 %v8616_v28  ;;  %v8624_v18 = vpack.c.bf16 %v1864_v48, %v1863_v53  ;;  %v10547_v28 = vld [vmem:[#allocation2 + $0xa0] sm:$0xff]  ;;  %v1211_v48 = vld [vmem:[#allocation2 + $0xa9] sm:$0xff] }
 0x23e   : > { %8621 = vmatprep.subr.bf16.mxu1 %v8620_v43  ;;  %v1209_v53 = vld [vmem:[#allocation2 + $0x99] sm:$0xff] }
 0x23f   : > { %2606 = vmatmul.mubr.f32.gmra.mrb[22].mxu0 %v10486_v2 }
 0x240   : > { %2610 = vmatprep.mubr.f32.mxu0 %v10351_v15  ;;  %8591 = vmatpush1.bf16.msra.mxu0 %v8590_v59  ;;  %v8596_v15 = vpack.c.bf16 %v1848_v21, %v1847_v9  ;;  %v8628_v59 = vpack.c.bf16 %v1866_v55, %v1865_v22  ;;  %v1199_v9 = vld [vmem:[#allocation2 + $0x49] sm:$0xff]  ;;  %v1200_v21 = vld [vmem:[#allocation2 + $0x51] sm:$0xff]  ;;  %v1218_v22 = vld [vmem:[#allocation2 + $0xe1] sm:$0xff] }
 0x241   : > { %8592 = vmatprep.subr.bf16.mxu0 %v13438_v0  ;;  %8623 = vmatpush3.bf16.msra.mxu1 %v8620_v43  ;;  %v1203_v43 = vld [vmem:[#allocation2 + $0x69] sm:$0xff]  ;;  %v1220_v55 = vld [vmem:[#allocation2 + $0xf1] sm:$0xff] }
 0x242   : > { %8625 = vmatprep.subr.bf16.mxu1 %v8624_v18 }
 0x243   : > { %2611 = vmatmul.mubr.f32.gmra.mrb[24].mxu0 %v10529_v58 }
 0x244   : > { %2615 = vmatprep.mubr.f32.mxu0 %v10356_v33  ;;  %8594 = vmatpush1.bf16.msra.mxu0 %v8593_v32  ;;  %v1851_v33 = vld [vmem:[#allocation7 + $0x3f0] sm:$0xff]  ;;  %v1198_v32 = vld [vmem:[#allocation2 + $0x41] sm:$0xff] }
 0x245   : > { %8595 = vmatprep.subr.bf16.mxu0 %v13438_v0  ;;  %8627 = vmatpush3.bf16.msra.mxu1 %v8624_v18  ;;  %v8602_v52 = vpack.c.bf16 %v1852_v49, %v1851_v33  ;;  %v10599_v18 = vld [vmem:[#allocation2 + $0x118] sm:$0xff]  ;;  %v1215_v33 = vld [vmem:[#allocation2 + $0xc9] sm:$0xff] }
 0x246   : > { %8629 = vmatprep.subr.bf16.mxu1 %v8628_v59  ;;  %v1216_v49 = vld [vmem:[#allocation2 + $0xd1] sm:$0xff] }
 0x247   : > { %2616 = vmatmul.mubr.f32.gmra.mrb[26].mxu0 %v10534_v34 }
 0x248   : > { %2620 = vmatprep.mubr.f32.mxu0 %v10361_v35  ;;  %8597 = vmatpush1.bf16.msra.mxu0 %v8596_v15  ;;  %v1867_v35 = vld [vmem:[#allocation7 + $0x470] sm:$0xff]  ;;  %v1205_v15 = vld [vmem:[#allocation2 + $0x79] sm:$0xff] }
 0x249   : > { %8598 = vmatprep.subr.bf16.mxu0 %v13438_v0  ;;  %8631 = vmatpush3.bf16.msra.mxu1 %v8628_v59  ;;  %v8632_v1 = vpack.c.bf16 %v1868_v11, %v1867_v35  ;;  %v1221_v59 = vld [vmem:[#allocation2 + $0xf9] sm:$0xff]  ;;  %v1224_v35 = vld [vmem:[#allocation2 + $0x111] sm:$0xff] }
 0x24a   : > { %v1225_v11 = vld [vmem:[#allocation2 + $0x119] sm:$0xff] }
 0x24b   : > { %2621 = vmatmul.mubr.f32.gmra.mrb[28].mxu0 %v10486_v2  ;;  %8633 = vmatprep.subr.bf16.mxu1 %v8632_v1 }
 0x24c   : > { %2625 = vmatprep.mubr.f32.mxu0 %v10365_v6  ;;  %8600 = vmatpush1.bf16.msra.mxu0 %v8599_v46  ;;  %v1197_v6 = vld [vmem:[#allocation2 + $0x39] sm:$0xff]  ;;  %v10605_v46 = vld [vmem:[#allocation2 + $0x128] sm:$0xff] }
 0x24d   : > { %8601 = vmatprep.subr.bf16.mxu0 %v13438_v0  ;;  %8635 = vmatpush3.bf16.msra.mxu1 %v8632_v1  ;;  %v10647_v1 = vld [vmem:[#allocation2 + $0x188] sm:$0xff] }
 0x24e   : > { %8236 = vmatprep.mubr.f32.mxu1 %v1197_v6  ;;  %8860 = vmatprep.subr.bf16.mxu1 %v13438_v0  ;;  %v10649_v6 = vld [vmem:[#allocation2 + $0x191] sm:$0xff] }
 0x24f   : > { %2626 = vmatmul.mubr.f32.gmra.mrb[30].mxu0 %v10542_v3 }
 0x250   : > { %2630 = vmatprep.mubr.f32.mxu0 %v10369_v38  ;;  %8603 = vmatpush1.bf16.msra.mxu0 %v8602_v52  ;;  %v10555_v38 = vld [vmem:[#allocation2 + $0xb0] sm:$0xff]  ;;  %v1222_v52 = vld [vmem:[#allocation2 + $0x101] sm:$0xff] }
 0x251   : > { %8636 = vmatprep.subr.bf16.mxu0 %v13438_v0  ;;  %8237 = vmatmul.mubr.f32.vlgmr.msra.gmra.mrb[0].mxu1 %v1198_v32  ;;  %v1227_v32 = vld [vmem:[#allocation2 + $0x129] sm:$0xff] }
 0x252   : > { %8239 = vmatprep.mubr.f32.mxu1 %v1199_v9  ;;  %v1228_v9 = vld [vmem:[#allocation2 + $0x131] sm:$0xff] }
 0x253   : > { %2631 = vmatmul.mubr.f32.gmra.mrb[32].mxu0 %v10547_v28 }
 0x254   : > { %2635 = vmatprep.mubr.f32.mxu0 %v10373_v24  ;;  %v1201_v24 = vld [vmem:[#allocation2 + $0x59] sm:$0xff] }
 0x255   : > { %8240 = vmatmul.mubr.f32.gmra.mrb[2].mxu1 %v1200_v21  ;;  %v1005_v21 = vld [vmem:[#allocation2 + $0x37] sm:$0xff] }
 0x256   : > { %8242 = vmatprep.mubr.f32.mxu1 %v1201_v24  ;;  %v1229_v24 = vld [vmem:[#allocation2 + $0x139] sm:$0xff] }
 0x257   : > { %2636 = vmatmul.mubr.f32.gmra.mrb[34].mxu0 %v10486_v2 }
 0x258   : > { %2640 = vmatprep.mubr.f32.mxu0 %v10377_v39  ;;  %v1202_v39 = vld [vmem:[#allocation2 + $0x61] sm:$0xff] }
 0x259   : > { %8243 = vmatmul.mubr.f32.gmra.mrb[4].mxu1 %v1202_v39  ;;  %v1230_v39 = vld [vmem:[#allocation2 + $0x141] sm:$0xff] }
 0x25a   : > { %8245 = vmatprep.mubr.f32.mxu1 %v1203_v43  ;;  %v1006_v43 = vld [vmem:[#allocation2 + $0x3f] sm:$0xff] }
 0x25b   : > { %2641 = vmatmul.mubr.f32.gmra.mrb[36].mxu0 %v10555_v38 }
 0x25c   : > { %2645 = vmatprep.mubr.f32.mxu0 %v10381_v41  ;;  %v10569_v41 = vld [vmem:[#allocation2 + $0xd0] sm:$0xff] }
 0x25f   : > { %2646 = vmatmul.mubr.f32.gmra.mrb[38].mxu0 %v10559_v26 }
 0x260   : > { %2650 = vmatprep.mubr.f32.mxu0 %v10385_v44  ;;  %v1204_v44 = vld [vmem:[#allocation2 + $0x71] sm:$0xff] }
 0x261   : > { %8246 = vmatmul.mubr.f32.gmra.mrb[6].mxu1 %v1204_v44  ;;  %v1007_v44 = vld [vmem:[#allocation2 + $0x47] sm:$0xff] }
 0x262   : > { %8248 = vmatprep.mubr.f32.mxu1 %v1205_v15  ;;  %v1231_v15 = vld [vmem:[#allocation2 + $0x149] sm:$0xff] }
 0x263   : > { %2651 = vmatmul.mubr.f32.gmra.mrb[40].mxu0 %v10486_v2 }
 0x264   : > { %2655 = vmatprep.mubr.f32.mxu0 %v10389_v45  ;;  %v10575_v45 = vld [vmem:[#allocation2 + $0xe0] sm:$0xff] }
 0x267   : > { %2656 = vmatmul.mubr.f32.gmra.mrb[42].mxu0 %v10565_v17 }
 0x268   : > { %2660 = vmatprep.mubr.f32.mxu0 %v10393_v47  ;;  %v1206_v47 = vld [vmem:[#allocation2 + $0x81] sm:$0xff] }
 0x269   : > { %8249 = vmatmul.mubr.f32.gmra.mrb[8].mxu1 %v1206_v47  ;;  %v1232_v47 = vld [vmem:[#allocation2 + $0x151] sm:$0xff] }
 0x26b   : > { %2661 = vmatmul.mubr.f32.gmra.mrb[44].mxu0 %v10569_v41 }
 0x26c   : > { %2665 = vmatprep.mubr.f32.mxu0 %v10397_v50  ;;  %v1207_v50 = vld [vmem:[#allocation2 + $0x89] sm:$0xff] }
 0x26d   : > { %8251 = vmatprep.mubr.f32.mxu1 %v1207_v50  ;;  %v1009_v50 = vld [vmem:[#allocation2 + $0x57] sm:$0xff] }
 0x26f   : > { %2666 = vmatmul.mubr.f32.gmra.mrb[46].mxu0 %v10486_v2 }
 0x270   : > { %2670 = vmatprep.mubr.f32.mxu0 %v10401_v51  ;;  %v1208_v51 = vld [vmem:[#allocation2 + $0x91] sm:$0xff] }
 0x271   : > { %8252 = vmatmul.mubr.f32.gmra.mrb[10].mxu1 %v1208_v51  ;;  %v1233_v51 = vld [vmem:[#allocation2 + $0x159] sm:$0xff] }
 0x272   : > { %8254 = vmatprep.mubr.f32.mxu1 %v1209_v53  ;;  %v5858_v53 = vld [vmem:[#allocation10] sm:$0xff] }
 0x273   : > { %2671 = vmatmul.mubr.f32.gmra.mrb[48].mxu0 %v10575_v45 }
 0x274   : > { %2675 = vmatprep.mubr.f32.mxu0 %v10405_v54  ;;  %v10589_v54 = vld [vmem:[#allocation2 + $0x100] sm:$0xff] }
 0x277   : > { %2676 = vmatmul.mubr.f32.gmra.mrb[50].mxu0 %v10579_v30 }
 0x278   : > { %2680 = vmatprep.mubr.f32.mxu0 %v10409_v56  ;;  %v1210_v56 = vld [vmem:[#allocation2 + $0xa1] sm:$0xff] }
 0x279   : > { %8255 = vmatmul.mubr.f32.gmra.mrb[12].mxu1 %v1210_v56  ;;  %v5859_v56 = vld [vmem:[#allocation10 + $0x8] sm:$0xff] }
 0x27a   : > { %8257 = vmatprep.mubr.f32.mxu1 %v1211_v48  ;;  %v1010_v48 = vld [vmem:[#allocation2 + $0x5f] sm:$0xff] }
 0x27b   : > { %2681 = vmatmul.mubr.f32.gmra.mrb[52].mxu0 %v10486_v2 }
 0x27c   : > { %2685 = vmatprep.mubr.f32.mxu0 %v10413_v57  ;;  %v10595_v57 = vld [vmem:[#allocation2 + $0x110] sm:$0xff] }
 0x27f   : > { %2686 = vmatmul.mubr.f32.gmra.mrb[54].mxu0 %v10585_v37 }
 0x280   : > { %2690 = vmatprep.mubr.f32.mxu0 %v10417_v60  ;;  %v1212_v60 = vld [vmem:[#allocation2 + $0xb1] sm:$0xff] }
 0x281   : > { %8258 = vmatmul.mubr.f32.gmra.mrb[14].mxu1 %v1212_v60  ;;  %v8637_v60 = vpack.c.bf16 %v5859_v56, %v5858_v53  ;;  %v5877_v56 = vld [vmem:[#allocation10 + $0x98] sm:$0xff] }
 0x283   : > { %2691 = vmatmul.mubr.f32.gmra.mrb[56].mxu0 %v10589_v54  ;;  %8876 = vmatpush1.bf16.msra.mxu1 %v8637_v60 }
 0x284   : > { %2695 = vmatprep.mubr.f32.mxu0 %v10421_v62  ;;  %v1213_v62 = vld [vmem:[#allocation2 + $0xb9] sm:$0xff]  ;;  %8861 = vmatprep.subr.bf16.mxu1 %v13438_v0 }
 0x285   : > { %8260 = vmatprep.mubr.f32.mxu1 %v1213_v62  ;;  %v5861_v62 = vld [vmem:[#allocation10 + $0x18] sm:$0xff] }
 0x287   : > { %2696 = vmatmul.mubr.f32.gmra.mrb[58].mxu0 %v10486_v2 }
 0x288   : > { %2700 = vmatprep.mubr.f32.mxu0 %v10425_v63  ;;  %v1214_v63 = vld [vmem:[#allocation2 + $0xc1] sm:$0xff] }
 0x289   : > { %8261 = vmatmul.mubr.f32.gmra.mrb[16].mxu1 %v1214_v63 }
 0x28a   : > { %8263 = vmatprep.mubr.f32.mxu1 %v1215_v33  ;;  %v1235_v33 = vld [vmem:[#allocation2 + $0x169] sm:$0xff] }
 0x28b   : > { %2701 = vmatmul.mubr.f32.gmra.mrb[60].mxu0 %v10595_v57 }
 0x28c   : > { %2705 = vmatprep.mubr.f32.mxu0 %v10429_v4  ;;  %v10609_v4 = vld [vmem:[#allocation2 + $0x130] sm:$0xff] }
 0x28d   : > { %8264 = vmatmul.mubr.f32.gmra.mrb[18].mxu1 %v1216_v49  ;;  %v1236_v49 = vld [vmem:[#allocation2 + $0x171] sm:$0xff] }
 0x28f   : > { %2706 = vmatmul.mubr.f32.gmra.mrb[62].mxu0 %v10599_v18 }
 0x290   : > { %2710 = vmatprep.mubr.f32.mxu0 %v10433_v7  ;;  %v10615_v7 = vld [vmem:[#allocation2 + $0x140] sm:$0xff] }
 0x293   : > { %2711 = vmatmul.mubr.f32.gmra.mrb[64].mxu0 %v10486_v2 }
 0x294   : > { %2715 = vmatprep.mubr.f32.mxu0 %v10437_v8  ;;  %v1217_v8 = vld [vmem:[#allocation2 + $0xd9] sm:$0xff] }
 0x295   : > { %8266 = vmatprep.mubr.f32.mxu1 %v1217_v8  ;;  %v5862_v8 = vld [vmem:[#allocation10 + $0x20] sm:$0xff] }
 0x296   : > { %8267 = vmatmul.mubr.f32.gmra.mrb[20].mxu1 %v1218_v22  ;;  %v5863_v22 = vld [vmem:[#allocation10 + $0x28] sm:$0xff] }
 0x297   : > { %2716 = vmatmul.mubr.f32.gmra.mrb[66].mxu0 %v10605_v46 }
 0x298   : > { %2720 = vmatprep.mubr.f32.mxu0 %v10441_v10  ;;  %v10619_v10 = vld [vmem:[#allocation2 + $0x148] sm:$0xff] }
 0x29b   : > { %2721 = vmatmul.mubr.f32.gmra.mrb[68].mxu0 %v10609_v4 }
 0x29c   : > { %2725 = vmatprep.mubr.f32.mxu0 %v10445_v13  ;;  %v1219_v13 = vld [vmem:[#allocation2 + $0xe9] sm:$0xff] }
 0x29d   : > { %8269 = vmatprep.mubr.f32.mxu1 %v1219_v13  ;;  %v1012_v13 = vld [vmem:[#allocation2 + $0x6f] sm:$0xff] }
 0x29e   : > { %8270 = vmatmul.mubr.f32.gmra.mrb[22].mxu1 %v1220_v55  ;;  %v8643_v55 = vpack.c.bf16 %v5863_v22, %v5862_v8  ;;  %v5881_v8 = vld [vmem:[#allocation10 + $0xb8] sm:$0xff]  ;;  %v5882_v22 = vld [vmem:[#allocation10 + $0xc0] sm:$0xff] }
 0x29f   : > { %2726 = vmatmul.mubr.f32.gmra.mrb[70].mxu0 %v10486_v2  ;;  %8272 = vmatprep.mubr.f32.mxu1 %v1221_v59  ;;  %v5865_v59 = vld [vmem:[#allocation10 + $0x38] sm:$0xff] }
 0x2a0   : > { %2730 = vmatprep.mubr.f32.mxu0 %v10449_v14  ;;  %v10625_v14 = vld [vmem:[#allocation2 + $0x158] sm:$0xff] }
 0x2a2   : > { %8273 = vmatmul.mubr.f32.gmra.mrb[24].mxu1 %v1222_v52  ;;  %v1013_v52 = vld [vmem:[#allocation2 + $0x77] sm:$0xff] }
 0x2a3   : > { %2731 = vmatmul.mubr.f32.gmra.mrb[72].mxu0 %v10615_v7 }
 0x2a4   : > { %2735 = vmatprep.mubr.f32.mxu0 %v10453_v16  ;;  %v10629_v16 = vld [vmem:[#allocation2 + $0x160] sm:$0xff] }
 0x2a7   : > { %2736 = vmatmul.mubr.f32.gmra.mrb[74].mxu0 %v10619_v10 }
 0x2a8   : > { %2740 = vmatprep.mubr.f32.mxu0 %v10457_v19  ;;  %v10635_v19 = vld [vmem:[#allocation2 + $0x170] sm:$0xff] }
 0x2ab   : > { %2741 = vmatmul.mubr.f32.gmra.mrb[76].mxu0 %v10486_v2 }
 0x2ac   : > { %2745 = vmatprep.mubr.f32.mxu0 %v10461_v20  ;;  %v1223_v20 = vld [vmem:[#allocation2 + $0x109] sm:$0xff] }
 0x2ad   : > { %8275 = vmatprep.mubr.f32.mxu1 %v1223_v20 }
 0x2ae   : > { %8276 = vmatmul.mubr.f32.gmra.mrb[26].mxu1 %v1224_v35  ;;  %v1237_v35 = vld [vmem:[#allocation2 + $0x179] sm:$0xff] }
 0x2af   : > { %2746 = vmatmul.mubr.f32.gmra.mrb[78].mxu0 %v10625_v14  ;;  %8278 = vmatprep.mubr.f32.mxu1 %v1225_v11  ;;  %v5866_v11 = vld [vmem:[#allocation10 + $0x40] sm:$0xff] }
 0x2b0   : > { %2750 = vmatprep.mubr.f32.mxu0 %v10465_v23  ;;  %v10639_v23 = vld [vmem:[#allocation2 + $0x178] sm:$0xff] }
 0x2b3   : > { %2751 = vmatmul.mubr.f32.gmra.mrb[80].mxu0 %v10629_v16 }
 0x2b4   : > { %2755 = vmatprep.mubr.f32.mxu0 %v10469_v25  ;;  %v10643_v25 = vld [vmem:[#allocation2 + $0x189] sm:$0xff] }
 0x2b7   : > { %2756 = vmatmul.mubr.f32.gmra.mrb[82].mxu0 %v10486_v2 }
 0x2b8   : > { %2760 = vmatprep.mubr.f32.mxu0 %v10472_v12  ;;  %v1226_v12 = vld [vmem:[#allocation2 + $0x121] sm:$0xff] }
 0x2b9   : > { %8279 = vmatmul.mubr.f32.gmra.mrb[28].mxu1 %v1226_v12  ;;  %v5867_v12 = vld [vmem:[#allocation10 + $0x48] sm:$0xff] }
 0x2ba   : > { %8281 = vmatprep.mubr.f32.mxu1 %v1227_v32  ;;  %v1014_v32 = vld [vmem:[#allocation2 + $0x7f] sm:$0xff] }
 0x2bb   : > { %2761 = vmatmul.mubr.f32.gmra.mrb[84].mxu0 %v10635_v19 }
 0x2bc   : > { %2765 = vmatprep.mubr.f32.mxu0 %v10475_v29  ;;  %v10653_v29 = vld [vmem:[#allocation2 + $0x190] sm:$0xff] }
 0x2bd   : > { %8282 = vmatmul.mubr.f32.gmra.mrb[30].mxu1 %v1228_v9  ;;  %v8649_v9 = vpack.c.bf16 %v5867_v12, %v5866_v11  ;;  %v1023_v11 = vld [vmem:[#allocation2 + $0xc7] sm:$0xff] }
 0x2be   : > { %8284 = vmatprep.mubr.f32.mxu1 %v1229_v24  ;;  %v5869_v24 = vld [vmem:[#allocation10 + $0x58] sm:$0xff] }
 0x2bf   : > { %2766 = vmatmul.mubr.f32.gmra.mrb[86].mxu0 %v10639_v23 }
 0x2c0   : > { %2770 = vmatprep.mubr.f32.mxu0 %v10478_v42  ;;  %v10655_v42 = vld [vmem:[#allocation2 + $0x199] sm:$0xff] }
 0x2c1   : > { %8285 = vmatmul.mubr.f32.gmra.mrb[32].mxu1 %v1230_v39  ;;  %v1015_v39 = vld [vmem:[#allocation2 + $0x87] sm:$0xff] }
 0x2c2   : > { %8287 = vmatprep.mubr.f32.mxu1 %v1231_v15  ;;  %v1017_v15 = vld [vmem:[#allocation2 + $0x97] sm:$0xff] }
 0x2c3   : > { %2771 = vmatmul.mubr.f32.gmra.mrb[88].mxu0 %v10486_v2 }
 0x2c4   : > { %2775 = vmatprep.mubr.f32.mxu0 %v10643_v25 }
 0x2c5   : > { %8288 = vmatmul.mubr.f32.gmra.mrb[34].mxu1 %v1232_v47 }
 0x2c6   : > { %8290 = vmatprep.mubr.f32.mxu1 %v1233_v51  ;;  %v5875_v51 = vld [vmem:[#allocation10 + $0x88] sm:$0xff] }
 0x2c7   : > { %2776 = vmatmul.mubr.f32.gmra.mrb[90].mxu0 %v10647_v1 }
 0x2c8   : > { %2780 = vmatprep.mubr.f32.mxu0 %v10649_v6 }
 0x2cb   : > { %2781 = vmatmul.mubr.f32.gmra.mrb[92].mxu0 %v10653_v29 }
 0x2cc   : > { %2785 = vmatprep.mubr.f32.mxu0 %v10655_v42 }
 0x2cf   : > { %2786 = vmatmul.mubr.f32.gmra.mrb[94].mxu0 %v10486_v2 }
 0x2d0   : > { %2855 = vmatprep.mubr.f32.mxu0 %v10490_v36  ;;  %v1008_v36 = vld [vmem:[#allocation2 + $0x4f] sm:$0xff] }
 0x2d3   : > { %2856 = vmatmul.mubr.f32.vlgmr.msra.gmra.mrb[0].mxu0 %v1005_v21  ;;  %v5868_v21 = vld [vmem:[#allocation10 + $0x50] sm:$0xff] }
 0x2d4   : > { %2860 = vmatprep.mubr.f32.mxu0 %v10495_v27  ;;  %v1234_v27 = vld [vmem:[#allocation2 + $0x161] sm:$0xff]  ;;  %8638 = vmatpush1.bf16.msra.mxu0 %v8637_v60 }
 0x2d5   : > { %8291 = vmatmul.mubr.f32.gmra.mrb[36].mxu1 %v1234_v27  ;;  %8639 = vmatprep.subr.bf16.mxu0 %v13438_v0  ;;  %v1018_v27 = vld [vmem:[#allocation2 + $0x9f] sm:$0xff] }
 0x2d6   : > { %8293 = vmatprep.mubr.f32.mxu1 %v1235_v33 }
 0x2d7   : > { %2861 = vmatmul.mubr.f32.gmra.mrb[2].mxu0 %v1006_v43  ;;  %v5871_v43 = vld [vmem:[#allocation10 + $0x68] sm:$0xff] }
 0x2d8   : > { %2865 = vmatprep.mubr.f32.mxu0 %v10486_v2 }
 0x2d9   : > { %8294 = vmatmul.mubr.f32.gmra.mrb[38].mxu1 %v1236_v49  ;;  %v5880_v49 = vld [vmem:[#allocation10 + $0xb0] sm:$0xff] }
 0x2da   : > { %8296 = vmatprep.mubr.f32.mxu1 %v1237_v35  ;;  %v5886_v35 = vld [vmem:[#allocation10 + $0xe0] sm:$0xff] }
 0x2db   : > { %2866 = vmatmul.mubr.f32.gmra.mrb[4].mxu0 %v1007_v44 }
 0x2dc   : > { %2870 = vmatprep.mubr.f32.mxu0 %v10503_v61  ;;  %v5860_v61 = vld [vmem:[#allocation10 + $0x10] sm:$0xff] }
 0x2dd   : > { %v8640_v63 = vpack.c.bf16 %v5861_v62, %v5860_v61  ;;  %v1244_v61 = vld [vmem:[#allocation2 + $0x1b1] sm:$0xff]  ;;  %v5878_v62 = vld [vmem:[#allocation10 + $0xa0] sm:$0xff] }
 0x2df   : > { %2871 = vmatmul.mubr.f32.gmra.mrb[6].mxu0 %v1008_v36  ;;  %8877 = vmatpush1.bf16.msra.mxu1 %v8640_v63  ;;  %v1242_v36 = vld [vmem:[#allocation2 + $0x1a1] sm:$0xff] }
 0x2e0   : > { %2875 = vmatprep.mubr.f32.mxu0 %v10508_v5  ;;  %v1011_v5 = vld [vmem:[#allocation2 + $0x67] sm:$0xff]  ;;  %8641 = vmatpush1.bf16.msra.mxu0 %v8640_v63  ;;  %v1020_v63 = vld [vmem:[#allocation2 + $0xaf] sm:$0xff] }
 0x2e1   : > { %8642 = vmatprep.subr.bf16.mxu0 %v13438_v0  ;;  %8862 = vmatprep.subr.bf16.mxu1 %v13438_v0 }
 0x2e3   : > { %2876 = vmatmul.mubr.f32.gmra.mrb[8].mxu0 %v1009_v50  ;;  %8878 = vmatpush1.bf16.msra.mxu1 %v8643_v55  ;;  %v5874_v50 = vld [vmem:[#allocation10 + $0x80] sm:$0xff] }
 0x2e4   : > { %2880 = vmatprep.mubr.f32.mxu0 %v10486_v2  ;;  %8644 = vmatpush1.bf16.msra.mxu0 %v8643_v55  ;;  %v8661_v53 = vpack.c.bf16 %v5875_v51, %v5874_v50  ;;  %v8670_v55 = vpack.c.bf16 %v5881_v8, %v5880_v49  ;;  %v1034_v50 = vld [vmem:[#allocation2 + $0x11f] sm:$0xff]  ;;  %v1044_v49 = vld [vmem:[#allocation2 + $0x16f] sm:$0xff] }
 0x2e5   : > { %8645 = vmatprep.subr.bf16.mxu0 %v13438_v0  ;;  %8863 = vmatprep.subr.bf16.mxu1 %v13438_v0 }
 0x2e7   : > { %2881 = vmatmul.mubr.f32.gmra.mrb[10].mxu0 %v1010_v48  ;;  %v1019_v48 = vld [vmem:[#allocation2 + $0xa7] sm:$0xff] }
 0x2e8   : > { %2885 = vmatprep.mubr.f32.mxu0 %v10516_v31  ;;  %v5864_v31 = vld [vmem:[#allocation10 + $0x30] sm:$0xff] }
 0x2e9   : > { %v8646_v20 = vpack.c.bf16 %v5865_v59, %v5864_v31  ;;  %v5884_v59 = vld [vmem:[#allocation10 + $0xd0] sm:$0xff] }
 0x2eb   : > { %2886 = vmatmul.mubr.f32.gmra.mrb[12].mxu0 %v1011_v5  ;;  %8879 = vmatpush1.bf16.msra.mxu1 %v8646_v20  ;;  %v5879_v5 = vld [vmem:[#allocation10 + $0xa8] sm:$0xff] }
 0x2ec   : > { %2890 = vmatprep.mubr.f32.mxu0 %v10521_v40  ;;  %v1238_v40 = vld [vmem:[#allocation2 + $0x181] sm:$0xff]  ;;  %8647 = vmatpush1.bf16.msra.mxu0 %v8646_v20  ;;  %v8667_v33 = vpack.c.bf16 %v5879_v5, %v5878_v62  ;;  %v1041_v62 = vld [vmem:[#allocation2 + $0x157] sm:$0xff] }
 0x2ed   : > { %8297 = vmatmul.mubr.f32.gmra.mrb[40].mxu1 %v1238_v40  ;;  %8648 = vmatprep.subr.bf16.mxu0 %v13438_v0  ;;  %v1022_v20 = vld [vmem:[#allocation2 + $0xbf] sm:$0xff]  ;;  %v5887_v40 = vld [vmem:[#allocation10 + $0xe8] sm:$0xff] }
 0x2ee   : > { %8299 = vmatprep.mubr.f32.mxu1 %v10643_v25  ;;  %8864 = vmatprep.subr.bf16.mxu1 %v13438_v0  ;;  %v5870_v25 = vld [vmem:[#allocation10 + $0x60] sm:$0xff]  ;;  %v8679_v12 = vpack.c.bf16 %v5887_v40, %v5886_v35 }
 0x2ef   : > { %2891 = vmatmul.mubr.f32.gmra.mrb[14].mxu0 %v1012_v13  ;;  %8880 = vmatpush1.bf16.msra.mxu1 %v8649_v9  ;;  %v8655_v44 = vpack.c.bf16 %v5871_v43, %v5870_v25  ;;  %v1021_v13 = vld [vmem:[#allocation2 + $0xb7] sm:$0xff]  ;;  %v1028_v43 = vld [vmem:[#allocation2 + $0xef] sm:$0xff]  ;;  %v1042_v5 = vld [vmem:[#allocation2 + $0x15f] sm:$0xff] }
 0x2f0   : > { %2895 = vmatprep.mubr.f32.mxu0 %v10486_v2  ;;  %8650 = vmatpush1.bf16.msra.mxu0 %v8649_v9  ;;  %v5889_v9 = vld [vmem:[#allocation10 + $0xf8] sm:$0xff]  ;;  %v1051_v35 = vld [vmem:[#allocation2 + $0x1a7] sm:$0xff] }
 0x2f1   : > { %8300 = vmatmul.mubr.f32.gmra.mrb[42].mxu1 %v10649_v6  ;;  %8651 = vmatprep.subr.bf16.mxu0 %v13438_v0  ;;  %v1016_v6 = vld [vmem:[#allocation2 + $0x8f] sm:$0xff] }
 0x2f2   : > { %8302 = vmatprep.mubr.f32.mxu1 %v10655_v42  ;;  %8865 = vmatprep.subr.bf16.mxu1 %v13438_v0  ;;  %v5873_v42 = vld [vmem:[#allocation10 + $0x78] sm:$0xff] }
 0x2f3   : > { %2896 = vmatmul.mubr.f32.gmra.mrb[16].mxu0 %v1013_v52  ;;  %v5885_v52 = vld [vmem:[#allocation10 + $0xd8] sm:$0xff] }
 0x2f4   : > { %2900 = vmatprep.mubr.f32.mxu0 %v10529_v58  ;;  %v8652_v58 = vpack.c.bf16 %v5869_v24, %v5868_v21  ;;  %v1025_v21 = vld [vmem:[#allocation2 + $0xd7] sm:$0xff] }
 0x2f5   : > { %8303 = vmatmul.mubr.f32.gmra.mrb[44].mxu1 %v1242_v36 }
 0x2f6   : > { %8653 = vmatpush1.bf16.msra.mxu0 %v8652_v58  ;;  %8881 = vmatpush1.bf16.msra.mxu1 %v8652_v58 }
 0x2f7   : > { %2901 = vmatmul.mubr.f32.gmra.mrb[18].mxu0 %v1014_v32  ;;  %8654 = vmatprep.subr.bf16.mxu0 %v13438_v0  ;;  %v1024_v32 = vld [vmem:[#allocation2 + $0xcf] sm:$0xff] }
 0x2f8   : > { %2905 = vmatprep.mubr.f32.mxu0 %v10534_v34  ;;  %v5872_v34 = vld [vmem:[#allocation10 + $0x70] sm:$0xff]  ;;  %8866 = vmatprep.subr.bf16.mxu1 %v13438_v0 }
 0x2f9   : > { %v8658_v47 = vpack.c.bf16 %v5873_v42, %v5872_v34  ;;  %v10730_v42 = vld [vmem:[#allocation2 + $0x8] sm:$0xff] }
 0x2fa   : > { %8656 = vmatpush1.bf16.msra.mxu0 %v8655_v44  ;;  %8882 = vmatpush1.bf16.msra.mxu1 %v8655_v44 }
 0x2fb   : > { %2906 = vmatmul.mubr.f32.gmra.mrb[20].mxu0 %v1015_v39  ;;  %8657 = vmatprep.subr.bf16.mxu0 %v13438_v0  ;;  %v1027_v39 = vld [vmem:[#allocation2 + $0xe7] sm:$0xff] }
 0x2fc   : > { %2910 = vmatprep.mubr.f32.mxu0 %v10486_v2  ;;  %8867 = vmatprep.subr.bf16.mxu1 %v13438_v0 }
 0x2fe   : > { %8659 = vmatpush1.bf16.msra.mxu0 %v8658_v47  ;;  %8883 = vmatpush1.bf16.msra.mxu1 %v8658_v47 }
 0x2ff   : > { %2911 = vmatmul.mubr.f32.gmra.mrb[22].mxu0 %v1016_v6  ;;  %8660 = vmatprep.subr.bf16.mxu0 %v13438_v0 }
 0x300   : > { %2915 = vmatprep.mubr.f32.mxu0 %v10542_v3  ;;  %v5876_v3 = vld [vmem:[#allocation10 + $0x90] sm:$0xff]  ;;  %8868 = vmatprep.subr.bf16.mxu1 %v13438_v0 }
 0x301   : > { %v8664_v60 = vpack.c.bf16 %v5877_v56, %v5876_v3  ;;  %v1037_v3 = vld [vmem:[#allocation2 + $0x137] sm:$0xff] }
 0x302   : > { %8662 = vmatpush1.bf16.msra.mxu0 %v8661_v53  ;;  %8884 = vmatpush1.bf16.msra.mxu1 %v8661_v53  ;;  %v1036_v53 = vld [vmem:[#allocation2 + $0x12f] sm:$0xff] }
 0x303   : > { %2916 = vmatmul.mubr.f32.gmra.mrb[24].mxu0 %v1017_v15  ;;  %8663 = vmatprep.subr.bf16.mxu0 %v13438_v0 }
 0x304   : > { %2920 = vmatprep.mubr.f32.mxu0 %v10547_v28  ;;  %v1243_v28 = vld [vmem:[#allocation2 + $0x1a9] sm:$0xff]  ;;  %8869 = vmatprep.subr.bf16.mxu1 %v13438_v0 }
 0x305   : > { %8305 = vmatprep.mubr.f32.mxu1 %v1243_v28  ;;  %v1040_v28 = vld [vmem:[#allocation2 + $0x14f] sm:$0xff] }
 0x306   : > { %8665 = vmatpush1.bf16.msra.mxu0 %v8664_v60  ;;  %8306 = vmatmul.mubr.f32.gmra.mrb[46].mxu1 %v1244_v61 }
 0x307   : > { %2921 = vmatmul.mubr.f32.gmra.mrb[26].mxu0 %v1018_v27  ;;  %8666 = vmatprep.subr.bf16.mxu0 %v13438_v0  ;;  %v1035_v27 = vld [vmem:[#allocation2 + $0x127] sm:$0xff] }
 0x308   : > { %2925 = vmatprep.mubr.f32.mxu0 %v10486_v2  ;;  %8885 = vmatpush1.bf16.msra.mxu1 %v8664_v60  ;;  %v1039_v60 = vld [vmem:[#allocation2 + $0x147] sm:$0xff] }
 0x309   : > { %8870 = vmatprep.subr.bf16.mxu1 %v13438_v0 }
 0x30a   : > { %8668 = vmatpush1.bf16.msra.mxu0 %v8667_v33 }
 0x30b   : > { %2926 = vmatmul.mubr.f32.gmra.mrb[28].mxu0 %v1019_v48  ;;  %8669 = vmatprep.subr.bf16.mxu0 %v13438_v0  ;;  %v1038_v48 = vld [vmem:[#allocation2 + $0x13f] sm:$0xff] }
 0x30c   : > { %2930 = vmatprep.mubr.f32.mxu0 %v10555_v38  ;;  %v5883_v38 = vld [vmem:[#allocation10 + $0xc8] sm:$0xff]  ;;  %8886 = vmatpush1.bf16.msra.mxu1 %v8667_v33 }
 0x30d   : > { %v8673_v31 = vpack.c.bf16 %v5883_v38, %v5882_v22  ;;  %8871 = vmatprep.subr.bf16.mxu1 %v13438_v0  ;;  %v1046_v22 = vld [vmem:[#allocation2 + $0x17f] sm:$0xff]  ;;  %v1048_v38 = vld [vmem:[#allocation2 + $0x18f] sm:$0xff] }
 0x30e   : > { %8671 = vmatpush1.bf16.msra.mxu0 %v8670_v55 }
 0x30f   : > { %2931 = vmatmul.mubr.f32.gmra.mrb[30].mxu0 %v1020_v63  ;;  %8672 = vmatprep.subr.bf16.mxu0 %v13438_v0  ;;  %v1043_v63 = vld [vmem:[#allocation2 + $0x167] sm:$0xff] }
 0x310   : > { %2935 = vmatprep.mubr.f32.mxu0 %v10559_v26  ;;  %v8676_v26 = vpack.c.bf16 %v5885_v52, %v5884_v59  ;;  %8887 = vmatpush1.bf16.msra.mxu1 %v8670_v55  ;;  %v1049_v59 = vld [vmem:[#allocation2 + $0x197] sm:$0xff]  ;;  %v3449_v52 = vlaneseq }
 0x311   : > { %8872 = vmatprep.subr.bf16.mxu1 %v13438_v0 }
 0x312   : > { %8674 = vmatpush1.bf16.msra.mxu0 %v8673_v31 }
 0x313   : > { %2936 = vmatmul.mubr.f32.gmra.mrb[32].mxu0 %v1021_v13  ;;  %8675 = vmatprep.subr.bf16.mxu0 %v13438_v0 }
 0x314   : > { %2940 = vmatprep.mubr.f32.mxu0 %v10486_v2  ;;  %8888 = vmatpush1.bf16.msra.mxu1 %v8673_v31 }
 0x315   : > { %8873 = vmatprep.subr.bf16.mxu1 %v13438_v0 }
 0x316   : > { %8677 = vmatpush1.bf16.msra.mxu0 %v8676_v26 }
 0x317   : > { %2941 = vmatmul.mubr.f32.gmra.mrb[34].mxu0 %v1022_v20  ;;  %8678 = vmatprep.subr.bf16.mxu0 %v13438_v0  ;;  %v1050_v20 = vld [vmem:[#allocation2 + $0x19f] sm:$0xff] }
 0x318   : > { %2945 = vmatprep.mubr.f32.mxu0 %v10565_v17  ;;  %8889 = vmatpush1.bf16.msra.mxu1 %v8676_v26  ;;  %v5888_v17 = vld [vmem:[#allocation10 + $0xf0] sm:$0xff]  ;;  %v10790_v26 = vshrl.u32 %v3449_v52, 7 }
 0x319   : > { %v8682_v24 = vpack.c.bf16 %v5889_v9, %v5888_v17  ;;  %8874 = vmatprep.subr.bf16.mxu1 %v13438_v0  ;;  %v1052_v17 = vld [vmem:[#allocation2 + $0x1af] sm:$0xff] }
 0x31a   : > { %8680 = vmatpush1.bf16.msra.mxu0 %v8679_v12  ;;  %v3451_v40 = vadd.s32 8, %v10790_v26 }
 0x31b   : > { %2946 = vmatmul.mubr.f32.gmra.mrb[36].mxu0 %v1023_v11  ;;  %8681 = vmatprep.subr.bf16.mxu0 %v13438_v0 }
 0x31c   : > { %2950 = vmatprep.mubr.f32.mxu0 %v10569_v41  ;;  %8890 = vmatpush1.bf16.msra.mxu1 %v8679_v12  ;;  %v1026_v41 = vld [vmem:[#allocation2 + $0xdf] sm:$0xff]  ;;  %v10799_v11 = vmul.u32.u64.low 2863311531, %v10790_v26  ;;  %v10800_v12 = vmul.u32.u64.high 2863311531, %v10790_v26, %v10799_v11 }
 0x31d   : > { %8875 = vmatprep.subr.bf16.mxu1 %v13438_v0 }
 0x31e   : > { %8683 = vmatpush1.bf16.msra.mxu0 %v8682_v24 }
 0x31f   : > { %2951 = vmatmul.mubr.f32.gmra.mrb[38].mxu0 %v1024_v32  ;;  %v3452_v32 = vadd.s32 16, %v10790_v26 }
 0x320   : > { %2955 = vmatprep.mubr.f32.mxu0 %v10486_v2  ;;  %8891 = vmatpush1.bf16.msra.mxu1 %v8682_v24 }
 0x321   : > { %8684 = vmatprep.subr.bf16.mxu1 %v13438_v0 }
 0x323   : > { %2956 = vmatmul.mubr.f32.gmra.mrb[40].mxu0 %v1025_v21  ;;  %v10804_v9 = vmul.u32.u64.low 2863311531, %v3451_v40  ;;  %v10805_v21 = vmul.u32.u64.high 2863311531, %v3451_v40, %v10804_v9 }
 0x324   : > { %2960 = vmatprep.mubr.f32.mxu0 %v10575_v45  ;;  %v10717_v58 = vpop.f32.mrb[0].mxu1  ;;  %v1029_v45 = vld [vmem:[#allocation2 + $0xf7] sm:$0xff] }
 0x325   : > { %v10719_v25 = vpop.f32.mrb[1].mxu1 }
 0x327   : > { %2961 = vmatmul.mubr.f32.gmra.mrb[42].mxu0 %v1026_v41 }
 0x328   : > { %2965 = vmatprep.mubr.f32.mxu0 %v10579_v30  ;;  %v10722_v6 = vpop.f32.mrb[2].mxu1  ;;  %v1030_v30 = vld [vmem:[#allocation2 + $0xff] sm:$0xff] }
 0x329   : > { %v10725_v44 = vpop.f32.mrb[3].mxu1 }
 0x32b   : > { %2966 = vmatmul.mubr.f32.gmra.mrb[44].mxu0 %v1027_v39  ;;  %v10809_v41 = vmul.u32.u64.low 2863311531, %v3452_v32  ;;  %v10810_v39 = vmul.u32.u64.high 2863311531, %v3452_v32, %v10809_v41 }
 0x32c   : > { %2970 = vmatprep.mubr.f32.mxu0 %v10486_v2  ;;  %v10728_v34 = vpop.f32.mrb[4].mxu1  ;;  %v1031_v2 = vld [vmem:[#allocation2 + $0x107] sm:$0xff] }
 0x32d   : > { %v10733_v15 = vpop.f32.mrb[5].mxu1 }
 0x32f   : > { %2971 = vmatmul.mubr.f32.gmra.mrb[46].mxu0 %v1028_v43 }
 0x330   : > { %2975 = vmatprep.mubr.f32.mxu0 %v10585_v37  ;;  %v1032_v37 = vld [vmem:[#allocation2 + $0x10f] sm:$0xff] }
 0x333   : > { %2976 = vmatmul.mubr.f32.gmra.mrb[48].mxu0 %v1029_v45  ;;  %v4562_v45 = vld [vmem:[#allocation4 + $0x7] sm:$0xff] }
 0x334   : > { %2980 = vmatprep.mubr.f32.mxu0 %v10589_v54  ;;  %v10736_v47 = vpop.f32.mrb[6].mxu1  ;;  %v1033_v54 = vld [vmem:[#allocation2 + $0x117] sm:$0xff] }
 0x335   : > { %v10739_v36 = vpop.f32.mrb[7].mxu1 }
 0x337   : > { %2981 = vmatmul.mubr.f32.gmra.mrb[50].mxu0 %v1030_v30  ;;  %v3504_v30 = vshrl.u32 %v10800_v12, 4 }
 0x338   : > { %2985 = vmatprep.mubr.f32.mxu0 %v10730_v42 }
 0x33b   : > { %2986 = vmatmul.mubr.f32.gmra.mrb[52].mxu0 %v1031_v2  ;;  %v3453_v2 = vadd.s32 24, %v10790_v26 }
 0x33c   : > { %2990 = vmatprep.mubr.f32.mxu0 %v10595_v57  ;;  %v10742_v51 = vpop.f32.mrb[8].mxu1 }
 0x33d   : > { %v10745_v57 = vpop.f32.mrb[9].mxu1 }
 0x33f   : > { %2991 = vmatmul.mubr.f32.gmra.mrb[54].mxu0 %v1032_v37  ;;  %v3515_v37 = vshrl.u32 %v10805_v21, 4 }
 0x340   : > { %2995 = vmatprep.mubr.f32.mxu0 %v10599_v18 }
 0x343   : > { %2996 = vmatmul.mubr.f32.gmra.mrb[56].mxu0 %v1033_v54  ;;  %v4563_v54 = vld [vmem:[#allocation4 + $0xf] sm:$0xff] }
 0x344   : > { %3000 = vmatprep.mubr.f32.mxu0 %v10730_v42  ;;  %v10748_v18 = vpop.f32.mrb[10].mxu1 }
 0x345   : > { %v10751_v56 = vpop.f32.mrb[11].mxu1 }
 0x347   : > { %3001 = vmatmul.mubr.f32.gmra.mrb[58].mxu0 %v1034_v50  ;;  %v3454_v50 = vadd.s32 32, %v10790_v26 }
 0x348   : > { %3005 = vmatprep.mubr.f32.mxu0 %v10605_v46 }
 0x34b   : > { %3006 = vmatmul.mubr.f32.gmra.mrb[60].mxu0 %v1035_v27  ;;  %v3505_v27 = vmul.u32 24, %v3504_v30 }
 0x34c   : > { %3010 = vmatprep.mubr.f32.mxu0 %v10609_v4  ;;  %v10754_v46 = vpop.f32.mrb[12].mxu1 }
 0x34d   : > { %v10757_v4 = vpop.f32.mrb[13].mxu1 }
 0x34f   : > { %3011 = vmatmul.mubr.f32.gmra.mrb[62].mxu0 %v1036_v53 }
 0x350   : > { %3015 = vmatprep.mubr.f32.mxu0 %v10730_v42 }
 0x353   : > { %3016 = vmatmul.mubr.f32.gmra.mrb[64].mxu0 %v1037_v3  ;;  %v3526_v3 = vshrl.u32 %v10810_v39, 4 }
 0x354   : > { %3020 = vmatprep.mubr.f32.mxu0 %v10615_v7  ;;  %v10760_v61 = vpop.f32.mrb[14].mxu1 }
 0x355   : > { %v10763_v7 = vpop.f32.mrb[15].mxu1 }
 0x357   : > { %3021 = vmatmul.mubr.f32.gmra.mrb[66].mxu0 %v1038_v48 }
 0x358   : > { %3025 = vmatprep.mubr.f32.mxu0 %v10619_v10 }
 0x35b   : > { %3026 = vmatmul.mubr.f32.gmra.mrb[68].mxu0 %v1039_v60  ;;  %v10823_v48 = vmul.u32.u64.low 2863311531, %v3453_v2  ;;  %v10824_v60 = vmul.u32.u64.high 2863311531, %v3453_v2, %v10823_v48 }
 0x35c   : > { %3030 = vmatprep.mubr.f32.mxu0 %v10730_v42  ;;  %v10766_v10 = vpop.f32.mrb[16].mxu1 }
 0x35d   : > { %v10769_v33 = vpop.f32.mrb[17].mxu1  ;;  %v3537_v11 = vshrl.u32 %v10824_v60, 4 }
 0x35f   : > { %3031 = vmatmul.mubr.f32.gmra.mrb[70].mxu0 %v1040_v28  ;;  %v3538_v30 = vmul.u32 24, %v3537_v11 }
 0x360   : > { %3035 = vmatprep.mubr.f32.mxu0 %v10625_v14  ;;  %v10772_v14 = vpop.f32.mrb[18].mxu1 }
 0x361   : > { %v10774_v8 = vpop.f32.mrb[19].mxu1  ;;  %v10893_v11 = vsub.s32 %v3453_v2, %v3538_v30 }
 0x363   : > { %3036 = vmatmul.mubr.f32.gmra.mrb[72].mxu0 %v1041_v62  ;;  %v3516_v62 = vmul.u32 24, %v3515_v37  ;;  %v10871_v37 = vld [vmem:[%s13430_s2] ss:$0 sm:$0xff]  ;;  %vm4029_vm12 = vcmp.ne.s32.totalorder %v10893_v11, 0  ;;  %vm4077_vm13 = vcmp.lt.s32.totalorder %v10893_v11, 0 }
 0x364   : > { %3040 = vmatprep.mubr.f32.mxu0 %v10629_v16  ;;  %v1045_v16 = vld [vmem:[#allocation2 + $0x177] sm:$0xff]  ;;  %vm10952_vm0 = vmand %vm4077_vm13, %vm4029_vm12 }
 0x367   : > { %3041 = vmatmul.mubr.f32.gmra.mrb[74].mxu0 %v1042_v5  ;;  %v4564_v5 = vld [vmem:[#allocation4 + $0x17] sm:$0xff] }
 0x368   : > { %3045 = vmatprep.mubr.f32.mxu0 %v10730_v42 }
 0x369   : > { %v10778_v13 = vpop.f32.mrb[20].mxu1 }
 0x36a   : > { %v10780_v55 = vpop.f32.mrb[21].mxu1 }
 0x36b   : > { %3046 = vmatmul.mubr.f32.gmra.mrb[76].mxu0 %v1043_v63 }
 0x36c   : > { %3050 = vmatprep.mubr.f32.mxu0 %v10635_v19  ;;  %v1047_v19 = vld [vmem:[#allocation2 + $0x187] sm:$0xff] }
 0x36f   : > { %3051 = vmatmul.mubr.f32.gmra.mrb[78].mxu0 %v1044_v49  ;;  %v10829_v63 = vmul.u32.u64.low 2863311531, %v3454_v50  ;;  %v10830_v49 = vmul.u32.u64.high 2863311531, %v3454_v50, %v10829_v63 }
 0x370   : > { %3055 = vmatprep.mubr.f32.mxu0 %v10639_v23 }
 0x371   : > { %v10784_v31 = vpop.f32.mrb[22].mxu1 }
 0x372   : > { %v10786_v23 = vpop.f32.mrb[23].mxu1 }
 0x373   : > { %3056 = vmatmul.mubr.f32.gmra.mrb[80].mxu0 %v1045_v16  ;;  %v10833_v16 = vadd.s32 40, %v10790_v26 }
 0x374   : > { %3060 = vmatprep.mubr.f32.mxu0 %v10730_v42 }
 0x377   : > { %3061 = vmatmul.mubr.f32.gmra.mrb[82].mxu0 %v1046_v22  ;;  %v3506_v22 = vsub.s32 %v10790_v26, %v3505_v27 }
 0x378   : > { %3065 = vmatprep.mubr.f32.mxu0 %v10647_v1  ;;  %v10792_v1 = vpop.f32.mrb[24].mxu1 }
 0x379   : > { %vm4026_vm1 = vcmp.ne.s32.totalorder %v3506_v22, 0  ;;  %vm4074_vm2 = vcmp.lt.s32.totalorder %v3506_v22, 0  ;;  %v4170_v21 = vadd.s32 24, %v3506_v22 }
 0x37a   : > { %vm10855_vm5 = vmand %vm4074_vm2, %vm4026_vm1 }
 0x37b   : > { %3066 = vmatmul.mubr.f32.gmra.mrb[84].mxu0 %v1047_v19  ;;  %v3527_v19 = vmul.u32 24, %v3526_v3 }
 0x37c   : > { %3070 = vmatprep.mubr.f32.mxu0 %v10653_v29  ;;  %v10794_v29 = vpop.f32.mrb[25].mxu1 }
 0x37f   : > { %3071 = vmatmul.mubr.f32.gmra.mrb[86].mxu0 %v1048_v38  ;;  %v10837_v38 = vadd.s32 48, %v10790_v26 }
 0x380   : > { %3075 = vmatprep.mubr.f32.mxu0 %v10730_v42 }
 0x381   : > { %v10807_v24 = vpop.f32.mrb[26].mxu1 }
 0x382   : > { %v10812_v43 = vpop.f32.mrb[27].mxu1 }
 0x383   : > { %3076 = vmatmul.mubr.f32.gmra.mrb[88].mxu0 %v1049_v59  ;;  %v3517_v59 = vsub.s32 %v3451_v40, %v3516_v62  ;;  %v3548_v40 = vshrl.u32 %v10830_v49, 4 }
 0x384   : > { %3080 = vmatprep.mubr.f32.mxu0 %v10730_v42 }
 0x385   : > { %vm4027_vm3 = vcmp.ne.s32.totalorder %v3517_v59, 0  ;;  %vm4075_vm4 = vcmp.lt.s32.totalorder %v3517_v59, 0  ;;  %v4171_v39 = vadd.s32 24, %v3517_v59  ;;  %v3549_v27 = vmul.u32 24, %v3548_v40 }
 0x386   : > { %vm10862_vm6 = vmand %vm4075_vm4, %vm4027_vm3 }
 0x387   : > { %3081 = vmatmul.mubr.f32.gmra.mrb[90].mxu0 %v1050_v20  ;;  %v10840_v52 = vmul.u32.u64.low 2863311531, %v10833_v16  ;;  %v10841_v20 = vmul.u32.u64.high 2863311531, %v10833_v16, %v10840_v52  ;;  %v4219_v63 = vsel %vm10862_vm6, %v4171_v39, %v3517_v59  ;;  %v10902_v40 = vsub.s32 %v3454_v50, %v3549_v27 }
 0x388   : > { %3085 = vmatprep.mubr.f32.mxu0 %v10730_v42  ;;  %vm10905_vm11 = vcmp.lt.s32.totalorder %v4219_v63, 16  ;;  %v10920_v50 = vadd.s32 80, %v10790_v26 }
 0x389   : > { %v3559_v48 = vshrl.u32 %v10841_v20, 4  ;;  %vm4030_vm14 = vcmp.ne.s32.totalorder %v10902_v40, 0  ;;  %vm4078_vm15 = vcmp.lt.s32.totalorder %v10902_v40, 0 }
 0x38a   : > { %vm10976_vm2 = vmand %vm4078_vm15, %vm4030_vm14 }
 0x38b   : > { %3086 = vmatmul.mubr.f32.gmra.mrb[92].mxu0 %v1051_v35  ;;  %v10845_v35 = vsub.s32 %v3452_v32, %v3527_v19  ;;  %v10860_v32 = vadd.s32 56, %v10790_v26  ;;  %v10888_v19 = vadd.s32 64, %v10790_v26 }
 0x38c   : > { %3090 = vmatprep.mubr.f32.mxu0 %v10730_v42  ;;  %v10820_v53 = vpop.f32.mrb[28].mxu1 }
 0x38d   : > { %v10826_v28 = vpop.f32.mrb[29].mxu1  ;;  %vm4028_vm7 = vcmp.ne.s32.totalorder %v10845_v35, 0  ;;  %vm4076_vm8 = vcmp.lt.s32.totalorder %v10845_v35, 0  ;;  %v4172_v3 = vadd.s32 24, %v10845_v35 }
 0x38e   : > { %v10878_v60 = vmul.u32.u64.low 2863311531, %v10860_v32  ;;  %v10879_v62 = vmul.u32.u64.high 2863311531, %v10860_v32, %v10878_v60  ;;  %vm10883_vm9 = vmand %vm4076_vm8, %vm4028_vm7 }
 0x38f   : > { %3091 = vmatmul.mubr.f32.gmra.mrb[94].mxu0 %v1052_v17  ;;  %v10849_v12 = vmul.u32.u64.low 2863311531, %v10837_v38  ;;  %v10850_v17 = vmul.u32.u64.high 2863311531, %v10837_v38, %v10849_v12  ;;  %v4220_v2 = vsel %vm10883_vm9, %v4172_v3, %v10845_v35  ;;  %v10917_v60 = vadd.s32 72, %v10790_v26 }
 0x390   : > { %6073 = vmatprep.mubr.f32.mxu0 %v10730_v42  ;;  %v4173_v35 = vadd.s32 24, %v10893_v11  ;;  %vm10968_vm1 = vcmp.lt.s32.totalorder %v4220_v2, 16 }
 0x391   : > { %v3570_v12 = vshrl.u32 %v10850_v17, 4 }
 0x393   : > { %6074 = vmatmul.mubr.f32.vlgmr.msra.gmra.mrb[96].mxu0 %v4562_v45  ;;  %v3560_v45 = vmul.u32 24, %v3559_v48  ;;  %v3571_v63 = vmul.u32 24, %v3570_v12 }
 0x394   : > { %6078 = vmatprep.mubr.f32.mxu0 %v10730_v42 }
 0x395   : > { %v10932_v49 = vsub.s32 %v10833_v16, %v3560_v45  ;;  %v10957_v59 = vsub.s32 %v10837_v38, %v3571_v63 }
 0x397   : > { %6079 = vmatmul.mubr.f32.gmra.mrb[98].mxu0 %v4563_v54  ;;  %v4218_v54 = vsel %vm10855_vm5, %v4170_v21, %v3506_v22  ;;  %vm4031_vm3 = vcmp.ne.s32.totalorder %v10932_v49, 0  ;;  %vm4079_vm4 = vcmp.lt.s32.totalorder %v10932_v49, 0  ;;  %vm4032_vm5 = vcmp.ne.s32.totalorder %v10957_v59, 0 }
 0x398   : > { %6083 = vmatprep.mubr.f32.mxu0 %v10730_v42  ;;  %v10843_v42 = vpop.f32.mrb[30].mxu1  ;;  %vm10898_vm10 = vcmp.lt.s32.totalorder %v4218_v54, 16  ;;  %v10913_v30 = vmul.u32.u64.low 2863311531, %v10888_v19  ;;  %v10914_v54 = vmul.u32.u64.high 2863311531, %v10888_v19, %v10913_v30  ;;  %vm4080_vm6 = vcmp.lt.s32.totalorder %v10957_v59, 0  ;;  %vm11004_vm7 = vmand %vm4079_vm4, %vm4031_vm3 }
 0x399   : > { %v10852_v9 = vpop.f32.mrb[31].mxu1  ;;  %vm11018_vm9 = vmand %vm4080_vm6, %vm4032_vm5 }
 0x39a   : > { %v10890_v22 = vpop.f32.mrb[32].mxu1 }
 0x39b   : > { %6084 = vmatmul.mubr.f32.gmra.mrb[100].mxu0 %v4564_v5  ;;  %v10896_v21 = vpop.f32.mrb[33].mxu1 }
 0x3a6   : > { %v2857_v5 = vpop.f32.mrb[0].mxu0 }
 0x3a7   : > { %v8892_v52 = vadd.f32 %v10871_v37, %v2857_v5  ;;  %v2859_v20 = vpop.f32.mrb[1].mxu0 }
 0x3a9   : > { %v3163_v41 = vadd.f32 %v8892_v52, %v10719_v25  ;;  %v3581_v52 = vshrl.u32 %v10879_v62, 4 }
 0x3aa   : > { %v2862_v17 = vpop.f32.mrb[2].mxu0 }
 0x3ab   : > { %v3401_v25 = vmax.f32 %v3163_v41, 0.0  ;;  %v8893_v27 = vadd.f32 %v10871_v37, %v2862_v17  ;;  %v2864_v5 = vpop.f32.mrb[3].mxu0  ;;  %v10938_v12 = vmul.u32.u64.low 2863311531, %v10917_v60  ;;  %v10939_v41 = vmul.u32.u64.high 2863311531, %v10917_v60, %v10938_v12 }
 0x3ac   : > { %v10942_v17 = vmul.u32.u64.low 2863311531, %v10920_v50  ;;  %v10943_v30 = vmul.u32.u64.high 2863311531, %v10920_v50, %v10942_v17  ;;  %v10945_v5 = vpop.f32.mrb[34].mxu1  ;;  %v3582_v63 = vmul.u32 24, %v3581_v52 }
 0x3ad   : > { %v4410_v3 = vsel %vm10898_vm10, %v3401_v25, 0.0  ;;  %v3168_v48 = vadd.f32 %v8893_v27, %v10717_v58  ;;  %9622 = vmatprep.mubr.msk.f32.mxu0 %vm10898_vm10, %v3401_v25  ;;  %13462 = vst [vmem:[#allocation16_spill] sm:$0xff] %v10945_v5  ;;  %v10959_v25 = vpop.f32.mrb[35].mxu1  ;;  %v4174_v27 = vadd.s32 24, %v10902_v40 }
 0x3ae   : > { %4514 = vst [vmem:[#allocation4 + $0x20] sm:$0xff] %v4410_v3  ;;  %v2867_v20 = vpop.f32.mrb[4].mxu0  ;;  %13465 = vst [vmem:[#allocation17_spill] sm:$0xff] %v10959_v25  ;;  %v10963_v3 = vadd.s32 88, %v10790_v26  ;;  %v3614_v5 = vshrl.u32 %v10943_v30, 4  ;;  %v11042_v30 = vadd.s32 104, %v10790_v26 }
 0x3af   : > { %v3402_v58 = vmax.f32 %v3168_v48, 0.0  ;;  %v8894_v16 = vadd.f32 %v10871_v37, %v2867_v20  ;;  %v2869_v45 = vpop.f32.mrb[5].mxu0  ;;  %v4222_v52 = vsel %vm10976_vm2, %v4174_v27, %v10902_v40  ;;  %v4176_v40 = vadd.s32 24, %v10957_v59 }
 0x3b0   : > { %v4221_v45 = vsel %vm10952_vm0, %v4173_v35, %v10893_v11  ;;  %v4175_v11 = vadd.s32 24, %v10932_v49  ;;  %v10994_v35 = vmul.u32.u64.low 2863311531, %v10963_v3  ;;  %v10995_v62 = vmul.u32.u64.high 2863311531, %v10963_v3, %v10994_v35 }
 0x3b1   : > { %v4411_v48 = vsel %vm10905_vm11, %v3402_v58, 0.0  ;;  %v3173_v20 = vadd.f32 %v8894_v16, %v10725_v44  ;;  %v3592_v44 = vshrl.u32 %v10914_v54, 4  ;;  %v11010_v27 = vsub.s32 %v10860_v32, %v3582_v63  ;;  %v11024_v32 = vpop.f32.mrb[36].mxu1 }
 0x3b2   : > { %4515 = vst [vmem:[#allocation4 + $0x28] sm:$0xff] %v4411_v48  ;;  %v2872_v17 = vpop.f32.mrb[6].mxu0  ;;  %vm11012_vm8 = vcmp.lt.s32.totalorder %v4221_v45, 16  ;;  %v3603_v35 = vshrl.u32 %v10939_v41, 4  ;;  %v11032_v25 = vpop.f32.mrb[37].mxu1  ;;  %vm11034_vm10 = vcmp.lt.s32.totalorder %v4222_v52, 16  ;;  %v4223_v41 = vsel %vm11004_vm7, %v4175_v11, %v10932_v49 }
 0x3b3   : > { %v3403_v2 = vmax.f32 %v3173_v20, 0.0  ;;  %v8895_v16 = vadd.f32 %v10871_v37, %v2872_v17  ;;  %v2874_v0 = vpop.f32.mrb[7].mxu0  ;;  %v4224_v52 = vsel %vm11018_vm9, %v4176_v40, %v10957_v59  ;;  %vm4081_vm12 = vcmp.lt.s32.totalorder %v11010_v27, 0 }
 0x3b4   : > { %v3604_v11 = vmul.u32 24, %v3603_v35  ;;  %v3615_v20 = vmul.u32 24, %v3614_v5  ;;  %v3625_v17 = vshrl.u32 %v10995_v62, 4  ;;  %vm11076_vm13 = vcmp.lt.s32.totalorder %v4223_v41, 16  ;;  %v11095_v41 = vpop.f32.mrb[38].mxu1 }
 0x3b5   : > { %v4412_v54 = vsel %vm10968_vm1, %v3403_v2, 0.0  ;;  %v3178_v48 = vadd.f32 %v8895_v16, %v10722_v6  ;;  %v4565_v0 = vld [vmem:[#allocation4 + $0x1f] sm:$0xff]  ;;  %v3593_v16 = vmul.u32 24, %v3592_v44  ;;  %vm11080_vm14 = vcmp.lt.s32.totalorder %v4224_v52, 16  ;;  %13484 = vst [vmem:[#allocation18_spill] sm:$0xff] %v11095_v41 }
 0x3b6   : > { %4516 = vst [vmem:[#allocation4 + $0x30] sm:$0xff] %v4412_v54  ;;  %v2877_v6 = vpop.f32.mrb[8].mxu0  ;;  %6088 = vmatmul.mubr.f32.gmra.mrb[102].mxu0 %v4565_v0  ;;  %v11030_v0 = vadd.s32 96, %v10790_v26  ;;  %v11197_v35 = vadd.s32 136, %v10790_v26 }
 0x3b7   : > { %v3404_v63 = vmax.f32 %v3178_v48, 0.0  ;;  %v8896_v45 = vadd.f32 %v10871_v37, %v2877_v6  ;;  %v2879_v54 = vpop.f32.mrb[9].mxu0  ;;  %9623 = vmatprep.mubr.msk.f32.mxu0 %vm10905_vm11, %v3402_v58  ;;  %vm4033_vm11 = vcmp.ne.s32.totalorder %v11010_v27, 0  ;;  %v11053_v49 = vsub.s32 %v10888_v19, %v3593_v16 }
 0x3b8   : > { %v11059_v59 = vmul.u32.u64.low 2863311531, %v11030_v0  ;;  %v11060_v40 = vmul.u32.u64.high 2863311531, %v11030_v0, %v11059_v59  ;;  %v11068_v19 = vadd.s32 112, %v10790_v26  ;;  %vm11088_vm15 = vmand %vm4081_vm12, %vm4033_vm11 }
 0x3b9   : > { %v4413_v39 = vsel %vm11012_vm8, %v3404_v63, 0.0  ;;  %v3183_v58 = vadd.f32 %v8896_v45, %v10733_v15  ;;  %v4566_v48 = vld [vmem:[#allocation4 + $0x27] sm:$0xff]  ;;  %vm4034_vm0 = vcmp.ne.s32.totalorder %v11053_v49, 0  ;;  %v11103_v59 = vpop.f32.mrb[39].mxu1 }
 0x3ba   : > { %4517 = vst [vmem:[#allocation4 + $0x38] sm:$0xff] %v4413_v39  ;;  %v2882_v6 = vpop.f32.mrb[10].mxu0  ;;  %6093 = vmatmul.mubr.f32.gmra.mrb[104].mxu0 %v4566_v48  ;;  %v11064_v39 = vmul.u32.u64.low 2863311531, %v11042_v30  ;;  %v11065_v48 = vmul.u32.u64.high 2863311531, %v11042_v30, %v11064_v39 }
 0x3bb   : > { %v3405_v54 = vmax.f32 %v3183_v58, 0.0  ;;  %v8897_v15 = vadd.f32 %v10871_v37, %v2882_v6  ;;  %v2884_v45 = vpop.f32.mrb[11].mxu0  ;;  %9624 = vmatprep.mubr.msk.f32.mxu0 %vm10968_vm1, %v3403_v2  ;;  %v4177_v2 = vadd.s32 24, %v11010_v27  ;;  %v11093_v6 = vsub.s32 %v10917_v60, %v3604_v11 }
 0x3bc   : > { %vm4082_vm1 = vcmp.lt.s32.totalorder %v11053_v49, 0  ;;  %v11106_v39 = vsub.s32 %v10920_v50, %v3615_v20  ;;  %v3626_v60 = vmul.u32 24, %v3625_v17  ;;  %v4178_v20 = vadd.s32 24, %v11053_v49 }
 0x3bd   : > { %v4414_v5 = vsel %vm11034_vm10, %v3405_v54, 0.0  ;;  %v11073_v16 = vadd.f32 %v8897_v15, %v10728_v34  ;;  %v4567_v12 = vld [vmem:[#allocation4 + $0x2f] sm:$0xff]  ;;  %vm4035_vm2 = vcmp.ne.s32.totalorder %v11093_v6, 0  ;;  %vm4083_vm3 = vcmp.lt.s32.totalorder %v11093_v6, 0  ;;  %vm11137_vm4 = vmand %vm4082_vm1, %vm4034_vm0 }
 0x3be   : > { %4518 = vst [vmem:[#allocation4 + $0x40] sm:$0xff] %v4414_v5  ;;  %v2887_v62 = vpop.f32.mrb[12].mxu0  ;;  %6098 = vmatmul.mubr.f32.gmra.mrb[106].mxu0 %v4567_v12  ;;  %v11109_v11 = vmul.u32.u64.low 2863311531, %v11068_v19  ;;  %v11110_v5 = vmul.u32.u64.high 2863311531, %v11068_v19, %v11109_v11  ;;  %vm4036_vm5 = vcmp.ne.s32.totalorder %v11106_v39, 0  ;;  %vm4084_vm6 = vcmp.lt.s32.totalorder %v11106_v39, 0 }
 0x3bf   : > { %v3406_v15 = vmax.f32 %v11073_v16, 0.0  ;;  %v8898_v52 = vadd.f32 %v10871_v37, %v2887_v62  ;;  %v2889_v45 = vpop.f32.mrb[13].mxu0  ;;  %9625 = vmatprep.mubr.msk.f32.mxu0 %vm11012_vm8, %v3404_v63  ;;  %v4225_v63 = vsel %vm11088_vm15, %v4177_v2, %v11010_v27  ;;  %v11121_v62 = vadd.s32 120, %v10790_v26  ;;  %vm11169_vm8 = vmand %vm4083_vm3, %vm4035_vm2 }
 0x3c0   : > { %v3636_v45 = vshrl.u32 %v11060_v40, 4  ;;  %v11146_v11 = vsub.s32 %v10963_v3, %v3626_v60  ;;  %v3647_v44 = vshrl.u32 %v11065_v48, 4  ;;  %vm11158_vm7 = vcmp.lt.s32.totalorder %v4225_v63, 16  ;;  %vm11190_vm9 = vmand %vm4084_vm6, %vm4036_vm5 }
 0x3c1   : > { %v4415_v16 = vsel %vm11076_vm13, %v3406_v15, 0.0  ;;  %v11115_v38 = vadd.f32 %v8898_v52, %v10739_v36  ;;  %v4568_v12 = vld [vmem:[#allocation4 + $0x37] sm:$0xff]  ;;  %v11127_v36 = vadd.s32 128, %v10790_v26  ;;  %v4179_v52 = vadd.s32 24, %v11093_v6 }
 0x3c2   : > { %4519 = vst [vmem:[#allocation4 + $0x48] sm:$0xff] %v4415_v16  ;;  %v2892_v50 = vpop.f32.mrb[14].mxu0  ;;  %6102 = vmatmul.mubr.f32.gmra.mrb[108].mxu0 %v4568_v12  ;;  %v4226_v48 = vsel %vm11137_vm4, %v4178_v20, %v11053_v49  ;;  %v4180_v49 = vadd.s32 24, %v11106_v39  ;;  %v3637_v20 = vmul.u32 24, %v3636_v45  ;;  %vm4085_vm11 = vcmp.lt.s32.totalorder %v11146_v11, 0 }
 0x3c3   : > { %v3407_v17 = vmax.f32 %v11115_v38, 0.0  ;;  %v8899_v27 = vadd.f32 %v10871_v37, %v2892_v50  ;;  %v2894_v2 = vpop.f32.mrb[15].mxu0  ;;  %9626 = vmatprep.mubr.msk.f32.mxu0 %vm11034_vm10, %v3405_v54  ;;  %v11155_v12 = vmul.u32.u64.low 2863311531, %v11121_v62  ;;  %v11156_v50 = vmul.u32.u64.high 2863311531, %v11121_v62, %v11155_v12 }
 0x3c4   : > { %v11174_v60 = vmul.u32.u64.low 2863311531, %v11127_v36  ;;  %v11175_v63 = vmul.u32.u64.high 2863311531, %v11127_v36, %v11174_v60  ;;  %vm4037_vm10 = vcmp.ne.s32.totalorder %v11146_v11, 0  ;;  %vm11208_vm12 = vcmp.lt.s32.totalorder %v4226_v48, 16 }
 0x3c5   : > { %v4416_v54 = vsel %vm11080_vm14, %v3407_v17, 0.0  ;;  %v11152_v16 = vadd.f32 %v8899_v27, %v10736_v47  ;;  %v4569_v38 = vld [vmem:[#allocation4 + $0x3f] sm:$0xff]  ;;  %v11177_v27 = vpop.f32.mrb[40].mxu1 }
 0x3c6   : > { %4520 = vst [vmem:[#allocation4 + $0x50] sm:$0xff] %v4416_v54  ;;  %v2897_v3 = vpop.f32.mrb[16].mxu0  ;;  %6107 = vmatmul.mubr.f32.gmra.mrb[110].mxu0 %v4569_v38  ;;  %13491 = vst [vmem:[#allocation19_spill] sm:$0xff] %v11177_v27  ;;  %v11184_v38 = vpop.f32.mrb[41].mxu1 }
 0x3c7   : > { %v3408_v2 = vmax.f32 %v11152_v16, 0.0  ;;  %v8900_v54 = vadd.f32 %v10871_v37, %v2897_v3  ;;  %v2899_v34 = vpop.f32.mrb[17].mxu0  ;;  %9627 = vmatprep.mubr.msk.f32.mxu0 %vm11076_vm13, %v3406_v15  ;;  %13492 = vst [vmem:[#allocation20_spill] sm:$0xff] %v11184_v38  ;;  %v3648_v16 = vmul.u32 24, %v3647_v44  ;;  %v4227_v3 = vsel %vm11169_vm8, %v4179_v52, %v11093_v6  ;;  %vm11224_vm13 = vmand %vm4085_vm11, %vm4037_vm10 }
 0x3c8   : > { %v3658_v34 = vshrl.u32 %v11110_v5, 4  ;;  %v4181_v38 = vadd.s32 24, %v11146_v11  ;;  %v4228_v6 = vsel %vm11190_vm9, %v4180_v49, %v11106_v39  ;;  %v11229_v52 = vsub.s32 %v11030_v0, %v3637_v20 }
 0x3c9   : > { %v4417_v15 = vsel %vm11158_vm7, %v3408_v2, 0.0  ;;  %v11202_v45 = vadd.f32 %v8900_v54, %v10745_v57  ;;  %v4570_v60 = vld [vmem:[#allocation4 + $0x47] sm:$0xff]  ;;  %vm11231_vm15 = vcmp.lt.s32.totalorder %v4227_v3, 16  ;;  %v11236_v58 = vsub.s32 %v11042_v30, %v3648_v16 }
 0x3ca   : > { %4521 = vst [vmem:[#allocation4 + $0x58] sm:$0xff] %v4417_v15  ;;  %v2902_v44 = vpop.f32.mrb[18].mxu0  ;;  %6112 = vmatmul.mubr.f32.gmra.mrb[112].mxu0 %v4570_v60  ;;  %v3659_v15 = vmul.u32 24, %v3658_v34  ;;  %v3669_v0 = vshrl.u32 %v11156_v50, 4  ;;  %v4229_v30 = vsel %vm11224_vm13, %v4181_v38, %v11146_v11  ;;  %v3680_v16 = vshrl.u32 %v11175_v63, 4 }
 0x3cb   : > { %v3409_v41 = vmax.f32 %v11202_v45, 0.0  ;;  %v8901_v57 = vadd.f32 %v10871_v37, %v2902_v44  ;;  %v2904_v54 = vpop.f32.mrb[19].mxu0  ;;  %9628 = vmatprep.mubr.msk.f32.mxu0 %vm11080_vm14, %v3407_v17  ;;  %v11239_v39 = vmul.u32.u64.low 2863311531, %v11197_v35  ;;  %v11240_v17 = vmul.u32.u64.high 2863311531, %v11197_v35, %v11239_v39 }
 0x3cc   : > { %vm11246_vm14 = vcmp.lt.s32.totalorder %v4228_v6, 16  ;;  %v11255_v3 = vadd.s32 144, %v10790_v26  ;;  %vm4038_vm0 = vcmp.ne.s32.totalorder %v11229_v52, 0  ;;  %vm4086_vm1 = vcmp.lt.s32.totalorder %v11229_v52, 0 }
 0x3cd   : > { %v4418_v47 = vsel %vm11208_vm12, %v3409_v41, 0.0  ;;  %v3208_v49 = vadd.f32 %v8901_v57, %v10742_v51  ;;  %v4571_v12 = vld [vmem:[#allocation4 + $0x4f] sm:$0xff]  ;;  %v11257_v51 = vpop.f32.mrb[42].mxu1  ;;  %v4182_v11 = vadd.s32 24, %v11229_v52  ;;  %vm4039_vm2 = vcmp.ne.s32.totalorder %v11236_v58, 0  ;;  %vm11284_vm4 = vmand %vm4086_vm1, %vm4038_vm0 }
 0x3ce   : > { %4522 = vst [vmem:[#allocation4 + $0x60] sm:$0xff] %v4418_v47  ;;  %v2907_v20 = vpop.f32.mrb[20].mxu0  ;;  %6116 = vmatmul.mubr.f32.gmra.mrb[114].mxu0 %v4571_v12  ;;  %v11264_v44 = vpop.f32.mrb[43].mxu1  ;;  %vm4087_vm3 = vcmp.lt.s32.totalorder %v11236_v58, 0  ;;  %v11270_v63 = vadd.s32 152, %v10790_v26  ;;  %v11278_v57 = vsub.s32 %v11068_v19, %v3659_v15  ;;  %v3670_v54 = vmul.u32 24, %v3669_v0 }
 0x3cf   : > { %v3410_v60 = vmax.f32 %v3208_v49, 0.0  ;;  %v8902_v50 = vadd.f32 %v10871_v37, %v2907_v20  ;;  %v2909_v34 = vpop.f32.mrb[21].mxu0  ;;  %9629 = vmatprep.mubr.msk.f32.mxu0 %vm11158_vm7, %v3408_v2  ;;  %v3681_v39 = vmul.u32 24, %v3680_v16  ;;  %v11293_v19 = vadd.s32 160, %v10790_v26  ;;  %vm11321_vm6 = vmand %vm4087_vm3, %vm4039_vm2 }
 0x3d0   : > { %vm11297_vm5 = vcmp.lt.s32.totalorder %v4229_v30, 16  ;;  %v4183_v20 = vadd.s32 24, %v11236_v58  ;;  %v3691_v16 = vshrl.u32 %v11240_v17, 4  ;;  %v4230_v27 = vsel %vm11284_vm4, %v4182_v11, %v11229_v52 }
 0x3d1   : > { %v4419_v38 = vsel %vm11231_vm15, %v3410_v60, 0.0  ;;  %v11275_v40 = vadd.f32 %v8902_v50, %v10751_v56  ;;  %v4572_v2 = vld [vmem:[#allocation4 + $0x57] sm:$0xff]  ;;  %v11289_v56 = vmul.u32.u64.low 2863311531, %v11255_v3  ;;  %v11290_v47 = vmul.u32.u64.high 2863311531, %v11255_v3, %v11289_v56 }
 0x3d2   : > { %4523 = vst [vmem:[#allocation4 + $0x68] sm:$0xff] %v4419_v38  ;;  %v2912_v6 = vpop.f32.mrb[22].mxu0  ;;  %6121 = vmatmul.mubr.f32.gmra.mrb[116].mxu0 %v4572_v2  ;;  %v11306_v50 = vmul.u32.u64.low 2863311531, %v11270_v63  ;;  %v11307_v34 = vmul.u32.u64.high 2863311531, %v11270_v63, %v11306_v50  ;;  %v11326_v17 = vsub.s32 %v11121_v62, %v3670_v54  ;;  %vm4040_vm7 = vcmp.ne.s32.totalorder %v11278_v57, 0 }
 0x3d3   : > { %v3411_v49 = vmax.f32 %v11275_v40, 0.0  ;;  %v8903_v12 = vadd.f32 %v10871_v37, %v2912_v6  ;;  %v2914_v0 = vpop.f32.mrb[23].mxu0  ;;  %9630 = vmatprep.mubr.msk.f32.mxu0 %vm11208_vm12, %v3409_v41  ;;  %v11333_v52 = vmul.u32.u64.low 2863311531, %v11293_v19  ;;  %v11334_v11 = vmul.u32.u64.high 2863311531, %v11293_v19, %v11333_v52  ;;  %v11336_v6 = vpop.f32.mrb[44].mxu1 }
 0x3d4   : > { %vm4088_vm8 = vcmp.lt.s32.totalorder %v11278_v57, 0  ;;  %v11344_v54 = vadd.s32 168, %v10790_v26  ;;  %vm11348_vm9 = vcmp.lt.s32.totalorder %v4230_v27, 16  ;;  %v3692_v0 = vmul.u32 24, %v3691_v16 }
 0x3d5   : > { %v4420_v38 = vsel %vm11246_vm14, %v3411_v49, 0.0  ;;  %v11312_v30 = vadd.f32 %v8903_v12, %v10748_v18  ;;  %v4573_v40 = vld [vmem:[#allocation4 + $0x5f] sm:$0xff]  ;;  %v11330_v18 = vsub.s32 %v11127_v36, %v3681_v39  ;;  %v11346_v36 = vpop.f32.mrb[45].mxu1  ;;  %v4231_v12 = vsel %vm11321_vm6, %v4183_v20, %v11236_v58  ;;  %vm11369_vm11 = vmand %vm4088_vm8, %vm4040_vm7 }
 0x3d6   : > { %4524 = vst [vmem:[#allocation4 + $0x70] sm:$0xff] %v4420_v38  ;;  %v2917_v2 = vpop.f32.mrb[24].mxu0  ;;  %6126 = vmatmul.mubr.f32.gmra.mrb[118].mxu0 %v4573_v40  ;;  %v11356_v50 = vadd.s32 176, %v10790_v26  ;;  %vm4041_vm10 = vcmp.ne.s32.totalorder %v11326_v17, 0  ;;  %vm4089_vm12 = vcmp.lt.s32.totalorder %v11326_v17, 0  ;;  %v11386_v52 = vsub.s32 %v11197_v35, %v3692_v0 }
 0x3d7   : > { %v3412_v5 = vmax.f32 %v11312_v30, 0.0  ;;  %v8904_v56 = vadd.f32 %v10871_v37, %v2917_v2  ;;  %v2919_v62 = vpop.f32.mrb[25].mxu0  ;;  %9631 = vmatprep.mubr.msk.f32.mxu0 %vm11231_vm15, %v3410_v60  ;;  %v4184_v30 = vadd.s32 24, %v11278_v57  ;;  %vm4042_vm13 = vcmp.ne.s32.totalorder %v11330_v18, 0  ;;  %vm11407_vm0 = vmand %vm4089_vm12, %vm4041_vm10 }
 0x3d8   : > { %vm4090_vm15 = vcmp.lt.s32.totalorder %v11330_v18, 0  ;;  %v11382_v41 = vmul.u32.u64.low 2863311531, %v11344_v54  ;;  %v11383_v2 = vmul.u32.u64.high 2863311531, %v11344_v54, %v11382_v41  ;;  %vm4043_vm3 = vcmp.ne.s32.totalorder %v11386_v52, 0 }
 0x3d9   : > { %v4421_v48 = vsel %vm11297_vm5, %v3412_v5, 0.0  ;;  %v11361_v60 = vadd.f32 %v8904_v56, %v10757_v4  ;;  %v4574_v38 = vld [vmem:[#allocation4 + $0x67] sm:$0xff]  ;;  %v3702_v4 = vshrl.u32 %v11290_v47, 4  ;;  %v3713_v56 = vshrl.u32 %v11307_v34, 4  ;;  %vm11421_vm1 = vmand %vm4090_vm15, %vm4042_vm13 }
 0x3da   : > { %4525 = vst [vmem:[#allocation4 + $0x78] sm:$0xff] %v4421_v48  ;;  %v2922_v40 = vpop.f32.mrb[26].mxu0  ;;  %6130 = vmatmul.mubr.f32.gmra.mrb[120].mxu0 %v4574_v38  ;;  %v11390_v62 = vmul.u32.u64.low 2863311531, %v11356_v50  ;;  %v11391_v47 = vmul.u32.u64.high 2863311531, %v11356_v50, %v11390_v62  ;;  %v4186_v38 = vadd.s32 24, %v11330_v18  ;;  %v11433_v15 = vadd.s32 184, %v10790_v26 }
 0x3db   : > { %v3413_v20 = vmax.f32 %v11361_v60, 0.0  ;;  %v8905_v16 = vadd.f32 %v10871_v37, %v2922_v40  ;;  %v2924_v27 = vpop.f32.mrb[27].mxu0  ;;  %9632 = vmatprep.mubr.msk.f32.mxu0 %vm11246_vm14, %v3411_v49  ;;  %v4232_v49 = vsel %vm11369_vm11, %v4184_v30, %v11278_v57  ;;  %vm11399_vm14 = vcmp.lt.s32.totalorder %v4231_v12, 16 }
 0x3dc   : > { %v3724_v57 = vshrl.u32 %v11334_v11, 4  ;;  %v11425_v27 = vpop.f32.mrb[46].mxu1  ;;  %vm11427_vm2 = vcmp.lt.s32.totalorder %v4232_v49, 16  ;;  %v3714_v41 = vmul.u32 24, %v3713_v56  ;;  %vm4091_vm4 = vcmp.lt.s32.totalorder %v11386_v52, 0 }
 0x3dd   : > { %v4422_v48 = vsel %vm11348_vm9, %v3413_v20, 0.0  ;;  %v3228_v60 = vadd.f32 %v8905_v16, %v10754_v46  ;;  %v4575_v45 = vld [vmem:[#allocation4 + $0x6f] sm:$0xff]  ;;  %v4185_v46 = vadd.s32 24, %v11326_v17  ;;  %v3703_v16 = vmul.u32 24, %v3702_v4  ;;  %13519 = vst [vmem:[#allocation21_spill] sm:$0xff] %v11425_v27 }
 0x3de   : > { %4526 = vst [vmem:[#allocation4 + $0x80] sm:$0xff] %v4422_v48  ;;  %v2927_v34 = vpop.f32.mrb[28].mxu0  ;;  %6135 = vmatmul.mubr.f32.gmra.mrb[122].mxu0 %v4575_v45  ;;  %v4234_v49 = vsel %vm11421_vm1, %v4186_v38, %v11330_v18  ;;  %v11467_v0 = vsub.s32 %v11270_v63, %v3714_v41 }
 0x3df   : > { %v3414_v12 = vmax.f32 %v3228_v60, 0.0  ;;  %v8906_v30 = vadd.f32 %v10871_v37, %v2927_v34  ;;  %v2929_v40 = vpop.f32.mrb[29].mxu0  ;;  %9633 = vmatprep.mubr.msk.f32.mxu0 %vm11297_vm5, %v3412_v5  ;;  %v11435_v5 = vpop.f32.mrb[47].mxu1  ;;  %v11442_v60 = vadd.s32 192, %v10790_v26  ;;  %v4233_v56 = vsel %vm11407_vm0, %v4185_v46, %v11326_v17  ;;  %vm11462_vm5 = vmand %vm4091_vm4, %vm4043_vm3 }
 0x3e0   : > { %v4187_v34 = vadd.s32 24, %v11386_v52  ;;  %v3735_v17 = vshrl.u32 %v11383_v2, 4  ;;  %v3746_v46 = vshrl.u32 %v11391_v47, 4  ;;  %vm11481_vm6 = vcmp.lt.s32.totalorder %v4233_v56, 16 }
 0x3e1   : > { %v4423_v62 = vsel %vm11399_vm14, %v3414_v12, 0.0  ;;  %v3233_v48 = vadd.f32 %v8906_v30, %v10763_v7  ;;  %v4576_v4 = vld [vmem:[#allocation4 + $0x77] sm:$0xff]  ;;  %v3725_v7 = vmul.u32 24, %v3724_v57  ;;  %vm11485_vm7 = vcmp.lt.s32.totalorder %v4234_v49, 16 }
 0x3e2   : > { %4527 = vst [vmem:[#allocation4 + $0x88] sm:$0xff] %v4423_v62  ;;  %v2932_v45 = vpop.f32.mrb[30].mxu0  ;;  %6140 = vmatmul.mubr.f32.gmra.mrb[124].mxu0 %v4576_v4  ;;  %v11455_v62 = vsub.s32 %v11255_v3, %v3703_v16  ;;  %v11478_v57 = vmul.u32.u64.low 2863311531, %v11442_v60  ;;  %v11479_v58 = vmul.u32.u64.high 2863311531, %v11442_v60, %v11478_v57  ;;  %v4235_v4 = vsel %vm11462_vm5, %v4187_v34, %v11386_v52 }
 0x3e3   : > { %v3415_v30 = vmax.f32 %v3233_v48, 0.0  ;;  %v8907_v40 = vadd.f32 %v10871_v37, %v2932_v45  ;;  %v2934_v27 = vpop.f32.mrb[31].mxu0  ;;  %9634 = vmatprep.mubr.msk.f32.mxu0 %vm11348_vm9, %v3413_v20  ;;  %v11471_v39 = vmul.u32.u64.low 2863311531, %v11433_v15  ;;  %v11472_v20 = vmul.u32.u64.high 2863311531, %v11433_v15, %v11471_v39 }
 0x3e4   : > { %v11490_v27 = vsub.s32 %v11293_v19, %v3725_v7  ;;  %v3736_v45 = vmul.u32 24, %v3735_v17  ;;  %vm4044_vm8 = vcmp.ne.s32.totalorder %v11455_v62, 0  ;;  %vm4092_vm9 = vcmp.lt.s32.totalorder %v11455_v62, 0 }
 0x3e5   : > { %v4424_v3 = vsel %vm11427_vm2, %v3415_v30, 0.0  ;;  %v3238_v2 = vadd.f32 %v8907_v40, %v10760_v61  ;;  %v4577_v38 = vld [vmem:[#allocation4 + $0x7f] sm:$0xff]  ;;  %v3747_v56 = vmul.u32 24, %v3746_v46  ;;  %v11501_v19 = vadd.s32 200, %v10790_v26  ;;  %vm11524_vm13 = vmand %vm4092_vm9, %vm4044_vm8 }
 0x3e6   : > { %4528 = vst [vmem:[#allocation4 + $0x90] sm:$0xff] %v4424_v3  ;;  %v2937_v47 = vpop.f32.mrb[32].mxu0  ;;  %6144 = vmatmul.mubr.f32.gmra.mrb[126].mxu0 %v4577_v38  ;;  %vm4045_vm10 = vcmp.ne.s32.totalorder %v11467_v0, 0  ;;  %vm4093_vm11 = vcmp.lt.s32.totalorder %v11467_v0, 0  ;;  %v4188_v35 = vadd.s32 24, %v11455_v62  ;;  %vm4046_vm12 = vcmp.ne.s32.totalorder %v11490_v27, 0 }
 0x3e7   : > { %v3416_v61 = vmax.f32 %v3238_v2, 0.0  ;;  %v8908_v41 = vadd.f32 %v10871_v37, %v2937_v47  ;;  %v2939_v48 = vpop.f32.mrb[33].mxu0  ;;  %9635 = vmatprep.mubr.msk.f32.mxu0 %vm11399_vm14, %v3414_v12  ;;  %v4189_v12 = vadd.s32 24, %v11467_v0  ;;  %v11514_v34 = vadd.s32 208, %v10790_v26  ;;  %vm11536_vm14 = vmand %vm4093_vm11, %vm4045_vm10 }
 0x3e8   : > { %vm4094_vm15 = vcmp.lt.s32.totalorder %v11490_v27, 0  ;;  %v11530_v39 = vsub.s32 %v11344_v54, %v3736_v45  ;;  %v3757_v3 = vshrl.u32 %v11472_v20, 4  ;;  %vm11551_vm0 = vcmp.lt.s32.totalorder %v4235_v4, 16 }
 0x3e9   : > { %v4425_v49 = vsel %vm11481_vm6, %v3416_v61, 0.0  ;;  %v11506_v7 = vadd.f32 %v8908_v41, %v10769_v33  ;;  %v4578_v40 = vld [vmem:[#allocation4 + $0x87] sm:$0xff]  ;;  %v11545_v2 = vmul.u32.u64.low 2863311531, %v11501_v19  ;;  %v11546_v38 = vmul.u32.u64.high 2863311531, %v11501_v19, %v11545_v2  ;;  %vm11574_vm1 = vmand %vm4094_vm15, %vm4046_vm12 }
 0x3ea   : > { %4529 = vst [vmem:[#allocation4 + $0x98] sm:$0xff] %v4425_v49  ;;  %v2942_v52 = vpop.f32.mrb[34].mxu0  ;;  %6149 = vmatmul.mubr.f32.gmra.mrb[128].mxu0 %v4578_v40  ;;  %v3768_v48 = vshrl.u32 %v11479_v58, 4  ;;  %v4236_v20 = vsel %vm11524_vm13, %v4188_v35, %v11455_v62  ;;  %v4190_v45 = vadd.s32 24, %v11490_v27  ;;  %v4237_v58 = vsel %vm11536_vm14, %v4189_v12, %v11467_v0 }
 0x3eb   : > { %v3417_v33 = vmax.f32 %v11506_v7, 0.0  ;;  %v8909_v17 = vadd.f32 %v10871_v37, %v2942_v52  ;;  %v2944_v18 = vpop.f32.mrb[35].mxu0  ;;  %9636 = vmatprep.mubr.msk.f32.mxu0 %vm11427_vm2, %v3415_v30  ;;  %v11541_v30 = vsub.s32 %v11356_v50, %v3747_v56  ;;  %vm4047_vm2 = vcmp.ne.s32.totalorder %v11530_v39, 0 }
 0x3ec   : > { %v11561_v56 = vmul.u32.u64.low 2863311531, %v11514_v34  ;;  %v11562_v49 = vmul.u32.u64.high 2863311531, %v11514_v34, %v11561_v56  ;;  %vm4095_vm3 = vcmp.lt.s32.totalorder %v11530_v39, 0  ;;  %v3758_v40 = vmul.u32 24, %v3757_v3 }
 0x3ed   : > { %v4426_v54 = vsel %vm11485_vm7, %v3417_v33, 0.0  ;;  %v3248_v57 = vadd.f32 %v8909_v17, %v10766_v10  ;;  %v4579_v41 = vld [vmem:[#allocation4 + $0x8f] sm:$0xff]  ;;  %vm4048_vm4 = vcmp.ne.s32.totalorder %v11541_v30, 0  ;;  %v11582_v0 = vadd.s32 216, %v10790_v26  ;;  %vm11614_vm9 = vmand %vm4095_vm3, %vm4047_vm2 }
 0x3ee   : > { %4530 = vst [vmem:[#allocation4 + $0xa0] sm:$0xff] %v4426_v54  ;;  %v2947_v50 = vpop.f32.mrb[36].mxu0  ;;  %6154 = vmatmul.mubr.f32.gmra.mrb[130].mxu0 %v4579_v41  ;;  %vm4096_vm5 = vcmp.lt.s32.totalorder %v11541_v30, 0  ;;  %v3769_v35 = vmul.u32 24, %v3768_v48  ;;  %v4238_v18 = vsel %vm11574_vm1, %v4190_v45, %v11490_v27  ;;  %v11598_v46 = vadd.s32 24, %v11530_v39  ;;  %v5890_v54 = vld [vmem:[#allocation10 + $0x100] sm:$0xff] }
 0x3ef   : > { %v3418_v10 = vmax.f32 %v3248_v57, 0.0  ;;  %v8910_v4 = vadd.f32 %v10871_v37, %v2947_v50  ;;  %v2949_v7 = vpop.f32.mrb[37].mxu0  ;;  %9637 = vmatprep.mubr.msk.f32.mxu0 %vm11481_vm6, %v3416_v61  ;;  %vm11590_vm6 = vcmp.lt.s32.totalorder %v4236_v20, 16  ;;  %vm11604_vm8 = vcmp.lt.s32.totalorder %v4237_v58, 16  ;;  %v5891_v57 = vld [vmem:[#allocation10 + $0x108] sm:$0xff]  ;;  %vm11623_vm10 = vmand %vm4096_vm5, %vm4048_vm4 }
 0x3f0   : > { %v4192_v47 = vadd.s32 24, %v11541_v30  ;;  %v11628_v16 = vsub.s32 %v11433_v15, %v3758_v40  ;;  %v11632_v48 = vmul.u32.u64.low 2863311531, %v11582_v0  ;;  %v11633_v50 = vmul.u32.u64.high 2863311531, %v11582_v0, %v11632_v48 }
 0x3f1   : > { %v4427_v63 = vsel %vm11551_vm0, %v3418_v10, 0.0  ;;  %v11587_v61 = vadd.f32 %v8910_v4, %v10774_v8  ;;  %v4580_v52 = vld [vmem:[#allocation4 + $0x97] sm:$0xff]  ;;  %9638 = vmatprep.mubr.msk.f32.mxu1 %vm11551_vm0, %v3418_v10  ;;  %v11645_v15 = vsub.s32 %v11442_v60, %v3769_v35  ;;  %v4239_v4 = vsel %vm11614_vm9, %v11598_v46, %v11530_v39 }
 0x3f2   : > { %4531 = vst [vmem:[#allocation4 + $0xa8] sm:$0xff] %v4427_v63  ;;  %v2952_v17 = vpop.f32.mrb[38].mxu0  ;;  %6158 = vmatmul.mubr.f32.gmra.mrb[132].mxu0 %v4580_v52  ;;  %v8685_v7 = vpack.c.bf16 %v5891_v57, %v5890_v54  ;;  %v11653_v58 = vadd.s32 224, %v10790_v26  ;;  %v4240_v63 = vsel %vm11623_vm10, %v4192_v47, %v11541_v30  ;;  %v5893_v52 = vld [vmem:[#allocation10 + $0x118] sm:$0xff]  ;;  %v11661_v35 = vadd.s32 232, %v10790_v26 }
 0x3f3   : > { %v3419_v8 = vmax.f32 %v11587_v61, 0.0  ;;  %v8911_v11 = vadd.f32 %v10871_v37, %v2952_v17  ;;  %v2954_v2 = vpop.f32.mrb[39].mxu0  ;;  %9639 = vmatprep.mubr.msk.f32.mxu0 %vm11485_vm7, %v3417_v33  ;;  %v3779_v33 = vshrl.u32 %v11546_v38, 4  ;;  %vm11640_vm7 = vcmp.lt.s32.totalorder %v4238_v18, 16  ;;  %v5892_v61 = vld [vmem:[#allocation10 + $0x110] sm:$0xff] }
 0x3f4   : > { %vm4049_vm11 = vcmp.ne.s32.totalorder %v11628_v16, 0  ;;  %vm4097_vm12 = vcmp.lt.s32.totalorder %v11628_v16, 0  ;;  %v11666_v39 = vadd.s32 24, %v11628_v16  ;;  %vm4050_vm13 = vcmp.ne.s32.totalorder %v11645_v15, 0 }
 0x3f5   : > { %v4428_v20 = vsel %vm11590_vm6, %v3419_v8, 0.0  ;;  %v11638_v45 = vadd.f32 %v8911_v11, %v10772_v14  ;;  %v4581_v56 = vld [vmem:[#allocation4 + $0x9f] sm:$0xff]  ;;  %v3790_v14 = vshrl.u32 %v11562_v49, 4  ;;  %v3780_v49 = vmul.u32 24, %v3779_v33  ;;  %vm11691_vm14 = vmand %vm4097_vm12, %vm4049_vm11 }
 0x3f6   : > { %4532 = vst [vmem:[#allocation4 + $0xb0] sm:$0xff] %v4428_v20  ;;  %v2957_v38 = vpop.f32.mrb[40].mxu0  ;;  %6163 = vmatmul.mubr.f32.gmra.mrb[134].mxu0 %v4581_v56  ;;  %vm4098_vm15 = vcmp.lt.s32.totalorder %v11645_v15, 0  ;;  %v8688_v11 = vpack.c.bf16 %v5893_v52, %v5892_v61  ;;  %v11676_v27 = vmul.u32.u64.low 2863311531, %v11653_v58  ;;  %v11677_v54 = vmul.u32.u64.high 2863311531, %v11653_v58, %v11676_v27  ;;  %v5895_v56 = vld [vmem:[#allocation10 + $0x128] sm:$0xff] }
 0x3f7   : > { %v3420_v62 = vmax.f32 %v11638_v45, 0.0  ;;  %v8912_v40 = vadd.f32 %v10871_v37, %v2957_v38  ;;  %v2959_v60 = vpop.f32.mrb[41].mxu0  ;;  %v3791_v2 = vmul.u32 24, %v3790_v14  ;;  %v13548_v20 = vmov 0.0|0.0   ;;  %v5894_v45 = vld [vmem:[#allocation10 + $0x120] sm:$0xff]  ;;  %vm11721_vm2 = vmand %vm4098_vm15, %vm4050_vm13 }
 0x3f8   : > { %v11684_v41 = vmul.u32.u64.low 2863311531, %v11661_v35  ;;  %v11685_v33 = vmul.u32.u64.high 2863311531, %v11661_v35, %v11684_v41  ;;  %v3801_v38 = vshrl.u32 %v11633_v50, 4  ;;  %v11698_v12 = vadd.s32 240, %v10790_v26  ;;  %v5902_v52 = vld [vmem:[#allocation10 + $0x160] sm:$0xff] }
 0x3f9   : > { %v4429_v17 = vsel %vm11604_vm8, %v3420_v62, 0.0  ;;  %v11671_v18 = vadd.f32 %v8912_v40, %v10780_v55  ;;  %v4582_v30 = vld [vmem:[#allocation4 + $0xa7] sm:$0xff]  ;;  %v4194_v40 = vadd.s32 24, %v11645_v15  ;;  %v11707_v60 = vsub.s32 %v11501_v19, %v3780_v49 }
 0x3fa   : > { %4533 = vst [vmem:[#allocation4 + $0xb8] sm:$0xff] %v4429_v17  ;;  %v2962_v46 = vpop.f32.mrb[42].mxu0  ;;  %6168 = vmatmul.mubr.f32.vlgmr.msra.gmra.mrb[48].mxu1 %v4582_v30  ;;  %vm11709_vm0 = vcmp.lt.s32.totalorder %v4239_v4, 16  ;;  %vm11713_vm1 = vcmp.lt.s32.totalorder %v4240_v63, 16  ;;  %v11726_v19 = vsub.s32 %v11514_v34, %v3791_v2  ;;  %v4241_v63 = vsel %vm11691_vm14, %v11666_v39, %v11628_v16  ;;  %v5896_v30 = vld [vmem:[#allocation10 + $0x130] sm:$0xff]  ;;  %v5897_v34 = vld [vmem:[#allocation10 + $0x138] sm:$0xff] }
 0x3fb   : > { %v3421_v57 = vmax.f32 %v11671_v18, 0.0  ;;  %v8913_v47 = vadd.f32 %v10871_v37, %v2962_v46  ;;  %v2964_v55 = vpop.f32.mrb[43].mxu0  ;;  %8686 = vmatpush1.bf16.msra.mxu1 %v8685_v7  ;;  %9640 = vmatprep.mubr.msk.f32.mxu1 %vm11590_vm6, %v3419_v8  ;;  %v8691_v18 = vpack.c.bf16 %v5895_v56, %v5894_v45  ;;  %v3802_v46 = vmul.u32 24, %v3801_v38  ;;  %v5898_v56 = vld [vmem:[#allocation10 + $0x140] sm:$0xff]  ;;  %v5899_v38 = vld [vmem:[#allocation10 + $0x148] sm:$0xff] }
 0x3fc   : > { %8687 = vmatprep.subr.bf16.mxu1 %v13548_v20  ;;  %v11738_v2 = vmul.u32.u64.low 2863311531, %v11698_v12  ;;  %v11739_v27 = vmul.u32.u64.high 2863311531, %v11698_v12, %v11738_v2  ;;  %v4242_v39 = vsel %vm11721_vm2, %v4194_v40, %v11645_v15  ;;  %vm4051_vm3 = vcmp.ne.s32.totalorder %v11707_v60, 0  ;;  %v11761_v55 = vld [vmem:[%s13430_s2] ss:$0 sm:$0xff] }
 0x3fd   : > { %v4430_v8 = vsel %vm11640_vm7, %v3421_v57, 0.0  ;;  %v11703_v7 = vadd.f32 %v8913_v47, %v10778_v13  ;;  %v4583_v14 = vld [vmem:[#allocation4 + $0xaf] sm:$0xff]  ;;  %vm4099_vm4 = vcmp.lt.s32.totalorder %v11707_v60, 0  ;;  %vm4052_vm5 = vcmp.ne.s32.totalorder %v11726_v19, 0 }
 0x3fe   : > { %4534 = vst [vmem:[#allocation4 + $0xc0] sm:$0xff] %v4430_v8  ;;  %v2967_v50 = vpop.f32.mrb[44].mxu0  ;;  %6172 = vmatmul.mubr.f32.gmra.mrb[50].mxu1 %v4583_v14  ;;  %vm4100_vm6 = vcmp.lt.s32.totalorder %v11726_v19, 0  ;;  %v3812_v47 = vshrl.u32 %v11677_v54, 4  ;;  %v8694_v48 = vpack.c.bf16 %v5897_v34, %v5896_v30  ;;  %v3823_v45 = vshrl.u32 %v11685_v33, 4 }
 0x3ff   : > { %v3422_v4 = vmax.f32 %v11703_v7, 0.0  ;;  %v8914_v49 = vadd.f32 %v10871_v37, %v2967_v50  ;;  %v2969_v17 = vpop.f32.mrb[45].mxu0  ;;  %9641 = vmatprep.mubr.msk.f32.mxu1 %vm11604_vm8, %v3420_v62  ;;  %8689 = vmatpush1.bf16.msra.mxu1 %v8688_v11  ;;  %v11742_v37 = vadd.s32 248, %v10790_v26  ;;  %v11769_v54 = vsub.s32 %v11582_v0, %v3802_v46  ;;  %vm11784_vm8 = vmand %vm4099_vm4, %vm4051_vm3 }
 0x400   : > { %8690 = vmatprep.subr.bf16.mxu1 %v13548_v20  ;;  %v4195_v33 = vadd.s32 24, %v11707_v60  ;;  %v4196_v40 = vadd.s32 24, %v11726_v19  ;;  %vm11790_vm9 = vcmp.lt.s32.totalorder %v4241_v63, 16  ;;  %vm11794_vm10 = vcmp.lt.s32.totalorder %v4242_v39, 16 }
 0x401   : > { %v4431_v16 = vsel %vm11709_vm0, %v3422_v4, 0.0  ;;  %v11747_v3 = vadd.f32 %v8914_v49, %v10786_v23  ;;  %v4584_v62 = vld [vmem:[#allocation4 + $0xb7] sm:$0xff]  ;;  %v11772_v8 = vmul.u32.u64.low 2863311531, %v11742_v37  ;;  %v11773_v7 = vmul.u32.u64.high 2863311531, %v11742_v37, %v11772_v8 }
 0x402   : > { %4535 = vst [vmem:[#allocation4 + $0xc8] sm:$0xff] %v4431_v16  ;;  %v2972_v11 = vpop.f32.mrb[46].mxu0  ;;  %6177 = vmatmul.mubr.f32.gmra.mrb[52].mxu1 %v4584_v62  ;;  %v3813_v17 = vmul.u32 24, %v3812_v47  ;;  %v11807_v63 = vadd.s32 256, %v10790_v26  ;;  %v8697_v46 = vpack.c.bf16 %v5899_v38, %v5898_v56  ;;  %v3824_v2 = vmul.u32 24, %v3823_v45  ;;  %v5900_v16 = vld [vmem:[#allocation10 + $0x150] sm:$0xff] }
 0x403   : > { %v3423_v23 = vmax.f32 %v11747_v3, 0.0  ;;  %v8915_v15 = vadd.f32 %v11761_v55, %v2972_v11  ;;  %v2974_v41 = vpop.f32.mrb[47].mxu0  ;;  %9642 = vmatprep.mubr.msk.f32.mxu1 %vm11640_vm7, %v3421_v57  ;;  %8692 = vmatpush1.bf16.msra.mxu1 %v8691_v18  ;;  %vm11802_vm7 = vmand %vm4100_vm6, %vm4052_vm5  ;;  %vm4053_vm11 = vcmp.ne.s32.totalorder %v11769_v54, 0  ;;  %vm4101_vm12 = vcmp.lt.s32.totalorder %v11769_v54, 0  ;;  %v5901_v3 = vld [vmem:[#allocation10 + $0x158] sm:$0xff] }
 0x404   : > { %8693 = vmatprep.subr.bf16.mxu1 %v13548_v20  ;;  %v3834_v62 = vshrl.u32 %v11739_v27, 4  ;;  %v11818_v39 = vadd.s32 264, %v10790_v26  ;;  %v4243_v11 = vsel %vm11784_vm8, %v4195_v33, %v11707_v60  ;;  %v11832_v41 = vadd.s32 24, %v11769_v54  ;;  %vm11849_vm13 = vmand %vm4101_vm12, %vm4053_vm11 }
 0x405   : > { %v4432_v14 = vsel %vm11713_vm1, %v3423_v23, 0.0  ;;  %v11778_v10 = vadd.f32 %v8915_v15, %v10784_v31  ;;  %v4585_v57 = vld [vmem:[#allocation4 + $0xbf] sm:$0xff]  ;;  %v4244_v15 = vsel %vm11802_vm7, %v4196_v40, %v11726_v19  ;;  %v8700_v8 = vpack.c.bf16 %v5901_v3, %v5900_v16  ;;  %v5904_v3 = vld [vmem:[#allocation10 + $0x170] sm:$0xff]  ;;  %v5911_v19 = vld [vmem:[#allocation10 + $0x1a8] sm:$0xff] }
 0x406   : > { %4536 = vst [vmem:[#allocation4 + $0xd0] sm:$0xff] %v4432_v14  ;;  %v2977_v31 = vpop.f32.mrb[48].mxu0  ;;  %6182 = vmatmul.mubr.f32.gmra.mrb[54].mxu1 %v4585_v57  ;;  %v3835_v14 = vmul.u32 24, %v3834_v62  ;;  %v11859_v57 = vmul.u32.u64.low 2863311531, %v11818_v39  ;;  %v11860_v0 = vmul.u32.u64.high 2863311531, %v11818_v39, %v11859_v57  ;;  %vm11867_vm15 = vcmp.lt.s32.totalorder %v4243_v11, 16 }
 0x407   : > { %v3424_v18 = vmax.f32 %v11778_v10, 0.0  ;;  %v8916_v30 = vadd.f32 %v11761_v55, %v2977_v31  ;;  %v2979_v34 = vpop.f32.mrb[49].mxu0  ;;  %9643 = vmatprep.mubr.msk.f32.mxu1 %vm11709_vm0, %v3422_v4  ;;  %8695 = vmatpush1.bf16.msra.mxu1 %v8694_v48  ;;  %v11835_v48 = vsub.s32 %v11653_v58, %v3813_v17  ;;  %v11854_v58 = vsub.s32 %v11661_v35, %v3824_v2  ;;  %v5905_v62 = vld [vmem:[#allocation10 + $0x178] sm:$0xff]  ;;  %v5908_v31 = vld [vmem:[#allocation10 + $0x190] sm:$0xff] }
 0x408   : > { %8696 = vmatprep.subr.bf16.mxu1 %v13548_v20  ;;  %v3845_v10 = vshrl.u32 %v11773_v7, 4  ;;  %vm11871_vm14 = vcmp.lt.s32.totalorder %v4244_v15, 16  ;;  %v4245_v17 = vsel %vm11849_vm13, %v11832_v41, %v11769_v54  ;;  %v11890_v54 = vsub.s32 %v11698_v12, %v3835_v14  ;;  %v5907_v14 = vld [vmem:[#allocation10 + $0x188] sm:$0xff] }
 0x409   : > { %v4433_v61 = vsel %vm11790_vm9, %v3424_v18, 0.0  ;;  %v11823_v4 = vadd.f32 %v8916_v30, %v10794_v29  ;;  %v4586_v47 = vld [vmem:[#allocation4 + $0xc7] sm:$0xff]  ;;  %v11838_v29 = vmul.u32.u64.low 2863311531, %v11807_v63  ;;  %v11839_v45 = vmul.u32.u64.high 2863311531, %v11807_v63, %v11838_v29 }
 0x40a   : > { %4537 = vst [vmem:[#allocation4 + $0xd8] sm:$0xff] %v4433_v61  ;;  %v2982_v27 = vpop.f32.mrb[50].mxu0  ;;  %6186 = vmatmul.mubr.f32.gmra.mrb[56].mxu1 %v4586_v47  ;;  %vm4054_vm0 = vcmp.ne.s32.totalorder %v11835_v48, 0  ;;  %vm4055_vm2 = vcmp.ne.s32.totalorder %v11854_v58, 0  ;;  %v3846_v16 = vmul.u32 24, %v3845_v10  ;;  %vm4103_vm3 = vcmp.lt.s32.totalorder %v11854_v58, 0 }
 0x40b   : > { %v3425_v60 = vmax.f32 %v11823_v4, 0.0  ;;  %v8917_v56 = vadd.f32 %v11761_v55, %v2982_v27  ;;  %v2984_v38 = vpop.f32.mrb[51].mxu0  ;;  %9644 = vmatprep.mubr.msk.f32.mxu1 %vm11713_vm1, %v3423_v23  ;;  %8698 = vmatpush1.bf16.msra.mxu1 %v8697_v46  ;;  %v5903_v23 = vld [vmem:[#allocation10 + $0x168] sm:$0xff]  ;;  %vm4102_vm1 = vcmp.lt.s32.totalorder %v11835_v48, 0  ;;  %v11900_v4 = vadd.s32 280, %v10790_v26  ;;  %vm11925_vm5 = vmand %vm4103_vm3, %vm4055_vm2 }
 0x40c   : > { %8699 = vmatprep.subr.bf16.mxu1 %v13548_v20  ;;  %v8703_v2 = vpack.c.bf16 %v5903_v23, %v5902_v52  ;;  %v4198_v11 = vadd.s32 24, %v11835_v48  ;;  %v3856_v47 = vshrl.u32 %v11839_v45, 4  ;;  %vm11916_vm4 = vmand %vm4102_vm1, %vm4054_vm0  ;;  %v4199_v45 = vadd.s32 24, %v11854_v58 }
 0x40d   : > { %v4434_v33 = vsel %vm11794_vm10, %v3425_v60, 0.0  ;;  %v11865_v40 = vadd.f32 %v8917_v56, %v10792_v1  ;;  %v4587_v35 = vld [vmem:[#allocation4 + $0xcf] sm:$0xff]  ;;  %v11880_v1 = vadd.s32 272, %v10790_v26  ;;  %v8706_v38 = vpack.c.bf16 %v5905_v62, %v5904_v3 }
 0x40e   : > { %4538 = vst [vmem:[#allocation4 + $0xe0] sm:$0xff] %v4434_v33  ;;  %v2987_v49 = vpop.f32.mrb[52].mxu0  ;;  %6191 = vmatmul.mubr.f32.gmra.mrb[58].mxu1 %v4587_v35  ;;  %vm4056_vm6 = vcmp.ne.s32.totalorder %v11890_v54, 0  ;;  %vm4104_vm8 = vcmp.lt.s32.totalorder %v11890_v54, 0  ;;  %v11932_v13 = vsub.s32 %v11742_v37, %v3846_v16  ;;  %v4200_v35 = vadd.s32 24, %v11890_v54 }
 0x40f   : > { %v3426_v30 = vmax.f32 %v11865_v40, 0.0  ;;  %v8918_v34 = vadd.f32 %v11761_v55, %v2987_v49  ;;  %v2989_v46 = vpop.f32.mrb[53].mxu0  ;;  %9645 = vmatprep.mubr.msk.f32.mxu1 %vm11790_vm9, %v3424_v18  ;;  %8701 = vmatpush1.bf16.msra.mxu1 %v8700_v8  ;;  %v11905_v15 = vmul.u32.u64.low 2863311531, %v11880_v1  ;;  %v11906_v27 = vmul.u32.u64.high 2863311531, %v11880_v1, %v11905_v15  ;;  %v5906_v8 = vld [vmem:[#allocation10 + $0x180] sm:$0xff] }
 0x410   : > { %8702 = vmatprep.subr.bf16.mxu1 %v13548_v20  ;;  %v11942_v57 = vmul.u32.u64.low 2863311531, %v11900_v4  ;;  %v11943_v33 = vmul.u32.u64.high 2863311531, %v11900_v4, %v11942_v57  ;;  %vm11945_vm9 = vcmp.lt.s32.totalorder %v4245_v17, 16  ;;  %v4246_v40 = vsel %vm11916_vm4, %v4198_v11, %v11835_v48 }
 0x411   : > { %v4435_v50 = vsel %vm11867_vm15, %v3426_v30, 0.0  ;;  %v11896_v18 = vadd.f32 %v8918_v34, %v10812_v43  ;;  %v4588_v61 = vld [vmem:[#allocation4 + $0xd7] sm:$0xff]  ;;  %v4247_v17 = vsel %vm11925_vm5, %v4199_v45, %v11854_v58  ;;  %vm4057_vm7 = vcmp.ne.s32.totalorder %v11932_v13, 0 }
 0x412   : > { %4539 = vst [vmem:[#allocation4 + $0xe8] sm:$0xff] %v4435_v50  ;;  %v2992_v12 = vpop.f32.mrb[54].mxu0  ;;  %6196 = vmatmul.mubr.f32.gmra.mrb[60].mxu1 %v4588_v61  ;;  %vm4105_vm11 = vcmp.lt.s32.totalorder %v11932_v13, 0  ;;  %v11972_v58 = vadd.s32 288, %v10790_v26  ;;  %vm11979_vm12 = vcmp.lt.s32.totalorder %v4246_v40, 16  ;;  %v4201_v11 = vadd.s32 24, %v11932_v13 }
 0x413   : > { %v3427_v43 = vmax.f32 %v11896_v18, 0.0  ;;  %v8919_v41 = vadd.f32 %v11761_v55, %v2992_v12  ;;  %v2994_v29 = vpop.f32.mrb[55].mxu0  ;;  %9646 = vmatprep.mubr.msk.f32.mxu1 %vm11794_vm10, %v3425_v60  ;;  %8704 = vmatpush1.bf16.msra.mxu1 %v8703_v2  ;;  %v3867_v60 = vshrl.u32 %v11860_v0, 4  ;;  %vm11964_vm10 = vmand %vm4104_vm8, %vm4056_vm6  ;;  %v8709_v2 = vpack.c.bf16 %v5907_v14, %v5906_v8 }
 0x414   : > { %8705 = vmatprep.subr.bf16.mxu1 %v13548_v20  ;;  %v4248_v12 = vsel %vm11964_vm10, %v4200_v35, %v11890_v54  ;;  %vm11993_vm13 = vcmp.lt.s32.totalorder %v4247_v17, 16  ;;  %v12015_v7 = vadd.s32 296, %v10790_v26  ;;  %v5913_v17 = vld [vmem:[#allocation10 + $0x1b8] sm:$0xff] }
 0x415   : > { %v4436_v10 = vsel %vm11871_vm14, %v3427_v43, 0.0  ;;  %v11939_v52 = vadd.f32 %v8919_v41, %v10807_v24  ;;  %v4589_v23 = vld [vmem:[#allocation4 + $0xdf] sm:$0xff]  ;;  %v3857_v24 = vmul.u32 24, %v3856_v47  ;;  %v3868_v16 = vmul.u32 24, %v3867_v60 }
 0x416   : > { %4540 = vst [vmem:[#allocation4 + $0xf0] sm:$0xff] %v4436_v10  ;;  %v2997_v0 = vpop.f32.mrb[56].mxu0  ;;  %6200 = vmatmul.mubr.f32.gmra.mrb[62].mxu1 %v4589_v23  ;;  %v3889_v10 = vshrl.u32 %v11943_v33, 4  ;;  %v5917_v29 = vld [vmem:[#allocation10 + $0x1d8] sm:$0xff] }
 0x417   : > { %v3428_v49 = vmax.f32 %v11939_v52, 0.0  ;;  %v8920_v34 = vadd.f32 %v11761_v55, %v2997_v0  ;;  %v2999_v46 = vpop.f32.mrb[57].mxu0  ;;  %9647 = vmatprep.mubr.msk.f32.mxu1 %vm11867_vm15, %v3426_v30  ;;  %8707 = vmatpush1.bf16.msra.mxu1 %v8706_v38  ;;  %v5909_v30 = vld [vmem:[#allocation10 + $0x198] sm:$0xff]  ;;  %v11988_v47 = vsub.s32 %v11807_v63, %v3857_v24  ;;  %vm12003_vm15 = vmand %vm4105_vm11, %vm4057_vm7  ;;  %v5915_v63 = vld [vmem:[#allocation10 + $0x1c8] sm:$0xff] }
 0x418   : > { %8708 = vmatprep.subr.bf16.mxu1 %v13548_v20  ;;  %v8712_v54 = vpack.c.bf16 %v5909_v30, %v5908_v31  ;;  %v12011_v45 = vmul.u32.u64.low 2863311531, %v11972_v58  ;;  %v12012_v38 = vmul.u32.u64.high 2863311531, %v11972_v58, %v12011_v45  ;;  %v4249_v23 = vsel %vm12003_vm15, %v4201_v11, %v11932_v13  ;;  %v5912_v46 = vld [vmem:[#allocation10 + $0x1b0] sm:$0xff] }
 0x419   : > { %v4437_v3 = vsel %vm11945_vm9, %v3428_v49, 0.0  ;;  %v11977_v62 = vadd.f32 %v8920_v34, %v10826_v28  ;;  %v4590_v18 = vld [vmem:[#allocation4 + $0xe7] sm:$0xff]  ;;  %v3878_v28 = vshrl.u32 %v11906_v27, 4  ;;  %v12008_v27 = vsub.s32 %v11818_v39, %v3868_v16 }
 0x41a   : > { %4541 = vst [vmem:[#allocation4 + $0xf8] sm:$0xff] %v4437_v3  ;;  %v3002_v61 = vpop.f32.mrb[58].mxu0  ;;  %6205 = vmatmul.mubr.f32.gmra.mrb[64].mxu1 %v4590_v18  ;;  %vm4058_vm0 = vcmp.ne.s32.totalorder %v11988_v47, 0  ;;  %vm4106_vm1 = vcmp.lt.s32.totalorder %v11988_v47, 0  ;;  %v4202_v13 = vadd.s32 24, %v11988_v47  ;;  %v8718_v11 = vpack.c.bf16 %v5913_v17, %v5912_v46 }
 0x41b   : > { %v3429_v15 = vmax.f32 %v11977_v62, 0.0  ;;  %v8921_v41 = vadd.f32 %v11761_v55, %v3002_v61  ;;  %v3004_v56 = vpop.f32.mrb[59].mxu0  ;;  %9648 = vmatprep.mubr.msk.f32.mxu1 %vm11871_vm14, %v3427_v43  ;;  %8710 = vmatpush1.bf16.msra.mxu1 %v8709_v2  ;;  %v5910_v43 = vld [vmem:[#allocation10 + $0x1a0] sm:$0xff]  ;;  %vm12023_vm14 = vcmp.lt.s32.totalorder %v4248_v12, 16  ;;  %v3879_v57 = vmul.u32 24, %v3878_v28  ;;  %vm12057_vm4 = vmand %vm4106_vm1, %vm4058_vm0 }
 0x41c   : > { %8711 = vmatprep.subr.bf16.mxu1 %v13548_v20  ;;  %v8715_v33 = vpack.c.bf16 %v5911_v19, %v5910_v43  ;;  %vm4059_vm2 = vcmp.ne.s32.totalorder %v12008_v27, 0  ;;  %v12043_v24 = vmul.u32.u64.low 2863311531, %v12015_v7  ;;  %v12044_v34 = vmul.u32.u64.high 2863311531, %v12015_v7, %v12043_v24  ;;  %v5914_v56 = vld [vmem:[#allocation10 + $0x1c0] sm:$0xff] }
 0x41d   : > { %v4438_v60 = vsel %vm11979_vm12, %v3429_v15, 0.0  ;;  %v12021_v8 = vadd.f32 %v8921_v41, %v10820_v53  ;;  %v4591_v14 = vld [vmem:[#allocation4 + $0xef] sm:$0xff]  ;;  %v12033_v53 = vadd.s32 304, %v10790_v26  ;;  %vm4107_vm3 = vcmp.lt.s32.totalorder %v12008_v27, 0 }
 0x41e   : > { %4542 = vst [vmem:[#allocation4 + $0x100] sm:$0xff] %v4438_v60  ;;  %v3007_v52 = vpop.f32.mrb[60].mxu0  ;;  %6210 = vmatmul.mubr.f32.gmra.mrb[66].mxu1 %v4591_v14  ;;  %v3890_v2 = vmul.u32 24, %v3889_v10  ;;  %v12062_v30 = vsub.s32 %v11880_v1, %v3879_v57  ;;  %v12069_v62 = vadd.s32 312, %v10790_v26  ;;  %vm12075_vm5 = vcmp.lt.s32.totalorder %v4249_v23, 16  ;;  %vm12094_vm6 = vmand %vm4107_vm3, %vm4059_vm2 }
 0x41f   : > { %v3430_v0 = vmax.f32 %v12021_v8, 0.0  ;;  %v8922_v40 = vadd.f32 %v11761_v55, %v3007_v52  ;;  %v3009_v35 = vpop.f32.mrb[61].mxu0  ;;  %9649 = vmatprep.mubr.msk.f32.mxu1 %vm11945_vm9, %v3428_v49  ;;  %8713 = vmatpush1.bf16.msra.mxu1 %v8712_v54  ;;  %v4203_v28 = vadd.s32 24, %v12008_v27  ;;  %v3900_v41 = vshrl.u32 %v12012_v38, 4 }
 0x420   : > { %8714 = vmatprep.subr.bf16.mxu1 %v13548_v20  ;;  %v4250_v45 = vsel %vm12057_vm4, %v4202_v13, %v11988_v47  ;;  %v12099_v43 = vsub.s32 %v11900_v4, %v3890_v2  ;;  %vm4060_vm8 = vcmp.ne.s32.totalorder %v12062_v30, 0  ;;  %v12107_v47 = vadd.s32 320, %v10790_v26  ;;  %v5916_v35 = vld [vmem:[#allocation10 + $0x1d0] sm:$0xff] }
 0x421   : > { %v4439_v37 = vsel %vm11993_vm13, %v3430_v0, 0.0  ;;  %v12050_v49 = vadd.f32 %v8922_v40, %v10852_v9  ;;  %v4592_v48 = vld [vmem:[#allocation4 + $0xf7] sm:$0xff]  ;;  %v12065_v9 = vmul.u32.u64.low 2863311531, %v12033_v53  ;;  %v12066_v3 = vmul.u32.u64.high 2863311531, %v12033_v53, %v12065_v9 }
 0x422   : > { %4543 = vst [vmem:[#allocation4 + $0x108] sm:$0xff] %v4439_v37  ;;  %v3012_v16 = vpop.f32.mrb[62].mxu0  ;;  %6214 = vmatmul.mubr.f32.gmra.mrb[68].mxu1 %v4592_v48  ;;  %vm4108_vm9 = vcmp.lt.s32.totalorder %v12062_v30, 0  ;;  %v8721_v4 = vpack.c.bf16 %v5915_v63, %v5914_v56  ;;  %vm12114_vm10 = vcmp.lt.s32.totalorder %v4250_v45, 16  ;;  %v4251_v23 = vsel %vm12094_vm6, %v4203_v28, %v12008_v27 }
 0x423   : > { %v3431_v18 = vmax.f32 %v12050_v49, 0.0  ;;  %v8923_v61 = vadd.f32 %v11761_v55, %v3012_v16  ;;  %v3014_v12 = vpop.f32.mrb[63].mxu0  ;;  %9650 = vmatprep.mubr.msk.f32.mxu1 %vm11979_vm12, %v3429_v15  ;;  %8716 = vmatpush1.bf16.msra.mxu1 %v8715_v33  ;;  %v3901_v57 = vmul.u32 24, %v3900_v41  ;;  %v3911_v40 = vshrl.u32 %v12044_v34, 4  ;;  %vm12134_vm11 = vmand %vm4108_vm9, %vm4060_vm8 }
 0x424   : > { %8717 = vmatprep.subr.bf16.mxu1 %v13548_v20  ;;  %v4204_v24 = vadd.s32 24, %v12062_v30  ;;  %vm4061_vm7 = vcmp.ne.s32.totalorder %v12099_v43, 0  ;;  %vm4109_vm12 = vcmp.lt.s32.totalorder %v12099_v43, 0  ;;  %v12144_v17 = vadd.s32 328, %v10790_v26  ;;  %v5918_v12 = vld [vmem:[#allocation10 + $0x1e0] sm:$0xff] }
 0x425   : > { %v4440_v54 = vsel %vm12023_vm14, %v3431_v18, 0.0  ;;  %v12085_v50 = vadd.f32 %v8923_v61, %v10843_v42  ;;  %v4593_v15 = vld [vmem:[#allocation4 + $0xff] sm:$0xff]  ;;  %v12103_v42 = vmul.u32.u64.low 2863311531, %v12069_v62  ;;  %v12104_v60 = vmul.u32.u64.high 2863311531, %v12069_v62, %v12103_v42  ;;  %vm12172_vm15 = vmand %vm4109_vm12, %vm4061_vm7 }
 0x426   : > { %4544 = vst [vmem:[#allocation4 + $0x110] sm:$0xff] %v4440_v54  ;;  %v3017_v19 = vpop.f32.mrb[64].mxu0  ;;  %6219 = vmatmul.mubr.f32.gmra.mrb[70].mxu1 %v4593_v15  ;;  %v3922_v2 = vshrl.u32 %v12066_v3, 4  ;;  %v8724_v16 = vpack.c.bf16 %v5917_v29, %v5916_v35  ;;  %v12156_v9 = vsub.s32 %v11972_v58, %v3901_v57  ;;  %v3912_v61 = vmul.u32 24, %v3911_v40 }
 0x427   : > { %v3432_v8 = vmax.f32 %v12085_v50, 0.0  ;;  %v8924_v14 = vadd.f32 %v11761_v55, %v3017_v19  ;;  %v3019_v10 = vpop.f32.mrb[65].mxu0  ;;  %9651 = vmatprep.mubr.msk.f32.mxu1 %vm11993_vm13, %v3430_v0  ;;  %8719 = vmatpush1.bf16.msra.mxu1 %v8718_v11  ;;  %vm12151_vm13 = vcmp.lt.s32.totalorder %v4251_v23, 16  ;;  %v5919_v11 = vld [vmem:[#allocation10 + $0x1e8] sm:$0xff]  ;;  %v4252_v28 = vsel %vm12134_vm11, %v4204_v24, %v12062_v30 }
 0x428   : > { %8720 = vmatprep.subr.bf16.mxu1 %v13548_v20  ;;  %v4205_v41 = vadd.s32 24, %v12099_v43  ;;  %v12178_v63 = vmul.u32.u64.low 2863311531, %v12144_v17  ;;  %v12179_v54 = vmul.u32.u64.high 2863311531, %v12144_v17, %v12178_v63  ;;  %v12182_v30 = vadd.s32 336, %v10790_v26  ;;  %v5921_v10 = vld [vmem:[#allocation10 + $0x1f8] sm:$0xff] }
 0x429   : > { %v4441_v0 = vsel %vm12075_vm5, %v3432_v8, 0.0  ;;  %v12126_v33 = vadd.f32 %v8924_v14, %v10896_v21  ;;  %v4594_v13 = vld [vmem:[#allocation4 + $0x107] sm:$0xff]  ;;  %v12140_v21 = vmul.u32.u64.low 2863311531, %v12107_v47  ;;  %v12141_v46 = vmul.u32.u64.high 2863311531, %v12107_v47, %v12140_v21  ;;  %v5920_v14 = vld [vmem:[#allocation10 + $0x1f0] sm:$0xff] }
 0x42a   : > { %4545 = vst [vmem:[#allocation4 + $0x118] sm:$0xff] %v4441_v0  ;;  %v3022_v27 = vpop.f32.mrb[66].mxu0  ;;  %6224 = vmatmul.mubr.f32.gmra.mrb[72].mxu1 %v4594_v13  ;;  %v3923_v38 = vmul.u32 24, %v3922_v2  ;;  %v8727_v19 = vpack.c.bf16 %v5919_v11, %v5918_v12  ;;  %vm4062_vm0 = vcmp.ne.s32.totalorder %v12156_v9, 0  ;;  %vm4110_vm1 = vcmp.lt.s32.totalorder %v12156_v9, 0 }
 0x42b   : > { %v3433_v37 = vmax.f32 %v12126_v33, 0.0  ;;  %v8925_v49 = vadd.f32 %v11761_v55, %v3022_v27  ;;  %v3024_v48 = vpop.f32.mrb[67].mxu0  ;;  %9652 = vmatprep.mubr.msk.f32.mxu1 %vm12023_vm14, %v3431_v18  ;;  %8722 = vmatpush1.bf16.msra.mxu1 %v8721_v4  ;;  %vm12188_vm14 = vcmp.lt.s32.totalorder %v4252_v28, 16  ;;  %v4253_v23 = vsel %vm12172_vm15, %v4205_v41, %v12099_v43  ;;  %vm12217_vm2 = vmand %vm4110_vm1, %vm4062_vm0 }
 0x42c   : > { %8723 = vmatprep.subr.bf16.mxu1 %v13548_v20  ;;  %v4206_v40 = vadd.s32 24, %v12156_v9  ;;  %v3944_v29 = vshrl.u32 %v12141_v46, 4  ;;  %v12207_v0 = vmul.u32.u64.low 2863311531, %v12182_v30  ;;  %v12208_v33 = vmul.u32.u64.high 2863311531, %v12182_v30, %v12207_v0 }
 0x42d   : > { %v4442_v39 = vsel %vm12114_vm10, %v3433_v37, 0.0  ;;  %v12162_v18 = vadd.f32 %v8925_v49, %v10890_v22  ;;  %v4595_v3 = vld [vmem:[#allocation4 + $0x10f] sm:$0xff]  ;;  %v3933_v22 = vshrl.u32 %v12104_v60, 4  ;;  %v12195_v60 = vsub.s32 %v12015_v7, %v3912_v61 }
 0x42e   : > { %4546 = vst [vmem:[#allocation4 + $0x120] sm:$0xff] %v4442_v39  ;;  %v3027_v58 = vpop.f32.mrb[68].mxu0  ;;  %6228 = vmatmul.mubr.f32.gmra.mrb[74].mxu1 %v4595_v3  ;;  %v12222_v34 = vsub.s32 %v12033_v53, %v3923_v38  ;;  %v8730_v21 = vpack.c.bf16 %v5921_v10, %v5920_v14  ;;  %v12227_v52 = vadd.s32 344, %v10790_v26  ;;  %v3945_v11 = vmul.u32 24, %v3944_v29 }
 0x42f   : > { %v3434_v50 = vmax.f32 %v12162_v18, 0.0  ;;  %v8926_v15 = vadd.f32 %v11761_v55, %v3027_v58  ;;  %v3029_v45 = vpop.f32.mrb[69].mxu0  ;;  %9653 = vmatprep.mubr.msk.f32.mxu1 %vm12075_vm5, %v3432_v8  ;;  %8725 = vmatpush1.bf16.msra.mxu1 %v8724_v16  ;;  %v13601_v8 = vld [vmem:[#allocation17_spill] sm:$0xff]  ;;  %v3934_v7 = vmul.u32 24, %v3933_v22  ;;  %vm4063_vm3 = vcmp.ne.s32.totalorder %v12195_v60, 0 }
 0x430   : > { %8726 = vmatprep.subr.bf16.mxu1 %v13548_v20  ;;  %vm4111_vm4 = vcmp.lt.s32.totalorder %v12195_v60, 0  ;;  %vm12233_vm5 = vcmp.lt.s32.totalorder %v4253_v23, 16  ;;  %v4254_v16 = vsel %vm12217_vm2, %v4206_v40, %v12156_v9  ;;  %v4207_v61 = vadd.s32 24, %v12195_v60 }
 0x431   : > { %v4443_v1 = vsel %vm12151_vm13, %v3434_v50, 0.0  ;;  %v3333_v4 = vadd.f32 %v8926_v15, %v13601_v8  ;;  %v4596_v57 = vld [vmem:[#allocation4 + $0x117] sm:$0xff]  ;;  %v12242_v12 = vsub.s32 %v12069_v62, %v3934_v7  ;;  %vm12249_vm6 = vmand %vm4111_vm4, %vm4063_vm3  ;;  %vm4064_vm8 = vcmp.ne.s32.totalorder %v12222_v34, 0 }
 0x432   : > { %4547 = vst [vmem:[#allocation4 + $0x128] sm:$0xff] %v4443_v1  ;;  %v3032_v35 = vpop.f32.mrb[70].mxu0  ;;  %6233 = vmatmul.mubr.f32.gmra.mrb[76].mxu1 %v4596_v57  ;;  %v3955_v62 = vshrl.u32 %v12179_v54, 4  ;;  %vm4112_vm9 = vcmp.lt.s32.totalorder %v12222_v34, 0  ;;  %v12259_v9 = vmul.u32.u64.low 2863311531, %v12227_v52  ;;  %v12260_v41 = vmul.u32.u64.high 2863311531, %v12227_v52, %v12259_v9 }
 0x433   : > { %v3435_v13 = vmax.f32 %v3333_v4, 0.0  ;;  %v8927_v24 = vadd.f32 %v11761_v55, %v3032_v35  ;;  %v3034_v27 = vpop.f32.mrb[71].mxu0  ;;  %9654 = vmatprep.mubr.msk.f32.mxu1 %vm12114_vm10, %v3433_v37  ;;  %8728 = vmatpush1.bf16.msra.mxu1 %v8727_v19  ;;  %v13604_v37 = vld [vmem:[#allocation16_spill] sm:$0xff]  ;;  %v12263_v58 = vadd.s32 352, %v10790_v26  ;;  %vm12269_vm10 = vcmp.lt.s32.totalorder %v4254_v16, 16  ;;  %vm12288_vm11 = vmand %vm4112_vm9, %vm4064_vm8  ;;  %v13621_v9 = vld [vmem:[#allocation18_spill] sm:$0xff] }
 0x434   : > { %8729 = vmatprep.subr.bf16.mxu1 %v13548_v20  ;;  %v4208_v15 = vadd.s32 24, %v12222_v34  ;;  %vm4065_vm7 = vcmp.ne.s32.totalorder %v12242_v12, 0  ;;  %v12279_v45 = vsub.s32 %v12107_v47, %v3945_v11  ;;  %v3956_v14 = vmul.u32 24, %v3955_v62 }
 0x435   : > { %v4444_v46 = vsel %vm12188_vm14, %v3435_v13, 0.0  ;;  %v3338_v49 = vadd.f32 %v8927_v24, %v13604_v37  ;;  %v4597_v53 = vld [vmem:[#allocation4 + $0x11f] sm:$0xff]  ;;  %v3966_v10 = vshrl.u32 %v12208_v33, 4  ;;  %vm4113_vm12 = vcmp.lt.s32.totalorder %v12242_v12, 0 }
 0x436   : > { %4548 = vst [vmem:[#allocation4 + $0x130] sm:$0xff] %v4444_v46  ;;  %v3037_v2 = vpop.f32.mrb[72].mxu0  ;;  %6238 = vmatmul.mubr.f32.gmra.mrb[78].mxu1 %v4597_v53  ;;  %v12295_v47 = vmul.u32.u64.low 2863311531, %v12263_v58  ;;  %v12296_v1 = vmul.u32.u64.high 2863311531, %v12263_v58, %v12295_v47  ;;  %v12299_v42 = vadd.s32 360, %v10790_v26  ;;  %v4256_v35 = vsel %vm12288_vm11, %v4208_v15, %v12222_v34  ;;  %vm12319_vm0 = vmand %vm4113_vm12, %vm4065_vm7 }
 0x437   : > { %v3436_v39 = vmax.f32 %v3338_v49, 0.0  ;;  %v8928_v18 = vadd.f32 %v11761_v55, %v3037_v2  ;;  %v3039_v3 = vpop.f32.mrb[73].mxu0  ;;  %9655 = vmatprep.mubr.msk.f32.mxu1 %vm12151_vm13, %v3434_v50  ;;  %8731 = vmatpush1.bf16.msra.mxu1 %v8730_v21  ;;  %v4255_v50 = vsel %vm12249_vm6, %v4207_v61, %v12195_v60  ;;  %v4209_v7 = vadd.s32 24, %v12242_v12 }
 0x438   : > { %8732 = vmatprep.subr.bf16.mxu1 %v13548_v20  ;;  %vm12304_vm13 = vcmp.lt.s32.totalorder %v4255_v50, 16  ;;  %vm4066_vm15 = vcmp.ne.s32.totalorder %v12279_v45, 0  ;;  %v3967_v24 = vmul.u32 24, %v3966_v10  ;;  %v3977_v27 = vshrl.u32 %v12260_v41, 4 }
 0x439   : > { %v4445_v31 = vsel %vm12233_vm5, %v3436_v39, 0.0  ;;  %v3343_v56 = vadd.f32 %v8928_v18, %v11032_v25  ;;  %v4598_v63 = vld [vmem:[#allocation4 + $0x127] sm:$0xff]  ;;  %v12330_v43 = vmul.u32.u64.low 2863311531, %v12299_v42  ;;  %v12331_v34 = vmul.u32.u64.high 2863311531, %v12299_v42, %v12330_v43 }
 0x43a   : > { %4549 = vst [vmem:[#allocation4 + $0x138] sm:$0xff] %v4445_v31  ;;  %v3042_v54 = vpop.f32.mrb[74].mxu0  ;;  %6242 = vmatmul.mubr.f32.gmra.mrb[80].mxu1 %v4598_v63  ;;  %v12334_v21 = vadd.s32 368, %v10790_v26  ;;  %vm12341_vm1 = vcmp.lt.s32.totalorder %v4256_v35, 16  ;;  %v4257_v53 = vsel %vm12319_vm0, %v4209_v7, %v12242_v12  ;;  %v4210_v2 = vadd.s32 24, %v12279_v45 }
 0x43b   : > { %v3437_v25 = vmax.f32 %v3343_v56, 0.0  ;;  %v8929_v38 = vadd.f32 %v11761_v55, %v3042_v54  ;;  %v3044_v19 = vpop.f32.mrb[75].mxu0  ;;  %9656 = vmatprep.mubr.msk.f32.mxu1 %vm12188_vm14, %v3435_v13  ;;  %vm4114_vm14 = vcmp.lt.s32.totalorder %v12279_v45, 0  ;;  %v12326_v13 = vsub.s32 %v12144_v17, %v3956_v14  ;;  %v13626_v14 = vld [vmem:[#allocation20_spill] sm:$0xff] }
 0x43c   : > { %vm12357_vm2 = vmand %vm4114_vm14, %vm4066_vm15  ;;  %v12363_v12 = vsub.s32 %v12182_v30, %v3967_v24  ;;  %v3988_v18 = vshrl.u32 %v12296_v1, 4  ;;  %v12367_v3 = vmul.u32.u64.low 2863311531, %v12334_v21  ;;  %v12368_v28 = vmul.u32.u64.high 2863311531, %v12334_v21, %v12367_v3  ;;  %v13631_v24 = vld [vmem:[#allocation19_spill] sm:$0xff] }
 0x43d   : > { %v4446_v8 = vsel %vm12269_vm10, %v3437_v25, 0.0  ;;  %v3348_v4 = vadd.f32 %v8929_v38, %v11024_v32  ;;  %v4599_v57 = vld [vmem:[#allocation4 + $0x12f] sm:$0xff]  ;;  %vm4067_vm3 = vcmp.ne.s32.totalorder %v12326_v13, 0  ;;  %vm4115_vm4 = vcmp.lt.s32.totalorder %v12326_v13, 0 }
 0x43e   : > { %4550 = vst [vmem:[#allocation4 + $0x140] sm:$0xff] %v4446_v8  ;;  %v3047_v40 = vpop.f32.mrb[76].mxu0  ;;  %6247 = vmatmul.mubr.f32.gmra.mrb[82].mxu1 %v4599_v57  ;;  %v12377_v56 = vadd.s32 376, %v10790_v26  ;;  %v4258_v63 = vsel %vm12357_vm2, %v4210_v2, %v12279_v45  ;;  %vm4068_vm6 = vcmp.ne.s32.totalorder %v12363_v12, 0  ;;  %vm12394_vm8 = vmand %vm4115_vm4, %vm4067_vm3  ;;  %vm4116_vm9 = vcmp.lt.s32.totalorder %v12363_v12, 0 }
 0x43f   : > { %v3438_v29 = vmax.f32 %v3348_v4, 0.0  ;;  %v8930_v32 = vadd.f32 %v11761_v55, %v3047_v40  ;;  %v3049_v0 = vpop.f32.mrb[77].mxu0  ;;  %9657 = vmatprep.mubr.msk.f32.mxu1 %vm12233_vm5, %v3436_v39  ;;  %v3978_v39 = vmul.u32 24, %v3977_v27  ;;  %vm12379_vm5 = vcmp.lt.s32.totalorder %v4257_v53, 16  ;;  %vm12428_vm7 = vmand %vm4116_vm9, %vm4068_vm6 }
 0x440   : > { %v3989_v38 = vmul.u32 24, %v3988_v18  ;;  %v3999_v19 = vshrl.u32 %v12331_v34, 4  ;;  %v12409_v1 = vmul.u32.u64.low 2863311531, %v12377_v56  ;;  %v12410_v8 = vmul.u32.u64.high 2863311531, %v12377_v56, %v12409_v1  ;;  %v4850_v18 = vld [vmem:[#allocation4 + $0x1f] sm:$0xff] }
 0x441   : > { %v4447_v46 = vsel %vm12304_vm13, %v3438_v29, 0.0  ;;  %v3353_v37 = vadd.f32 %v8930_v32, %v11103_v59  ;;  %v12339_v49 = vld [vmem:[#allocation4 + $0x137] sm:$0xff]  ;;  %v12400_v45 = vsub.s32 %v12227_v52, %v3978_v39  ;;  %v4212_v7 = vadd.s32 24, %v12363_v12 }
 0x442   : > { %4551 = vst [vmem:[#allocation4 + $0x148] sm:$0xff] %v4447_v46  ;;  %v3052_v48 = vpop.f32.mrb[78].mxu0  ;;  %6252 = vmatmul.mubr.f32.gmra.mrb[84].mxu1 %v12339_v49  ;;  %v12433_v32 = vsub.s32 %v12263_v58, %v3989_v38  ;;  %v4000_v0 = vmul.u32 24, %v3999_v19  ;;  %v4010_v33 = vshrl.u32 %v12368_v28, 4  ;;  %v4021_v39 = vshrl.u32 %v12410_v8, 4  ;;  %v4853_v1 = vld [vmem:[#allocation4 + $0x37] sm:$0xff] }
 0x443   : > { %v3439_v16 = vmax.f32 %v3353_v37, 0.0  ;;  %v8931_v61 = vadd.f32 %v11761_v55, %v3052_v48  ;;  %v3054_v59 = vpop.f32.mrb[79].mxu0  ;;  %9658 = vmatprep.mubr.msk.f32.mxu1 %vm12269_vm10, %v3437_v25  ;;  %v4211_v25 = vadd.s32 24, %v12326_v13  ;;  %vm12412_vm10 = vcmp.lt.s32.totalorder %v4258_v63, 16 }
 0x444   : > { %vm4069_vm11 = vcmp.ne.s32.totalorder %v12400_v45, 0  ;;  %vm4117_vm12 = vcmp.lt.s32.totalorder %v12400_v45, 0  ;;  %v4260_v48 = vsel %vm12428_vm7, %v4212_v7, %v12363_v12  ;;  %v4213_v53 = vadd.s32 24, %v12400_v45 }
 0x445   : > { %v4448_v62 = vsel %vm12341_vm1, %v3439_v16, 0.0  ;;  %v3358_v41 = vadd.f32 %v8931_v61, %v13621_v9  ;;  %v12373_v31 = vld [vmem:[#allocation4 + $0x13f] sm:$0xff]  ;;  %v4259_v40 = vsel %vm12394_vm8, %v4211_v25, %v12326_v13  ;;  %vm12455_vm15 = vmand %vm4117_vm12, %vm4069_vm11  ;;  %vm4070_vm14 = vcmp.ne.s32.totalorder %v12433_v32, 0 }
 0x446   : > { %4552 = vst [vmem:[#allocation4 + $0x150] sm:$0xff] %v4448_v62  ;;  %v3057_v22 = vpop.f32.mrb[80].mxu0  ;;  %6256 = vmatmul.mubr.f32.gmra.mrb[86].mxu1 %v12373_v31  ;;  %v4011_v61 = vmul.u32 24, %v4010_v33  ;;  %vm4118_vm0 = vcmp.lt.s32.totalorder %v12433_v32, 0  ;;  %v4214_v9 = vadd.s32 24, %v12433_v32 }
 0x447   : > { %v3440_v54 = vmax.f32 %v3358_v41, 0.0  ;;  %v8932_v50 = vadd.f32 %v11761_v55, %v3057_v22  ;;  %v3059_v15 = vpop.f32.mrb[81].mxu0  ;;  %9659 = vmatprep.mubr.msk.f32.mxu1 %vm12304_vm13, %v3438_v29  ;;  %vm12443_vm13 = vcmp.lt.s32.totalorder %v4259_v40, 16  ;;  %vm12482_vm2 = vmand %vm4118_vm0, %vm4070_vm14  ;;  %v5925_v41 = vld [vmem:[#allocation10 + $0x218] sm:$0xff] }
 0x448   : > { %v4012_v30 = vsub.s32 %v12334_v21, %v4011_v61  ;;  %v5923_v61 = vld [vmem:[#allocation10 + $0x208] sm:$0xff]  ;;  %v5933_v40 = vld [vmem:[#allocation10 + $0x258] sm:$0xff] }
 0x449   : > { %v4449_v60 = vsel %vm12379_vm5, %v3440_v54, 0.0  ;;  %v3363_v10 = vadd.f32 %v8932_v50, %v13626_v14  ;;  %v12406_v47 = vld [vmem:[#allocation4 + $0x147] sm:$0xff]  ;;  %v4022_v50 = vmul.u32 24, %v4021_v39 }
 0x44a   : > { %4553 = vst [vmem:[#allocation4 + $0x158] sm:$0xff] %v4449_v60  ;;  %v3062_v52 = vpop.f32.mrb[82].mxu0  ;;  %6261 = vmatmul.mubr.f32.gmra.mrb[88].mxu1 %v12406_v47  ;;  %vm4072_vm8 = vcmp.ne.s32.totalorder %v4012_v30, 0  ;;  %vm4120_vm9 = vcmp.lt.s32.totalorder %v4012_v30, 0 }
 0x44b   : > { %v3441_v23 = vmax.f32 %v3363_v10, 0.0  ;;  %v8933_v57 = vadd.f32 %v11761_v55, %v3062_v52  ;;  %v3064_v35 = vpop.f32.mrb[83].mxu0  ;;  %9660 = vmatprep.mubr.msk.f32.mxu1 %vm12341_vm1, %v3439_v16  ;;  %v4001_v16 = vsub.s32 %v12299_v42, %v4000_v0  ;;  %vm12468_vm1 = vcmp.lt.s32.totalorder %v4260_v48, 16  ;;  %v9619_v52 = vld [vmem:[%s13430_s2] ss:$0 sm:$0xff]  ;;  %vm12527_vm7 = vmand %vm4120_vm9, %vm4072_vm8 }
 0x44c   : > { %v4023_v10 = vsub.s32 %v12377_v56, %v4022_v50  ;;  %v4216_v56 = vadd.s32 24, %v4012_v30  ;;  %v4755_v50 = vld [vmem:[#allocation4 + $0x11] sm:$0xff] }
 0x44d   : > { %v4450_v13 = vsel %vm12412_vm10, %v3441_v23, 0.0  ;;  %v3368_v27 = vadd.f32 %v8933_v57, %v13631_v24  ;;  %v12439_v43 = vld [vmem:[#allocation4 + $0x14f] sm:$0xff]  ;;  %vm4071_vm3 = vcmp.ne.s32.totalorder %v4001_v16, 0  ;;  %vm4119_vm4 = vcmp.lt.s32.totalorder %v4001_v16, 0 }
 0x44e   : > { %4554 = vst [vmem:[#allocation4 + $0x160] sm:$0xff] %v4450_v13  ;;  %v3067_v58 = vpop.f32.mrb[84].mxu0  ;;  %6266 = vmatmul.mubr.f32.gmra.mrb[90].mxu1 %v12439_v43  ;;  %v4215_v38 = vadd.s32 24, %v4001_v16  ;;  %vm12504_vm6 = vmand %vm4119_vm4, %vm4071_vm3  ;;  %vm4073_vm11 = vcmp.ne.s32.totalorder %v4023_v10, 0  ;;  %vm4121_vm12 = vcmp.lt.s32.totalorder %v4023_v10, 0  ;;  %v4264_v24 = vsel %vm12527_vm7, %v4216_v56, %v4012_v30  ;;  %v5932_v56 = vld [vmem:[#allocation10 + $0x250] sm:$0xff] }
 0x44f   : > { %v3442_v46 = vmax.f32 %v3368_v27, 0.0  ;;  %v8934_v37 = vadd.f32 %v11761_v55, %v3067_v58  ;;  %v3069_v17 = vpop.f32.mrb[85].mxu0  ;;  %9661 = vmatprep.mubr.msk.f32.mxu1 %vm12379_vm5, %v3440_v54  ;;  %v4217_v27 = vadd.s32 24, %v4023_v10  ;;  %vm4312_vm14 = vcmp.lt.s32.totalorder %v4264_v24, 16  ;;  %v4856_v24 = vld [vmem:[#allocation4 + $0x4f] sm:$0xff] }
 0x451   : > { %v4451_v59 = vsel %vm12443_vm13, %v3442_v46, 0.0  ;;  %v3373_v11 = vadd.f32 %v8934_v37, %v11264_v44  ;;  %v12464_v12 = vld [vmem:[#allocation4 + $0x157] sm:$0xff]  ;;  %v4261_v44 = vsel %vm12455_vm15, %v4213_v53, %v12400_v45  ;;  %vm12541_vm15 = vmand %vm4121_vm12, %vm4073_vm11 }
 0x452   : > { %4555 = vst [vmem:[#allocation4 + $0x168] sm:$0xff] %v4451_v59  ;;  %v3072_v3 = vpop.f32.mrb[86].mxu0  ;;  %6270 = vmatmul.mubr.f32.gmra.mrb[92].mxu1 %v12464_v12  ;;  %vm12492_vm5 = vcmp.lt.s32.totalorder %v4261_v44, 16  ;;  %v4265_v53 = vsel %vm12541_vm15, %v4217_v27, %v4023_v10  ;;  %v4756_v10 = vld [vmem:[#allocation4 + $0x19] sm:$0xff] }
 0x453   : > { %v3443_v42 = vmax.f32 %v3373_v11, 0.0  ;;  %v8935_v28 = vadd.f32 %v11761_v55, %v3072_v3  ;;  %v3074_v62 = vpop.f32.mrb[87].mxu0  ;;  %9662 = vmatprep.mubr.msk.f32.mxu1 %vm12412_vm10, %v3441_v23  ;;  %vm4313_vm0 = vcmp.lt.s32.totalorder %v4265_v53, 16  ;;  %v5939_v53 = vld [vmem:[#allocation10 + $0x288] sm:$0xff] }
 0x455   : > { %v4452_v22 = vsel %vm12468_vm1, %v3443_v42, 0.0  ;;  %v3378_v63 = vadd.f32 %v8935_v28, %v11257_v51  ;;  %v12490_v54 = vld [vmem:[#allocation4 + $0x15f] sm:$0xff]  ;;  %v4262_v51 = vsel %vm12482_vm2, %v4214_v9, %v12433_v32  ;;  %v4754_v28 = vld [vmem:[#allocation4 + $0x9] sm:$0xff]  ;;  %vm7629_vm2 = vcmask 57344  }
 0x456   : > { %4556 = vst [vmem:[#allocation4 + $0x170] sm:$0xff] %v4452_v22  ;;  %v3077_v25 = vpop.f32.mrb[88].mxu0  ;;  %6275 = vmatmul.mubr.f32.gmra.mrb[94].mxu1 %v12490_v54  ;;  %vm12514_vm10 = vcmp.lt.s32.totalorder %v4262_v51, 16  ;;  %v5924_v9 = vld [vmem:[#allocation10 + $0x210] sm:$0xff]  ;;  %v4851_v22 = vld [vmem:[#allocation4 + $0x27] sm:$0xff] }
 0x457   : > { %v3444_v26 = vmax.f32 %v3378_v63, 0.0  ;;  %v8936_v21 = vadd.f32 %v11761_v55, %v3077_v25  ;;  %v3079_v45 = vpop.f32.mrb[89].mxu0  ;;  %9663 = vmatprep.mubr.msk.f32.mxu1 %vm12443_vm13, %v3442_v46  ;;  %v8736_v15 = vpack.c.bf16 %v5925_v41, %v5924_v9  ;;  %v5943_v9 = vld [vmem:[#allocation10 + $0x2a8] sm:$0xff] }
 0x458   : > { %v4852_v45 = vld [vmem:[#allocation4 + $0x2f] sm:$0xff] }
 0x459   : > { %v4453_v60 = vsel %vm12492_vm5, %v3444_v26, 0.0  ;;  %v3383_v55 = vadd.f32 %v8936_v21, %v11346_v36  ;;  %v12511_v14 = vld [vmem:[#allocation4 + $0x167] sm:$0xff]  ;;  %v4263_v36 = vsel %vm12504_vm6, %v4215_v38, %v4001_v16 }
 0x45a   : > { %4557 = vst [vmem:[#allocation4 + $0x178] sm:$0xff] %v4453_v60  ;;  %v3082_v8 = vpop.f32.mrb[90].mxu0  ;;  %6280 = vmatmul.mubr.f32.gmra.mrb[96].mxu1 %v12511_v14  ;;  %vm4311_vm13 = vcmp.lt.s32.totalorder %v4263_v36, 16  ;;  %v5922_v16 = vld [vmem:[#allocation10 + $0x200] sm:$0xff]  ;;  %v5927_v21 = vld [vmem:[#allocation10 + $0x228] sm:$0xff]  ;;  %v5928_v60 = vld [vmem:[#allocation10 + $0x230] sm:$0xff] }
 0x45b   : > { %v3445_v4 = vmax.f32 %v3383_v55, 0.0  ;;  %v8937_v23 = vadd.f32 %v9619_v52, %v3082_v8  ;;  %v3084_v57 = vpop.f32.mrb[91].mxu0  ;;  %9664 = vmatprep.mubr.msk.f32.mxu1 %vm12468_vm1, %v3443_v42  ;;  %v8733_v44 = vpack.c.bf16 %v5923_v61, %v5922_v16  ;;  %v5929_v55 = vld [vmem:[#allocation10 + $0x238] sm:$0xff]  ;;  %vm7486_vm1 = vcmask 64512  }
 0x45c   : > { %v8742_v8 = vpack.c.bf16 %v5929_v55, %v5928_v60  ;;  %v4854_v36 = vld [vmem:[#allocation4 + $0x3f] sm:$0xff]  ;;  %v5947_v55 = vld [vmem:[#allocation10 + $0x2c8] sm:$0xff] }
 0x45d   : > { %v4454_v35 = vsel %vm12514_vm10, %v3445_v4, 0.0  ;;  %v3388_v7 = vadd.f32 %v8937_v23, %v11336_v6  ;;  %v12534_v29 = vld [vmem:[#allocation4 + $0x16f] sm:$0xff]  ;;  %v12564_v23 = vld [vmem:[#allocation4 + $0x21] sm:$0xff] }
 0x45e   : > { %4558 = vst [vmem:[#allocation4 + $0x180] sm:$0xff] %v4454_v35  ;;  %v3087_v32 = vpop.f32.mrb[92].mxu0  ;;  %6284 = vmatmul.mubr.f32.gmra.mrb[98].mxu1 %v12534_v29  ;;  %v12568_v35 = vld [vmem:[#allocation4 + $0x29] sm:$0xff]  ;;  %v4858_v16 = vld [vmem:[#allocation4 + $0x5f] sm:$0xff] }
 0x45f   : > { %v3446_v0 = vmax.f32 %v3388_v7, 0.0  ;;  %v8938_v33 = vadd.f32 %v9619_v52, %v3087_v32  ;;  %v3089_v13 = vpop.f32.mrb[93].mxu0  ;;  %9665 = vmatprep.mubr.msk.f32.mxu1 %vm12492_vm5, %v3444_v26  ;;  %v5926_v26 = vld [vmem:[#allocation10 + $0x220] sm:$0xff]  ;;  %v8748_v32 = vpack.c.bf16 %v5933_v40, %v5932_v56  ;;  %v5936_v6 = vld [vmem:[#allocation10 + $0x270] sm:$0xff] }
 0x460   : > { %v8739_v38 = vpack.c.bf16 %v5927_v21, %v5926_v26  ;;  %v4855_v7 = vld [vmem:[#allocation4 + $0x47] sm:$0xff]  ;;  %v12572_v13 = vld [vmem:[#allocation4 + $0x31] sm:$0xff] }
 0x461   : > { %v4455_v34 = vsel %vm4311_vm13, %v3446_v0, 0.0  ;;  %v3393_v58 = vadd.f32 %v8938_v33, %v11435_v5  ;;  %v12546_v46 = vld [vmem:[#allocation4 + $0x177] sm:$0xff]  ;;  %v13650_v5 = vld [vmem:[#allocation21_spill] sm:$0xff]  ;;  %v5934_v0 = vld [vmem:[#allocation10 + $0x260] sm:$0xff] }
 0x462   : > { %4559 = vst [vmem:[#allocation4 + $0x188] sm:$0xff] %v4455_v34  ;;  %v3092_v37 = vpop.f32.mrb[94].mxu0  ;;  %6289 = vmatmul.mubr.f32.gmra.mrb[100].mxu1 %v12546_v46  ;;  %v5935_v33 = vld [vmem:[#allocation10 + $0x268] sm:$0xff]  ;;  %v5937_v34 = vld [vmem:[#allocation10 + $0x278] sm:$0xff]  ;;  %v5946_v60 = vld [vmem:[#allocation10 + $0x2c0] sm:$0xff] }
 0x463   : > { %v3447_v17 = vmax.f32 %v3393_v58, 0.0  ;;  %v8939_v48 = vadd.f32 %v9619_v52, %v3092_v37  ;;  %v3094_v2 = vpop.f32.mrb[95].mxu0  ;;  %9666 = vmatprep.mubr.msk.f32.mxu1 %vm12514_vm10, %v3445_v4  ;;  %v5930_v4 = vld [vmem:[#allocation10 + $0x240] sm:$0xff]  ;;  %v5931_v52 = vld [vmem:[#allocation10 + $0x248] sm:$0xff]  ;;  %v8751_v27 = vpack.c.bf16 %v5935_v33, %v5934_v0  ;;  %v4857_v37 = vld [vmem:[#allocation4 + $0x57] sm:$0xff] }
 0x464   : > { %v8745_v57 = vpack.c.bf16 %v5931_v52, %v5930_v4  ;;  %v12576_v58 = vld [vmem:[#allocation4 + $0x39] sm:$0xff]  ;;  %v12580_v2 = vld [vmem:[#allocation4 + $0x41] sm:$0xff]  ;;  %v8769_v52 = vpack.c.bf16 %v5947_v55, %v5946_v60  ;;  %v12608_v40 = vld [vmem:[#allocation4 + $0x69] sm:$0xff] }
 0x465   : > { %v4456_v59 = vsel %vm4312_vm14, %v3447_v17, 0.0  ;;  %v3398_v11 = vadd.f32 %v8939_v48, %v13650_v5  ;;  %v12554_v39 = vld [vmem:[#allocation4 + $0x17f] sm:$0xff]  ;;  %v8754_v17 = vpack.c.bf16 %v5937_v34, %v5936_v6  ;;  %v12612_v6 = vld [vmem:[#allocation4 + $0x71] sm:$0xff] }
 0x466   : > { %4560 = vst [vmem:[#allocation4 + $0x190] sm:$0xff] %v4456_v59  ;;  %6294 = vmatmul.mubr.f32.gmra.mrb[102].mxu1 %v12554_v39  ;;  %v12557_v3 = vpop.f32.mrb[96].mxu0  ;;  %v5938_v48 = vld [vmem:[#allocation10 + $0x280] sm:$0xff]  ;;  %v5940_v59 = vld [vmem:[#allocation10 + $0x290] sm:$0xff]  ;;  %v5941_v5 = vld [vmem:[#allocation10 + $0x298] sm:$0xff] }
 0x467   : > { %v3448_v42 = vmax.f32 %v3398_v11, 0.0  ;;  %6362 = vmatprep.mubr.f32.mxu1 %v4850_v18  ;;  %v6077_v62 = vpop.f32.mrb[97].mxu0  ;;  %v8757_v61 = vpack.c.bf16 %v5939_v53, %v5938_v48  ;;  %v12586_v18 = vld [vmem:[#allocation4 + $0x49] sm:$0xff]  ;;  %v5945_v26 = vld [vmem:[#allocation10 + $0x2b8] sm:$0xff]  ;;  %v5950_v33 = vld [vmem:[#allocation10 + $0x2e0] sm:$0xff] }
 0x468   : > { %v5942_v62 = vld [vmem:[#allocation10 + $0x2a0] sm:$0xff]  ;;  %v5952_v48 = vld [vmem:[#allocation10 + $0x2f0] sm:$0xff]  ;;  %v5953_v53 = vld [vmem:[#allocation10 + $0x2f8] sm:$0xff] }
 0x469   : > { %v4457_v30 = vsel %vm4313_vm0, %v3448_v42, 0.0  ;;  %v4862_v4 = vld [vmem:[#allocation4 + $0x7f] sm:$0xff] }
 0x46a   : > { %4561 = vst [vmem:[#allocation4 + $0x198] sm:$0xff] %v4457_v30  ;;  %6363 = vmatmul.mubr.f32.vlgmr.msra.gmra.mrb[104].mxu1 %v4754_v28  ;;  %v12559_v63 = vpop.f32.mrb[98].mxu0  ;;  %v4859_v28 = vld [vmem:[#allocation4 + $0x67] sm:$0xff]  ;;  %v12592_v30 = vld [vmem:[#allocation4 + $0x51] sm:$0xff]  ;;  %v12638_v60 = vld [vmem:[#allocation4 + $0x99] sm:$0xff] }
 0x46b   : > { %6367 = vmatprep.mubr.f32.mxu1 %v4851_v22  ;;  %8734 = vmatpush1.bf16.msra.mxu1 %v8733_v44  ;;  %v6082_v25 = vpop.f32.mrb[99].mxu0  ;;  %v8760_v44 = vpack.c.bf16 %v5941_v5, %v5940_v59  ;;  %v4865_v5 = vld [vmem:[#allocation4 + $0x97] sm:$0xff] }
 0x46c   : > { %8735 = vmatprep.subr.bf16.mxu1 %v13548_v20  ;;  %v5944_v25 = vld [vmem:[#allocation10 + $0x2b0] sm:$0xff] }
 0x46e   : > { %6368 = vmatmul.mubr.f32.gmra.mrb[106].mxu1 %v4755_v50  ;;  %v6085_v51 = vpop.f32.mrb[100].mxu0  ;;  %v4860_v50 = vld [vmem:[#allocation4 + $0x6f] sm:$0xff] }
 0x46f   : > { %6372 = vmatprep.mubr.f32.mxu1 %v4852_v45  ;;  %8737 = vmatpush1.bf16.msra.mxu1 %v8736_v15  ;;  %v6086_v19 = vpop.f32.mrb[101].mxu0  ;;  %v8763_v15 = vpack.c.bf16 %v5943_v9, %v5942_v62  ;;  %v12596_v45 = vld [vmem:[#allocation4 + $0x59] sm:$0xff] }
 0x470   : > { %8738 = vmatprep.subr.bf16.mxu1 %v13548_v20  ;;  %v8766_v19 = vpack.c.bf16 %v5945_v26, %v5944_v25  ;;  %v4866_v9 = vld [vmem:[#allocation4 + $0x9f] sm:$0xff]  ;;  %v4867_v25 = vld [vmem:[#allocation4 + $0xa7] sm:$0xff] }
 0x472   : > { %6373 = vmatmul.mubr.f32.gmra.mrb[108].mxu1 %v4756_v10 }
 0x473   : > { %6376 = vmatprep.mubr.f32.mxu1 %v4853_v1  ;;  %8740 = vmatpush1.bf16.msra.mxu1 %v8739_v38  ;;  %v4861_v38 = vld [vmem:[#allocation4 + $0x77] sm:$0xff]  ;;  %v12602_v1 = vld [vmem:[#allocation4 + $0x61] sm:$0xff] }
 0x474   : > { %8741 = vmatprep.subr.bf16.mxu1 %v13548_v20 }
 0x476   : > { %6377 = vmatmul.mubr.f32.gmra.mrb[110].mxu1 %v12564_v23 }
 0x477   : > { %6381 = vmatprep.mubr.f32.mxu1 %v4854_v36  ;;  %8743 = vmatpush1.bf16.msra.mxu1 %v8742_v8  ;;  %v5948_v36 = vld [vmem:[#allocation10 + $0x2d0] sm:$0xff] }
 0x478   : > { %8744 = vmatprep.subr.bf16.mxu1 %v13548_v20 }
 0x47a   : > { %6382 = vmatmul.mubr.f32.gmra.mrb[112].mxu1 %v12568_v35 }
 0x47b   : > { %6386 = vmatprep.mubr.f32.mxu1 %v4855_v7  ;;  %8746 = vmatpush1.bf16.msra.mxu1 %v8745_v57  ;;  %v5949_v57 = vld [vmem:[#allocation10 + $0x2d8] sm:$0xff] }
 0x47c   : > { %8747 = vmatprep.subr.bf16.mxu1 %v13548_v20  ;;  %v8772_v0 = vpack.c.bf16 %v5949_v57, %v5948_v36  ;;  %v4870_v57 = vld [vmem:[#allocation4 + $0xbf] sm:$0xff] }
 0x47e   : > { %6387 = vmatmul.mubr.f32.gmra.mrb[114].mxu1 %v12572_v13 }
 0x47f   : > { %6390 = vmatprep.mubr.f32.mxu1 %v4856_v24  ;;  %8749 = vmatpush1.bf16.msra.mxu1 %v8748_v32  ;;  %v4863_v32 = vld [vmem:[#allocation4 + $0x87] sm:$0xff] }
 0x480   : > { %8750 = vmatprep.subr.bf16.mxu1 %v13548_v20  ;;  %v5951_v24 = vld [vmem:[#allocation10 + $0x2e8] sm:$0xff] }
 0x482   : > { %6391 = vmatmul.mubr.f32.gmra.mrb[116].mxu1 %v12576_v58 }
 0x483   : > { %6395 = vmatprep.mubr.f32.mxu1 %v4857_v37  ;;  %8752 = vmatpush1.bf16.msra.mxu1 %v8751_v27  ;;  %v4864_v37 = vld [vmem:[#allocation4 + $0x8f] sm:$0xff] }
 0x484   : > { %8753 = vmatprep.subr.bf16.mxu1 %v13548_v20 }
 0x486   : > { %6396 = vmatmul.mubr.f32.gmra.mrb[118].mxu1 %v12580_v2 }
 0x487   : > { %6400 = vmatprep.mubr.f32.mxu1 %v4858_v16  ;;  %8755 = vmatpush1.bf16.msra.mxu1 %v8754_v17  ;;  %v8775_v17 = vpack.c.bf16 %v5951_v24, %v5950_v33  ;;  %v4871_v33 = vld [vmem:[#allocation4 + $0xc7] sm:$0xff] }
 0x488   : > { %8756 = vmatprep.subr.bf16.mxu1 %v13548_v20 }
 0x489   : > { %v12584_v11 = vpop.f32.mrb[102].mxu0 }
 0x48a   : > { %13651 = vst [vmem:[#allocation17_spill] sm:$0xff] %v12584_v11  ;;  %v6091_v42 = vpop.f32.mrb[103].mxu0  ;;  %6401 = vmatmul.mubr.f32.gmra.mrb[120].mxu1 %v12586_v18  ;;  %v12743_v11 = vld [vmem:[#allocation4 + $0x181] sm:$0xff] }
 0x48b   : > { %6404 = vmatprep.mubr.f32.mxu1 %v4859_v28  ;;  %8758 = vmatpush1.bf16.msra.mxu1 %v8757_v61  ;;  %v12618_v61 = vld [vmem:[#allocation4 + $0x79] sm:$0xff]  ;;  %v8778_v42 = vpack.c.bf16 %v5953_v53, %v5952_v48 }
 0x48c   : > { %8759 = vmatprep.subr.bf16.mxu1 %v13548_v20  ;;  %v12654_v48 = vld [vmem:[#allocation4 + $0xb9] sm:$0xff] }
 0x48d   : > { %v12590_v41 = vpop.f32.mrb[104].mxu0 }
 0x48e   : > { %v6096_v22 = vpop.f32.mrb[105].mxu0  ;;  %6405 = vmatmul.mubr.f32.gmra.mrb[122].mxu1 %v12592_v30 }
 0x48f   : > { %6409 = vmatprep.mubr.f32.mxu1 %v4860_v50  ;;  %8761 = vmatpush1.bf16.msra.mxu1 %v8760_v44  ;;  %v12624_v44 = vld [vmem:[#allocation4 + $0x81] sm:$0xff]  ;;  %v12628_v50 = vld [vmem:[#allocation4 + $0x89] sm:$0xff] }
 0x490   : > { %8762 = vmatprep.subr.bf16.mxu1 %v13548_v20 }
 0x491   : > { %v6099_v21 = vpop.f32.mrb[106].mxu0 }
 0x492   : > { %v6100_v51 = vpop.f32.mrb[107].mxu0  ;;  %6410 = vmatmul.mubr.f32.gmra.mrb[124].mxu1 %v12596_v45  ;;  %v12633_v21 = vld [vmem:[#allocation4 + $0x91] sm:$0xff] }
 0x493   : > { %6414 = vmatprep.mubr.f32.mxu1 %v4861_v38  ;;  %8764 = vmatpush1.bf16.msra.mxu1 %v8763_v15  ;;  %v4868_v38 = vld [vmem:[#allocation4 + $0xaf] sm:$0xff] }
 0x494   : > { %8765 = vmatprep.subr.bf16.mxu1 %v13548_v20 }
 0x495   : > { %v12600_v10 = vpop.f32.mrb[108].mxu0 }
 0x496   : > { %v6105_v8 = vpop.f32.mrb[109].mxu0  ;;  %6415 = vmatmul.mubr.f32.gmra.mrb[126].mxu1 %v12602_v1 }
 0x497   : > { %6418 = vmatprep.mubr.f32.mxu1 %v4862_v4  ;;  %8767 = vmatpush1.bf16.msra.mxu1 %v8766_v19  ;;  %v4869_v8 = vld [vmem:[#allocation4 + $0xb7] sm:$0xff] }
 0x498   : > { %8768 = vmatprep.subr.bf16.mxu1 %v13548_v20 }
 0x499   : > { %v12606_v56 = vpop.f32.mrb[110].mxu0 }
 0x49a   : > { %v6110_v7 = vpop.f32.mrb[111].mxu0  ;;  %6419 = vmatmul.mubr.f32.gmra.mrb[128].mxu1 %v12608_v40 }
 0x49b   : > { %6423 = vmatprep.mubr.f32.mxu1 %v4863_v32  ;;  %8770 = vmatpush1.bf16.msra.mxu1 %v8769_v52  ;;  %v12641_v52 = vld [vmem:[#allocation4 + $0xa1] sm:$0xff]  ;;  %v12646_v32 = vld [vmem:[#allocation4 + $0xa9] sm:$0xff] }
 0x49c   : > { %8771 = vmatprep.subr.bf16.mxu1 %v13548_v20 }
 0x49d   : > { %v6113_v27 = vpop.f32.mrb[112].mxu0 }
 0x49e   : > { %v6114_v34 = vpop.f32.mrb[113].mxu0  ;;  %6424 = vmatmul.mubr.f32.gmra.mrb[130].mxu1 %v12612_v6  ;;  %v12651_v27 = vld [vmem:[#allocation4 + $0xb1] sm:$0xff] }
 0x49f   : > { %6428 = vmatprep.mubr.f32.mxu1 %v4864_v37  ;;  %8773 = vmatpush1.bf16.msra.mxu1 %v8772_v0  ;;  %v4872_v37 = vld [vmem:[#allocation4 + $0xcf] sm:$0xff] }
 0x4a0   : > { %8774 = vmatprep.subr.bf16.mxu1 %v13548_v20 }
 0x4a1   : > { %v12616_v16 = vpop.f32.mrb[114].mxu0 }
 0x4a2   : > { %13652 = vst [vmem:[#allocation16_spill] sm:$0xff] %v12616_v16  ;;  %v6119_v59 = vpop.f32.mrb[115].mxu0  ;;  %6429 = vmatmul.mubr.f32.gmra.mrb[132].mxu1 %v12618_v61  ;;  %v5955_v16 = vld [vmem:[#allocation10 + $0x308] sm:$0xff] }
 0x4a3   : > { %6432 = vmatprep.mubr.f32.mxu1 %v4865_v5  ;;  %8776 = vmatpush1.bf16.msra.mxu1 %v8775_v17  ;;  %v4873_v59 = vld [vmem:[#allocation4 + $0xd7] sm:$0xff] }
 0x4a4   : > { %8777 = vmatprep.subr.bf16.mxu1 %v13548_v20 }
 0x4a5   : > { %v12622_v28 = vpop.f32.mrb[116].mxu0 }
 0x4a6   : > { %v6124_v62 = vpop.f32.mrb[117].mxu0  ;;  %6433 = vmatmul.mubr.f32.gmra.mrb[134].mxu1 %v12624_v44 }
 0x4a7   : > { %6437 = vmatprep.mubr.f32.mxu1 %v4866_v9  ;;  %8779 = vmatpush1.bf16.msra.mxu1 %v8778_v42  ;;  %v12659_v42 = vld [vmem:[#allocation4 + $0xc1] sm:$0xff] }
 0x4a8   : > { %8780 = vmatprep.subr.bf16.mxu1 %v13548_v20  ;;  %v4874_v9 = vld [vmem:[#allocation4 + $0xdf] sm:$0xff] }
 0x4a9   : > { %v6127_v22 = vpop.f32.mrb[118].mxu0 }
 0x4aa   : > { %v6128_v15 = vpop.f32.mrb[119].mxu0  ;;  %6438 = vmatmul.mubr.f32.gmra.mrb[136].mxu1 %v12628_v50 }
 0x4ab   : > { %6442 = vmatprep.mubr.f32.mxu1 %v4867_v25  ;;  %v12664_v15 = vld [vmem:[#allocation4 + $0xc9] sm:$0xff] }
 0x4ad   : > { %v12631_v26 = vpop.f32.mrb[120].mxu0 }
 0x4ae   : > { %13653 = vst [vmem:[#allocation18_spill] sm:$0xff] %v12631_v26  ;;  %v6133_v51 = vpop.f32.mrb[121].mxu0  ;;  %6443 = vmatmul.mubr.f32.gmra.mrb[138].mxu1 %v12633_v21 }
 0x4af   : > { %6446 = vmatprep.mubr.f32.mxu1 %v4868_v38  ;;  %v4875_v51 = vld [vmem:[#allocation4 + $0xe7] sm:$0xff] }
 0x4b1   : > { %v12636_v19 = vpop.f32.mrb[122].mxu0 }
 0x4b2   : > { %13654 = vst [vmem:[#allocation20_spill] sm:$0xff] %v12636_v19  ;;  %v6138_v55 = vpop.f32.mrb[123].mxu0  ;;  %6447 = vmatmul.mubr.f32.gmra.mrb[140].mxu1 %v12638_v60  ;;  %v4947_v19 = vld [vmem:[#allocation4 + $0x28] sm:$0xff] }
 0x4b3   : > { %6451 = vmatprep.mubr.f32.mxu1 %v4869_v8  ;;  %v12667_v55 = vld [vmem:[#allocation4 + $0xd1] sm:$0xff] }
 0x4b5   : > { %v6141_v4 = vpop.f32.mrb[124].mxu0 }
 0x4b6   : > { %v6142_v36 = vpop.f32.mrb[125].mxu0  ;;  %6452 = vmatmul.mubr.f32.gmra.mrb[142].mxu1 %v12641_v52  ;;  %v4876_v4 = vld [vmem:[#allocation4 + $0xef] sm:$0xff] }
 0x4b7   : > { %6456 = vmatprep.mubr.f32.mxu1 %v4870_v57  ;;  %v12670_v36 = vld [vmem:[#allocation4 + $0xd9] sm:$0xff] }
 0x4b8   : > { %v4877_v57 = vld [vmem:[#allocation4 + $0xf7] sm:$0xff] }
 0x4b9   : > { %v12644_v7 = vpop.f32.mrb[126].mxu0 }
 0x4ba   : > { %13655 = vst [vmem:[#allocation19_spill] sm:$0xff] %v12644_v7  ;;  %v6147_v0 = vpop.f32.mrb[127].mxu0  ;;  %6457 = vmatmul.mubr.f32.gmra.mrb[144].mxu1 %v12646_v32  ;;  %v4897_v7 = vld [vmem:[#allocation4 + $0x197] sm:$0xff] }
 0x4bb   : > { %6460 = vmatprep.mubr.f32.mxu1 %v4871_v33  ;;  %v12673_v0 = vld [vmem:[#allocation4 + $0xe1] sm:$0xff] }
 0x4bc   : > { %v4878_v33 = vld [vmem:[#allocation4 + $0xff] sm:$0xff] }
 0x4bd   : > { %v12649_v24 = vpop.f32.mrb[128].mxu0 }
 0x4be   : > { %13656 = vst [vmem:[#allocation21_spill] sm:$0xff] %v12649_v24  ;;  %v6152_v34 = vpop.f32.mrb[129].mxu0  ;;  %6461 = vmatmul.mubr.f32.gmra.mrb[50].mxu1 %v12651_v27 }
 0x4bf   : > { %6465 = vmatprep.mubr.f32.mxu1 %v4872_v37  ;;  %v12676_v37 = vld [vmem:[#allocation4 + $0xe9] sm:$0xff] }
 0x4c1   : > { %v6155_v17 = vpop.f32.mrb[130].mxu0 }
 0x4c2   : > { %v6156_v53 = vpop.f32.mrb[131].mxu0  ;;  %6466 = vmatmul.mubr.f32.gmra.mrb[52].mxu1 %v12654_v48 }
 0x4c3   : > { %6470 = vmatprep.mubr.f32.mxu1 %v4873_v59  ;;  %v4879_v53 = vld [vmem:[#allocation4 + $0x107] sm:$0xff]  ;;  %v12679_v59 = vld [vmem:[#allocation4 + $0xf1] sm:$0xff] }
 0x4c5   : > { %v12657_v5 = vpop.f32.mrb[132].mxu0 }
 0x4c6   : > { %13657 = vst [vmem:[#allocation22_spill] sm:$0xff] %v12657_v5  ;;  %v6161_v62 = vpop.f32.mrb[133].mxu0  ;;  %6471 = vmatmul.mubr.f32.gmra.mrb[146].mxu1 %v12659_v42  ;;  %v5957_v5 = vld [vmem:[#allocation10 + $0x318] sm:$0xff] }
 0x4c7   : > { %6474 = vmatprep.mubr.f32.mxu1 %v4874_v9  ;;  %v4880_v62 = vld [vmem:[#allocation4 + $0x10f] sm:$0xff]  ;;  %v12682_v9 = vld [vmem:[#allocation4 + $0xf9] sm:$0xff] }
 0x4c9   : > { %v12662_v22 = vpop.f32.mrb[134].mxu0 }
 0x4ca   : > { %13658 = vst [vmem:[#allocation23_spill] sm:$0xff] %v12662_v22  ;;  %v6166_v25 = vpop.f32.mrb[135].mxu0  ;;  %6475 = vmatmul.mubr.f32.gmra.mrb[56].mxu1 %v12664_v15  ;;  %v5956_v22 = vld [vmem:[#allocation10 + $0x310] sm:$0xff] }
 0x4cb   : > { %6479 = vmatprep.mubr.f32.mxu1 %v4875_v51  ;;  %v4881_v25 = vld [vmem:[#allocation4 + $0x117] sm:$0xff] }
 0x4cd   : > { %v6169_v38 = vpop.f32.mrb[48].mxu1 }
 0x4ce   : > { %v6170_v8 = vpop.f32.mrb[49].mxu1  ;;  %6480 = vmatmul.mubr.f32.gmra.mrb[58].mxu1 %v12667_v55  ;;  %v12685_v38 = vld [vmem:[#allocation4 + $0x101] sm:$0xff] }
 0x4cf   : > { %6484 = vmatprep.mubr.f32.mxu1 %v4876_v4  ;;  %v4882_v4 = vld [vmem:[#allocation4 + $0x11f] sm:$0xff] }
 0x4d2   : > { %6485 = vmatmul.mubr.f32.gmra.mrb[148].mxu1 %v12670_v36 }
 0x4d3   : > { %6488 = vmatprep.mubr.f32.mxu1 %v4877_v57  ;;  %v12688_v57 = vld [vmem:[#allocation4 + $0x109] sm:$0xff] }
 0x4d6   : > { %6489 = vmatmul.mubr.f32.gmra.mrb[62].mxu1 %v12673_v0 }
 0x4d7   : > { %6493 = vmatprep.mubr.f32.mxu1 %v4878_v33  ;;  %v4883_v33 = vld [vmem:[#allocation4 + $0x127] sm:$0xff] }
 0x4d9   : > { %v6183_v34 = vpop.f32.mrb[54].mxu1 }
 0x4da   : > { %v6184_v17 = vpop.f32.mrb[55].mxu1  ;;  %6494 = vmatmul.mubr.f32.gmra.mrb[64].mxu1 %v12676_v37  ;;  %v12691_v34 = vld [vmem:[#allocation4 + $0x111] sm:$0xff] }
 0x4db   : > { %6498 = vmatprep.mubr.f32.mxu1 %v4879_v53  ;;  %v4884_v17 = vld [vmem:[#allocation4 + $0x12f] sm:$0xff] }
 0x4de   : > { %6499 = vmatmul.mubr.f32.gmra.mrb[150].mxu1 %v12679_v59 }
 0x4df   : > { %6502 = vmatprep.mubr.f32.mxu1 %v4880_v62  ;;  %v12694_v62 = vld [vmem:[#allocation4 + $0x119] sm:$0xff] }
 0x4e2   : > { %6503 = vmatmul.mubr.f32.gmra.mrb[68].mxu1 %v12682_v9 }
 0x4e3   : > { %6507 = vmatprep.mubr.f32.mxu1 %v4881_v25 }
 0x4e5   : > { %v6197_v51 = vpop.f32.mrb[60].mxu1 }
 0x4e6   : > { %v6198_v8 = vpop.f32.mrb[61].mxu1  ;;  %6508 = vmatmul.mubr.f32.gmra.mrb[70].mxu1 %v12685_v38  ;;  %v12698_v51 = vld [vmem:[#allocation4 + $0x121] sm:$0xff] }
 0x4e7   : > { %6512 = vmatprep.mubr.f32.mxu1 %v4882_v4  ;;  %v12702_v8 = vld [vmem:[#allocation4 + $0x129] sm:$0xff] }
 0x4ea   : > { %6513 = vmatmul.mubr.f32.gmra.mrb[152].mxu1 %v12688_v57 }
 0x4eb   : > { %6516 = vmatprep.mubr.f32.mxu1 %v4883_v33  ;;  %v12706_v33 = vld [vmem:[#allocation4 + $0x131] sm:$0xff] }
 0x4ee   : > { %6517 = vmatmul.mubr.f32.gmra.mrb[74].mxu1 %v12691_v34 }
 0x4ef   : > { %6521 = vmatprep.mubr.f32.mxu1 %v4884_v17 }
 0x4f1   : > { %v6211_v53 = vpop.f32.mrb[66].mxu1 }
 0x4f2   : > { %v6212_v25 = vpop.f32.mrb[67].mxu1  ;;  %6522 = vmatmul.mubr.f32.gmra.mrb[76].mxu1 %v12694_v62  ;;  %v12718_v53 = vld [vmem:[#allocation4 + $0x149] sm:$0xff] }
 0x4f3   : > { %6526 = vmatprep.mubr.f32.mxu1 %v12339_v49  ;;  %v12710_v49 = vld [vmem:[#allocation4 + $0x139] sm:$0xff] }
 0x4f6   : > { %6527 = vmatmul.mubr.f32.gmra.mrb[154].mxu1 %v12698_v51 }
 0x4f7   : > { %6530 = vmatprep.mubr.f32.mxu1 %v12373_v31  ;;  %v12714_v31 = vld [vmem:[#allocation4 + $0x141] sm:$0xff] }
 0x4fa   : > { %6531 = vmatmul.mubr.f32.gmra.mrb[80].mxu1 %v12702_v8 }
 0x4fb   : > { %6535 = vmatprep.mubr.f32.mxu1 %v12406_v47 }
 0x4fd   : > { %v6225_v4 = vpop.f32.mrb[72].mxu1 }
 0x4fe   : > { %v6226_v17 = vpop.f32.mrb[73].mxu1  ;;  %6536 = vmatmul.mubr.f32.gmra.mrb[82].mxu1 %v12706_v33  ;;  %v12730_v4 = vld [vmem:[#allocation4 + $0x161] sm:$0xff] }
 0x4ff   : > { %6540 = vmatprep.mubr.f32.mxu1 %v12439_v43  ;;  %v12722_v43 = vld [vmem:[#allocation4 + $0x151] sm:$0xff] }
 0x502   : > { %6541 = vmatmul.mubr.f32.gmra.mrb[156].mxu1 %v12710_v49 }
 0x503   : > { %6544 = vmatprep.mubr.f32.mxu1 %v12464_v12  ;;  %v12726_v12 = vld [vmem:[#allocation4 + $0x159] sm:$0xff] }
 0x506   : > { %6545 = vmatmul.mubr.f32.gmra.mrb[86].mxu1 %v12714_v31 }
 0x507   : > { %6549 = vmatprep.mubr.f32.mxu1 %v12490_v54 }
 0x509   : > { %v6239_v47 = vpop.f32.mrb[78].mxu1 }
 0x50a   : > { %v6240_v25 = vpop.f32.mrb[79].mxu1  ;;  %6550 = vmatmul.mubr.f32.gmra.mrb[88].mxu1 %v12718_v53  ;;  %v4895_v47 = vld [vmem:[#allocation4 + $0x187] sm:$0xff] }
 0x50b   : > { %6554 = vmatprep.mubr.f32.mxu1 %v12511_v14  ;;  %v12734_v14 = vld [vmem:[#allocation4 + $0x169] sm:$0xff] }
 0x50c   : > { %v4896_v25 = vld [vmem:[#allocation4 + $0x18f] sm:$0xff] }
 0x50e   : > { %6555 = vmatmul.mubr.f32.gmra.mrb[158].mxu1 %v12722_v43 }
 0x50f   : > { %6558 = vmatprep.mubr.f32.mxu1 %v12534_v29  ;;  %v12737_v29 = vld [vmem:[#allocation4 + $0x171] sm:$0xff] }
 0x512   : > { %6559 = vmatmul.mubr.f32.gmra.mrb[92].mxu1 %v12726_v12 }
 0x513   : > { %6563 = vmatprep.mubr.f32.mxu1 %v12546_v46 }
 0x515   : > { %v6253_v54 = vpop.f32.mrb[84].mxu1 }
 0x516   : > { %v6254_v17 = vpop.f32.mrb[85].mxu1  ;;  %6564 = vmatmul.mubr.f32.gmra.mrb[94].mxu1 %v12730_v4  ;;  %v12740_v54 = vld [vmem:[#allocation4 + $0x179] sm:$0xff] }
 0x517   : > { %6568 = vmatprep.mubr.f32.mxu1 %v12554_v39  ;;  %v5954_v39 = vld [vmem:[#allocation10 + $0x300] sm:$0xff] }
 0x51a   : > { %6569 = vmatmul.mubr.f32.gmra.mrb[160].mxu1 %v12734_v14 }
 0x51b   : > { %6572 = vmatprep.mubr.f32.mxu1 %v4895_v47  ;;  %v8781_v47 = vpack.c.bf16 %v5955_v16, %v5954_v39  ;;  %v5960_v16 = vld [vmem:[#allocation10 + $0x330] sm:$0xff]  ;;  %v5961_v39 = vld [vmem:[#allocation10 + $0x338] sm:$0xff] }
 0x51e   : > { %6573 = vmatmul.mubr.f32.gmra.mrb[98].mxu1 %v12737_v29 }
 0x51f   : > { %6577 = vmatprep.mubr.f32.mxu1 %v4896_v25  ;;  %v4946_v25 = vld [vmem:[#allocation4 + $0x20] sm:$0xff] }
 0x521   : > { %v6267_v46 = vpop.f32.mrb[90].mxu1 }
 0x522   : > { %v6268_v17 = vpop.f32.mrb[91].mxu1  ;;  %6578 = vmatmul.mubr.f32.gmra.mrb[100].mxu1 %v12740_v54  ;;  %v8784_v46 = vpack.c.bf16 %v5957_v5, %v5956_v22  ;;  %v5963_v5 = vld [vmem:[#allocation10 + $0x348] sm:$0xff]  ;;  %v5965_v22 = vld [vmem:[#allocation10 + $0x358] sm:$0xff] }
 0x523   : > { %6582 = vmatprep.mubr.f32.mxu1 %v4897_v7  ;;  %v5958_v7 = vld [vmem:[#allocation10 + $0x320] sm:$0xff]  ;;  %v5959_v17 = vld [vmem:[#allocation10 + $0x328] sm:$0xff] }
 0x526   : > { %6583 = vmatmul.mubr.f32.gmra.mrb[162].mxu1 %v12743_v11 }
 0x527   : > { %6651 = vmatprep.mubr.f32.mxu1 %v12564_v23  ;;  %v8787_v23 = vpack.c.bf16 %v5959_v17, %v5958_v7  ;;  %v5966_v17 = vld [vmem:[#allocation10 + $0x360] sm:$0xff] }
 0x52a   : > { %6652 = vmatmul.mubr.f32.vlgmr.msra.gmra.mrb[104].mxu1 %v4946_v25  ;;  %v4948_v25 = vld [vmem:[#allocation4 + $0x30] sm:$0xff] }
 0x52b   : > { %6656 = vmatprep.mubr.f32.mxu1 %v12568_v35  ;;  %8782 = vmatpush1.bf16.msra.mxu1 %v8781_v47  ;;  %v8790_v35 = vpack.c.bf16 %v5961_v39, %v5960_v16  ;;  %v5968_v39 = vld [vmem:[#allocation10 + $0x370] sm:$0xff] }
 0x52c   : > { %8783 = vmatprep.subr.bf16.mxu1 %v13548_v20 }
 0x52d   : > { %v6281_v24 = vpop.f32.mrb[96].mxu1 }
 0x52e   : > { %v6282_v26 = vpop.f32.mrb[97].mxu1  ;;  %6657 = vmatmul.mubr.f32.gmra.mrb[106].mxu1 %v4947_v19  ;;  %v5962_v24 = vld [vmem:[#allocation10 + $0x340] sm:$0xff]  ;;  %v5964_v19 = vld [vmem:[#allocation10 + $0x350] sm:$0xff] }
 0x52f   : > { %6661 = vmatprep.mubr.f32.mxu1 %v12572_v13  ;;  %8785 = vmatpush1.bf16.msra.mxu1 %v8784_v46  ;;  %v12753_v26 = vld [vmem:[#allocation4 + $0x38] sm:$0xff]  ;;  %v8793_v13 = vpack.c.bf16 %v5963_v5, %v5962_v24  ;;  %v8796_v7 = vpack.c.bf16 %v5965_v22, %v5964_v19  ;;  %v5970_v24 = vld [vmem:[#allocation10 + $0x380] sm:$0xff]  ;;  %v5971_v5 = vld [vmem:[#allocation10 + $0x388] sm:$0xff] }
 0x530   : > { %8786 = vmatprep.subr.bf16.mxu1 %v13548_v20  ;;  %v8805_v22 = vpack.c.bf16 %v5971_v5, %v5970_v24 }
 0x532   : > { %6662 = vmatmul.mubr.f32.gmra.mrb[164].mxu1 %v4948_v25  ;;  %v5969_v25 = vld [vmem:[#allocation10 + $0x378] sm:$0xff] }
 0x533   : > { %6665 = vmatprep.mubr.f32.mxu1 %v12576_v58  ;;  %8788 = vmatpush1.bf16.msra.mxu1 %v8787_v23  ;;  %v12758_v58 = vld [vmem:[#allocation4 + $0x40] sm:$0xff]  ;;  %v12763_v23 = vld [vmem:[#allocation4 + $0x48] sm:$0xff] }
 0x534   : > { %8789 = vmatprep.subr.bf16.mxu1 %v13548_v20 }
 0x536   : > { %6666 = vmatmul.mubr.f32.gmra.mrb[110].mxu1 %v12753_v26 }
 0x537   : > { %6670 = vmatprep.mubr.f32.mxu1 %v12580_v2  ;;  %8791 = vmatpush1.bf16.msra.mxu1 %v8790_v35  ;;  %v5967_v2 = vld [vmem:[#allocation10 + $0x368] sm:$0xff]  ;;  %v12768_v35 = vld [vmem:[#allocation4 + $0x50] sm:$0xff] }
 0x538   : > { %8792 = vmatprep.subr.bf16.mxu1 %v13548_v20  ;;  %v8799_v16 = vpack.c.bf16 %v5967_v2, %v5966_v17  ;;  %v5974_v17 = vld [vmem:[#allocation10 + $0x3a0] sm:$0xff]  ;;  %v5975_v2 = vld [vmem:[#allocation10 + $0x3a8] sm:$0xff] }
 0x539   : > { %v6295_v47 = vpop.f32.mrb[102].mxu1 }
 0x53a   : > { %v6296_v46 = vpop.f32.mrb[103].mxu1  ;;  %6671 = vmatmul.mubr.f32.gmra.mrb[112].mxu1 %v12758_v58  ;;  %v5972_v47 = vld [vmem:[#allocation10 + $0x390] sm:$0xff] }
 0x53b   : > { %6675 = vmatprep.mubr.f32.mxu1 %v12586_v18  ;;  %8794 = vmatpush1.bf16.msra.mxu1 %v8793_v13  ;;  %v8802_v18 = vpack.c.bf16 %v5969_v25, %v5968_v39  ;;  %v12778_v46 = vld [vmem:[#allocation4 + $0x60] sm:$0xff]  ;;  %v5976_v39 = vld [vmem:[#allocation10 + $0x3b0] sm:$0xff]  ;;  %v5977_v25 = vld [vmem:[#allocation10 + $0x3b8] sm:$0xff] }
 0x53c   : > { %8795 = vmatprep.subr.bf16.mxu1 %v13548_v20  ;;  %v8814_v5 = vpack.c.bf16 %v5977_v25, %v5976_v39 }
 0x53e   : > { %6676 = vmatmul.mubr.f32.gmra.mrb[166].mxu1 %v12763_v23 }
 0x53f   : > { %6679 = vmatprep.mubr.f32.mxu1 %v12592_v30  ;;  %8797 = vmatpush1.bf16.msra.mxu1 %v8796_v7  ;;  %v12773_v30 = vld [vmem:[#allocation4 + $0x58] sm:$0xff] }
 0x540   : > { %8798 = vmatprep.subr.bf16.mxu1 %v13548_v20 }
 0x542   : > { %6680 = vmatmul.mubr.f32.gmra.mrb[116].mxu1 %v12768_v35 }
 0x543   : > { %6684 = vmatprep.mubr.f32.mxu1 %v12596_v45  ;;  %8800 = vmatpush1.bf16.msra.mxu1 %v8799_v16  ;;  %v5973_v45 = vld [vmem:[#allocation10 + $0x398] sm:$0xff]  ;;  %v12783_v16 = vld [vmem:[#allocation4 + $0x68] sm:$0xff] }
 0x544   : > { %8801 = vmatprep.subr.bf16.mxu1 %v13548_v20  ;;  %v8808_v7 = vpack.c.bf16 %v5973_v45, %v5972_v47  ;;  %v5980_v47 = vld [vmem:[#allocation10 + $0x3d0] sm:$0xff]  ;;  %v5981_v45 = vld [vmem:[#allocation10 + $0x3d8] sm:$0xff] }
 0x545   : > { %v6374_v13 = vpop.f32.mrb[108].mxu1 }
 0x546   : > { %v6375_v19 = vpop.f32.mrb[109].mxu1  ;;  %6685 = vmatmul.mubr.f32.gmra.mrb[118].mxu1 %v12773_v30  ;;  %v5978_v13 = vld [vmem:[#allocation10 + $0x3c0] sm:$0xff] }
 0x547   : > { %6689 = vmatprep.mubr.f32.mxu1 %v12602_v1  ;;  %8803 = vmatpush1.bf16.msra.mxu1 %v8802_v18  ;;  %v8811_v1 = vpack.c.bf16 %v5975_v2, %v5974_v17  ;;  %v12793_v19 = vld [vmem:[#allocation4 + $0x78] sm:$0xff]  ;;  %v5982_v17 = vld [vmem:[#allocation10 + $0x3e0] sm:$0xff]  ;;  %v5983_v2 = vld [vmem:[#allocation10 + $0x3e8] sm:$0xff] }
 0x548   : > { %8804 = vmatprep.subr.bf16.mxu1 %v13548_v20  ;;  %v8823_v25 = vpack.c.bf16 %v5983_v2, %v5982_v17  ;;  %v12832_v17 = vld [vmem:[#allocation4 + $0xb8] sm:$0xff]  ;;  %v12836_v2 = vld [vmem:[#allocation4 + $0xc0] sm:$0xff] }
 0x54a   : > { %6690 = vmatmul.mubr.f32.gmra.mrb[168].mxu1 %v12778_v46 }
 0x54b   : > { %6693 = vmatprep.mubr.f32.mxu1 %v12608_v40  ;;  %8806 = vmatpush1.bf16.msra.mxu1 %v8805_v22  ;;  %v12788_v40 = vld [vmem:[#allocation4 + $0x70] sm:$0xff] }
 0x54c   : > { %8807 = vmatprep.subr.bf16.mxu1 %v13548_v20 }
 0x54e   : > { %6694 = vmatmul.mubr.f32.gmra.mrb[122].mxu1 %v12783_v16 }
 0x54f   : > { %6698 = vmatprep.mubr.f32.mxu1 %v12612_v6  ;;  %8809 = vmatpush1.bf16.msra.mxu1 %v8808_v7  ;;  %v5979_v6 = vld [vmem:[#allocation10 + $0x3c8] sm:$0xff]  ;;  %v12798_v7 = vld [vmem:[#allocation4 + $0x80] sm:$0xff] }
 0x550   : > { %8810 = vmatprep.subr.bf16.mxu1 %v13548_v20  ;;  %v8817_v22 = vpack.c.bf16 %v5979_v6, %v5978_v13  ;;  %v12813_v13 = vld [vmem:[#allocation4 + $0x98] sm:$0xff]  ;;  %v12817_v6 = vld [vmem:[#allocation4 + $0xa0] sm:$0xff] }
 0x551   : > { %v6388_v18 = vpop.f32.mrb[114].mxu1 }
 0x552   : > { %v6389_v24 = vpop.f32.mrb[115].mxu1  ;;  %6699 = vmatmul.mubr.f32.gmra.mrb[124].mxu1 %v12788_v40  ;;  %v5984_v18 = vld [vmem:[#allocation10 + $0x3f0] sm:$0xff] }
 0x553   : > { %6703 = vmatprep.mubr.f32.mxu1 %v12618_v61  ;;  %8812 = vmatpush1.bf16.msra.mxu1 %v8811_v1  ;;  %v8820_v61 = vpack.c.bf16 %v5981_v45, %v5980_v47  ;;  %v12808_v24 = vld [vmem:[#allocation4 + $0x90] sm:$0xff]  ;;  %v5986_v47 = vld [vmem:[#allocation10 + $0x400] sm:$0xff]  ;;  %v5987_v45 = vld [vmem:[#allocation10 + $0x408] sm:$0xff] }
 0x554   : > { %8813 = vmatprep.subr.bf16.mxu1 %v13548_v20 }
 0x556   : > { %6704 = vmatmul.mubr.f32.gmra.mrb[170].mxu1 %v12793_v19 }
 0x557   : > { %6707 = vmatprep.mubr.f32.mxu1 %v12624_v44  ;;  %8815 = vmatpush1.bf16.msra.mxu1 %v8814_v5  ;;  %v12803_v44 = vld [vmem:[#allocation4 + $0x88] sm:$0xff] }
 0x558   : > { %8816 = vmatprep.subr.bf16.mxu1 %v13548_v20 }
 0x55a   : > { %6708 = vmatmul.mubr.f32.gmra.mrb[128].mxu1 %v12798_v7 }
 0x55b   : > { %6712 = vmatprep.mubr.f32.mxu1 %v12628_v50  ;;  %8818 = vmatpush1.bf16.msra.mxu1 %v8817_v22  ;;  %v5985_v50 = vld [vmem:[#allocation10 + $0x3f8] sm:$0xff] }
 0x55c   : > { %8819 = vmatprep.subr.bf16.mxu1 %v13548_v20  ;;  %v8826_v5 = vpack.c.bf16 %v5985_v50, %v5984_v18  ;;  %v12868_v50 = vld [vmem:[#allocation4 + $0x100] sm:$0xff] }
 0x55d   : > { %v6402_v1 = vpop.f32.mrb[120].mxu1 }
 0x55e   : > { %v6403_v39 = vpop.f32.mrb[121].mxu1  ;;  %6713 = vmatmul.mubr.f32.gmra.mrb[130].mxu1 %v12803_v44  ;;  %v12844_v1 = vld [vmem:[#allocation4 + $0xd0] sm:$0xff] }
 0x55f   : > { %6717 = vmatprep.mubr.f32.mxu1 %v12633_v21  ;;  %8821 = vmatpush1.bf16.msra.mxu1 %v8820_v61 }
 0x560   : > { %8822 = vmatprep.subr.bf16.mxu1 %v13548_v20 }
 0x562   : > { %6718 = vmatmul.mubr.f32.gmra.mrb[172].mxu1 %v12808_v24 }
 0x563   : > { %6721 = vmatprep.mubr.f32.mxu1 %v12638_v60  ;;  %8824 = vmatpush1.bf16.msra.mxu1 %v8823_v25  ;;  %v12821_v60 = vpack.c.bf16 %v5987_v45, %v5986_v47  ;;  %v12856_v25 = vld [vmem:[#allocation4 + $0xe8] sm:$0xff]  ;;  %v12892_v47 = vld [vmem:[#allocation4 + $0x130] sm:$0xff] }
 0x564   : > { %8825 = vmatprep.subr.bf16.mxu1 %v13548_v20  ;;  %v12823_v20 = vld [vmem:[#allocation4 + $0xa8] sm:$0xff] }
 0x566   : > { %6722 = vmatmul.mubr.f32.gmra.mrb[134].mxu1 %v12813_v13 }
 0x567   : > { %6726 = vmatprep.mubr.f32.mxu1 %v12641_v52  ;;  %8827 = vmatpush1.bf16.msra.mxu1 %v8826_v5  ;;  %v12828_v52 = vld [vmem:[#allocation4 + $0xb0] sm:$0xff] }
 0x568   : > { %8829 = vmatprep.subr.bf16.mxu1 %v12821_v60 }
 0x569   : > { %v6416_v21 = vpop.f32.mrb[126].mxu1 }
 0x56a   : > { %v6417_v22 = vpop.f32.mrb[127].mxu1  ;;  %6727 = vmatmul.mubr.f32.gmra.mrb[136].mxu1 %v12817_v6  ;;  %v12880_v21 = vld [vmem:[#allocation4 + $0x118] sm:$0xff] }
 0x56b   : > { %6731 = vmatprep.mubr.f32.mxu1 %v12646_v32 }
 0x56e   : > { %6732 = vmatmul.mubr.f32.gmra.mrb[174].mxu1 %v12823_v20 }
 0x56f   : > { %6735 = vmatprep.mubr.f32.mxu1 %v12651_v27  ;;  %v12840_v27 = vld [vmem:[#allocation4 + $0xc8] sm:$0xff] }
 0x572   : > { %6736 = vmatmul.mubr.f32.gmra.mrb[140].mxu1 %v12828_v52 }
 0x573   : > { %6740 = vmatprep.mubr.f32.mxu1 %v12654_v48 }
 0x575   : > { %v6430_v61 = vpop.f32.mrb[132].mxu1 }
 0x576   : > { %v6431_v32 = vpop.f32.mrb[133].mxu1  ;;  %6741 = vmatmul.mubr.f32.gmra.mrb[142].mxu1 %v12832_v17  ;;  %v12904_v61 = vld [vmem:[#allocation4 + $0x148] sm:$0xff] }
 0x577   : > { %6745 = vmatprep.mubr.f32.mxu1 %v12659_v42  ;;  %v12848_v42 = vld [vmem:[#allocation4 + $0xd8] sm:$0xff] }
 0x57a   : > { %6746 = vmatmul.mubr.f32.gmra.mrb[176].mxu1 %v12836_v2 }
 0x57b   : > { %6749 = vmatprep.mubr.f32.mxu1 %v12664_v15  ;;  %v12852_v15 = vld [vmem:[#allocation4 + $0xe0] sm:$0xff] }
 0x57e   : > { %6750 = vmatmul.mubr.f32.gmra.mrb[50].mxu1 %v12840_v27 }
 0x57f   : > { %6754 = vmatprep.mubr.f32.mxu1 %v12667_v55 }
 0x581   : > { %v6444_v48 = vpop.f32.mrb[138].mxu1 }
 0x582   : > { %v6445_v39 = vpop.f32.mrb[139].mxu1  ;;  %6755 = vmatmul.mubr.f32.gmra.mrb[52].mxu1 %v12844_v1  ;;  %v12916_v48 = vld [vmem:[#allocation4 + $0x160] sm:$0xff] }
 0x583   : > { %6759 = vmatprep.mubr.f32.mxu1 %v12670_v36  ;;  %v12860_v36 = vld [vmem:[#allocation4 + $0xf0] sm:$0xff] }
 0x586   : > { %6760 = vmatmul.mubr.f32.gmra.mrb[178].mxu1 %v12848_v42 }
 0x587   : > { %6763 = vmatprep.mubr.f32.mxu1 %v12673_v0  ;;  %v12864_v0 = vld [vmem:[#allocation4 + $0xf8] sm:$0xff] }
 0x58a   : > { %6764 = vmatmul.mubr.f32.gmra.mrb[56].mxu1 %v12852_v15 }
 0x58b   : > { %6768 = vmatprep.mubr.f32.mxu1 %v12676_v37 }
 0x58d   : > { %v6458_v55 = vpop.f32.mrb[144].mxu1 }
 0x58e   : > { %v6459_v18 = vpop.f32.mrb[145].mxu1  ;;  %6769 = vmatmul.mubr.f32.gmra.mrb[58].mxu1 %v12856_v25  ;;  %v12928_v55 = vld [vmem:[#allocation4 + $0x178] sm:$0xff] }
 0x58f   : > { %6773 = vmatprep.mubr.f32.mxu1 %v12679_v59  ;;  %v12872_v59 = vld [vmem:[#allocation4 + $0x108] sm:$0xff] }
 0x592   : > { %6774 = vmatmul.mubr.f32.gmra.mrb[180].mxu1 %v12860_v36 }
 0x593   : > { %6777 = vmatprep.mubr.f32.mxu1 %v12682_v9  ;;  %v12876_v9 = vld [vmem:[#allocation4 + $0x110] sm:$0xff] }
 0x596   : > { %6778 = vmatmul.mubr.f32.gmra.mrb[62].mxu1 %v12864_v0 }
 0x597   : > { %6782 = vmatprep.mubr.f32.mxu1 %v12685_v38 }
 0x599   : > { %v6472_v37 = vpop.f32.mrb[146].mxu1 }
 0x59a   : > { %v6473_v5 = vpop.f32.mrb[147].mxu1  ;;  %6783 = vmatmul.mubr.f32.gmra.mrb[64].mxu1 %v12868_v50  ;;  %v12935_v37 = vld [vmem:[#allocation4 + $0x189] sm:$0xff] }
 0x59b   : > { %6787 = vmatprep.mubr.f32.mxu1 %v12688_v57  ;;  %v12884_v57 = vld [vmem:[#allocation4 + $0x120] sm:$0xff]  ;;  %13659 = vst [vmem:[#allocation24_spill] sm:$0xff] %v12935_v37 }
 0x59e   : > { %6788 = vmatmul.mubr.f32.gmra.mrb[182].mxu1 %v12872_v59 }
 0x59f   : > { %6791 = vmatprep.mubr.f32.mxu1 %v12691_v34  ;;  %v12888_v34 = vld [vmem:[#allocation4 + $0x128] sm:$0xff] }
 0x5a2   : > { %6792 = vmatmul.mubr.f32.gmra.mrb[68].mxu1 %v12876_v9 }
 0x5a3   : > { %6796 = vmatprep.mubr.f32.mxu1 %v12694_v62 }
 0x5a5   : > { %v6486_v38 = vpop.f32.mrb[148].mxu1 }
 0x5a6   : > { %v6487_v22 = vpop.f32.mrb[149].mxu1  ;;  %6797 = vmatmul.mubr.f32.gmra.mrb[70].mxu1 %v12880_v21  ;;  %v12944_v38 = vld [vmem:[#allocation4 + $0x190] sm:$0xff] }
 0x5a7   : > { %6801 = vmatprep.mubr.f32.mxu1 %v12698_v51  ;;  %v12896_v51 = vld [vmem:[#allocation4 + $0x138] sm:$0xff] }
 0x5a8   : > { %v12947_v22 = vld [vmem:[#allocation4 + $0x199] sm:$0xff] }
 0x5a9   : > { %13661 = vst [vmem:[#allocation26_spill] sm:$0xff] %v12947_v22 }
 0x5aa   : > { %6802 = vmatmul.mubr.f32.gmra.mrb[184].mxu1 %v12884_v57 }
 0x5ab   : > { %6805 = vmatprep.mubr.f32.mxu1 %v12702_v8  ;;  %v12900_v8 = vld [vmem:[#allocation4 + $0x140] sm:$0xff] }
 0x5ae   : > { %6806 = vmatmul.mubr.f32.gmra.mrb[74].mxu1 %v12888_v34 }
 0x5af   : > { %6810 = vmatprep.mubr.f32.mxu1 %v12706_v33 }
 0x5b1   : > { %v6500_v62 = vpop.f32.mrb[150].mxu1 }
 0x5b2   : > { %v6501_v45 = vpop.f32.mrb[151].mxu1  ;;  %6811 = vmatmul.mubr.f32.gmra.mrb[76].mxu1 %v12892_v47  ;;  %v12950_v62 = vld [vmem:[#allocation4 + $0x198] sm:$0xff] }
 0x5b3   : > { %6815 = vmatprep.mubr.f32.mxu1 %v12710_v49  ;;  %v12908_v49 = vld [vmem:[#allocation4 + $0x150] sm:$0xff] }
 0x5b4   : > { %v5988_v45 = vld [vmem:[#allocation10 + $0x410] sm:$0xff] }
 0x5b6   : > { %6816 = vmatmul.mubr.f32.gmra.mrb[186].mxu1 %v12896_v51 }
 0x5b7   : > { %6819 = vmatprep.mubr.f32.mxu1 %v12714_v31  ;;  %v12912_v31 = vld [vmem:[#allocation4 + $0x158] sm:$0xff] }
 0x5ba   : > { %6820 = vmatmul.mubr.f32.gmra.mrb[80].mxu1 %v12900_v8 }
 0x5bb   : > { %6824 = vmatprep.mubr.f32.mxu1 %v12718_v53 }
 0x5bd   : > { %v6514_v33 = vpop.f32.mrb[152].mxu1 }
 0x5be   : > { %v6515_v32 = vpop.f32.mrb[153].mxu1  ;;  %6825 = vmatmul.mubr.f32.gmra.mrb[82].mxu1 %v12904_v61  ;;  %v5989_v33 = vld [vmem:[#allocation10 + $0x418] sm:$0xff] }
 0x5bf   : > { %6829 = vmatprep.mubr.f32.mxu1 %v12722_v43  ;;  %v12920_v43 = vld [vmem:[#allocation4 + $0x168] sm:$0xff]  ;;  %v8832_v32 = vpack.c.bf16 %v5989_v33, %v5988_v45  ;;  %v5994_v33 = vld [vmem:[#allocation10 + $0x440] sm:$0xff] }
 0x5c0   : > { %v5140_v45 = vld [vmem:[#allocation4 + $0x47] sm:$0xff] }
 0x5c2   : > { %6830 = vmatmul.mubr.f32.gmra.mrb[188].mxu1 %v12908_v49 }
 0x5c3   : > { %6833 = vmatprep.mubr.f32.mxu1 %v12726_v12  ;;  %v12924_v12 = vld [vmem:[#allocation4 + $0x170] sm:$0xff] }
 0x5c6   : > { %6834 = vmatmul.mubr.f32.gmra.mrb[86].mxu1 %v12912_v31 }
 0x5c7   : > { %6838 = vmatprep.mubr.f32.mxu1 %v12730_v4 }
 0x5c9   : > { %v6528_v53 = vpop.f32.mrb[154].mxu1 }
 0x5ca   : > { %v6529_v39 = vpop.f32.mrb[155].mxu1  ;;  %6839 = vmatmul.mubr.f32.gmra.mrb[88].mxu1 %v12916_v48  ;;  %v5138_v53 = vld [vmem:[#allocation4 + $0x37] sm:$0xff] }
 0x5cb   : > { %6843 = vmatprep.mubr.f32.mxu1 %v12734_v14  ;;  %v12932_v14 = vld [vmem:[#allocation4 + $0x180] sm:$0xff] }
 0x5cc   : > { %v5990_v39 = vld [vmem:[#allocation10 + $0x420] sm:$0xff] }
 0x5ce   : > { %6844 = vmatmul.mubr.f32.gmra.mrb[190].mxu1 %v12920_v43 }
 0x5cf   : > { %6847 = vmatprep.mubr.f32.mxu1 %v12737_v29  ;;  %v12938_v29 = vld [vmem:[#allocation4 + $0x188] sm:$0xff] }
 0x5d2   : > { %6848 = vmatmul.mubr.f32.gmra.mrb[92].mxu1 %v12924_v12 }
 0x5d3   : > { %6852 = vmatprep.mubr.f32.mxu1 %v12740_v54  ;;  %v12941_v54 = vld [vmem:[#allocation4 + $0x191] sm:$0xff] }
 0x5d4   : > { %13660 = vst [vmem:[#allocation25_spill] sm:$0xff] %v12941_v54 }
 0x5d5   : > { %v6542_v4 = vpop.f32.mrb[156].mxu1 }
 0x5d6   : > { %v6543_v18 = vpop.f32.mrb[157].mxu1  ;;  %6853 = vmatmul.mubr.f32.gmra.mrb[94].mxu1 %v12928_v55  ;;  %v5991_v4 = vld [vmem:[#allocation10 + $0x428] sm:$0xff] }
 0x5d7   : > { %6857 = vmatprep.mubr.f32.mxu1 %v12743_v11  ;;  %v8836_v18 = vpack.c.bf16 %v5991_v4, %v5990_v39  ;;  %v5996_v39 = vld [vmem:[#allocation10 + $0x450] sm:$0xff]  ;;  %v5997_v4 = vld [vmem:[#allocation10 + $0x458] sm:$0xff] }
 0x5da   : > { %6858 = vmatmul.mubr.f32.gmra.mrb[192].mxu1 %v12932_v14 }
 0x5db   : > { %6861 = vmatprep.mubr.f32.mxu1 %v12935_v37 }
 0x5de   : > { %6862 = vmatmul.mubr.f32.gmra.mrb[98].mxu1 %v12938_v29 }
 0x5df   : > { %6866 = vmatprep.mubr.f32.mxu1 %v12941_v54  ;;  %v5993_v54 = vld [vmem:[#allocation10 + $0x438] sm:$0xff] }
 0x5e1   : > { %v6556_v5 = vpop.f32.mrb[158].mxu1 }
 0x5e2   : > { %v6557_v11 = vpop.f32.mrb[159].mxu1  ;;  %6867 = vmatmul.mubr.f32.gmra.mrb[100].mxu1 %v12944_v38 }
 0x5e3   : > { %6871 = vmatprep.mubr.f32.mxu1 %v12947_v22  ;;  %v5139_v11 = vld [vmem:[#allocation4 + $0x3f] sm:$0xff]  ;;  %v5992_v22 = vld [vmem:[#allocation10 + $0x430] sm:$0xff] }
 0x5e6   : > { %6872 = vmatmul.mubr.f32.gmra.mrb[194].mxu1 %v12950_v62 }
 0x5e7   : > { %6940 = vmatprep.mubr.f32.mxu1 %v12753_v26  ;;  %v8840_v26 = vpack.c.bf16 %v5993_v54, %v5992_v22  ;;  %v5142_v54 = vld [vmem:[#allocation4 + $0x57] sm:$0xff] }
 0x5ea   : > { %6941 = vmatmul.mubr.f32.vlgmr.msra.gmra.mrb[104].mxu1 %v5138_v53  ;;  %v5995_v53 = vld [vmem:[#allocation10 + $0x448] sm:$0xff] }
 0x5eb   : > { %6945 = vmatprep.mubr.f32.mxu1 %v12758_v58  ;;  %8831 = vmatpush3.bf16.msra.mxu1 %v12821_v60  ;;  %v8844_v58 = vpack.c.bf16 %v5995_v53, %v5994_v33  ;;  %v5141_v60 = vld [vmem:[#allocation4 + $0x4f] sm:$0xff]  ;;  %v5147_v33 = vld [vmem:[#allocation4 + $0x7f] sm:$0xff]  ;;  %v5148_v53 = vld [vmem:[#allocation4 + $0x87] sm:$0xff] }
 0x5ec   : > { %8833 = vmatprep.subr.bf16.mxu1 %v8832_v32 }
 0x5ed   : > { %v6570_v5 = vpop.f32.mrb[160].mxu1 }
 0x5ee   : > { %v6571_v37 = vpop.f32.mrb[161].mxu1  ;;  %6946 = vmatmul.mubr.f32.gmra.mrb[106].mxu1 %v5139_v11  ;;  %v5999_v5 = vld [vmem:[#allocation10 + $0x468] sm:$0xff] }
 0x5ef   : > { %6950 = vmatprep.mubr.f32.mxu1 %v12763_v23  ;;  %8835 = vmatpush3.bf16.msra.mxu1 %v8832_v32  ;;  %v8848_v23 = vpack.c.bf16 %v5997_v4, %v5996_v39  ;;  %v5998_v32 = vld [vmem:[#allocation10 + $0x460] sm:$0xff]  ;;  %v5149_v4 = vld [vmem:[#allocation4 + $0x8f] sm:$0xff] }
 0x5f0   : > { %8837 = vmatprep.subr.bf16.mxu1 %v8836_v18 }
 0x5f2   : > { %6951 = vmatmul.mubr.f32.gmra.mrb[196].mxu1 %v5140_v45 }
 0x5f3   : > { %6954 = vmatprep.mubr.f32.mxu1 %v12768_v35  ;;  %8839 = vmatpush3.bf16.msra.mxu1 %v8836_v18  ;;  %v8852_v35 = vpack.c.bf16 %v5999_v5, %v5998_v32  ;;  %v5143_v18 = vld [vmem:[#allocation4 + $0x5f] sm:$0xff]  ;;  %v5156_v32 = vld [vmem:[#allocation4 + $0xc7] sm:$0xff] }
 0x5f4   : > { %8841 = vmatprep.subr.bf16.mxu1 %v8840_v26 }
 0x5f6   : > { %6955 = vmatmul.mubr.f32.gmra.mrb[110].mxu1 %v5141_v60  ;;  %v6001_v60 = vld [vmem:[#allocation10 + $0x478] sm:$0xff] }
 0x5f7   : > { %6959 = vmatprep.mubr.f32.mxu1 %v12773_v30  ;;  %8843 = vmatpush3.bf16.msra.mxu1 %v8840_v26  ;;  %v5144_v30 = vld [vmem:[#allocation4 + $0x67] sm:$0xff]  ;;  %v5145_v26 = vld [vmem:[#allocation4 + $0x6f] sm:$0xff] }
 0x5f8   : > { %8845 = vmatprep.subr.bf16.mxu1 %v8844_v58 }
 0x5f9   : > { %v6584_v37 = vpop.f32.mrb[162].mxu1 }
 0x5fa   : > { %v6585_v22 = vpop.f32.mrb[163].mxu1  ;;  %6960 = vmatmul.mubr.f32.gmra.mrb[112].mxu1 %v5142_v54  ;;  %v5152_v37 = vld [vmem:[#allocation4 + $0xa7] sm:$0xff]  ;;  %v5154_v54 = vld [vmem:[#allocation4 + $0xb7] sm:$0xff] }
 0x5fb   : > { %6964 = vmatprep.mubr.f32.mxu1 %v12778_v46  ;;  %8847 = vmatpush3.bf16.msra.mxu1 %v8844_v58  ;;  %v5146_v46 = vld [vmem:[#allocation4 + $0x77] sm:$0xff] }
 0x5fc   : > { %8849 = vmatprep.subr.bf16.mxu1 %v8848_v23 }
 0x5fe   : > { %6965 = vmatmul.mubr.f32.gmra.mrb[198].mxu1 %v5143_v18 }
 0x5ff   : > { %6968 = vmatprep.mubr.f32.mxu1 %v12783_v16  ;;  %8851 = vmatpush3.bf16.msra.mxu1 %v8848_v23 }
 0x600   : > { %8853 = vmatprep.subr.bf16.mxu1 %v8852_v35 }
 0x602   : > { %6969 = vmatmul.mubr.f32.gmra.mrb[116].mxu1 %v5144_v30  ;;  %v5162_v30 = vld [vmem:[#allocation4 + $0xf7] sm:$0xff] }
 0x603   : > { %6973 = vmatprep.mubr.f32.mxu1 %v12788_v40  ;;  %8855 = vmatpush3.bf16.msra.mxu1 %v8852_v35  ;;  %v6000_v40 = vld [vmem:[#allocation10 + $0x470] sm:$0xff]  ;;  %v5159_v35 = vld [vmem:[#allocation4 + $0xdf] sm:$0xff] }
 0x604   : > { %v8856_v39 = vpack.c.bf16 %v6001_v60, %v6000_v40  ;;  %v5177_v60 = vld [vmem:[#allocation4 + $0x16f] sm:$0xff] }
 0x605   : > { %v6663_v11 = vpop.f32.mrb[164].mxu1 }
 0x606   : > { %v6664_v45 = vpop.f32.mrb[165].mxu1  ;;  %6974 = vmatmul.mubr.f32.gmra.mrb[118].mxu1 %v5145_v26  ;;  %8857 = vmatprep.subr.bf16.mxu1 %v8856_v39  ;;  %v5165_v26 = vld [vmem:[#allocation4 + $0x10f] sm:$0xff] }
 0x607   : > { %6978 = vmatprep.mubr.f32.mxu1 %v12793_v19  ;;  %8859 = vmatpush3.bf16.msra.mxu1 %v8856_v39  ;;  %v5150_v19 = vld [vmem:[#allocation4 + $0x97] sm:$0xff] }
 0x60a   : > { %6979 = vmatmul.mubr.f32.gmra.mrb[200].mxu1 %v5146_v46  ;;  %v5168_v46 = vld [vmem:[#allocation4 + $0x127] sm:$0xff] }
 0x60b   : > { %6982 = vmatprep.mubr.f32.mxu1 %v12798_v7 }
 0x60e   : > { %6983 = vmatmul.mubr.f32.gmra.mrb[122].mxu1 %v5147_v33 }
 0x60f   : > { %6987 = vmatprep.mubr.f32.mxu1 %v12803_v44  ;;  %v5151_v44 = vld [vmem:[#allocation4 + $0x9f] sm:$0xff] }
 0x611   : > { %v6677_v16 = vpop.f32.mrb[166].mxu1 }
 0x612   : > { %v6678_v58 = vpop.f32.mrb[167].mxu1  ;;  %6988 = vmatmul.mubr.f32.gmra.mrb[124].mxu1 %v5148_v53  ;;  %v5171_v16 = vld [vmem:[#allocation4 + $0x13f] sm:$0xff] }
 0x613   : > { %6992 = vmatprep.mubr.f32.mxu1 %v12808_v24  ;;  %v5153_v24 = vld [vmem:[#allocation4 + $0xaf] sm:$0xff]  ;;  %v5174_v58 = vld [vmem:[#allocation4 + $0x157] sm:$0xff] }
 0x616   : > { %6993 = vmatmul.mubr.f32.gmra.mrb[202].mxu1 %v5149_v4  ;;  %v5180_v4 = vld [vmem:[#allocation4 + $0x187] sm:$0xff] }
 0x617   : > { %6996 = vmatprep.mubr.f32.mxu1 %v12813_v13 }
 0x61a   : > { %6997 = vmatmul.mubr.f32.gmra.mrb[128].mxu1 %v5150_v19 }
 0x61b   : > { %7001 = vmatprep.mubr.f32.mxu1 %v12817_v6  ;;  %v5155_v6 = vld [vmem:[#allocation4 + $0xbf] sm:$0xff] }
 0x61d   : > { %v6691_v7 = vpop.f32.mrb[168].mxu1 }
 0x61e   : > { %v6692_v23 = vpop.f32.mrb[169].mxu1  ;;  %7002 = vmatmul.mubr.f32.gmra.mrb[130].mxu1 %v5151_v44  ;;  %v9620_v7 = vld [vmem:[#allocation2 + $0x8] sm:$0xff]  ;;  %v5183_v44 = vld [vmem:[#allocation4 + $0x19f] sm:$0xff] }
 0x61f   : > { %7006 = vmatprep.mubr.f32.mxu1 %v12823_v20 }
 0x622   : > { %7007 = vmatmul.mubr.f32.gmra.mrb[204].mxu1 %v5152_v37  ;;  %v5185_v37 = vld [vmem:[#allocation4 + $0x1af] sm:$0xff] }
 0x623   : > { %7010 = vmatprep.mubr.f32.mxu1 %v12828_v52  ;;  %v5157_v52 = vld [vmem:[#allocation4 + $0xcf] sm:$0xff] }
 0x626   : > { %7011 = vmatmul.mubr.f32.gmra.mrb[134].mxu1 %v5153_v24  ;;  %v5331_v24 = vld [vmem:[#allocation4 + $0x41] sm:$0xff] }
 0x627   : > { %7015 = vmatprep.mubr.f32.mxu1 %v12832_v17  ;;  %v5158_v17 = vld [vmem:[#allocation4 + $0xd7] sm:$0xff] }
 0x629   : > { %v6705_v13 = vpop.f32.mrb[170].mxu1 }
 0x62a   : > { %v6706_v22 = vpop.f32.mrb[171].mxu1  ;;  %7016 = vmatmul.mubr.f32.gmra.mrb[136].mxu1 %v5154_v54  ;;  %v5332_v13 = vld [vmem:[#allocation4 + $0x49] sm:$0xff]  ;;  %v5333_v54 = vld [vmem:[#allocation4 + $0x51] sm:$0xff] }
 0x62b   : > { %7020 = vmatprep.mubr.f32.mxu1 %v12836_v2 }
 0x62e   : > { %7021 = vmatmul.mubr.f32.gmra.mrb[206].mxu1 %v5155_v6  ;;  %v5334_v6 = vld [vmem:[#allocation4 + $0x59] sm:$0xff] }
 0x62f   : > { %7024 = vmatprep.mubr.f32.mxu1 %v12840_v27  ;;  %v5160_v27 = vld [vmem:[#allocation4 + $0xe7] sm:$0xff] }
 0x632   : > { %7025 = vmatmul.mubr.f32.gmra.mrb[140].mxu1 %v5156_v32  ;;  %v5335_v32 = vld [vmem:[#allocation4 + $0x61] sm:$0xff] }
 0x633   : > { %7029 = vmatprep.mubr.f32.mxu1 %v12844_v1  ;;  %v5161_v1 = vld [vmem:[#allocation4 + $0xef] sm:$0xff] }
 0x635   : > { %v6719_v20 = vpop.f32.mrb[172].mxu1 }
 0x636   : > { %v6720_v5 = vpop.f32.mrb[173].mxu1  ;;  %7030 = vmatmul.mubr.f32.gmra.mrb[142].mxu1 %v5157_v52  ;;  %v5336_v20 = vld [vmem:[#allocation4 + $0x69] sm:$0xff]  ;;  %v5337_v52 = vld [vmem:[#allocation4 + $0x71] sm:$0xff] }
 0x637   : > { %7034 = vmatprep.mubr.f32.mxu1 %v12848_v42  ;;  %v5338_v5 = vld [vmem:[#allocation4 + $0x79] sm:$0xff] }
 0x63a   : > { %7035 = vmatmul.mubr.f32.gmra.mrb[208].mxu1 %v5158_v17  ;;  %v13002_v17 = vld [vmem:[%s13432_s4] ss:$0 sm:$0xff] }
 0x63b   : > { %7038 = vmatprep.mubr.f32.mxu1 %v12852_v15  ;;  %v5163_v15 = vld [vmem:[#allocation4 + $0xff] sm:$0xff] }
 0x63e   : > { %7039 = vmatmul.mubr.f32.gmra.mrb[50].mxu1 %v5159_v35 }
 0x63f   : > { %7043 = vmatprep.mubr.f32.mxu1 %v12856_v25  ;;  %v5164_v25 = vld [vmem:[#allocation4 + $0x107] sm:$0xff] }
 0x641   : > { %v6733_v2 = vpop.f32.mrb[174].mxu1 }
 0x642   : > { %v6734_v18 = vpop.f32.mrb[175].mxu1  ;;  %7044 = vmatmul.mubr.f32.gmra.mrb[52].mxu1 %v5160_v27  ;;  %v5339_v2 = vld [vmem:[#allocation4 + $0x81] sm:$0xff]  ;;  %v6076_v27 = vadd.f32 %v13002_v17, %v12557_v3 }
 0x643   : > { %7048 = vmatprep.mubr.f32.mxu1 %v12860_v36 }
 0x646   : > { %7049 = vmatmul.mubr.f32.gmra.mrb[210].mxu1 %v5161_v1  ;;  %v5340_v1 = vld [vmem:[#allocation4 + $0x89] sm:$0xff] }
 0x647   : > { %7052 = vmatprep.mubr.f32.mxu1 %v12864_v0  ;;  %v5166_v0 = vld [vmem:[#allocation4 + $0x117] sm:$0xff] }
 0x64a   : > { %7053 = vmatmul.mubr.f32.gmra.mrb[56].mxu1 %v5162_v30 }
 0x64b   : > { %7057 = vmatprep.mubr.f32.mxu1 %v12868_v50  ;;  %v5167_v50 = vld [vmem:[#allocation4 + $0x11f] sm:$0xff] }
 0x64d   : > { %v6747_v42 = vpop.f32.mrb[176].mxu1 }
 0x64e   : > { %v6748_v11 = vpop.f32.mrb[177].mxu1  ;;  %7058 = vmatmul.mubr.f32.gmra.mrb[58].mxu1 %v5163_v15  ;;  %v5341_v42 = vld [vmem:[#allocation4 + $0x91] sm:$0xff]  ;;  %v6081_v15 = vadd.f32 %v13002_v17, %v12559_v63  ;;  %v5347_v63 = vld [vmem:[#allocation4 + $0xc1] sm:$0xff] }
 0x64f   : > { %7062 = vmatprep.mubr.f32.mxu1 %v12872_v59 }
 0x652   : > { %7063 = vmatmul.mubr.f32.gmra.mrb[212].mxu1 %v5164_v25 }
 0x653   : > { %7066 = vmatprep.mubr.f32.mxu1 %v12876_v9  ;;  %v5169_v9 = vld [vmem:[#allocation4 + $0x12f] sm:$0xff] }
 0x656   : > { %7067 = vmatmul.mubr.f32.gmra.mrb[62].mxu1 %v5165_v26  ;;  %v5342_v26 = vld [vmem:[#allocation4 + $0x99] sm:$0xff] }
 0x657   : > { %7071 = vmatprep.mubr.f32.mxu1 %v12880_v21  ;;  %v5170_v21 = vld [vmem:[#allocation4 + $0x137] sm:$0xff] }
 0x659   : > { %v6761_v36 = vpop.f32.mrb[178].mxu1 }
 0x65a   : > { %v6762_v45 = vpop.f32.mrb[179].mxu1  ;;  %7072 = vmatmul.mubr.f32.gmra.mrb[64].mxu1 %v5166_v0  ;;  %v5343_v0 = vld [vmem:[#allocation4 + $0xa1] sm:$0xff] }
 0x65b   : > { %7076 = vmatprep.mubr.f32.mxu1 %v12884_v57 }
 0x65e   : > { %7077 = vmatmul.mubr.f32.gmra.mrb[214].mxu1 %v5167_v50  ;;  %v5344_v50 = vld [vmem:[#allocation4 + $0xa9] sm:$0xff] }
 0x65f   : > { %7080 = vmatprep.mubr.f32.mxu1 %v12888_v34  ;;  %v5172_v34 = vld [vmem:[#allocation4 + $0x147] sm:$0xff] }
 0x662   : > { %7081 = vmatmul.mubr.f32.gmra.mrb[68].mxu1 %v5168_v46 }
 0x663   : > { %7085 = vmatprep.mubr.f32.mxu1 %v12892_v47  ;;  %v5173_v47 = vld [vmem:[#allocation4 + $0x14f] sm:$0xff] }
 0x665   : > { %v6775_v59 = vpop.f32.mrb[180].mxu1 }
 0x666   : > { %v6776_v33 = vpop.f32.mrb[181].mxu1  ;;  %7086 = vmatmul.mubr.f32.gmra.mrb[70].mxu1 %v5169_v9  ;;  %v5345_v59 = vld [vmem:[#allocation4 + $0xb1] sm:$0xff] }
 0x667   : > { %7090 = vmatprep.mubr.f32.mxu1 %v12896_v51  ;;  %v5346_v33 = vld [vmem:[#allocation4 + $0xb9] sm:$0xff] }
 0x66a   : > { %7091 = vmatmul.mubr.f32.gmra.mrb[216].mxu1 %v5170_v21  ;;  %v5348_v21 = vld [vmem:[#allocation4 + $0xc9] sm:$0xff] }
 0x66b   : > { %7094 = vmatprep.mubr.f32.mxu1 %v12900_v8  ;;  %v5175_v8 = vld [vmem:[#allocation4 + $0x15f] sm:$0xff] }
 0x66e   : > { %7095 = vmatmul.mubr.f32.gmra.mrb[74].mxu1 %v5171_v16  ;;  %v6095_v16 = vadd.f32 %v13002_v17, %v12590_v41 }
 0x66f   : > { %7099 = vmatprep.mubr.f32.mxu1 %v12904_v61  ;;  %v5176_v61 = vld [vmem:[#allocation4 + $0x167] sm:$0xff] }
 0x671   : > { %v6789_v57 = vpop.f32.mrb[182].mxu1 }
 0x672   : > { %v6790_v53 = vpop.f32.mrb[183].mxu1  ;;  %7100 = vmatmul.mubr.f32.gmra.mrb[76].mxu1 %v5172_v34  ;;  %v5349_v34 = vld [vmem:[#allocation4 + $0xd1] sm:$0xff] }
 0x673   : > { %7104 = vmatprep.mubr.f32.mxu1 %v12908_v49 }
 0x676   : > { %7105 = vmatmul.mubr.f32.gmra.mrb[218].mxu1 %v5173_v47 }
 0x677   : > { %7108 = vmatprep.mubr.f32.mxu1 %v12912_v31  ;;  %v5178_v31 = vld [vmem:[#allocation4 + $0x177] sm:$0xff] }
 0x67a   : > { %7109 = vmatmul.mubr.f32.gmra.mrb[80].mxu1 %v5174_v58  ;;  %v5350_v58 = vld [vmem:[#allocation4 + $0xd9] sm:$0xff] }
 0x67b   : > { %7113 = vmatprep.mubr.f32.mxu1 %v12916_v48  ;;  %v5179_v48 = vld [vmem:[#allocation4 + $0x17f] sm:$0xff] }
 0x67d   : > { %v6803_v51 = vpop.f32.mrb[184].mxu1 }
 0x67e   : > { %v6804_v40 = vpop.f32.mrb[185].mxu1  ;;  %7114 = vmatmul.mubr.f32.gmra.mrb[82].mxu1 %v5175_v8  ;;  %v5351_v8 = vld [vmem:[#allocation4 + $0xe1] sm:$0xff] }
 0x67f   : > { %7118 = vmatprep.mubr.f32.mxu1 %v12920_v43 }
 0x682   : > { %7119 = vmatmul.mubr.f32.gmra.mrb[220].mxu1 %v5176_v61  ;;  %v5352_v61 = vld [vmem:[#allocation4 + $0xe9] sm:$0xff] }
 0x683   : > { %7122 = vmatprep.mubr.f32.mxu1 %v12924_v12  ;;  %v5181_v12 = vld [vmem:[#allocation4 + $0x18f] sm:$0xff] }
 0x686   : > { %7123 = vmatmul.mubr.f32.gmra.mrb[86].mxu1 %v5177_v60  ;;  %v6104_v60 = vadd.f32 %v13002_v17, %v12600_v10 }
 0x687   : > { %7127 = vmatprep.mubr.f32.mxu1 %v12928_v55  ;;  %v5182_v55 = vld [vmem:[#allocation4 + $0x197] sm:$0xff] }
 0x689   : > { %v6817_v49 = vpop.f32.mrb[186].mxu1 }
 0x68a   : > { %v6818_v39 = vpop.f32.mrb[187].mxu1  ;;  %7128 = vmatmul.mubr.f32.gmra.mrb[88].mxu1 %v5178_v31  ;;  %v5353_v31 = vld [vmem:[#allocation4 + $0xf1] sm:$0xff] }
 0x68b   : > { %7132 = vmatprep.mubr.f32.mxu1 %v12932_v14  ;;  %v5184_v14 = vld [vmem:[#allocation4 + $0x1a7] sm:$0xff] }
 0x68e   : > { %7133 = vmatmul.mubr.f32.gmra.mrb[222].mxu1 %v5179_v48  ;;  %v5354_v48 = vld [vmem:[#allocation4 + $0xf9] sm:$0xff] }
 0x68f   : > { %7136 = vmatprep.mubr.f32.mxu1 %v12938_v29 }
 0x692   : > { %7137 = vmatmul.mubr.f32.gmra.mrb[92].mxu1 %v5180_v4  ;;  %v6109_v4 = vadd.f32 %v13002_v17, %v12606_v56  ;;  %v6123_v56 = vadd.f32 %v13002_v17, %v12622_v28 }
 0x693   : > { %7141 = vmatprep.mubr.f32.mxu1 %v12944_v38  ;;  %v5330_v38 = vld [vmem:[#allocation4 + $0x39] sm:$0xff] }
 0x695   : > { %v6831_v43 = vpop.f32.mrb[188].mxu1 }
 0x696   : > { %v6832_v19 = vpop.f32.mrb[189].mxu1  ;;  %7142 = vmatmul.mubr.f32.gmra.mrb[94].mxu1 %v5181_v12  ;;  %v5355_v12 = vld [vmem:[#allocation4 + $0x101] sm:$0xff] }
 0x697   : > { %7146 = vmatprep.mubr.f32.mxu1 %v12950_v62 }
 0x69a   : > { %7147 = vmatmul.mubr.f32.gmra.mrb[224].mxu1 %v5182_v55 }
 0x69b   : > { %7150 = vmatprep.mubr.f32.mxu1 %v9620_v7 }
 0x69e   : > { %7151 = vmatmul.mubr.f32.gmra.mrb[98].mxu1 %v5183_v44  ;;  %v5357_v44 = vld [vmem:[#allocation4 + $0x111] sm:$0xff] }
 0x69f   : > { %7155 = vmatprep.mubr.f32.mxu1 %v9620_v7 }
 0x6a1   : > { %v6845_v23 = vpop.f32.mrb[190].mxu1 }
 0x6a2   : > { %v6846_v29 = vpop.f32.mrb[191].mxu1  ;;  %7156 = vmatmul.mubr.f32.gmra.mrb[100].mxu1 %v5184_v14  ;;  %v5358_v23 = vld [vmem:[#allocation4 + $0x119] sm:$0xff] }
 0x6a3   : > { %7160 = vmatprep.mubr.f32.mxu1 %v9620_v7  ;;  %v5356_v7 = vld [vmem:[#allocation4 + $0x109] sm:$0xff]  ;;  %v5359_v29 = vld [vmem:[#allocation4 + $0x121] sm:$0xff] }
 0x6a6   : > { %7161 = vmatmul.mubr.f32.gmra.mrb[226].mxu1 %v5185_v37  ;;  %v5360_v37 = vld [vmem:[#allocation4 + $0x129] sm:$0xff] }
 0x6a7   : > { %8340 = vmatprep.mubr.f32.mxu1 %v5330_v38 }
 0x6aa   : > { %8341 = vmatmul.mubr.f32.vlgmr.msra.gmra.mrb[228].mxu1 %v5331_v24  ;;  %v5361_v24 = vld [vmem:[#allocation4 + $0x131] sm:$0xff] }
 0x6ab   : > { %8343 = vmatprep.mubr.f32.mxu1 %v5332_v13 }
 0x6ad   : > { %v6859_v62 = vpop.f32.mrb[192].mxu1 }
 0x6ae   : > { %v6860_v22 = vpop.f32.mrb[193].mxu1  ;;  %8344 = vmatmul.mubr.f32.gmra.mrb[110].mxu1 %v5333_v54  ;;  %v5362_v54 = vld [vmem:[#allocation4 + $0x139] sm:$0xff] }
 0x6af   : > { %8346 = vmatprep.mubr.f32.mxu1 %v5334_v6  ;;  %v5363_v6 = vld [vmem:[#allocation4 + $0x141] sm:$0xff] }
 0x6b2   : > { %8347 = vmatmul.mubr.f32.gmra.mrb[230].mxu1 %v5335_v32 }
 0x6b3   : > { %8349 = vmatprep.mubr.f32.mxu1 %v5336_v20  ;;  %v5364_v20 = vld [vmem:[#allocation4 + $0x149] sm:$0xff] }
 0x6b6   : > { %8350 = vmatmul.mubr.f32.gmra.mrb[232].mxu1 %v5337_v52  ;;  %v13662_v52 = vld [vmem:[#allocation18_spill] sm:$0xff] }
 0x6b7   : > { %8352 = vmatprep.mubr.f32.mxu1 %v5338_v5  ;;  %v6132_v5 = vadd.f32 %v13002_v17, %v13662_v52 }
 0x6b9   : > { %v6873_v35 = vpop.f32.mrb[194].mxu1 }
 0x6ba   : > { %v6874_v18 = vpop.f32.mrb[195].mxu1  ;;  %8353 = vmatmul.mubr.f32.gmra.mrb[122].mxu1 %v5339_v2  ;;  %v5365_v2 = vld [vmem:[#allocation4 + $0x151] sm:$0xff] }
 0x6bb   : > { %8355 = vmatprep.mubr.f32.mxu1 %v5340_v1  ;;  %v5366_v18 = vld [vmem:[#allocation4 + $0x159] sm:$0xff] }
 0x6bc   : > { %v13663_v1 = vld [vmem:[#allocation20_spill] sm:$0xff] }
 0x6bd   : > { %v6942_v30 = vpop.f32.mrb[104].mxu1 }
 0x6be   : > { %v13008_v11 = vadd.f32 %v6942_v30, %v6076_v27  ;;  %v6944_v25 = vpop.f32.mrb[105].mxu1  ;;  %8356 = vmatmul.mubr.f32.gmra.mrb[234].mxu1 %v5341_v42  ;;  %v6137_v30 = vadd.f32 %v13002_v17, %v13663_v1 }
 0x6bf   : > { %8358 = vmatprep.mubr.f32.mxu1 %v5342_v26 }
 0x6c1   : > { %v6947_v36 = vpop.f32.mrb[106].mxu1 }
 0x6c2   : > { %v13010_v45 = vadd.f32 %v6947_v36, %v6081_v15  ;;  %v6949_v3 = vpop.f32.mrb[107].mxu1  ;;  %8359 = vmatmul.mubr.f32.gmra.mrb[236].mxu1 %v5343_v0  ;;  %v5367_v15 = vld [vmem:[#allocation4 + $0x161] sm:$0xff]  ;;  %v5368_v36 = vld [vmem:[#allocation4 + $0x169] sm:$0xff] }
 0x6c3   : > { %8361 = vmatprep.mubr.f32.mxu1 %v5344_v50  ;;  %v5369_v3 = vld [vmem:[#allocation4 + $0x171] sm:$0xff] }
 0x6c5   : > { %v6952_v46 = vpop.f32.mrb[196].mxu1 }
 0x6c6   : > { %v6953_v9 = vpop.f32.mrb[197].mxu1  ;;  %8362 = vmatmul.mubr.f32.gmra.mrb[134].mxu1 %v5345_v59  ;;  %v5370_v46 = vld [vmem:[#allocation4 + $0x179] sm:$0xff]  ;;  %v5371_v59 = vld [vmem:[#allocation4 + $0x181] sm:$0xff] }
 0x6c7   : > { %8364 = vmatprep.mubr.f32.mxu1 %v5346_v33  ;;  %v13664_v9 = vld [vmem:[#allocation24_spill] sm:$0xff]  ;;  %v13665_v33 = vld [vmem:[#allocation21_spill] sm:$0xff] }
 0x6ca   : > { %8365 = vmatmul.mubr.f32.gmra.mrb[238].mxu1 %v5347_v63  ;;  %v6151_v63 = vadd.f32 %v13002_v17, %v13665_v33 }
 0x6cb   : > { %8367 = vmatprep.mubr.f32.mxu1 %v5348_v21 }
 0x6cd   : > { %v6961_v57 = vpop.f32.mrb[112].mxu1 }
 0x6ce   : > { %v13014_v53 = vadd.f32 %v6961_v57, %v6095_v16  ;;  %v6963_v47 = vpop.f32.mrb[113].mxu1  ;;  %8368 = vmatmul.mubr.f32.gmra.mrb[240].mxu1 %v5349_v34  ;;  %v13666_v34 = vld [vmem:[#allocation25_spill] sm:$0xff] }
 0x6cf   : > { %8370 = vmatprep.mubr.f32.mxu1 %v5350_v58  ;;  %v13667_v47 = vld [vmem:[#allocation26_spill] sm:$0xff]  ;;  %v5375_v58 = vld [vmem:[#allocation4 + $0x1a1] sm:$0xff] }
 0x6d1   : > { %v6966_v51 = vpop.f32.mrb[198].mxu1 }
 0x6d2   : > { %v6967_v40 = vpop.f32.mrb[199].mxu1  ;;  %8371 = vmatmul.mubr.f32.gmra.mrb[50].mxu1 %v5351_v8  ;;  %v5376_v51 = vld [vmem:[#allocation4 + $0x1a9] sm:$0xff] }
 0x6d3   : > { %8373 = vmatprep.mubr.f32.mxu1 %v5352_v61  ;;  %v5377_v61 = vld [vmem:[#allocation4 + $0x1b1] sm:$0xff] }
 0x6d5   : > { %v6970_v49 = vpop.f32.mrb[116].mxu1 }
 0x6d6   : > { %v13018_v41 = vadd.f32 %v6970_v49, %v6104_v60  ;;  %v6972_v39 = vpop.f32.mrb[117].mxu1  ;;  %8374 = vmatmul.mubr.f32.gmra.mrb[242].mxu1 %v5353_v31  ;;  %v13668_v60 = vld [vmem:[#allocation22_spill] sm:$0xff] }
 0x6d7   : > { %8376 = vmatprep.mubr.f32.mxu1 %v5354_v48  ;;  %v6160_v49 = vadd.f32 %v13002_v17, %v13668_v60 }
 0x6d9   : > { %v6975_v43 = vpop.f32.mrb[118].mxu1 }
 0x6da   : > { %v13022_v19 = vadd.f32 %v6975_v43, %v6109_v4  ;;  %v6977_v55 = vpop.f32.mrb[119].mxu1  ;;  %8377 = vmatmul.mubr.f32.gmra.mrb[244].mxu1 %v5355_v12  ;;  %v13669_v4 = vld [vmem:[#allocation23_spill] sm:$0xff] }
 0x6db   : > { %8379 = vmatprep.mubr.f32.mxu1 %v5356_v7  ;;  %v6165_v43 = vadd.f32 %v13002_v17, %v13669_v4 }
 0x6dd   : > { %v6980_v10 = vpop.f32.mrb[200].mxu1 }
 0x6de   : > { %v6981_v14 = vpop.f32.mrb[201].mxu1  ;;  %8380 = vmatmul.mubr.f32.gmra.mrb[62].mxu1 %v5357_v44 }
 0x6df   : > { %8382 = vmatprep.mubr.f32.mxu1 %v5358_v23 }
 0x6e2   : > { %8383 = vmatmul.mubr.f32.gmra.mrb[246].mxu1 %v5359_v29 }
 0x6e3   : > { %8385 = vmatprep.mubr.f32.mxu1 %v5360_v37 }
 0x6e5   : > { %v6989_v38 = vpop.f32.mrb[124].mxu1 }
 0x6e6   : > { %v13026_v13 = vadd.f32 %v6989_v38, %v6123_v56  ;;  %v6991_v62 = vpop.f32.mrb[125].mxu1  ;;  %8386 = vmatmul.mubr.f32.gmra.mrb[248].mxu1 %v5361_v24 }
 0x6e7   : > { %8388 = vmatprep.mubr.f32.mxu1 %v5362_v54 }
 0x6e9   : > { %v6994_v22 = vpop.f32.mrb[202].mxu1 }
 0x6ea   : > { %v6995_v32 = vpop.f32.mrb[203].mxu1  ;;  %8389 = vmatmul.mubr.f32.gmra.mrb[74].mxu1 %v5363_v6 }
 0x6eb   : > { %8391 = vmatprep.mubr.f32.mxu1 %v5364_v20 }
 0x6ed   : > { %v6998_v35 = vpop.f32.mrb[128].mxu1 }
 0x6ee   : > { %v13030_v28 = vadd.f32 %v6998_v35, %v6132_v5  ;;  %v7000_v27 = vpop.f32.mrb[129].mxu1  ;;  %8392 = vmatmul.mubr.f32.gmra.mrb[250].mxu1 %v5365_v2 }
 0x6ef   : > { %8394 = vmatprep.mubr.f32.mxu1 %v5366_v18 }
 0x6f1   : > { %v7003_v42 = vpop.f32.mrb[130].mxu1 }
 0x6f2   : > { %v13034_v25 = vadd.f32 %v7003_v42, %v6137_v30  ;;  %v7005_v26 = vpop.f32.mrb[131].mxu1  ;;  %8395 = vmatmul.mubr.f32.gmra.mrb[252].mxu1 %v5367_v15 }
 0x6f3   : > { %8397 = vmatprep.mubr.f32.mxu1 %v5368_v36 }
 0x6f5   : > { %v7008_v0 = vpop.f32.mrb[204].mxu1 }
 0x6f6   : > { %v7009_v50 = vpop.f32.mrb[205].mxu1  ;;  %8398 = vmatmul.mubr.f32.gmra.mrb[86].mxu1 %v5369_v3 }
 0x6f7   : > { %8400 = vmatprep.mubr.f32.mxu1 %v5370_v46 }
 0x6fa   : > { %8401 = vmatmul.mubr.f32.gmra.mrb[254].mxu1 %v5371_v59 }
 0x6fb   : > { %8403 = vmatprep.mubr.f32.mxu1 %v13664_v9 }
 0x6fd   : > { %v7017_v21 = vpop.f32.mrb[136].mxu1 }
 0x6fe   : > { %v13039_v16 = vadd.f32 %v7017_v21, %v6151_v63  ;;  %v7019_v57 = vpop.f32.mrb[137].mxu1  ;;  %8404 = vmatmul.mubr.f32.gmra.mrb[0].mxu1 %v13666_v34 }
 0x6ff   : > { %8406 = vmatprep.mubr.f32.mxu1 %v13667_v47 }
 0x701   : > { %v7022_v8 = vpop.f32.mrb[206].mxu1 }
 0x702   : > { %v7023_v40 = vpop.f32.mrb[207].mxu1  ;;  %8407 = vmatmul.mubr.f32.gmra.mrb[98].mxu1 %v5375_v58 }
 0x703   : > { %8409 = vmatprep.mubr.f32.mxu1 %v5376_v51 }
 0x705   : > { %v7026_v31 = vpop.f32.mrb[140].mxu1 }
 0x706   : > { %v13045_v39 = vadd.f32 %v7026_v31, %v6160_v49  ;;  %v7028_v48 = vpop.f32.mrb[141].mxu1  ;;  %8410 = vmatmul.mubr.f32.gmra.mrb[2].mxu1 %v5377_v61 }
 0x709   : > { %v7031_v12 = vpop.f32.mrb[142].mxu1 }
 0x70a   : > { %v13049_v55 = vadd.f32 %v7031_v12, %v6165_v43  ;;  %v7033_v7 = vpop.f32.mrb[143].mxu1  ;;  %v13670_v12 = vld [vmem:[#allocation17_spill] sm:$0xff] }
 0x70b   : > { %v6090_v7 = vadd.f32 %v13002_v17, %v13670_v12 }
 0x70d   : > { %v7036_v10 = vpop.f32.mrb[208].mxu1 }
 0x70e   : > { %v7037_v44 = vpop.f32.mrb[209].mxu1 }
 0x715   : > { %v13051_v14 = vpop.f32.mrb[52].mxu1 }
 0x716   : > { %v7047_v23 = vpop.f32.mrb[53].mxu1 }
 0x719   : > { %v7050_v29 = vpop.f32.mrb[210].mxu1 }
 0x71a   : > { %v7051_v37 = vpop.f32.mrb[211].mxu1 }
 0x71d   : > { %v13053_v56 = vpop.f32.mrb[56].mxu1 }
 0x71e   : > { %v7056_v38 = vpop.f32.mrb[57].mxu1 }
 0x721   : > { %v13055_v24 = vpop.f32.mrb[58].mxu1 }
 0x722   : > { %v7061_v62 = vpop.f32.mrb[59].mxu1 }
 0x725   : > { %v7064_v54 = vpop.f32.mrb[212].mxu1 }
 0x726   : > { %v7065_v22 = vpop.f32.mrb[213].mxu1 }
 0x72d   : > { %v13057_v6 = vpop.f32.mrb[64].mxu1 }
 0x72e   : > { %v7075_v32 = vpop.f32.mrb[65].mxu1 }
 0x731   : > { %v7078_v20 = vpop.f32.mrb[214].mxu1 }
 0x732   : > { %v7079_v52 = vpop.f32.mrb[215].mxu1 }
 0x735   : > { %v13059_v5 = vpop.f32.mrb[68].mxu1 }
 0x736   : > { %v7084_v35 = vpop.f32.mrb[69].mxu1 }
 0x739   : > { %v13061_v2 = vpop.f32.mrb[70].mxu1 }
 0x73a   : > { %v7089_v27 = vpop.f32.mrb[71].mxu1 }
 0x73d   : > { %v7092_v18 = vpop.f32.mrb[216].mxu1 }
 0x73e   : > { %v7093_v1 = vpop.f32.mrb[217].mxu1 }
 0x745   : > { %v13063_v30 = vpop.f32.mrb[76].mxu1 }
 0x746   : > { %v7103_v42 = vpop.f32.mrb[77].mxu1 }
 0x747   : > { %v13671_v42 = vld [vmem:[#allocation16_spill] sm:$0xff] }
 0x749   : > { %v7106_v15 = vpop.f32.mrb[218].mxu1 }
 0x74a   : > { %v7107_v26 = vpop.f32.mrb[219].mxu1  ;;  %v6118_v15 = vadd.f32 %v13002_v17, %v13671_v42 }
 0x74d   : > { %v13065_v36 = vpop.f32.mrb[80].mxu1 }
 0x74e   : > { %v7112_v0 = vpop.f32.mrb[81].mxu1 }
 0x751   : > { %v13067_v3 = vpop.f32.mrb[82].mxu1 }
 0x752   : > { %v7117_v50 = vpop.f32.mrb[83].mxu1 }
 0x755   : > { %v7120_v46 = vpop.f32.mrb[220].mxu1 }
 0x756   : > { %v7121_v59 = vpop.f32.mrb[221].mxu1 }
 0x75d   : > { %v13069_v9 = vpop.f32.mrb[88].mxu1 }
 0x75e   : > { %v7131_v33 = vpop.f32.mrb[89].mxu1 }
 0x761   : > { %v7134_v63 = vpop.f32.mrb[222].mxu1 }
 0x762   : > { %v7135_v21 = vpop.f32.mrb[223].mxu1 }
 0x765   : > { %v13071_v57 = vpop.f32.mrb[92].mxu1 }
 0x766   : > { %v7140_v34 = vpop.f32.mrb[93].mxu1 }
 0x769   : > { %v13073_v47 = vpop.f32.mrb[94].mxu1 }
 0x76a   : > { %v7145_v58 = vpop.f32.mrb[95].mxu1 }
 0x76d   : > { %v7148_v51 = vpop.f32.mrb[224].mxu1 }
 0x76e   : > { %v7149_v8 = vpop.f32.mrb[225].mxu1 }
 0x775   : > { %v13075_v40 = vpop.f32.mrb[100].mxu1 }
 0x776   : > { %v7159_v61 = vpop.f32.mrb[101].mxu1 }
 0x779   : > { %v7162_v60 = vpop.f32.mrb[226].mxu1 }
 0x77a   : > { %v7163_v49 = vpop.f32.mrb[227].mxu1 }
 0x77d   : > { %v8342_v31 = vpop.f32.mrb[228].mxu1 }
 0x77e   : > { %v7237_v48 = vadd.f32 %v13010_v45, %v8342_v31  ;;  %v7231_v4 = vpop.f32.mrb[229].mxu1 }
 0x77f   : > { %v7232_v43 = vadd.f32 %v13008_v11, %v7231_v4 }
 0x780   : > { %v7455_v10 = vmax.f32 %v7237_v48, 0.0 }
 0x781   : > { %v7454_v44 = vmax.f32 %v7232_v43, 0.0  ;;  %v8345_v23 = vpop.f32.mrb[110].mxu1 }
 0x782   : > { %7488 = vst.msk [vmem:[%s13083_s14 + $0x8] sm:$0xff] %vm7486_vm1, %v7455_v10  ;;  %7490 = vst.msk [vmem:[#allocation6 + $0x8] sm:$0xff] %vm7486_vm1, %v7455_v10  ;;  %v8945_v45 = vadd.f32 %v8345_v23, %v6090_v7  ;;  %v7241_v29 = vpop.f32.mrb[111].mxu1 }
 0x783   : > { %7487 = vst.msk [vmem:[%s13083_s14] sm:$0xff] %vm7486_vm1, %v7454_v44  ;;  %7489 = vst.msk [vmem:[#allocation6] sm:$0xff] %vm7486_vm1, %v7454_v44 }
 0x784   : > { %v7456_v37 = vmax.f32 %v8945_v45, 0.0 }
 0x785   : > { %v8348_v38 = vpop.f32.mrb[230].mxu1 }
 0x786   : > { %8038 = vst.msk [vmem:[%s13083_s14 + $0x10] sm:$0xff] %vm7486_vm1, %v7456_v37  ;;  %v7250_v11 = vpop.f32.mrb[231].mxu1 }
 0x787   : > { %v7251_v62 = vadd.f32 %v13014_v53, %v7250_v11 }
 0x789   : > { %v7457_v54 = vmax.f32 %v7251_v62, 0.0  ;;  %v7495_v22 = vld [vmem:[#allocation6 + $0x8] sm:$0xff]  ;;  %v8351_v32 = vpop.f32.mrb[232].mxu1 }
 0x78a   : > { %v7494_v20 = vld [vmem:[#allocation6] sm:$0xff]  ;;  %v7265_v52 = vadd.f32 %v13022_v19, %v8351_v32  ;;  %v7259_v35 = vpop.f32.mrb[233].mxu1  ;;  %v13672_v32 = vld [vmem:[#allocation19_spill] sm:$0xff] }
 0x78b   : > { %v7496_v27 = vmax.f32 %v7494_v20, %v7456_v37  ;;  %8039 = vst.msk [vmem:[%s13083_s14 + $0x18] sm:$0xff] %vm7486_vm1, %v7457_v54  ;;  %v7497_v18 = vmax.f32 %v7495_v22, %v7457_v54  ;;  %v7260_v1 = vadd.f32 %v13018_v41, %v7259_v35  ;;  %v6146_v20 = vadd.f32 %v13002_v17, %v13672_v32 }
 0x78c   : > { %v7459_v53 = vmax.f32 %v7265_v52, 0.0 }
 0x78d   : > { %7498 = vst.msk [vmem:[#allocation6] sm:$0xff] %vm7486_vm1, %v7496_v27  ;;  %7499 = vst.msk [vmem:[#allocation6 + $0x8] sm:$0xff] %vm7486_vm1, %v7497_v18  ;;  %v7458_v19 = vmax.f32 %v7260_v1, 0.0  ;;  %v8354_v26 = vpop.f32.mrb[122].mxu1 }
 0x78e   : > { %8041 = vst.msk [vmem:[%s13083_s14 + $0x28] sm:$0xff] %vm7486_vm1, %v7459_v53  ;;  %7505 = vst.msk [vmem:[#allocation6 + $0x18] sm:$0xff] %vm7486_vm1, %v7459_v53  ;;  %v8953_v0 = vadd.f32 %v8354_v26, %v6118_v15  ;;  %v7269_v50 = vpop.f32.mrb[123].mxu1 }
 0x78f   : > { %8040 = vst.msk [vmem:[%s13083_s14 + $0x20] sm:$0xff] %vm7486_vm1, %v7458_v19  ;;  %7504 = vst.msk [vmem:[#allocation6 + $0x10] sm:$0xff] %vm7486_vm1, %v7458_v19 }
 0x790   : > { %v7460_v41 = vmax.f32 %v8953_v0, 0.0 }
 0x791   : > { %v8357_v46 = vpop.f32.mrb[234].mxu1 }
 0x792   : > { %8042 = vst.msk [vmem:[%s13083_s14 + $0x30] sm:$0xff] %vm7486_vm1, %v7460_v41  ;;  %v7278_v59 = vpop.f32.mrb[235].mxu1 }
 0x793   : > { %v7279_v33 = vadd.f32 %v13026_v13, %v7278_v59 }
 0x794   : > { %v7605_v63 = vld [vmem:[#allocation6] sm:$0x1]  ;;  %v7613_v21 = vld [vmem:[#allocation6 + $0x1] sm:$0x1]  ;;  %v7638_v34 = vld [vmem:[#allocation6 + $0x2] sm:$0x1] }
 0x795   : > { %v7621_v58 = vmax.f32 %v7605_v63, %v7613_v21  ;;  %v7646_v51 = vld [vmem:[#allocation6 + $0x3] sm:$0x1]  ;;  %v7670_v8 = vld [vmem:[#allocation6 + $0x4] sm:$0x1]  ;;  %v7678_v61 = vld [vmem:[#allocation6 + $0x5] sm:$0x1] }
 0x796   : > { %v7654_v60 = vmax.f32 %v7638_v34, %v7646_v51  ;;  %v7686_v49 = vmax.f32 %v7670_v8, %v7678_v61  ;;  %v7702_v31 = vld [vmem:[#allocation6 + $0x6] sm:$0x1]  ;;  %v7710_v48 = vld [vmem:[#allocation6 + $0x7] sm:$0x1]  ;;  %v7734_v4 = vld [vmem:[#allocation6 + $0x8] sm:$0x1] }
 0x797   : > { %7630 = vst.msk [vmem:[%s13117_s29] sm:$0x1] %vm7629_vm2, %v7621_v58  ;;  %v7718_v13 = vmax.f32 %v7702_v31, %v7710_v48  ;;  %v7742_v43 = vld [vmem:[#allocation6 + $0x9] sm:$0x1]  ;;  %v7766_v12 = vld [vmem:[#allocation6 + $0xa] sm:$0x1] }
 0x798   : > { %v7774_v7 = vld [vmem:[#allocation6 + $0xb] sm:$0x1]  ;;  %7662 = vst.msk [vmem:[%s13117_s29 + $0x1] sm:$0x1] %vm7629_vm2, %v7654_v60  ;;  %7694 = vst.msk [vmem:[%s13117_s29 + $0x2] sm:$0x1] %vm7629_vm2, %v7686_v49  ;;  %v7750_v10 = vmax.f32 %v7734_v4, %v7742_v43 }
 0x799   : > { %v7782_v44 = vmax.f32 %v7766_v12, %v7774_v7  ;;  %v7798_v23 = vld [vmem:[#allocation6 + $0xc] sm:$0x1]  ;;  %v7806_v45 = vld [vmem:[#allocation6 + $0xd] sm:$0x1]  ;;  %v7830_v29 = vld [vmem:[#allocation6 + $0xe] sm:$0x1] }
 0x79a   : > { %7726 = vst.msk [vmem:[%s13117_s29 + $0x3] sm:$0x1] %vm7629_vm2, %v7718_v13  ;;  %v7814_v37 = vmax.f32 %v7798_v23, %v7806_v45  ;;  %v7838_v38 = vld [vmem:[#allocation6 + $0xf] sm:$0x1]  ;;  %v7509_v11 = vld [vmem:[#allocation6 + $0x10] sm:$0xff]  ;;  %v7461_v62 = vmax.f32 %v7279_v33, 0.0 }
 0x79b   : > { %v7510_v54 = vld [vmem:[#allocation6 + $0x18] sm:$0xff]  ;;  %v8360_v22 = vpop.f32.mrb[236].mxu1  ;;  %7758 = vst.msk [vmem:[%s13117_s29 + $0x4] sm:$0x1] %vm7629_vm2, %v7750_v10  ;;  %7790 = vst.msk [vmem:[%s13117_s29 + $0x5] sm:$0x1] %vm7629_vm2, %v7782_v44  ;;  %v7846_v52 = vmax.f32 %v7830_v29, %v7838_v38  ;;  %v7511_v35 = vmax.f32 %v7509_v11, %v7460_v41 }
 0x79c   : > { %v7293_v27 = vadd.f32 %v13034_v25, %v8360_v22  ;;  %v7287_v18 = vpop.f32.mrb[237].mxu1  ;;  %7822 = vst.msk [vmem:[%s13117_s29 + $0x6] sm:$0x1] %vm7629_vm2, %v7814_v37  ;;  %v7512_v1 = vmax.f32 %v7510_v54, %v7461_v62 }
 0x79d   : > { %8043 = vst.msk [vmem:[%s13083_s14 + $0x38] sm:$0xff] %vm7486_vm1, %v7461_v62  ;;  %v7288_v42 = vadd.f32 %v13030_v28, %v7287_v18  ;;  %v8363_v15 = vpop.f32.mrb[134].mxu1  ;;  %7513 = vst.msk [vmem:[#allocation6 + $0x10] sm:$0xff] %vm7486_vm1, %v7511_v35  ;;  %v8969_v18 = vadd.f32 %v13002_v17, %v13051_v14 }
 0x79e   : > { %7854 = vst.msk [vmem:[%s13117_s29 + $0x7] sm:$0x1] %vm7629_vm2, %v7846_v52  ;;  %v7463_v53 = vmax.f32 %v7293_v27, 0.0  ;;  %v8961_v19 = vadd.f32 %v8363_v15, %v6146_v20  ;;  %v7297_v26 = vpop.f32.mrb[135].mxu1 }
 0x79f   : > { %7514 = vst.msk [vmem:[#allocation6 + $0x18] sm:$0xff] %vm7486_vm1, %v7512_v1  ;;  %v7462_v25 = vmax.f32 %v7288_v42, 0.0  ;;  %v8366_v0 = vpop.f32.mrb[238].mxu1  ;;  %v8971_v42 = vadd.f32 %v13002_v17, %v13055_v24 }
 0x7a0   : > { %8045 = vst.msk [vmem:[%s13083_s14 + $0x48] sm:$0xff] %vm7486_vm1, %v7463_v53  ;;  %7520 = vst.msk [vmem:[#allocation6 + $0x28] sm:$0xff] %vm7486_vm1, %v7463_v53  ;;  %v7464_v50 = vmax.f32 %v8961_v19, 0.0  ;;  %v7306_v28 = vpop.f32.mrb[239].mxu1  ;;  %v8970_v19 = vadd.f32 %v13002_v17, %v13053_v56 }
 0x7a1   : > { %8044 = vst.msk [vmem:[%s13083_s14 + $0x40] sm:$0xff] %vm7486_vm1, %v7462_v25  ;;  %7519 = vst.msk [vmem:[#allocation6 + $0x20] sm:$0xff] %vm7486_vm1, %v7462_v25  ;;  %v7307_v41 = vadd.f32 %v13039_v16, %v7306_v28  ;;  %v8369_v59 = vpop.f32.mrb[240].mxu1 }
 0x7a2   : > { %8046 = vst.msk [vmem:[%s13083_s14 + $0x50] sm:$0xff] %vm7486_vm1, %v7464_v50  ;;  %v7321_v33 = vadd.f32 %v13049_v55, %v8369_v59  ;;  %v7315_v63 = vpop.f32.mrb[241].mxu1 }
 0x7a3   : > { %v7465_v46 = vmax.f32 %v7307_v41, 0.0  ;;  %v7316_v51 = vadd.f32 %v13045_v39, %v7315_v63 }
 0x7a4   : > { %v7606_v21 = vld [vmem:[#allocation6 + $0x10] sm:$0x1]  ;;  %v7614_v34 = vld [vmem:[#allocation6 + $0x11] sm:$0x1]  ;;  %v7639_v58 = vld [vmem:[#allocation6 + $0x12] sm:$0x1] }
 0x7a5   : > { %8047 = vst.msk [vmem:[%s13083_s14 + $0x58] sm:$0xff] %vm7486_vm1, %v7465_v46  ;;  %v7622_v8 = vmax.f32 %v7606_v21, %v7614_v34  ;;  %v7647_v61 = vld [vmem:[#allocation6 + $0x13] sm:$0x1]  ;;  %v7671_v16 = vld [vmem:[#allocation6 + $0x14] sm:$0x1]  ;;  %v7467_v62 = vmax.f32 %v7321_v33, 0.0 }
 0x7a6   : > { %v7679_v60 = vld [vmem:[#allocation6 + $0x15] sm:$0x1]  ;;  %v7655_v49 = vmax.f32 %v7639_v58, %v7647_v61  ;;  %v7703_v48 = vld [vmem:[#allocation6 + $0x16] sm:$0x1]  ;;  %v7711_v55 = vld [vmem:[#allocation6 + $0x17] sm:$0x1] }
 0x7a7   : > { %v7687_v31 = vmax.f32 %v7671_v16, %v7679_v60  ;;  %v7735_v4 = vld [vmem:[#allocation6 + $0x18] sm:$0x1]  ;;  %7631 = vst.msk [vmem:[%s13117_s29 + $0x8] sm:$0x1] %vm7629_vm2, %v7622_v8  ;;  %v7719_v13 = vmax.f32 %v7703_v48, %v7711_v55  ;;  %v7743_v43 = vld [vmem:[#allocation6 + $0x19] sm:$0x1] }
 0x7a8   : > { %v7767_v12 = vld [vmem:[#allocation6 + $0x1a] sm:$0x1]  ;;  %v7775_v7 = vld [vmem:[#allocation6 + $0x1b] sm:$0x1]  ;;  %7663 = vst.msk [vmem:[%s13117_s29 + $0x9] sm:$0x1] %vm7629_vm2, %v7655_v49  ;;  %v7751_v39 = vmax.f32 %v7735_v4, %v7743_v43 }
 0x7a9   : > { %7695 = vst.msk [vmem:[%s13117_s29 + $0xa] sm:$0x1] %vm7629_vm2, %v7687_v31  ;;  %v7783_v10 = vmax.f32 %v7767_v12, %v7775_v7  ;;  %v7799_v44 = vld [vmem:[#allocation6 + $0x1c] sm:$0x1]  ;;  %v7807_v23 = vld [vmem:[#allocation6 + $0x1d] sm:$0x1] }
 0x7aa   : > { %v7831_v45 = vld [vmem:[#allocation6 + $0x1e] sm:$0x1]  ;;  %7727 = vst.msk [vmem:[%s13117_s29 + $0xb] sm:$0x1] %vm7629_vm2, %v7719_v13  ;;  %v7815_v29 = vmax.f32 %v7799_v44, %v7807_v23  ;;  %v7839_v37 = vld [vmem:[#allocation6 + $0x1f] sm:$0x1] }
 0x7ab   : > { %v7524_v38 = vld [vmem:[#allocation6 + $0x20] sm:$0xff]  ;;  %v7525_v11 = vld [vmem:[#allocation6 + $0x28] sm:$0xff]  ;;  %v7466_v54 = vmax.f32 %v7316_v51, 0.0  ;;  %7759 = vst.msk [vmem:[%s13117_s29 + $0xc] sm:$0x1] %vm7629_vm2, %v7751_v39  ;;  %v7847_v22 = vmax.f32 %v7831_v45, %v7839_v37  ;;  %v8372_v52 = vpop.f32.mrb[50].mxu1 }
 0x7ac   : > { %7791 = vst.msk [vmem:[%s13117_s29 + $0xd] sm:$0x1] %vm7629_vm2, %v7783_v10  ;;  %v7526_v32 = vmax.f32 %v7524_v38, %v7464_v50  ;;  %v7527_v20 = vmax.f32 %v7525_v11, %v7465_v46  ;;  %7823 = vst.msk [vmem:[%s13117_s29 + $0xe] sm:$0x1] %vm7629_vm2, %v7815_v29  ;;  %v8968_v35 = vadd.f32 %v8372_v52, %v13002_v17  ;;  %v7325_v27 = vpop.f32.mrb[51].mxu1 }
 0x7ad   : > { %8049 = vst.msk [vmem:[%s13083_s14 + $0x68] sm:$0xff] %vm7486_vm1, %v7467_v62  ;;  %7535 = vst.msk [vmem:[#allocation6 + $0x38] sm:$0xff] %vm7486_vm1, %v7467_v62  ;;  %v8375_v1 = vpop.f32.mrb[242].mxu1  ;;  %v8973_v62 = vadd.f32 %v13002_v17, %v13057_v6 }
 0x7ae   : > { %8048 = vst.msk [vmem:[%s13083_s14 + $0x60] sm:$0xff] %vm7486_vm1, %v7466_v54  ;;  %7534 = vst.msk [vmem:[#allocation6 + $0x30] sm:$0xff] %vm7486_vm1, %v7466_v54  ;;  %v7468_v15 = vmax.f32 %v8968_v35, 0.0  ;;  %v7334_v53 = vpop.f32.mrb[243].mxu1 }
 0x7af   : > { %7855 = vst.msk [vmem:[%s13117_s29 + $0xf] sm:$0x1] %vm7629_vm2, %v7847_v22  ;;  %v7335_v26 = vadd.f32 %v8969_v18, %v7334_v53  ;;  %v8378_v25 = vpop.f32.mrb[244].mxu1 }
 0x7b0   : > { %7528 = vst.msk [vmem:[#allocation6 + $0x20] sm:$0xff] %vm7486_vm1, %v7526_v32  ;;  %7529 = vst.msk [vmem:[#allocation6 + $0x28] sm:$0xff] %vm7486_vm1, %v7527_v20  ;;  %v7349_v14 = vadd.f32 %v8971_v42, %v8378_v25  ;;  %v7343_v0 = vpop.f32.mrb[245].mxu1  ;;  %v8975_v32 = vadd.f32 %v13002_v17, %v13061_v2 }
 0x7b1   : > { %8050 = vst.msk [vmem:[%s13083_s14 + $0x70] sm:$0xff] %vm7486_vm1, %v7468_v15  ;;  %v7469_v50 = vmax.f32 %v7335_v26, 0.0  ;;  %v7344_v28 = vadd.f32 %v8970_v19, %v7343_v0  ;;  %v8381_v33 = vpop.f32.mrb[62].mxu1 }
 0x7b2   : > { %v7471_v41 = vmax.f32 %v7349_v14, 0.0  ;;  %v8972_v60 = vadd.f32 %v8381_v33, %v13002_v17  ;;  %v7353_v11 = vpop.f32.mrb[63].mxu1 }
 0x7b3   : > { %8051 = vst.msk [vmem:[%s13083_s14 + $0x78] sm:$0xff] %vm7486_vm1, %v7469_v50  ;;  %v7470_v59 = vmax.f32 %v7344_v28, 0.0 }
 0x7b4   : > { %v7540_v24 = vld [vmem:[#allocation6 + $0x38] sm:$0xff]  ;;  %8053 = vst.msk [vmem:[%s13083_s14 + $0x88] sm:$0xff] %vm7486_vm1, %v7471_v41  ;;  %7550 = vst.msk [vmem:[#allocation6 + $0x48] sm:$0xff] %vm7486_vm1, %v7471_v41  ;;  %v7472_v38 = vmax.f32 %v8972_v60, 0.0 }
 0x7b5   : > { %v7539_v46 = vld [vmem:[#allocation6 + $0x30] sm:$0xff]  ;;  %v7542_v58 = vmax.f32 %v7540_v24, %v7469_v50  ;;  %8052 = vst.msk [vmem:[%s13083_s14 + $0x80] sm:$0xff] %vm7486_vm1, %v7470_v59  ;;  %7549 = vst.msk [vmem:[#allocation6 + $0x40] sm:$0xff] %vm7486_vm1, %v7470_v59  ;;  %v8384_v22 = vpop.f32.mrb[246].mxu1 }
 0x7b6   : > { %v7541_v34 = vmax.f32 %v7539_v46, %v7468_v15  ;;  %8054 = vst.msk [vmem:[%s13083_s14 + $0x90] sm:$0xff] %vm7486_vm1, %v7472_v38  ;;  %v7362_v20 = vpop.f32.mrb[247].mxu1 }
 0x7b7   : > { %v7607_v63 = vld [vmem:[#allocation6 + $0x20] sm:$0x1]  ;;  %v7615_v21 = vld [vmem:[#allocation6 + $0x21] sm:$0x1]  ;;  %v7640_v56 = vld [vmem:[#allocation6 + $0x22] sm:$0x1]  ;;  %v7363_v35 = vadd.f32 %v8973_v62, %v7362_v20  ;;  %v8978_v20 = vadd.f32 %v13002_v17, %v13065_v36 }
 0x7b8   : > { %v7623_v51 = vmax.f32 %v7607_v63, %v7615_v21  ;;  %v7648_v8 = vld [vmem:[#allocation6 + $0x23] sm:$0x1]  ;;  %v7672_v61 = vld [vmem:[#allocation6 + $0x24] sm:$0x1]  ;;  %v7680_v16 = vld [vmem:[#allocation6 + $0x25] sm:$0x1]  ;;  %v8974_v63 = vadd.f32 %v13002_v17, %v13059_v5 }
 0x7b9   : > { %v7656_v49 = vmax.f32 %v7640_v56, %v7648_v8  ;;  %v7688_v31 = vmax.f32 %v7672_v61, %v7680_v16  ;;  %v7704_v48 = vld [vmem:[#allocation6 + $0x26] sm:$0x1]  ;;  %v7712_v55 = vld [vmem:[#allocation6 + $0x27] sm:$0x1]  ;;  %v7736_v4 = vld [vmem:[#allocation6 + $0x28] sm:$0x1] }
 0x7ba   : > { %7543 = vst.msk [vmem:[#allocation6 + $0x30] sm:$0xff] %vm7486_vm1, %v7541_v34  ;;  %7544 = vst.msk [vmem:[#allocation6 + $0x38] sm:$0xff] %vm7486_vm1, %v7542_v58  ;;  %v7720_v13 = vmax.f32 %v7704_v48, %v7712_v55  ;;  %v7744_v43 = vld [vmem:[#allocation6 + $0x29] sm:$0x1]  ;;  %v7768_v12 = vld [vmem:[#allocation6 + $0x2a] sm:$0x1] }
 0x7bb   : > { %7632 = vst.msk [vmem:[%s13117_s29 + $0x10] sm:$0x1] %vm7629_vm2, %v7623_v51  ;;  %v7776_v7 = vld [vmem:[#allocation6 + $0x2b] sm:$0x1]  ;;  %7664 = vst.msk [vmem:[%s13117_s29 + $0x11] sm:$0x1] %vm7629_vm2, %v7656_v49  ;;  %v7752_v39 = vmax.f32 %v7736_v4, %v7744_v43 }
 0x7bc   : > { %7696 = vst.msk [vmem:[%s13117_s29 + $0x12] sm:$0x1] %vm7629_vm2, %v7688_v31  ;;  %v7784_v10 = vmax.f32 %v7768_v12, %v7776_v7  ;;  %v7800_v44 = vld [vmem:[#allocation6 + $0x2c] sm:$0x1]  ;;  %v7808_v23 = vld [vmem:[#allocation6 + $0x2d] sm:$0x1] }
 0x7bd   : > { %v7832_v45 = vld [vmem:[#allocation6 + $0x2e] sm:$0x1]  ;;  %7728 = vst.msk [vmem:[%s13117_s29 + $0x13] sm:$0x1] %vm7629_vm2, %v7720_v13  ;;  %v7816_v29 = vmax.f32 %v7800_v44, %v7808_v23  ;;  %v7840_v37 = vld [vmem:[#allocation6 + $0x2f] sm:$0x1]  ;;  %v8977_v44 = vadd.f32 %v13002_v17, %v13063_v30 }
 0x7be   : > { %7760 = vst.msk [vmem:[%s13117_s29 + $0x14] sm:$0x1] %vm7629_vm2, %v7752_v39  ;;  %7792 = vst.msk [vmem:[%s13117_s29 + $0x15] sm:$0x1] %vm7629_vm2, %v7784_v10  ;;  %v7848_v54 = vmax.f32 %v7832_v45, %v7840_v37  ;;  %v7554_v52 = vld [vmem:[#allocation6 + $0x40] sm:$0xff]  ;;  %v8387_v27 = vpop.f32.mrb[248].mxu1 }
 0x7bf   : > { %7824 = vst.msk [vmem:[%s13117_s29 + $0x16] sm:$0x1] %vm7629_vm2, %v7816_v29  ;;  %v7556_v42 = vmax.f32 %v7554_v52, %v7472_v38  ;;  %v7377_v15 = vadd.f32 %v8975_v32, %v8387_v27  ;;  %v7555_v41 = vld [vmem:[#allocation6 + $0x48] sm:$0xff]  ;;  %v7473_v16 = vmax.f32 %v7363_v35, 0.0  ;;  %v7371_v5 = vpop.f32.mrb[249].mxu1  ;;  %v8979_v38 = vadd.f32 %v13002_v17, %v13067_v3 }
 0x7c0   : > { %7856 = vst.msk [vmem:[%s13117_s29 + $0x17] sm:$0x1] %vm7629_vm2, %v7848_v54  ;;  %v7372_v31 = vadd.f32 %v8974_v63, %v7371_v5  ;;  %v8390_v48 = vpop.f32.mrb[74].mxu1 }
 0x7c1   : > { %v7608_v6 = vld [vmem:[#allocation6 + $0x30] sm:$0x1]  ;;  %v7616_v18 = vld [vmem:[#allocation6 + $0x31] sm:$0x1]  ;;  %v7641_v1 = vld [vmem:[#allocation6 + $0x32] sm:$0x1]  ;;  %v7557_v55 = vmax.f32 %v7555_v41, %v7473_v16  ;;  %v13245_v4 = vadd.f32 %v8390_v48, %v13002_v17 }
 0x7c2   : > { %v7624_v53 = vmax.f32 %v7608_v6, %v7616_v18  ;;  %v7649_v19 = vld [vmem:[#allocation6 + $0x33] sm:$0x1]  ;;  %v7673_v2 = vld [vmem:[#allocation6 + $0x34] sm:$0x1]  ;;  %v7681_v26 = vld [vmem:[#allocation6 + $0x35] sm:$0x1] }
 0x7c3   : > { %v7657_v25 = vmax.f32 %v7641_v1, %v7649_v19  ;;  %v7689_v14 = vmax.f32 %v7673_v2, %v7681_v26  ;;  %v7705_v0 = vld [vmem:[#allocation6 + $0x36] sm:$0x1]  ;;  %v7713_v50 = vld [vmem:[#allocation6 + $0x37] sm:$0x1]  ;;  %v7737_v28 = vld [vmem:[#allocation6 + $0x38] sm:$0x1] }
 0x7c4   : > { %7558 = vst.msk [vmem:[#allocation6 + $0x40] sm:$0xff] %vm7486_vm1, %v7556_v42  ;;  %v7721_v46 = vmax.f32 %v7705_v0, %v7713_v50  ;;  %v7745_v24 = vld [vmem:[#allocation6 + $0x39] sm:$0x1]  ;;  %v7769_v59 = vld [vmem:[#allocation6 + $0x3a] sm:$0x1]  ;;  %v7475_v60 = vmax.f32 %v7377_v15, 0.0 }
 0x7c5   : > { %7633 = vst.msk [vmem:[%s13117_s29 + $0x18] sm:$0x1] %vm7629_vm2, %v7624_v53  ;;  %v7777_v33 = vld [vmem:[#allocation6 + $0x3b] sm:$0x1]  ;;  %7665 = vst.msk [vmem:[%s13117_s29 + $0x19] sm:$0x1] %vm7629_vm2, %v7657_v25  ;;  %v7753_v21 = vmax.f32 %v7737_v28, %v7745_v24 }
 0x7c6   : > { %7697 = vst.msk [vmem:[%s13117_s29 + $0x1a] sm:$0x1] %vm7629_vm2, %v7689_v14  ;;  %v7785_v56 = vmax.f32 %v7769_v59, %v7777_v33  ;;  %v7801_v34 = vld [vmem:[#allocation6 + $0x3c] sm:$0x1]  ;;  %v7809_v58 = vld [vmem:[#allocation6 + $0x3d] sm:$0x1] }
 0x7c7   : > { %v7833_v51 = vld [vmem:[#allocation6 + $0x3e] sm:$0x1]  ;;  %7729 = vst.msk [vmem:[%s13117_s29 + $0x1b] sm:$0x1] %vm7629_vm2, %v7721_v46  ;;  %v7817_v8 = vmax.f32 %v7801_v34, %v7809_v58  ;;  %v7841_v61 = vld [vmem:[#allocation6 + $0x3f] sm:$0x1] }
 0x7c8   : > { %7761 = vst.msk [vmem:[%s13117_s29 + $0x1c] sm:$0x1] %vm7629_vm2, %v7753_v21  ;;  %7793 = vst.msk [vmem:[%s13117_s29 + $0x1d] sm:$0x1] %vm7629_vm2, %v7785_v56  ;;  %v7849_v49 = vmax.f32 %v7833_v51, %v7841_v61  ;;  %v7381_v13 = vpop.f32.mrb[75].mxu1  ;;  %v7474_v43 = vmax.f32 %v7372_v31, 0.0 }
 0x7c9   : > { %7825 = vst.msk [vmem:[%s13117_s29 + $0x1e] sm:$0x1] %vm7629_vm2, %v7817_v8  ;;  %v8393_v12 = vpop.f32.mrb[250].mxu1  ;;  %v7476_v30 = vmax.f32 %v13245_v4, 0.0  ;;  %v13282_v21 = vld [vmem:[%s13432_s4] ss:$0 sm:$0xff] }
 0x7ca   : > { %8055 = vst.msk [vmem:[%s13083_s14 + $0x98] sm:$0xff] %vm7486_vm1, %v7473_v16  ;;  %8057 = vst.msk [vmem:[%s13083_s14 + $0xa8] sm:$0xff] %vm7486_vm1, %v7475_v60  ;;  %v7390_v32 = vpop.f32.mrb[251].mxu1  ;;  %v8981_v56 = vadd.f32 %v13282_v21, %v13069_v9  ;;  %v8983_v9 = vadd.f32 %v13282_v21, %v13073_v47 }
 0x7cb   : > { %7565 = vst.msk [vmem:[#allocation6 + $0x58] sm:$0xff] %vm7486_vm1, %v7475_v60  ;;  %v7609_v7 = vld [vmem:[#allocation6 + $0x40] sm:$0x1]  ;;  %v7617_v39 = vld [vmem:[#allocation6 + $0x41] sm:$0x1]  ;;  %7559 = vst.msk [vmem:[#allocation6 + $0x48] sm:$0xff] %vm7486_vm1, %v7557_v55  ;;  %v7391_v35 = vadd.f32 %v8977_v44, %v7390_v32  ;;  %v8982_v60 = vadd.f32 %v13282_v21, %v13071_v57 }
 0x7cc   : > { %7857 = vst.msk [vmem:[%s13117_s29 + $0x1f] sm:$0x1] %vm7629_vm2, %v7849_v49  ;;  %v7642_v10 = vld [vmem:[#allocation6 + $0x42] sm:$0x1]  ;;  %v7625_v23 = vmax.f32 %v7609_v7, %v7617_v39  ;;  %v7650_v45 = vld [vmem:[#allocation6 + $0x43] sm:$0x1] }
 0x7cd   : > { %v7674_v29 = vld [vmem:[#allocation6 + $0x44] sm:$0x1]  ;;  %v7682_v37 = vld [vmem:[#allocation6 + $0x45] sm:$0x1]  ;;  %8056 = vst.msk [vmem:[%s13083_s14 + $0xa0] sm:$0xff] %vm7486_vm1, %v7474_v43  ;;  %7564 = vst.msk [vmem:[#allocation6 + $0x50] sm:$0xff] %vm7486_vm1, %v7474_v43  ;;  %v7658_v11 = vmax.f32 %v7642_v10, %v7650_v45 }
 0x7ce   : > { %v7690_v62 = vmax.f32 %v7674_v29, %v7682_v37  ;;  %v7706_v54 = vld [vmem:[#allocation6 + $0x46] sm:$0x1]  ;;  %v7714_v22 = vld [vmem:[#allocation6 + $0x47] sm:$0x1]  ;;  %7634 = vst.msk [vmem:[%s13117_s29 + $0x20] sm:$0x1] %vm7629_vm2, %v7625_v23 }
 0x7cf   : > { %v7722_v52 = vmax.f32 %v7706_v54, %v7714_v22  ;;  %v8396_v27 = vpop.f32.mrb[252].mxu1  ;;  %7666 = vst.msk [vmem:[%s13117_s29 + $0x21] sm:$0x1] %vm7629_vm2, %v7658_v11  ;;  %v7477_v18 = vmax.f32 %v7391_v35, 0.0 }
 0x7d0   : > { %7698 = vst.msk [vmem:[%s13117_s29 + $0x22] sm:$0x1] %vm7629_vm2, %v7690_v62  ;;  %v7405_v3 = vadd.f32 %v8979_v38, %v8396_v27  ;;  %v7399_v6 = vpop.f32.mrb[253].mxu1 }
 0x7d1   : > { %8058 = vst.msk [vmem:[%s13083_s14 + $0xb0] sm:$0xff] %vm7486_vm1, %v7476_v30  ;;  %v7400_v36 = vadd.f32 %v8978_v20, %v7399_v6  ;;  %v8399_v42 = vpop.f32.mrb[86].mxu1  ;;  %8059 = vst.msk [vmem:[%s13083_s14 + $0xb8] sm:$0xff] %vm7486_vm1, %v7477_v18 }
 0x7d2   : > { %7730 = vst.msk [vmem:[%s13117_s29 + $0x23] sm:$0x1] %vm7629_vm2, %v7722_v52  ;;  %v7570_v1 = vld [vmem:[#allocation6 + $0x58] sm:$0xff]  ;;  %v7479_v15 = vmax.f32 %v7405_v3, 0.0  ;;  %v13271_v53 = vadd.f32 %v8399_v42, %v13002_v17  ;;  %v7409_v19 = vpop.f32.mrb[87].mxu1 }
 0x7d3   : > { %v7738_v2 = vld [vmem:[#allocation6 + $0x48] sm:$0x1]  ;;  %v7746_v26 = vld [vmem:[#allocation6 + $0x49] sm:$0x1]  ;;  %v7770_v25 = vld [vmem:[#allocation6 + $0x4a] sm:$0x1]  ;;  %v7572_v14 = vmax.f32 %v7570_v1, %v7477_v18  ;;  %v8985_v19 = vadd.f32 %v13282_v21, %v13075_v40 }
 0x7d4   : > { %v7754_v0 = vmax.f32 %v7738_v2, %v7746_v26  ;;  %v7778_v50 = vld [vmem:[#allocation6 + $0x4b] sm:$0x1]  ;;  %v7802_v28 = vld [vmem:[#allocation6 + $0x4c] sm:$0x1]  ;;  %v7810_v41 = vld [vmem:[#allocation6 + $0x4d] sm:$0x1] }
 0x7d5   : > { %8061 = vst.msk [vmem:[%s13083_s14 + $0xc8] sm:$0xff] %vm7486_vm1, %v7479_v15  ;;  %7580 = vst.msk [vmem:[#allocation6 + $0x68] sm:$0xff] %vm7486_vm1, %v7479_v15  ;;  %v7786_v17 = vmax.f32 %v7770_v25, %v7778_v50  ;;  %v7818_v46 = vmax.f32 %v7802_v28, %v7810_v41  ;;  %v7834_v24 = vld [vmem:[#allocation6 + $0x4e] sm:$0x1]  ;;  %v7842_v59 = vld [vmem:[#allocation6 + $0x4f] sm:$0x1] }
 0x7d6   : > { %v7569_v33 = vld [vmem:[#allocation6 + $0x50] sm:$0xff]  ;;  %7574 = vst.msk [vmem:[#allocation6 + $0x58] sm:$0xff] %vm7486_vm1, %v7572_v14  ;;  %v7478_v63 = vmax.f32 %v7400_v36, 0.0  ;;  %v7850_v34 = vmax.f32 %v7834_v24, %v7842_v59  ;;  %v7480_v51 = vmax.f32 %v13271_v53, 0.0  ;;  %v8402_v8 = vpop.f32.mrb[254].mxu1 }
 0x7d7   : > { %7762 = vst.msk [vmem:[%s13117_s29 + $0x24] sm:$0x1] %vm7629_vm2, %v7754_v0  ;;  %v7571_v58 = vmax.f32 %v7569_v33, %v7476_v30  ;;  %7794 = vst.msk [vmem:[%s13117_s29 + $0x25] sm:$0x1] %vm7629_vm2, %v7786_v17  ;;  %v7418_v61 = vpop.f32.mrb[255].mxu1 }
 0x7d8   : > { %7826 = vst.msk [vmem:[%s13117_s29 + $0x26] sm:$0x1] %vm7629_vm2, %v7818_v46  ;;  %7858 = vst.msk [vmem:[%s13117_s29 + $0x27] sm:$0x1] %vm7629_vm2, %v7850_v34  ;;  %v7419_v16 = vadd.f32 %v8981_v56, %v7418_v61  ;;  %v8405_v5 = vpop.f32.mrb[0].mxu1 }
 0x7d9   : > { %8060 = vst.msk [vmem:[%s13083_s14 + $0xc0] sm:$0xff] %vm7486_vm1, %v7478_v63  ;;  %7579 = vst.msk [vmem:[#allocation6 + $0x60] sm:$0xff] %vm7486_vm1, %v7478_v63  ;;  %v7433_v31 = vadd.f32 %v8983_v9, %v8405_v5  ;;  %v7427_v48 = vpop.f32.mrb[1].mxu1 }
 0x7da   : > { %7573 = vst.msk [vmem:[#allocation6 + $0x50] sm:$0xff] %vm7486_vm1, %v7571_v58  ;;  %8062 = vst.msk [vmem:[%s13083_s14 + $0xd0] sm:$0xff] %vm7486_vm1, %v7480_v51  ;;  %v7481_v49 = vmax.f32 %v7419_v16, 0.0  ;;  %v7428_v4 = vadd.f32 %v8982_v60, %v7427_v48  ;;  %v8408_v36 = vpop.f32.mrb[98].mxu1 }
 0x7db   : > { %v7483_v38 = vmax.f32 %v7433_v31, 0.0  ;;  %v8984_v15 = vadd.f32 %v13282_v21, %v8408_v36  ;;  %v7437_v53 = vpop.f32.mrb[99].mxu1 }
 0x7dc   : > { %v7585_v55 = vld [vmem:[#allocation6 + $0x68] sm:$0xff]  ;;  %8063 = vst.msk [vmem:[%s13083_s14 + $0xd8] sm:$0xff] %vm7486_vm1, %v7481_v49  ;;  %v7482_v1 = vmax.f32 %v7428_v4, 0.0  ;;  %v8411_v2 = vpop.f32.mrb[2].mxu1 }
 0x7dd   : > { %v7739_v13 = vld [vmem:[#allocation6 + $0x58] sm:$0x1]  ;;  %v7747_v43 = vld [vmem:[#allocation6 + $0x59] sm:$0x1]  ;;  %v7771_v12 = vld [vmem:[#allocation6 + $0x5a] sm:$0x1]  ;;  %v7587_v47 = vmax.f32 %v7585_v55, %v7481_v49 }
 0x7de   : > { %v7755_v7 = vmax.f32 %v7739_v13, %v7747_v43  ;;  %v7779_v39 = vld [vmem:[#allocation6 + $0x5b] sm:$0x1]  ;;  %v7803_v10 = vld [vmem:[#allocation6 + $0x5c] sm:$0x1]  ;;  %v7811_v44 = vld [vmem:[#allocation6 + $0x5d] sm:$0x1] }
 0x7df   : > { %v7787_v23 = vmax.f32 %v7771_v12, %v7779_v39  ;;  %v7819_v45 = vmax.f32 %v7803_v10, %v7811_v44  ;;  %v7835_v57 = vld [vmem:[#allocation6 + $0x5e] sm:$0x1]  ;;  %v7843_v29 = vld [vmem:[#allocation6 + $0x5f] sm:$0x1]  ;;  %7589 = vst.msk [vmem:[#allocation6 + $0x68] sm:$0xff] %vm7486_vm1, %v7587_v47  ;;  %8065 = vst.msk [vmem:[%s13083_s14 + $0xe8] sm:$0xff] %vm7486_vm1, %v7483_v38 }
 0x7e0   : > { %v7584_v37 = vld [vmem:[#allocation6 + $0x60] sm:$0xff]  ;;  %7763 = vst.msk [vmem:[%s13117_s29 + $0x2c] sm:$0x1] %vm7629_vm2, %v7755_v7  ;;  %v7851_v22 = vmax.f32 %v7835_v57, %v7843_v29  ;;  %v7484_v26 = vmax.f32 %v8984_v15, 0.0  ;;  %v7446_v25 = vpop.f32.mrb[3].mxu1 }
 0x7e1   : > { %v7610_v11 = vld [vmem:[#allocation6 + $0x50] sm:$0x1]  ;;  %v7618_v62 = vld [vmem:[#allocation6 + $0x51] sm:$0x1]  ;;  %v7643_v54 = vld [vmem:[#allocation6 + $0x52] sm:$0x1]  ;;  %v7586_v30 = vmax.f32 %v7584_v37, %v7480_v51  ;;  %v7447_v28 = vadd.f32 %v8985_v19, %v7446_v25 }
 0x7e2   : > { %v7626_v32 = vmax.f32 %v7610_v11, %v7618_v62  ;;  %v7651_v20 = vld [vmem:[#allocation6 + $0x53] sm:$0x1]  ;;  %v7675_v52 = vld [vmem:[#allocation6 + $0x54] sm:$0x1]  ;;  %v7683_v35 = vld [vmem:[#allocation6 + $0x55] sm:$0x1] }
 0x7e3   : > { %7795 = vst.msk [vmem:[%s13117_s29 + $0x2d] sm:$0x1] %vm7629_vm2, %v7787_v23  ;;  %7827 = vst.msk [vmem:[%s13117_s29 + $0x2e] sm:$0x1] %vm7629_vm2, %v7819_v45  ;;  %v7659_v27 = vmax.f32 %v7643_v54, %v7651_v20  ;;  %v7691_v3 = vmax.f32 %v7675_v52, %v7683_v35  ;;  %v7707_v6 = vld [vmem:[#allocation6 + $0x56] sm:$0x1] }
 0x7e4   : > { %7595 = vst.msk [vmem:[#allocation6 + $0x78] sm:$0xff] %vm7486_vm1, %v7483_v38  ;;  %v7715_v18 = vld [vmem:[#allocation6 + $0x57] sm:$0x1]  ;;  %7588 = vst.msk [vmem:[#allocation6 + $0x60] sm:$0xff] %vm7486_vm1, %v7586_v30  ;;  %v7485_v21 = vmax.f32 %v7447_v28, 0.0 }
 0x7e5   : > { %7859 = vst.msk [vmem:[%s13117_s29 + $0x2f] sm:$0x1] %vm7629_vm2, %v7851_v22  ;;  %7635 = vst.msk [vmem:[%s13117_s29 + $0x28] sm:$0x1] %vm7629_vm2, %v7626_v32  ;;  %v7723_v42 = vmax.f32 %v7707_v6, %v7715_v18 }
 0x7e6   : > { %7667 = vst.msk [vmem:[%s13117_s29 + $0x29] sm:$0x1] %vm7629_vm2, %v7659_v27  ;;  %7699 = vst.msk [vmem:[%s13117_s29 + $0x2a] sm:$0x1] %vm7629_vm2, %v7691_v3  ;;  %v7740_v14 = vld [vmem:[#allocation6 + $0x68] sm:$0x1] }
 0x7e7   : > { %8064 = vst.msk [vmem:[%s13083_s14 + $0xe0] sm:$0xff] %vm7486_vm1, %v7482_v1  ;;  %7594 = vst.msk [vmem:[#allocation6 + $0x70] sm:$0xff] %vm7486_vm1, %v7482_v1  ;;  %v7748_v0 = vld [vmem:[#allocation6 + $0x69] sm:$0x1]  ;;  %v7772_v50 = vld [vmem:[#allocation6 + $0x6a] sm:$0x1] }
 0x7e8   : > { %7731 = vst.msk [vmem:[%s13117_s29 + $0x2b] sm:$0x1] %vm7629_vm2, %v7723_v42  ;;  %v7756_v40 = vmax.f32 %v7740_v14, %v7748_v0  ;;  %v7780_v41 = vld [vmem:[#allocation6 + $0x6b] sm:$0x1]  ;;  %v7804_v17 = vld [vmem:[#allocation6 + $0x6c] sm:$0x1] }
 0x7e9   : > { %v7812_v46 = vld [vmem:[#allocation6 + $0x6d] sm:$0x1]  ;;  %8066 = vst.msk [vmem:[%s13083_s14 + $0xf0] sm:$0xff] %vm7486_vm1, %v7484_v26  ;;  %v7788_v24 = vmax.f32 %v7772_v50, %v7780_v41  ;;  %v7836_v33 = vld [vmem:[#allocation6 + $0x6e] sm:$0x1]  ;;  %8067 = vst.msk [vmem:[%s13083_s14 + $0xf8] sm:$0xff] %vm7486_vm1, %v7485_v21 }
 0x7ea   : > { %v7820_v59 = vmax.f32 %v7804_v17, %v7812_v46  ;;  %v7844_v63 = vld [vmem:[#allocation6 + $0x6f] sm:$0x1]  ;;  %7764 = vst.msk [vmem:[%s13117_s29 + $0x34] sm:$0x1] %vm7629_vm2, %v7756_v40 }
 0x7eb   : > { %v7600_v56 = vld [vmem:[#allocation6 + $0x78] sm:$0xff]  ;;  %v7611_v34 = vld [vmem:[#allocation6 + $0x60] sm:$0x1]  ;;  %v7619_v58 = vld [vmem:[#allocation6 + $0x61] sm:$0x1]  ;;  %v7852_v8 = vmax.f32 %v7836_v33, %v7844_v63 }
 0x7ec   : > { %v7644_v51 = vld [vmem:[#allocation6 + $0x62] sm:$0x1]  ;;  %v7627_v61 = vmax.f32 %v7611_v34, %v7619_v58  ;;  %v7652_v9 = vld [vmem:[#allocation6 + $0x63] sm:$0x1]  ;;  %v7676_v16 = vld [vmem:[#allocation6 + $0x64] sm:$0x1]  ;;  %v7602_v5 = vmax.f32 %v7600_v56, %v7485_v21 }
 0x7ed   : > { %v7684_v60 = vld [vmem:[#allocation6 + $0x65] sm:$0x1]  ;;  %7796 = vst.msk [vmem:[%s13117_s29 + $0x35] sm:$0x1] %vm7629_vm2, %v7788_v24  ;;  %7828 = vst.msk [vmem:[%s13117_s29 + $0x36] sm:$0x1] %vm7629_vm2, %v7820_v59  ;;  %v7660_v49 = vmax.f32 %v7644_v51, %v7652_v9 }
 0x7ee   : > { %v7692_v31 = vmax.f32 %v7676_v16, %v7684_v60  ;;  %v7708_v48 = vld [vmem:[#allocation6 + $0x66] sm:$0x1]  ;;  %v7716_v55 = vld [vmem:[#allocation6 + $0x67] sm:$0x1]  ;;  %7860 = vst.msk [vmem:[%s13117_s29 + $0x37] sm:$0x1] %vm7629_vm2, %v7852_v8 }
 0x7ef   : > { %v7599_v4 = vld [vmem:[#allocation6 + $0x70] sm:$0xff]  ;;  %7636 = vst.msk [vmem:[%s13117_s29 + $0x30] sm:$0x1] %vm7629_vm2, %v7627_v61  ;;  %v7724_v13 = vmax.f32 %v7708_v48, %v7716_v55  ;;  %7668 = vst.msk [vmem:[%s13117_s29 + $0x31] sm:$0x1] %vm7629_vm2, %v7660_v49 }
 0x7f0   : > { %v7601_v43 = vmax.f32 %v7599_v4, %v7484_v26  ;;  %7604 = vst.msk [vmem:[#allocation6 + $0x78] sm:$0xff] %vm7486_vm1, %v7602_v5 }
 0x7f1   : > { %7700 = vst.msk [vmem:[%s13117_s29 + $0x32] sm:$0x1] %vm7629_vm2, %v7692_v31  ;;  %7732 = vst.msk [vmem:[%s13117_s29 + $0x33] sm:$0x1] %vm7629_vm2, %v7724_v13 }
 0x7f2   : > { %7603 = vst.msk [vmem:[#allocation6 + $0x70] sm:$0xff] %vm7486_vm1, %v7601_v43 }
 0x7f7   : > { %v7741_v12 = vld [vmem:[#allocation6 + $0x78] sm:$0x1]  ;;  %v7749_v47 = vld [vmem:[#allocation6 + $0x79] sm:$0x1]  ;;  %v7773_v7 = vld [vmem:[#allocation6 + $0x7a] sm:$0x1] }
 0x7f8   : > { %v7757_v39 = vmax.f32 %v7741_v12, %v7749_v47  ;;  %v7781_v10 = vld [vmem:[#allocation6 + $0x7b] sm:$0x1]  ;;  %v7805_v44 = vld [vmem:[#allocation6 + $0x7c] sm:$0x1]  ;;  %v7813_v23 = vld [vmem:[#allocation6 + $0x7d] sm:$0x1] }
 0x7f9   : > { %v7612_v45 = vld [vmem:[#allocation6 + $0x70] sm:$0x1]  ;;  %v7620_v57 = vld [vmem:[#allocation6 + $0x71] sm:$0x1]  ;;  %v7645_v29 = vld [vmem:[#allocation6 + $0x72] sm:$0x1]  ;;  %v7789_v37 = vmax.f32 %v7773_v7, %v7781_v10  ;;  %v7821_v38 = vmax.f32 %v7805_v44, %v7813_v23 }
 0x7fa   : > { %v7628_v11 = vmax.f32 %v7612_v45, %v7620_v57  ;;  %v7653_v62 = vld [vmem:[#allocation6 + $0x73] sm:$0x1]  ;;  %v7677_v54 = vld [vmem:[#allocation6 + $0x74] sm:$0x1]  ;;  %v7685_v22 = vld [vmem:[#allocation6 + $0x75] sm:$0x1] }
 0x7fb   : > { %7765 = vst.msk [vmem:[%s13117_s29 + $0x3c] sm:$0x1] %vm7629_vm2, %v7757_v39  ;;  %v7661_v30 = vmax.f32 %v7645_v29, %v7653_v62  ;;  %v7693_v32 = vmax.f32 %v7677_v54, %v7685_v22  ;;  %v7709_v20 = vld [vmem:[#allocation6 + $0x76] sm:$0x1]  ;;  %v7717_v52 = vld [vmem:[#allocation6 + $0x77] sm:$0x1] }
 0x7fc   : > { %7797 = vst.msk [vmem:[%s13117_s29 + $0x3d] sm:$0x1] %vm7629_vm2, %v7789_v37  ;;  %7829 = vst.msk [vmem:[%s13117_s29 + $0x3e] sm:$0x1] %vm7629_vm2, %v7821_v38  ;;  %v7837_v35 = vld [vmem:[#allocation6 + $0x7e] sm:$0x1]  ;;  %v7725_v27 = vmax.f32 %v7709_v20, %v7717_v52 }
 0x7fd   : > { %7637 = vst.msk [vmem:[%s13117_s29 + $0x38] sm:$0x1] %vm7629_vm2, %v7628_v11  ;;  %v7845_v3 = vld [vmem:[#allocation6 + $0x7f] sm:$0x1]  ;;  %7669 = vst.msk [vmem:[%s13117_s29 + $0x39] sm:$0x1] %vm7629_vm2, %v7661_v30 }
 0x7fe   : > { %7701 = vst.msk [vmem:[%s13117_s29 + $0x3a] sm:$0x1] %vm7629_vm2, %v7693_v32  ;;  %v7853_v6 = vmax.f32 %v7837_v35, %v7845_v3  ;;  %7733 = vst.msk [vmem:[%s13117_s29 + $0x3b] sm:$0x1] %vm7629_vm2, %v7725_v27 }
 0x800   : > { %7861 = vst.msk [vmem:[%s13117_s29 + $0x3f] sm:$0x1] %vm7629_vm2, %v7853_v6 }
 0x801   : > { %9736 = shalt.err (!%p9733_p11)
}
 0x802   : > { %s9737_s14 = scalar_lea.hbm %s13371_s26, 1024  ;;  %s9741_s29 = scalar_lea.hbm %s13434_s6, 2048 }
 0x803   : > { %p9738_p13 = scmp.ne.s32.totalorder %s13371_s26, %s9737_s14  ;;  %p9742_p6 = scmp.lt.u32.totalorder %s13371_s26, %s13434_s6 }
 0x804   : > { %p9743_p9 = scmp.lt.u32.totalorder %s9741_s29, %s9737_s14  ;;  %p9745_p10 = scmp.lt.u32.totalorder %s9737_s14, %s13371_s26 }
 0x805   : > { %p9739_p5 = pnand %p9738_p13, %p13673_p1 }
 0x806   : > { %p9744_p12 = por %p9743_p9, %p9742_p6 }
 0x807   : > { %p9740_p0 = pneg %p9739_p5 }
 0x808   : > { %p9746_p2 = por %p9745_p10, %p9744_p12 }
 0x80a   : > { %p9747_p3 = pnand %p9746_p2, %p9740_p0 }
 0x80c   : > { %9750 = shalt.err (!%p9747_p3)
}
 0x80d   : > { %s9802_s17 = smov 128   ;;  %s9803_s19 = smov 8  }
 0x80e   : > { %9558 = dma.vmem_to_hbm [thread:$0]  (%p13673_p1), %s13375_s18, 1024, %s13371_s26, %s13387_s25, %s9802_s17, %s9802_s17, %s9803_s19  }
 0x80f PF: > { %p9575_p4 = scmp.ge.s32.totalorder %s9793_s24, 2  ;;  %s7907_s20 = sand.u32 1, %s9781_s21  }
 0x810   : > { %p13674_p7 = scmp.ne.s32.totalorder %s13444_s8, 0  ;;  %s7908_s28 = scalar_lea.sflag [#allocation9], %s7907_s20 }
 0x812   : > { %p9568_p8 = pnand %p9575_p4, %p13674_p7 }
 0x814   : > { %9776 = dma.done.wait (!%p9568_p8), %s7908_s28, 1024  }
 0x815   : > { %9778 = vsyncadd (!%p9568_p8), %s7908_s28, 4294966272  ;;  %p19_p11 = scmp.ge.s32.totalorder %s9864_s27, 4   ;;  %s13675_s21 = smov %s9785_s22 }
 0x816   : > { %s13676_s22 = smov %s9789_s23  ;;  %s13677_s23 = smov %s9875_s30 }
 0x817   : > { %s13678_s24 = smov %s9864_s27  ;;  %21 = sbr.rel (!%p19_p11) target bundleno = 5 (0x5), region = 133 }
 0x81e   :  { %7913 = vsyncpa [#allocation8], 1 }
 0x81f   :  { %7915 = vsyncpa [#allocation8 + $0x1], 1 }
 0x820   :  { %7916 = vsyncpa [#allocation11], 1 }
 0x821   :  { %7917 = vsyncpa [#allocation9], 1 }
 0x822   :  { %7919 = vsyncpa [#allocation9 + $0x1], 1 }

</bundles_post_ra>
